<compile_context>
chip_gen: v5e
topology: v5e:2x2
jax: 0.10.0
libtpu: 0.0.40
codegen_flags: <defaults>
</compile_context>

<pallas_src>
import numpy as np

import jax
import jax.numpy as jnp
from jax.experimental import pallas as pl
from jax.experimental.pallas import tpu as pltpu

EPS = 1e-5


# ---------------------------------------------------------------------------
# elementwise helpers (only ops that lower cleanly in Mosaic)
# ---------------------------------------------------------------------------
def _erf(x):
    # Abramowitz & Stegun 7.1.26 polynomial approximation, |err| < 1.5e-7.
    # (torch nn.GELU default is exact erf; the review's v5e tanh-GELU suggestion is
    #  skipped to preserve module semantics - the erf poly is MXU-shadowed filler.)
    a1, a2, a3, a4, a5 = (0.254829592, -0.284496736, 1.421413741,
                          -1.453152027, 1.061405429)
    p = 0.3275911
    sgn = jnp.where(x >= 0.0, 1.0, -1.0)
    ax = jnp.abs(x)
    t = 1.0 / (1.0 + p * ax)
    poly = ((((a5 * t + a4) * t + a3) * t + a2) * t + a1) * t
    return sgn * (1.0 - poly * jnp.exp(-ax * ax))


def _gelu(x):
    # exact (erf-based) GELU, matching torch nn.GELU() defaults
    return 0.5 * x * (1.0 + _erf(x * 0.7071067811865476))


# ---------------------------------------------------------------------------
# fused Down kernel: one grid step == one sample, activations live as (C, HW)
# ---------------------------------------------------------------------------
def _make_down_kernel(Wp, mxu_dtype):
    def kernel(xin_ref, masks_ref,
               w1_ref, g1_ref, b1_ref,
               w2_ref, g2_ref, b2_ref,
               w3_ref, g3_ref, b3_ref,
               w4_ref, g4_ref, b4_ref,
               emb_ref, o_ref):
        f32 = jnp.float32
        HW = o_ref.shape[-1]

        # fused MaxPool2d(2): element-wise max over the 4 packed window taps
        xp = jnp.maximum(jnp.maximum(xin_ref[0, 0], xin_ref[0, 1]),
                         jnp.maximum(xin_ref[0, 2], xin_ref[0, 3]))      # (Cin, HW) f32

        def conv3x3_gn(x, w_ref, g_ref, b_ref):
            """3x3 SAME conv as 9 accumulated (Co,Ci)@(Ci,HW) MXU matmuls on
            roll-shifted flat activations (+ border masks), then GroupNorm(1)."""
            xb = x.astype(mxu_dtype)                 # bf16 MXU operand (review item 1)
            acc = None
            k = 0
            for oh in (-1, 0, 1):
                for ow in (-1, 0, 1):
                    s = oh * Wp + ow                 # source offset in the flat HW axis
                    if s == 0:
                        xs = xb
                    else:
                        # lane roll (XLU) + precomputed border mask == zero-padded shift
                        xs = pltpu.roll(xb, (-s) % HW, axis=1) * masks_ref[k]
                    t = jnp.dot(w_ref[k], xs, preferred_element_type=f32)
                    acc = t if acc is None else acc + t
                    k += 1
            y = acc                                   # (Co, HW) f32 accumulator
            # GroupNorm(num_groups=1): per-channel (sublane) partial sums first,
            # centered two-pass variance (review item 9 + correctness concern).
            inv_cnt = 1.0 / float(y.shape[0] * HW)
            mean = jnp.sum(jnp.sum(y, axis=0, keepdims=True)) * inv_cnt
            d = y - mean
            var = jnp.sum(jnp.sum(d * d, axis=0, keepdims=True)) * inv_cnt
            yn = d * jax.lax.rsqrt(var + EPS)
            return yn * g_ref[...] + b_ref[...]       # (Co,1) affine, broadcast on lanes

        # DoubleConv(in, in, residual=True)
        h = _gelu(conv3x3_gn(xp, w1_ref, g1_ref, b1_ref))                # (Cin, HW)
        h = conv3x3_gn(h, w2_ref, g2_ref, b2_ref)
        h = _gelu(xp + h)                                                # residual GELU
        # DoubleConv(in, out)
        y = _gelu(conv3x3_gn(h, w3_ref, g3_ref, b3_ref))                 # (Cout, HW)
        y = conv3x3_gn(y, w4_ref, g4_ref, b4_ref)
        # fused per-sample time-embedding bias; lane-dense (Cout, HW) store
        o_ref[0] = (y + emb_ref[0]).astype(o_ref.dtype)

    return kernel


# ---------------------------------------------------------------------------
# Down.forward wrapper
# ---------------------------------------------------------------------------
def down_forward(params, x_nchw, t, *, mxu_dtype=jnp.bfloat16):
    N, Cin, H, W = x_nchw.shape
    Hp, Wp = H // 2, W // 2
    HW = Hp * Wp
    Cout = params["w3"].shape[-1]

    # pack the 2x2 pooling windows on a leading "tap" axis:
    #   (N, Cin, H, W) -> (N, 4, Cin, Hp*Wp), tap q = dh*2+dw, flat p = i*Wp + j
    xin = (x_nchw.reshape(N, Cin, Hp, 2, Wp, 2)
           .transpose(0, 3, 5, 1, 2, 4)
           .reshape(N, 4, Cin, HW)).astype(jnp.float32)

    # tiny per-sample time-embedding bias e = SiLU(t) @ W + b: plain XLA, added in-kernel
    emb = ((t * jax.nn.sigmoid(t)) @ params["wl"] + params["bl"]).astype(jnp.float32)
    emb = emb.reshape(N, Cout, 1)

    # border-validity masks for the 9 roll-shifted taps (flat HW layout), built on host
    ii = np.repeat(np.arange(Hp), Wp)
    jj = np.tile(np.arange(Wp), Hp)
    m = np.stack([((ii + oh >= 0) & (ii + oh < Hp) & (jj + ow >= 0) & (jj + ow < Wp))
                  for oh in (-1, 0, 1) for ow in (-1, 0, 1)]).astype(np.float32)
    masks = jnp.asarray(m.reshape(9, 1, HW), dtype=mxu_dtype)

    def wq(w):   # HWIO (3,3,Ci,Co) -> (9, Co, Ci) in the MXU dtype (bf16 by default)
        return jnp.transpose(w.reshape(9, w.shape[2], w.shape[3]), (0, 2, 1)).astype(mxu_dtype)

    def col(v):  # (C,) -> (C, 1) f32 column; broadcasts along the lane (HW) axis
        return v.reshape(-1, 1).astype(jnp.float32)

    kernel = _make_down_kernel(Wp, mxu_dtype)
    operands = (xin, masks,
                wq(params["w1"]), col(params["g1"]), col(params["b1"]),
                wq(params["w2"]), col(params["g2"]), col(params["b2"]),
                wq(params["w3"]), col(params["g3"]), col(params["b3"]),
                wq(params["w4"]), col(params["g4"]), col(params["b4"]),
                emb)

    def run(single_buffer_consts):
        # constant-index blocks (weights / affine / masks) stay VMEM-resident across the
        # grid; request single buffering so no VMEM is wasted on a second buffer.
        ckw = dict(pipeline_mode=pl.Buffered(1)) if single_buffer_consts else {}
        cspec = lambda shape: pl.BlockSpec(shape, lambda n: (0,) * len(shape), **ckw)
        return pl.pallas_call(
            kernel,
            out_shape=jax.ShapeDtypeStruct((N, Cout, HW), jnp.float32),
            grid=(N,),
            in_specs=[
                pl.BlockSpec((1, 4, Cin, HW), lambda n: (n, 0, 0, 0)),
                cspec((9, 1, HW)),
                cspec((9, Cin, Cin)), cspec((Cin, 1)), cspec((Cin, 1)),
                cspec((9, Cin, Cin)), cspec((Cin, 1)), cspec((Cin, 1)),
                cspec((9, Cout, Cin)), cspec((Cout, 1)), cspec((Cout, 1)),
                cspec((9, Cout, Cout)), cspec((Cout, 1)), cspec((Cout, 1)),
                pl.BlockSpec((1, Cout, 1), lambda n: (n, 0, 0)),
            ],
            out_specs=pl.BlockSpec((1, Cout, HW), lambda n: (n, 0, 0)),
            compiler_params=pltpu.CompilerParams(
                dimension_semantics=("parallel",),        # batch across TensorCores
                vmem_limit_bytes=32 * 1024 * 1024),
        )(*operands)

    try:
        out = run(True)
    except Exception:
        # pl.Buffered(1) not honored on this jax version -> fall back to default buffering
        out = run(False)

    # (N, Cout, Hp*Wp) -> NCHW is a pure reshape (no transpose / extra HBM pass)
    return out.reshape(N, Cout, Hp, Wp)


# ---------------------------------------------------------------------------
# pure-JAX reference (exact module semantics, f32) for a correctness check
# ---------------------------------------------------------------------------
def down_reference(params, x_nchw, t):
    x = jnp.transpose(x_nchw, (0, 2, 3, 1))
    N, H, W, C = x.shape
    x = x.reshape(N, H // 2, 2, W // 2, 2, C).max(axis=(2, 4))
    conv = lambda v, w: jax.lax.conv_general_dilated(
        v, w, (1, 1), "SAME", dimension_numbers=("NHWC", "HWIO", "NHWC"))

    def gn(v, g, b):
        m = v.mean(axis=(1, 2, 3), keepdims=True)
        s = ((v - m) ** 2).mean(axis=(1, 2, 3), keepdims=True)
        return (v - m) / jnp.sqrt(s + EPS) * g + b

    gelu = lambda v: jax.nn.gelu(v, approximate=False)
    h = gelu(gn(conv(x, params["w1"]), params["g1"], params["b1"]))
    h = gn(conv(h, params["w2"]), params["g2"], params["b2"])
    h = gelu(x + h)
    y = gelu(gn(conv(h, params["w3"]), params["g3"], params["b3"]))
    y = gn(conv(y, params["w4"]), params["g4"], params["b4"])
    e = (t * jax.nn.sigmoid(t)) @ params["wl"] + params["bl"]
    y = y + e[:, None, None, :]
    return jnp.transpose(y, (0, 3, 1, 2))


if __name__ == "__main__":
    # H=W=32 -> pooled feature map 16x16 (HW=256): lane-aligned flat spatial dim.
    N, Cin, Cout, H, W, E = 2, 4, 8, 32, 32, 32
    key = jax.random.PRNGKey(0)
    ks = jax.random.split(key, 16)
    params = {
        "w1": 0.2 * jax.random.normal(ks[0], (3, 3, Cin, Cin), jnp.float32),
        "g1": 1.0 + 0.1 * jax.random.normal(ks[1], (Cin,), jnp.float32),
        "b1": 0.1 * jax.random.normal(ks[2], (Cin,), jnp.float32),
        "w2": 0.2 * jax.random.normal(ks[3], (3, 3, Cin, Cin), jnp.float32),
        "g2": 1.0 + 0.1 * jax.random.normal(ks[4], (Cin,), jnp.float32),
        "b2": 0.1 * jax.random.normal(ks[5], (Cin,), jnp.float32),
        "w3": 0.2 * jax.random.normal(ks[6], (3, 3, Cin, Cout), jnp.float32),
        "g3": 1.0 + 0.1 * jax.random.normal(ks[7], (Cout,), jnp.float32),
        "b3": 0.1 * jax.random.normal(ks[8], (Cout,), jnp.float32),
        "w4": 0.2 * jax.random.normal(ks[9], (3, 3, Cout, Cout), jnp.float32),
        "g4": 1.0 + 0.1 * jax.random.normal(ks[10], (Cout,), jnp.float32),
        "b4": 0.1 * jax.random.normal(ks[11], (Cout,), jnp.float32),
        "wl": 0.2 * jax.random.normal(ks[12], (E, Cout), jnp.float32),
        "bl": 0.1 * jax.random.normal(ks[13], (Cout,), jnp.float32),
    }
    x = jax.random.normal(ks[14], (N, Cin, H, W), jnp.float32)   # NCHW, like PyTorch
    t = jax.random.normal(ks[15], (N, E), jnp.float32)

    ref = jax.block_until_ready(down_reference(params, x, t))

    # 1) exact-semantics check: f32 MXU operands (same math as the module)
    out_f32 = jax.block_until_ready(down_forward(params, x, t, mxu_dtype=jnp.float32))
    assert out_f32.shape == (N, Cout, H // 2, W // 2), out_f32.shape
    err_f32 = float(jnp.max(jnp.abs(out_f32 - ref)))
    assert err_f32 < 2e-3, err_f32

    # 2) production path: bf16 MXU operands, f32 accumulation (perf-review item 1).
    #    bf16 operand rounding through 4 conv+GN stages gives O(1e-2) deviation vs the
    #    f32 reference; bound it with loose max / tighter mean tolerances.
    out_bf16 = jax.block_until_ready(down_forward(params, x, t))
    err_max = float(jnp.max(jnp.abs(out_bf16 - ref)))
    err_mean = float(jnp.mean(jnp.abs(out_bf16 - ref)))
    assert err_max < 1e-1 and err_mean < 2e-2, (err_max, err_mean)

    print("KERNEL_OK")
</pallas_src>

<mosaic_0001>
module attributes {stable_mosaic.version = 11 : i64} {
  func.func @kernel(%arg0: i32, %arg1: memref<1x4x4x256xf32, #tpu.memory_space<vmem>>, %arg2: memref<9x1x256xf32, #tpu.memory_space<vmem>>, %arg3: memref<9x4x4xf32, #tpu.memory_space<vmem>>, %arg4: memref<4x1xf32, #tpu.memory_space<vmem>>, %arg5: memref<4x1xf32, #tpu.memory_space<vmem>>, %arg6: memref<9x4x4xf32, #tpu.memory_space<vmem>>, %arg7: memref<4x1xf32, #tpu.memory_space<vmem>>, %arg8: memref<4x1xf32, #tpu.memory_space<vmem>>, %arg9: memref<9x8x4xf32, #tpu.memory_space<vmem>>, %arg10: memref<8x1xf32, #tpu.memory_space<vmem>>, %arg11: memref<8x1xf32, #tpu.memory_space<vmem>>, %arg12: memref<9x8x8xf32, #tpu.memory_space<vmem>>, %arg13: memref<8x1xf32, #tpu.memory_space<vmem>>, %arg14: memref<8x1xf32, #tpu.memory_space<vmem>>, %arg15: memref<1x8x1xf32, #tpu.memory_space<vmem>>, %arg16: memref<1x8x256xf32, #tpu.memory_space<vmem>>) attributes {dimension_semantics = [#tpu.dimension_semantics<parallel>], iteration_bounds = array<i64: 2>, scalar_prefetch = 0 : i64, scratch_operands = 0 : i64, tpu.core_type = #tpu.core_type<tc>, window_params = [{transform_indices = @transform_0, window_bounds = array<i64: 1, 4, 4, 256>}, {pipeline_mode = #tpu.pipeline_mode<synchronous>, transform_indices = @transform_1, window_bounds = array<i64: 9, 1, 256>}, {pipeline_mode = #tpu.pipeline_mode<synchronous>, transform_indices = @transform_2, window_bounds = array<i64: 9, 4, 4>}, {pipeline_mode = #tpu.pipeline_mode<synchronous>, transform_indices = @transform_3, window_bounds = array<i64: 4, 1>}, {pipeline_mode = #tpu.pipeline_mode<synchronous>, transform_indices = @transform_4, window_bounds = array<i64: 4, 1>}, {pipeline_mode = #tpu.pipeline_mode<synchronous>, transform_indices = @transform_5, window_bounds = array<i64: 9, 4, 4>}, {pipeline_mode = #tpu.pipeline_mode<synchronous>, transform_indices = @transform_6, window_bounds = array<i64: 4, 1>}, {pipeline_mode = #tpu.pipeline_mode<synchronous>, transform_indices = @transform_7, window_bounds = array<i64: 4, 1>}, {pipeline_mode = #tpu.pipeline_mode<synchronous>, transform_indices = @transform_8, window_bounds = array<i64: 9, 8, 4>}, {pipeline_mode = #tpu.pipeline_mode<synchronous>, transform_indices = @transform_9, window_bounds = array<i64: 8, 1>}, {pipeline_mode = #tpu.pipeline_mode<synchronous>, transform_indices = @transform_10, window_bounds = array<i64: 8, 1>}, {pipeline_mode = #tpu.pipeline_mode<synchronous>, transform_indices = @transform_11, window_bounds = array<i64: 9, 8, 8>}, {pipeline_mode = #tpu.pipeline_mode<synchronous>, transform_indices = @transform_12, window_bounds = array<i64: 8, 1>}, {pipeline_mode = #tpu.pipeline_mode<synchronous>, transform_indices = @transform_13, window_bounds = array<i64: 8, 1>}, {transform_indices = @transform_14, window_bounds = array<i64: 1, 8, 1>}, {transform_indices = @transform_15, window_bounds = array<i64: 1, 8, 256>}]} {
    %c0 = arith.constant 0 : index
    %c0_0 = arith.constant 0 : index
    %c0_1 = arith.constant 0 : index
    %c0_2 = arith.constant 0 : index
    %0 = vector.load %arg1[%c0, %c0_0, %c0_1, %c0_2] : memref<1x4x4x256xf32, #tpu.memory_space<vmem>>, vector<1x1x4x256xf32>
    %1 = vector.shape_cast %0 : vector<1x1x4x256xf32> to vector<4x256xf32>
    %c0_3 = arith.constant 0 : index
    %c1 = arith.constant 1 : index
    %c0_4 = arith.constant 0 : index
    %c0_5 = arith.constant 0 : index
    %2 = vector.load %arg1[%c0_3, %c1, %c0_4, %c0_5] : memref<1x4x4x256xf32, #tpu.memory_space<vmem>>, vector<1x1x4x256xf32>
    %3 = vector.shape_cast %2 : vector<1x1x4x256xf32> to vector<4x256xf32>
    %4 = arith.maximumf %1, %3 : vector<4x256xf32>
    %c0_6 = arith.constant 0 : index
    %c2 = arith.constant 2 : index
    %c0_7 = arith.constant 0 : index
    %c0_8 = arith.constant 0 : index
    %5 = vector.load %arg1[%c0_6, %c2, %c0_7, %c0_8] : memref<1x4x4x256xf32, #tpu.memory_space<vmem>>, vector<1x1x4x256xf32>
    %6 = vector.shape_cast %5 : vector<1x1x4x256xf32> to vector<4x256xf32>
    %c0_9 = arith.constant 0 : index
    %c3 = arith.constant 3 : index
    %c0_10 = arith.constant 0 : index
    %c0_11 = arith.constant 0 : index
    %7 = vector.load %arg1[%c0_9, %c3, %c0_10, %c0_11] : memref<1x4x4x256xf32, #tpu.memory_space<vmem>>, vector<1x1x4x256xf32>
    %8 = vector.shape_cast %7 : vector<1x1x4x256xf32> to vector<4x256xf32>
    %9 = arith.maximumf %6, %8 : vector<4x256xf32>
    %10 = arith.maximumf %4, %9 : vector<4x256xf32>
    %c17_i32 = arith.constant 17 : i32
    %11 = tpu.dynamic_rotate %10 by %c17_i32 dim 1 : vector<4x256xf32>, i32 -> vector<4x256xf32>
    %c0_12 = arith.constant 0 : index
    %c0_13 = arith.constant 0 : index
    %c0_14 = arith.constant 0 : index
    %12 = vector.load %arg2[%c0_12, %c0_13, %c0_14] : memref<9x1x256xf32, #tpu.memory_space<vmem>>, vector<1x1x256xf32>
    %13 = vector.shape_cast %12 : vector<1x1x256xf32> to vector<1x256xf32>
    %14 = vector.broadcast %13 : vector<1x256xf32> to vector<4x256xf32>
    %15 = arith.mulf %11, %14 : vector<4x256xf32>
    %c0_15 = arith.constant 0 : index
    %c0_16 = arith.constant 0 : index
    %c0_17 = arith.constant 0 : index
    %16 = vector.load %arg3[%c0_15, %c0_16, %c0_17] : memref<9x4x4xf32, #tpu.memory_space<vmem>>, vector<1x4x4xf32>
    %17 = vector.shape_cast %16 : vector<1x4x4xf32> to vector<4x4xf32>
    %cst = arith.constant dense<0.000000e+00> : vector<4x256xf32>
    %18 = tpu.matmul %17, %15, %cst {dimension_numbers = #tpu.dot_dimension_numbers<[1], [0], [0], [1], [0, 0, 1, 1], [], []>} : vector<4x4xf32>, vector<4x256xf32>, vector<4x256xf32> -> vector<4x256xf32>
    %c16_i32 = arith.constant 16 : i32
    %19 = tpu.dynamic_rotate %10 by %c16_i32 dim 1 : vector<4x256xf32>, i32 -> vector<4x256xf32>
    %c1_18 = arith.constant 1 : index
    %c0_19 = arith.constant 0 : index
    %c0_20 = arith.constant 0 : index
    %20 = vector.load %arg2[%c1_18, %c0_19, %c0_20] : memref<9x1x256xf32, #tpu.memory_space<vmem>>, vector<1x1x256xf32>
    %21 = vector.shape_cast %20 : vector<1x1x256xf32> to vector<1x256xf32>
    %22 = vector.broadcast %21 : vector<1x256xf32> to vector<4x256xf32>
    %23 = arith.mulf %19, %22 : vector<4x256xf32>
    %c1_21 = arith.constant 1 : index
    %c0_22 = arith.constant 0 : index
    %c0_23 = arith.constant 0 : index
    %24 = vector.load %arg3[%c1_21, %c0_22, %c0_23] : memref<9x4x4xf32, #tpu.memory_space<vmem>>, vector<1x4x4xf32>
    %25 = vector.shape_cast %24 : vector<1x4x4xf32> to vector<4x4xf32>
    %cst_24 = arith.constant dense<0.000000e+00> : vector<4x256xf32>
    %26 = tpu.matmul %25, %23, %cst_24 {dimension_numbers = #tpu.dot_dimension_numbers<[1], [0], [0], [1], [0, 0, 1, 1], [], []>} : vector<4x4xf32>, vector<4x256xf32>, vector<4x256xf32> -> vector<4x256xf32>
    %27 = arith.addf %18, %26 : vector<4x256xf32>
    %c15_i32 = arith.constant 15 : i32
    %28 = tpu.dynamic_rotate %10 by %c15_i32 dim 1 : vector<4x256xf32>, i32 -> vector<4x256xf32>
    %c2_25 = arith.constant 2 : index
    %c0_26 = arith.constant 0 : index
    %c0_27 = arith.constant 0 : index
    %29 = vector.load %arg2[%c2_25, %c0_26, %c0_27] : memref<9x1x256xf32, #tpu.memory_space<vmem>>, vector<1x1x256xf32>
    %30 = vector.shape_cast %29 : vector<1x1x256xf32> to vector<1x256xf32>
    %31 = vector.broadcast %30 : vector<1x256xf32> to vector<4x256xf32>
    %32 = arith.mulf %28, %31 : vector<4x256xf32>
    %c2_28 = arith.constant 2 : index
    %c0_29 = arith.constant 0 : index
    %c0_30 = arith.constant 0 : index
    %33 = vector.load %arg3[%c2_28, %c0_29, %c0_30] : memref<9x4x4xf32, #tpu.memory_space<vmem>>, vector<1x4x4xf32>
    %34 = vector.shape_cast %33 : vector<1x4x4xf32> to vector<4x4xf32>
    %cst_31 = arith.constant dense<0.000000e+00> : vector<4x256xf32>
    %35 = tpu.matmul %34, %32, %cst_31 {dimension_numbers = #tpu.dot_dimension_numbers<[1], [0], [0], [1], [0, 0, 1, 1], [], []>} : vector<4x4xf32>, vector<4x256xf32>, vector<4x256xf32> -> vector<4x256xf32>
    %36 = arith.addf %27, %35 : vector<4x256xf32>
    %c1_i32 = arith.constant 1 : i32
    %37 = tpu.dynamic_rotate %10 by %c1_i32 dim 1 : vector<4x256xf32>, i32 -> vector<4x256xf32>
    %c3_32 = arith.constant 3 : index
    %c0_33 = arith.constant 0 : index
    %c0_34 = arith.constant 0 : index
    %38 = vector.load %arg2[%c3_32, %c0_33, %c0_34] : memref<9x1x256xf32, #tpu.memory_space<vmem>>, vector<1x1x256xf32>
    %39 = vector.shape_cast %38 : vector<1x1x256xf32> to vector<1x256xf32>
    %40 = vector.broadcast %39 : vector<1x256xf32> to vector<4x256xf32>
    %41 = arith.mulf %37, %40 : vector<4x256xf32>
    %c3_35 = arith.constant 3 : index
    %c0_36 = arith.constant 0 : index
    %c0_37 = arith.constant 0 : index
    %42 = vector.load %arg3[%c3_35, %c0_36, %c0_37] : memref<9x4x4xf32, #tpu.memory_space<vmem>>, vector<1x4x4xf32>
    %43 = vector.shape_cast %42 : vector<1x4x4xf32> to vector<4x4xf32>
    %cst_38 = arith.constant dense<0.000000e+00> : vector<4x256xf32>
    %44 = tpu.matmul %43, %41, %cst_38 {dimension_numbers = #tpu.dot_dimension_numbers<[1], [0], [0], [1], [0, 0, 1, 1], [], []>} : vector<4x4xf32>, vector<4x256xf32>, vector<4x256xf32> -> vector<4x256xf32>
    %45 = arith.addf %36, %44 : vector<4x256xf32>
    %c4 = arith.constant 4 : index
    %c0_39 = arith.constant 0 : index
    %c0_40 = arith.constant 0 : index
    %46 = vector.load %arg3[%c4, %c0_39, %c0_40] : memref<9x4x4xf32, #tpu.memory_space<vmem>>, vector<1x4x4xf32>
    %47 = vector.shape_cast %46 : vector<1x4x4xf32> to vector<4x4xf32>
    %cst_41 = arith.constant dense<0.000000e+00> : vector<4x256xf32>
    %48 = tpu.matmul %47, %10, %cst_41 {dimension_numbers = #tpu.dot_dimension_numbers<[1], [0], [0], [1], [0, 0, 1, 1], [], []>} : vector<4x4xf32>, vector<4x256xf32>, vector<4x256xf32> -> vector<4x256xf32>
    %49 = arith.addf %45, %48 : vector<4x256xf32>
    %c255_i32 = arith.constant 255 : i32
    %50 = tpu.dynamic_rotate %10 by %c255_i32 dim 1 : vector<4x256xf32>, i32 -> vector<4x256xf32>
    %c5 = arith.constant 5 : index
    %c0_42 = arith.constant 0 : index
    %c0_43 = arith.constant 0 : index
    %51 = vector.load %arg2[%c5, %c0_42, %c0_43] : memref<9x1x256xf32, #tpu.memory_space<vmem>>, vector<1x1x256xf32>
    %52 = vector.shape_cast %51 : vector<1x1x256xf32> to vector<1x256xf32>
    %53 = vector.broadcast %52 : vector<1x256xf32> to vector<4x256xf32>
    %54 = arith.mulf %50, %53 : vector<4x256xf32>
    %c5_44 = arith.constant 5 : index
    %c0_45 = arith.constant 0 : index
    %c0_46 = arith.constant 0 : index
    %55 = vector.load %arg3[%c5_44, %c0_45, %c0_46] : memref<9x4x4xf32, #tpu.memory_space<vmem>>, vector<1x4x4xf32>
    %56 = vector.shape_cast %55 : vector<1x4x4xf32> to vector<4x4xf32>
    %cst_47 = arith.constant dense<0.000000e+00> : vector<4x256xf32>
    %57 = tpu.matmul %56, %54, %cst_47 {dimension_numbers = #tpu.dot_dimension_numbers<[1], [0], [0], [1], [0, 0, 1, 1], [], []>} : vector<4x4xf32>, vector<4x256xf32>, vector<4x256xf32> -> vector<4x256xf32>
    %58 = arith.addf %49, %57 : vector<4x256xf32>
    %c241_i32 = arith.constant 241 : i32
    %59 = tpu.dynamic_rotate %10 by %c241_i32 dim 1 : vector<4x256xf32>, i32 -> vector<4x256xf32>
    %c6 = arith.constant 6 : index
    %c0_48 = arith.constant 0 : index
    %c0_49 = arith.constant 0 : index
    %60 = vector.load %arg2[%c6, %c0_48, %c0_49] : memref<9x1x256xf32, #tpu.memory_space<vmem>>, vector<1x1x256xf32>
    %61 = vector.shape_cast %60 : vector<1x1x256xf32> to vector<1x256xf32>
    %62 = vector.broadcast %61 : vector<1x256xf32> to vector<4x256xf32>
    %63 = arith.mulf %59, %62 : vector<4x256xf32>
    %c6_50 = arith.constant 6 : index
    %c0_51 = arith.constant 0 : index
    %c0_52 = arith.constant 0 : index
    %64 = vector.load %arg3[%c6_50, %c0_51, %c0_52] : memref<9x4x4xf32, #tpu.memory_space<vmem>>, vector<1x4x4xf32>
    %65 = vector.shape_cast %64 : vector<1x4x4xf32> to vector<4x4xf32>
    %cst_53 = arith.constant dense<0.000000e+00> : vector<4x256xf32>
    %66 = tpu.matmul %65, %63, %cst_53 {dimension_numbers = #tpu.dot_dimension_numbers<[1], [0], [0], [1], [0, 0, 1, 1], [], []>} : vector<4x4xf32>, vector<4x256xf32>, vector<4x256xf32> -> vector<4x256xf32>
    %67 = arith.addf %58, %66 : vector<4x256xf32>
    %c240_i32 = arith.constant 240 : i32
    %68 = tpu.dynamic_rotate %10 by %c240_i32 dim 1 : vector<4x256xf32>, i32 -> vector<4x256xf32>
    %c7 = arith.constant 7 : index
    %c0_54 = arith.constant 0 : index
    %c0_55 = arith.constant 0 : index
    %69 = vector.load %arg2[%c7, %c0_54, %c0_55] : memref<9x1x256xf32, #tpu.memory_space<vmem>>, vector<1x1x256xf32>
    %70 = vector.shape_cast %69 : vector<1x1x256xf32> to vector<1x256xf32>
    %71 = vector.broadcast %70 : vector<1x256xf32> to vector<4x256xf32>
    %72 = arith.mulf %68, %71 : vector<4x256xf32>
    %c7_56 = arith.constant 7 : index
    %c0_57 = arith.constant 0 : index
    %c0_58 = arith.constant 0 : index
    %73 = vector.load %arg3[%c7_56, %c0_57, %c0_58] : memref<9x4x4xf32, #tpu.memory_space<vmem>>, vector<1x4x4xf32>
    %74 = vector.shape_cast %73 : vector<1x4x4xf32> to vector<4x4xf32>
    %cst_59 = arith.constant dense<0.000000e+00> : vector<4x256xf32>
    %75 = tpu.matmul %74, %72, %cst_59 {dimension_numbers = #tpu.dot_dimension_numbers<[1], [0], [0], [1], [0, 0, 1, 1], [], []>} : vector<4x4xf32>, vector<4x256xf32>, vector<4x256xf32> -> vector<4x256xf32>
    %76 = arith.addf %67, %75 : vector<4x256xf32>
    %c239_i32 = arith.constant 239 : i32
    %77 = tpu.dynamic_rotate %10 by %c239_i32 dim 1 : vector<4x256xf32>, i32 -> vector<4x256xf32>
    %c8 = arith.constant 8 : index
    %c0_60 = arith.constant 0 : index
    %c0_61 = arith.constant 0 : index
    %78 = vector.load %arg2[%c8, %c0_60, %c0_61] : memref<9x1x256xf32, #tpu.memory_space<vmem>>, vector<1x1x256xf32>
    %79 = vector.shape_cast %78 : vector<1x1x256xf32> to vector<1x256xf32>
    %80 = vector.broadcast %79 : vector<1x256xf32> to vector<4x256xf32>
    %81 = arith.mulf %77, %80 : vector<4x256xf32>
    %c8_62 = arith.constant 8 : index
    %c0_63 = arith.constant 0 : index
    %c0_64 = arith.constant 0 : index
    %82 = vector.load %arg3[%c8_62, %c0_63, %c0_64] : memref<9x4x4xf32, #tpu.memory_space<vmem>>, vector<1x4x4xf32>
    %83 = vector.shape_cast %82 : vector<1x4x4xf32> to vector<4x4xf32>
    %cst_65 = arith.constant dense<0.000000e+00> : vector<4x256xf32>
    %84 = tpu.matmul %83, %81, %cst_65 {dimension_numbers = #tpu.dot_dimension_numbers<[1], [0], [0], [1], [0, 0, 1, 1], [], []>} : vector<4x4xf32>, vector<4x256xf32>, vector<4x256xf32> -> vector<4x256xf32>
    %85 = arith.addf %76, %84 : vector<4x256xf32>
    %cst_66 = arith.constant dense<0.000000e+00> : vector<256xf32>
    %86 = vector.multi_reduction <add>, %85, %cst_66 [0] : vector<4x256xf32> to vector<256xf32>
    %87 = vector.shape_cast %86 : vector<256xf32> to vector<1x256xf32>
    %88 = vector.shape_cast %87 : vector<1x256xf32> to vector<1x1x256xf32>
    %cst_67 = arith.constant dense<0.000000e+00> : vector<1xf32>
    %89 = vector.multi_reduction <add>, %88, %cst_67 [1, 2] : vector<1x1x256xf32> to vector<1xf32>
    %90 = vector.shape_cast %89 : vector<1xf32> to vector<1x1x1xf32>
    %91 = vector.extract %90[0, 0, 0] : f32 from vector<1x1x1xf32>
    %cst_68 = arith.constant 9.765625E-4 : f32
    %92 = arith.mulf %91, %cst_68 : f32
    %93 = vector.broadcast %92 : f32 to vector<4x256xf32>
    %94 = arith.subf %85, %93 : vector<4x256xf32>
    %95 = arith.mulf %94, %94 : vector<4x256xf32>
    %cst_69 = arith.constant dense<0.000000e+00> : vector<256xf32>
    %96 = vector.multi_reduction <add>, %95, %cst_69 [0] : vector<4x256xf32> to vector<256xf32>
    %97 = vector.shape_cast %96 : vector<256xf32> to vector<1x256xf32>
    %98 = vector.shape_cast %97 : vector<1x256xf32> to vector<1x1x256xf32>
    %cst_70 = arith.constant dense<0.000000e+00> : vector<1xf32>
    %99 = vector.multi_reduction <add>, %98, %cst_70 [1, 2] : vector<1x1x256xf32> to vector<1xf32>
    %100 = vector.shape_cast %99 : vector<1xf32> to vector<1x1x1xf32>
    %101 = vector.extract %100[0, 0, 0] : f32 from vector<1x1x1xf32>
    %cst_71 = arith.constant 9.765625E-4 : f32
    %102 = arith.mulf %101, %cst_71 : f32
    %cst_72 = arith.constant 9.99999974E-6 : f32
    %103 = arith.addf %102, %cst_72 : f32
    %104 = math.rsqrt %103 : f32
    %105 = vector.broadcast %104 : f32 to vector<4x256xf32>
    %106 = arith.mulf %94, %105 : vector<4x256xf32>
    %c0_73 = arith.constant 0 : index
    %c0_74 = arith.constant 0 : index
    %107 = vector.load %arg4[%c0_73, %c0_74] : memref<4x1xf32, #tpu.memory_space<vmem>>, vector<4x1xf32>
    %108 = vector.broadcast %107 : vector<4x1xf32> to vector<4x256xf32>
    %109 = arith.mulf %106, %108 : vector<4x256xf32>
    %c0_75 = arith.constant 0 : index
    %c0_76 = arith.constant 0 : index
    %110 = vector.load %arg5[%c0_75, %c0_76] : memref<4x1xf32, #tpu.memory_space<vmem>>, vector<4x1xf32>
    %111 = vector.broadcast %110 : vector<4x1xf32> to vector<4x256xf32>
    %112 = arith.addf %109, %111 : vector<4x256xf32>
    %cst_77 = arith.constant 5.000000e-01 : f32
    %113 = vector.broadcast %cst_77 : f32 to vector<4x256xf32>
    %114 = arith.mulf %113, %112 : vector<4x256xf32>
    %cst_78 = arith.constant 0.707106769 : f32
    %115 = vector.broadcast %cst_78 : f32 to vector<4x256xf32>
    %116 = arith.mulf %112, %115 : vector<4x256xf32>
    %cst_79 = arith.constant 0.000000e+00 : f32
    %117 = vector.broadcast %cst_79 : f32 to vector<4x256xf32>
    %118 = arith.cmpf oge, %116, %117 : vector<4x256xf32>
    %cst_80 = arith.constant 1.000000e+00 : f32
    %cst_81 = arith.constant -1.000000e+00 : f32
    %119 = vector.broadcast %cst_80 : f32 to vector<4x256xf32>
    %120 = vector.broadcast %cst_81 : f32 to vector<4x256xf32>
    %121 = arith.select %118, %119, %120 : vector<4x256xi1>, vector<4x256xf32>
    %122 = math.absf %116 : vector<4x256xf32>
    %cst_82 = arith.constant 0.327591091 : f32
    %123 = vector.broadcast %cst_82 : f32 to vector<4x256xf32>
    %124 = arith.mulf %123, %122 : vector<4x256xf32>
    %cst_83 = arith.constant 1.000000e+00 : f32
    %125 = vector.broadcast %cst_83 : f32 to vector<4x256xf32>
    %126 = arith.addf %125, %124 : vector<4x256xf32>
    %cst_84 = arith.constant 1.000000e+00 : f32
    %127 = vector.broadcast %cst_84 : f32 to vector<4x256xf32>
    %128 = arith.divf %127, %126 : vector<4x256xf32>
    %cst_85 = arith.constant 1.06140542 : f32
    %129 = vector.broadcast %cst_85 : f32 to vector<4x256xf32>
    %130 = arith.mulf %129, %128 : vector<4x256xf32>
    %cst_86 = arith.constant -1.45315206 : f32
    %131 = vector.broadcast %cst_86 : f32 to vector<4x256xf32>
    %132 = arith.addf %130, %131 : vector<4x256xf32>
    %133 = arith.mulf %132, %128 : vector<4x256xf32>
    %cst_87 = arith.constant 1.42141378 : f32
    %134 = vector.broadcast %cst_87 : f32 to vector<4x256xf32>
    %135 = arith.addf %133, %134 : vector<4x256xf32>
    %136 = arith.mulf %135, %128 : vector<4x256xf32>
    %cst_88 = arith.constant -0.284496725 : f32
    %137 = vector.broadcast %cst_88 : f32 to vector<4x256xf32>
    %138 = arith.addf %136, %137 : vector<4x256xf32>
    %139 = arith.mulf %138, %128 : vector<4x256xf32>
    %cst_89 = arith.constant 0.254829586 : f32
    %140 = vector.broadcast %cst_89 : f32 to vector<4x256xf32>
    %141 = arith.addf %139, %140 : vector<4x256xf32>
    %142 = arith.mulf %141, %128 : vector<4x256xf32>
    %cst_90 = arith.constant 0.000000e+00 : f32
    %143 = vector.broadcast %cst_90 : f32 to vector<4x256xf32>
    %144 = arith.subf %143, %122 : vector<4x256xf32>
    %145 = arith.mulf %144, %122 : vector<4x256xf32>
    %146 = math.exp %145 : vector<4x256xf32>
    %147 = arith.mulf %142, %146 : vector<4x256xf32>
    %cst_91 = arith.constant 1.000000e+00 : f32
    %148 = vector.broadcast %cst_91 : f32 to vector<4x256xf32>
    %149 = arith.subf %148, %147 : vector<4x256xf32>
    %150 = arith.mulf %121, %149 : vector<4x256xf32>
    %cst_92 = arith.constant 1.000000e+00 : f32
    %151 = vector.broadcast %cst_92 : f32 to vector<4x256xf32>
    %152 = arith.addf %151, %150 : vector<4x256xf32>
    %153 = arith.mulf %114, %152 : vector<4x256xf32>
    %c17_i32_93 = arith.constant 17 : i32
    %154 = tpu.dynamic_rotate %153 by %c17_i32_93 dim 1 : vector<4x256xf32>, i32 -> vector<4x256xf32>
    %c0_94 = arith.constant 0 : index
    %c0_95 = arith.constant 0 : index
    %c0_96 = arith.constant 0 : index
    %155 = vector.load %arg2[%c0_94, %c0_95, %c0_96] : memref<9x1x256xf32, #tpu.memory_space<vmem>>, vector<1x1x256xf32>
    %156 = vector.shape_cast %155 : vector<1x1x256xf32> to vector<1x256xf32>
    %157 = vector.broadcast %156 : vector<1x256xf32> to vector<4x256xf32>
    %158 = arith.mulf %154, %157 : vector<4x256xf32>
    %c0_97 = arith.constant 0 : index
    %c0_98 = arith.constant 0 : index
    %c0_99 = arith.constant 0 : index
    %159 = vector.load %arg6[%c0_97, %c0_98, %c0_99] : memref<9x4x4xf32, #tpu.memory_space<vmem>>, vector<1x4x4xf32>
    %160 = vector.shape_cast %159 : vector<1x4x4xf32> to vector<4x4xf32>
    %cst_100 = arith.constant dense<0.000000e+00> : vector<4x256xf32>
    %161 = tpu.matmul %160, %158, %cst_100 {dimension_numbers = #tpu.dot_dimension_numbers<[1], [0], [0], [1], [0, 0, 1, 1], [], []>} : vector<4x4xf32>, vector<4x256xf32>, vector<4x256xf32> -> vector<4x256xf32>
    %c16_i32_101 = arith.constant 16 : i32
    %162 = tpu.dynamic_rotate %153 by %c16_i32_101 dim 1 : vector<4x256xf32>, i32 -> vector<4x256xf32>
    %c1_102 = arith.constant 1 : index
    %c0_103 = arith.constant 0 : index
    %c0_104 = arith.constant 0 : index
    %163 = vector.load %arg2[%c1_102, %c0_103, %c0_104] : memref<9x1x256xf32, #tpu.memory_space<vmem>>, vector<1x1x256xf32>
    %164 = vector.shape_cast %163 : vector<1x1x256xf32> to vector<1x256xf32>
    %165 = vector.broadcast %164 : vector<1x256xf32> to vector<4x256xf32>
    %166 = arith.mulf %162, %165 : vector<4x256xf32>
    %c1_105 = arith.constant 1 : index
    %c0_106 = arith.constant 0 : index
    %c0_107 = arith.constant 0 : index
    %167 = vector.load %arg6[%c1_105, %c0_106, %c0_107] : memref<9x4x4xf32, #tpu.memory_space<vmem>>, vector<1x4x4xf32>
    %168 = vector.shape_cast %167 : vector<1x4x4xf32> to vector<4x4xf32>
    %cst_108 = arith.constant dense<0.000000e+00> : vector<4x256xf32>
    %169 = tpu.matmul %168, %166, %cst_108 {dimension_numbers = #tpu.dot_dimension_numbers<[1], [0], [0], [1], [0, 0, 1, 1], [], []>} : vector<4x4xf32>, vector<4x256xf32>, vector<4x256xf32> -> vector<4x256xf32>
    %170 = arith.addf %161, %169 : vector<4x256xf32>
    %c15_i32_109 = arith.constant 15 : i32
    %171 = tpu.dynamic_rotate %153 by %c15_i32_109 dim 1 : vector<4x256xf32>, i32 -> vector<4x256xf32>
    %c2_110 = arith.constant 2 : index
    %c0_111 = arith.constant 0 : index
    %c0_112 = arith.constant 0 : index
    %172 = vector.load %arg2[%c2_110, %c0_111, %c0_112] : memref<9x1x256xf32, #tpu.memory_space<vmem>>, vector<1x1x256xf32>
    %173 = vector.shape_cast %172 : vector<1x1x256xf32> to vector<1x256xf32>
    %174 = vector.broadcast %173 : vector<1x256xf32> to vector<4x256xf32>
    %175 = arith.mulf %171, %174 : vector<4x256xf32>
    %c2_113 = arith.constant 2 : index
    %c0_114 = arith.constant 0 : index
    %c0_115 = arith.constant 0 : index
    %176 = vector.load %arg6[%c2_113, %c0_114, %c0_115] : memref<9x4x4xf32, #tpu.memory_space<vmem>>, vector<1x4x4xf32>
    %177 = vector.shape_cast %176 : vector<1x4x4xf32> to vector<4x4xf32>
    %cst_116 = arith.constant dense<0.000000e+00> : vector<4x256xf32>
    %178 = tpu.matmul %177, %175, %cst_116 {dimension_numbers = #tpu.dot_dimension_numbers<[1], [0], [0], [1], [0, 0, 1, 1], [], []>} : vector<4x4xf32>, vector<4x256xf32>, vector<4x256xf32> -> vector<4x256xf32>
    %179 = arith.addf %170, %178 : vector<4x256xf32>
    %c1_i32_117 = arith.constant 1 : i32
    %180 = tpu.dynamic_rotate %153 by %c1_i32_117 dim 1 : vector<4x256xf32>, i32 -> vector<4x256xf32>
    %c3_118 = arith.constant 3 : index
    %c0_119 = arith.constant 0 : index
    %c0_120 = arith.constant 0 : index
    %181 = vector.load %arg2[%c3_118, %c0_119, %c0_120] : memref<9x1x256xf32, #tpu.memory_space<vmem>>, vector<1x1x256xf32>
    %182 = vector.shape_cast %181 : vector<1x1x256xf32> to vector<1x256xf32>
    %183 = vector.broadcast %182 : vector<1x256xf32> to vector<4x256xf32>
    %184 = arith.mulf %180, %183 : vector<4x256xf32>
    %c3_121 = arith.constant 3 : index
    %c0_122 = arith.constant 0 : index
    %c0_123 = arith.constant 0 : index
    %185 = vector.load %arg6[%c3_121, %c0_122, %c0_123] : memref<9x4x4xf32, #tpu.memory_space<vmem>>, vector<1x4x4xf32>
    %186 = vector.shape_cast %185 : vector<1x4x4xf32> to vector<4x4xf32>
    %cst_124 = arith.constant dense<0.000000e+00> : vector<4x256xf32>
    %187 = tpu.matmul %186, %184, %cst_124 {dimension_numbers = #tpu.dot_dimension_numbers<[1], [0], [0], [1], [0, 0, 1, 1], [], []>} : vector<4x4xf32>, vector<4x256xf32>, vector<4x256xf32> -> vector<4x256xf32>
    %188 = arith.addf %179, %187 : vector<4x256xf32>
    %c4_125 = arith.constant 4 : index
    %c0_126 = arith.constant 0 : index
    %c0_127 = arith.constant 0 : index
    %189 = vector.load %arg6[%c4_125, %c0_126, %c0_127] : memref<9x4x4xf32, #tpu.memory_space<vmem>>, vector<1x4x4xf32>
    %190 = vector.shape_cast %189 : vector<1x4x4xf32> to vector<4x4xf32>
    %cst_128 = arith.constant dense<0.000000e+00> : vector<4x256xf32>
    %191 = tpu.matmul %190, %153, %cst_128 {dimension_numbers = #tpu.dot_dimension_numbers<[1], [0], [0], [1], [0, 0, 1, 1], [], []>} : vector<4x4xf32>, vector<4x256xf32>, vector<4x256xf32> -> vector<4x256xf32>
    %192 = arith.addf %188, %191 : vector<4x256xf32>
    %c255_i32_129 = arith.constant 255 : i32
    %193 = tpu.dynamic_rotate %153 by %c255_i32_129 dim 1 : vector<4x256xf32>, i32 -> vector<4x256xf32>
    %c5_130 = arith.constant 5 : index
    %c0_131 = arith.constant 0 : index
    %c0_132 = arith.constant 0 : index
    %194 = vector.load %arg2[%c5_130, %c0_131, %c0_132] : memref<9x1x256xf32, #tpu.memory_space<vmem>>, vector<1x1x256xf32>
    %195 = vector.shape_cast %194 : vector<1x1x256xf32> to vector<1x256xf32>
    %196 = vector.broadcast %195 : vector<1x256xf32> to vector<4x256xf32>
    %197 = arith.mulf %193, %196 : vector<4x256xf32>
    %c5_133 = arith.constant 5 : index
    %c0_134 = arith.constant 0 : index
    %c0_135 = arith.constant 0 : index
    %198 = vector.load %arg6[%c5_133, %c0_134, %c0_135] : memref<9x4x4xf32, #tpu.memory_space<vmem>>, vector<1x4x4xf32>
    %199 = vector.shape_cast %198 : vector<1x4x4xf32> to vector<4x4xf32>
    %cst_136 = arith.constant dense<0.000000e+00> : vector<4x256xf32>
    %200 = tpu.matmul %199, %197, %cst_136 {dimension_numbers = #tpu.dot_dimension_numbers<[1], [0], [0], [1], [0, 0, 1, 1], [], []>} : vector<4x4xf32>, vector<4x256xf32>, vector<4x256xf32> -> vector<4x256xf32>
    %201 = arith.addf %192, %200 : vector<4x256xf32>
    %c241_i32_137 = arith.constant 241 : i32
    %202 = tpu.dynamic_rotate %153 by %c241_i32_137 dim 1 : vector<4x256xf32>, i32 -> vector<4x256xf32>
    %c6_138 = arith.constant 6 : index
    %c0_139 = arith.constant 0 : index
    %c0_140 = arith.constant 0 : index
    %203 = vector.load %arg2[%c6_138, %c0_139, %c0_140] : memref<9x1x256xf32, #tpu.memory_space<vmem>>, vector<1x1x256xf32>
    %204 = vector.shape_cast %203 : vector<1x1x256xf32> to vector<1x256xf32>
    %205 = vector.broadcast %204 : vector<1x256xf32> to vector<4x256xf32>
    %206 = arith.mulf %202, %205 : vector<4x256xf32>
    %c6_141 = arith.constant 6 : index
    %c0_142 = arith.constant 0 : index
    %c0_143 = arith.constant 0 : index
    %207 = vector.load %arg6[%c6_141, %c0_142, %c0_143] : memref<9x4x4xf32, #tpu.memory_space<vmem>>, vector<1x4x4xf32>
    %208 = vector.shape_cast %207 : vector<1x4x4xf32> to vector<4x4xf32>
    %cst_144 = arith.constant dense<0.000000e+00> : vector<4x256xf32>
    %209 = tpu.matmul %208, %206, %cst_144 {dimension_numbers = #tpu.dot_dimension_numbers<[1], [0], [0], [1], [0, 0, 1, 1], [], []>} : vector<4x4xf32>, vector<4x256xf32>, vector<4x256xf32> -> vector<4x256xf32>
    %210 = arith.addf %201, %209 : vector<4x256xf32>
    %c240_i32_145 = arith.constant 240 : i32
    %211 = tpu.dynamic_rotate %153 by %c240_i32_145 dim 1 : vector<4x256xf32>, i32 -> vector<4x256xf32>
    %c7_146 = arith.constant 7 : index
    %c0_147 = arith.constant 0 : index
    %c0_148 = arith.constant 0 : index
    %212 = vector.load %arg2[%c7_146, %c0_147, %c0_148] : memref<9x1x256xf32, #tpu.memory_space<vmem>>, vector<1x1x256xf32>
    %213 = vector.shape_cast %212 : vector<1x1x256xf32> to vector<1x256xf32>
    %214 = vector.broadcast %213 : vector<1x256xf32> to vector<4x256xf32>
    %215 = arith.mulf %211, %214 : vector<4x256xf32>
    %c7_149 = arith.constant 7 : index
    %c0_150 = arith.constant 0 : index
    %c0_151 = arith.constant 0 : index
    %216 = vector.load %arg6[%c7_149, %c0_150, %c0_151] : memref<9x4x4xf32, #tpu.memory_space<vmem>>, vector<1x4x4xf32>
    %217 = vector.shape_cast %216 : vector<1x4x4xf32> to vector<4x4xf32>
    %cst_152 = arith.constant dense<0.000000e+00> : vector<4x256xf32>
    %218 = tpu.matmul %217, %215, %cst_152 {dimension_numbers = #tpu.dot_dimension_numbers<[1], [0], [0], [1], [0, 0, 1, 1], [], []>} : vector<4x4xf32>, vector<4x256xf32>, vector<4x256xf32> -> vector<4x256xf32>
    %219 = arith.addf %210, %218 : vector<4x256xf32>
    %c239_i32_153 = arith.constant 239 : i32
    %220 = tpu.dynamic_rotate %153 by %c239_i32_153 dim 1 : vector<4x256xf32>, i32 -> vector<4x256xf32>
    %c8_154 = arith.constant 8 : index
    %c0_155 = arith.constant 0 : index
    %c0_156 = arith.constant 0 : index
    %221 = vector.load %arg2[%c8_154, %c0_155, %c0_156] : memref<9x1x256xf32, #tpu.memory_space<vmem>>, vector<1x1x256xf32>
    %222 = vector.shape_cast %221 : vector<1x1x256xf32> to vector<1x256xf32>
    %223 = vector.broadcast %222 : vector<1x256xf32> to vector<4x256xf32>
    %224 = arith.mulf %220, %223 : vector<4x256xf32>
    %c8_157 = arith.constant 8 : index
    %c0_158 = arith.constant 0 : index
    %c0_159 = arith.constant 0 : index
    %225 = vector.load %arg6[%c8_157, %c0_158, %c0_159] : memref<9x4x4xf32, #tpu.memory_space<vmem>>, vector<1x4x4xf32>
    %226 = vector.shape_cast %225 : vector<1x4x4xf32> to vector<4x4xf32>
    %cst_160 = arith.constant dense<0.000000e+00> : vector<4x256xf32>
    %227 = tpu.matmul %226, %224, %cst_160 {dimension_numbers = #tpu.dot_dimension_numbers<[1], [0], [0], [1], [0, 0, 1, 1], [], []>} : vector<4x4xf32>, vector<4x256xf32>, vector<4x256xf32> -> vector<4x256xf32>
    %228 = arith.addf %219, %227 : vector<4x256xf32>
    %cst_161 = arith.constant dense<0.000000e+00> : vector<256xf32>
    %229 = vector.multi_reduction <add>, %228, %cst_161 [0] : vector<4x256xf32> to vector<256xf32>
    %230 = vector.shape_cast %229 : vector<256xf32> to vector<1x256xf32>
    %231 = vector.shape_cast %230 : vector<1x256xf32> to vector<1x1x256xf32>
    %cst_162 = arith.constant dense<0.000000e+00> : vector<1xf32>
    %232 = vector.multi_reduction <add>, %231, %cst_162 [1, 2] : vector<1x1x256xf32> to vector<1xf32>
    %233 = vector.shape_cast %232 : vector<1xf32> to vector<1x1x1xf32>
    %234 = vector.extract %233[0, 0, 0] : f32 from vector<1x1x1xf32>
    %cst_163 = arith.constant 9.765625E-4 : f32
    %235 = arith.mulf %234, %cst_163 : f32
    %236 = vector.broadcast %235 : f32 to vector<4x256xf32>
    %237 = arith.subf %228, %236 : vector<4x256xf32>
    %238 = arith.mulf %237, %237 : vector<4x256xf32>
    %cst_164 = arith.constant dense<0.000000e+00> : vector<256xf32>
    %239 = vector.multi_reduction <add>, %238, %cst_164 [0] : vector<4x256xf32> to vector<256xf32>
    %240 = vector.shape_cast %239 : vector<256xf32> to vector<1x256xf32>
    %241 = vector.shape_cast %240 : vector<1x256xf32> to vector<1x1x256xf32>
    %cst_165 = arith.constant dense<0.000000e+00> : vector<1xf32>
    %242 = vector.multi_reduction <add>, %241, %cst_165 [1, 2] : vector<1x1x256xf32> to vector<1xf32>
    %243 = vector.shape_cast %242 : vector<1xf32> to vector<1x1x1xf32>
    %244 = vector.extract %243[0, 0, 0] : f32 from vector<1x1x1xf32>
    %cst_166 = arith.constant 9.765625E-4 : f32
    %245 = arith.mulf %244, %cst_166 : f32
    %cst_167 = arith.constant 9.99999974E-6 : f32
    %246 = arith.addf %245, %cst_167 : f32
    %247 = math.rsqrt %246 : f32
    %248 = vector.broadcast %247 : f32 to vector<4x256xf32>
    %249 = arith.mulf %237, %248 : vector<4x256xf32>
    %c0_168 = arith.constant 0 : index
    %c0_169 = arith.constant 0 : index
    %250 = vector.load %arg7[%c0_168, %c0_169] : memref<4x1xf32, #tpu.memory_space<vmem>>, vector<4x1xf32>
    %251 = vector.broadcast %250 : vector<4x1xf32> to vector<4x256xf32>
    %252 = arith.mulf %249, %251 : vector<4x256xf32>
    %c0_170 = arith.constant 0 : index
    %c0_171 = arith.constant 0 : index
    %253 = vector.load %arg8[%c0_170, %c0_171] : memref<4x1xf32, #tpu.memory_space<vmem>>, vector<4x1xf32>
    %254 = vector.broadcast %253 : vector<4x1xf32> to vector<4x256xf32>
    %255 = arith.addf %252, %254 : vector<4x256xf32>
    %256 = arith.addf %10, %255 : vector<4x256xf32>
    %cst_172 = arith.constant 5.000000e-01 : f32
    %257 = vector.broadcast %cst_172 : f32 to vector<4x256xf32>
    %258 = arith.mulf %257, %256 : vector<4x256xf32>
    %cst_173 = arith.constant 0.707106769 : f32
    %259 = vector.broadcast %cst_173 : f32 to vector<4x256xf32>
    %260 = arith.mulf %256, %259 : vector<4x256xf32>
    %cst_174 = arith.constant 0.000000e+00 : f32
    %261 = vector.broadcast %cst_174 : f32 to vector<4x256xf32>
    %262 = arith.cmpf oge, %260, %261 : vector<4x256xf32>
    %cst_175 = arith.constant 1.000000e+00 : f32
    %cst_176 = arith.constant -1.000000e+00 : f32
    %263 = vector.broadcast %cst_175 : f32 to vector<4x256xf32>
    %264 = vector.broadcast %cst_176 : f32 to vector<4x256xf32>
    %265 = arith.select %262, %263, %264 : vector<4x256xi1>, vector<4x256xf32>
    %266 = math.absf %260 : vector<4x256xf32>
    %cst_177 = arith.constant 0.327591091 : f32
    %267 = vector.broadcast %cst_177 : f32 to vector<4x256xf32>
    %268 = arith.mulf %267, %266 : vector<4x256xf32>
    %cst_178 = arith.constant 1.000000e+00 : f32
    %269 = vector.broadcast %cst_178 : f32 to vector<4x256xf32>
    %270 = arith.addf %269, %268 : vector<4x256xf32>
    %cst_179 = arith.constant 1.000000e+00 : f32
    %271 = vector.broadcast %cst_179 : f32 to vector<4x256xf32>
    %272 = arith.divf %271, %270 : vector<4x256xf32>
    %cst_180 = arith.constant 1.06140542 : f32
    %273 = vector.broadcast %cst_180 : f32 to vector<4x256xf32>
    %274 = arith.mulf %273, %272 : vector<4x256xf32>
    %cst_181 = arith.constant -1.45315206 : f32
    %275 = vector.broadcast %cst_181 : f32 to vector<4x256xf32>
    %276 = arith.addf %274, %275 : vector<4x256xf32>
    %277 = arith.mulf %276, %272 : vector<4x256xf32>
    %cst_182 = arith.constant 1.42141378 : f32
    %278 = vector.broadcast %cst_182 : f32 to vector<4x256xf32>
    %279 = arith.addf %277, %278 : vector<4x256xf32>
    %280 = arith.mulf %279, %272 : vector<4x256xf32>
    %cst_183 = arith.constant -0.284496725 : f32
    %281 = vector.broadcast %cst_183 : f32 to vector<4x256xf32>
    %282 = arith.addf %280, %281 : vector<4x256xf32>
    %283 = arith.mulf %282, %272 : vector<4x256xf32>
    %cst_184 = arith.constant 0.254829586 : f32
    %284 = vector.broadcast %cst_184 : f32 to vector<4x256xf32>
    %285 = arith.addf %283, %284 : vector<4x256xf32>
    %286 = arith.mulf %285, %272 : vector<4x256xf32>
    %cst_185 = arith.constant 0.000000e+00 : f32
    %287 = vector.broadcast %cst_185 : f32 to vector<4x256xf32>
    %288 = arith.subf %287, %266 : vector<4x256xf32>
    %289 = arith.mulf %288, %266 : vector<4x256xf32>
    %290 = math.exp %289 : vector<4x256xf32>
    %291 = arith.mulf %286, %290 : vector<4x256xf32>
    %cst_186 = arith.constant 1.000000e+00 : f32
    %292 = vector.broadcast %cst_186 : f32 to vector<4x256xf32>
    %293 = arith.subf %292, %291 : vector<4x256xf32>
    %294 = arith.mulf %265, %293 : vector<4x256xf32>
    %cst_187 = arith.constant 1.000000e+00 : f32
    %295 = vector.broadcast %cst_187 : f32 to vector<4x256xf32>
    %296 = arith.addf %295, %294 : vector<4x256xf32>
    %297 = arith.mulf %258, %296 : vector<4x256xf32>
    %c17_i32_188 = arith.constant 17 : i32
    %298 = tpu.dynamic_rotate %297 by %c17_i32_188 dim 1 : vector<4x256xf32>, i32 -> vector<4x256xf32>
    %c0_189 = arith.constant 0 : index
    %c0_190 = arith.constant 0 : index
    %c0_191 = arith.constant 0 : index
    %299 = vector.load %arg2[%c0_189, %c0_190, %c0_191] : memref<9x1x256xf32, #tpu.memory_space<vmem>>, vector<1x1x256xf32>
    %300 = vector.shape_cast %299 : vector<1x1x256xf32> to vector<1x256xf32>
    %301 = vector.broadcast %300 : vector<1x256xf32> to vector<4x256xf32>
    %302 = arith.mulf %298, %301 : vector<4x256xf32>
    %c0_192 = arith.constant 0 : index
    %c0_193 = arith.constant 0 : index
    %c0_194 = arith.constant 0 : index
    %303 = vector.load %arg9[%c0_192, %c0_193, %c0_194] : memref<9x8x4xf32, #tpu.memory_space<vmem>>, vector<1x8x4xf32>
    %304 = vector.shape_cast %303 : vector<1x8x4xf32> to vector<8x4xf32>
    %cst_195 = arith.constant dense<0.000000e+00> : vector<8x256xf32>
    %305 = tpu.matmul %304, %302, %cst_195 {dimension_numbers = #tpu.dot_dimension_numbers<[1], [0], [0], [1], [0, 0, 1, 1], [], []>} : vector<8x4xf32>, vector<4x256xf32>, vector<8x256xf32> -> vector<8x256xf32>
    %c16_i32_196 = arith.constant 16 : i32
    %306 = tpu.dynamic_rotate %297 by %c16_i32_196 dim 1 : vector<4x256xf32>, i32 -> vector<4x256xf32>
    %c1_197 = arith.constant 1 : index
    %c0_198 = arith.constant 0 : index
    %c0_199 = arith.constant 0 : index
    %307 = vector.load %arg2[%c1_197, %c0_198, %c0_199] : memref<9x1x256xf32, #tpu.memory_space<vmem>>, vector<1x1x256xf32>
    %308 = vector.shape_cast %307 : vector<1x1x256xf32> to vector<1x256xf32>
    %309 = vector.broadcast %308 : vector<1x256xf32> to vector<4x256xf32>
    %310 = arith.mulf %306, %309 : vector<4x256xf32>
    %c1_200 = arith.constant 1 : index
    %c0_201 = arith.constant 0 : index
    %c0_202 = arith.constant 0 : index
    %311 = vector.load %arg9[%c1_200, %c0_201, %c0_202] : memref<9x8x4xf32, #tpu.memory_space<vmem>>, vector<1x8x4xf32>
    %312 = vector.shape_cast %311 : vector<1x8x4xf32> to vector<8x4xf32>
    %cst_203 = arith.constant dense<0.000000e+00> : vector<8x256xf32>
    %313 = tpu.matmul %312, %310, %cst_203 {dimension_numbers = #tpu.dot_dimension_numbers<[1], [0], [0], [1], [0, 0, 1, 1], [], []>} : vector<8x4xf32>, vector<4x256xf32>, vector<8x256xf32> -> vector<8x256xf32>
    %314 = arith.addf %305, %313 : vector<8x256xf32>
    %c15_i32_204 = arith.constant 15 : i32
    %315 = tpu.dynamic_rotate %297 by %c15_i32_204 dim 1 : vector<4x256xf32>, i32 -> vector<4x256xf32>
    %c2_205 = arith.constant 2 : index
    %c0_206 = arith.constant 0 : index
    %c0_207 = arith.constant 0 : index
    %316 = vector.load %arg2[%c2_205, %c0_206, %c0_207] : memref<9x1x256xf32, #tpu.memory_space<vmem>>, vector<1x1x256xf32>
    %317 = vector.shape_cast %316 : vector<1x1x256xf32> to vector<1x256xf32>
    %318 = vector.broadcast %317 : vector<1x256xf32> to vector<4x256xf32>
    %319 = arith.mulf %315, %318 : vector<4x256xf32>
    %c2_208 = arith.constant 2 : index
    %c0_209 = arith.constant 0 : index
    %c0_210 = arith.constant 0 : index
    %320 = vector.load %arg9[%c2_208, %c0_209, %c0_210] : memref<9x8x4xf32, #tpu.memory_space<vmem>>, vector<1x8x4xf32>
    %321 = vector.shape_cast %320 : vector<1x8x4xf32> to vector<8x4xf32>
    %cst_211 = arith.constant dense<0.000000e+00> : vector<8x256xf32>
    %322 = tpu.matmul %321, %319, %cst_211 {dimension_numbers = #tpu.dot_dimension_numbers<[1], [0], [0], [1], [0, 0, 1, 1], [], []>} : vector<8x4xf32>, vector<4x256xf32>, vector<8x256xf32> -> vector<8x256xf32>
    %323 = arith.addf %314, %322 : vector<8x256xf32>
    %c1_i32_212 = arith.constant 1 : i32
    %324 = tpu.dynamic_rotate %297 by %c1_i32_212 dim 1 : vector<4x256xf32>, i32 -> vector<4x256xf32>
    %c3_213 = arith.constant 3 : index
    %c0_214 = arith.constant 0 : index
    %c0_215 = arith.constant 0 : index
    %325 = vector.load %arg2[%c3_213, %c0_214, %c0_215] : memref<9x1x256xf32, #tpu.memory_space<vmem>>, vector<1x1x256xf32>
    %326 = vector.shape_cast %325 : vector<1x1x256xf32> to vector<1x256xf32>
    %327 = vector.broadcast %326 : vector<1x256xf32> to vector<4x256xf32>
    %328 = arith.mulf %324, %327 : vector<4x256xf32>
    %c3_216 = arith.constant 3 : index
    %c0_217 = arith.constant 0 : index
    %c0_218 = arith.constant 0 : index
    %329 = vector.load %arg9[%c3_216, %c0_217, %c0_218] : memref<9x8x4xf32, #tpu.memory_space<vmem>>, vector<1x8x4xf32>
    %330 = vector.shape_cast %329 : vector<1x8x4xf32> to vector<8x4xf32>
    %cst_219 = arith.constant dense<0.000000e+00> : vector<8x256xf32>
    %331 = tpu.matmul %330, %328, %cst_219 {dimension_numbers = #tpu.dot_dimension_numbers<[1], [0], [0], [1], [0, 0, 1, 1], [], []>} : vector<8x4xf32>, vector<4x256xf32>, vector<8x256xf32> -> vector<8x256xf32>
    %332 = arith.addf %323, %331 : vector<8x256xf32>
    %c4_220 = arith.constant 4 : index
    %c0_221 = arith.constant 0 : index
    %c0_222 = arith.constant 0 : index
    %333 = vector.load %arg9[%c4_220, %c0_221, %c0_222] : memref<9x8x4xf32, #tpu.memory_space<vmem>>, vector<1x8x4xf32>
    %334 = vector.shape_cast %333 : vector<1x8x4xf32> to vector<8x4xf32>
    %cst_223 = arith.constant dense<0.000000e+00> : vector<8x256xf32>
    %335 = tpu.matmul %334, %297, %cst_223 {dimension_numbers = #tpu.dot_dimension_numbers<[1], [0], [0], [1], [0, 0, 1, 1], [], []>} : vector<8x4xf32>, vector<4x256xf32>, vector<8x256xf32> -> vector<8x256xf32>
    %336 = arith.addf %332, %335 : vector<8x256xf32>
    %c255_i32_224 = arith.constant 255 : i32
    %337 = tpu.dynamic_rotate %297 by %c255_i32_224 dim 1 : vector<4x256xf32>, i32 -> vector<4x256xf32>
    %c5_225 = arith.constant 5 : index
    %c0_226 = arith.constant 0 : index
    %c0_227 = arith.constant 0 : index
    %338 = vector.load %arg2[%c5_225, %c0_226, %c0_227] : memref<9x1x256xf32, #tpu.memory_space<vmem>>, vector<1x1x256xf32>
    %339 = vector.shape_cast %338 : vector<1x1x256xf32> to vector<1x256xf32>
    %340 = vector.broadcast %339 : vector<1x256xf32> to vector<4x256xf32>
    %341 = arith.mulf %337, %340 : vector<4x256xf32>
    %c5_228 = arith.constant 5 : index
    %c0_229 = arith.constant 0 : index
    %c0_230 = arith.constant 0 : index
    %342 = vector.load %arg9[%c5_228, %c0_229, %c0_230] : memref<9x8x4xf32, #tpu.memory_space<vmem>>, vector<1x8x4xf32>
    %343 = vector.shape_cast %342 : vector<1x8x4xf32> to vector<8x4xf32>
    %cst_231 = arith.constant dense<0.000000e+00> : vector<8x256xf32>
    %344 = tpu.matmul %343, %341, %cst_231 {dimension_numbers = #tpu.dot_dimension_numbers<[1], [0], [0], [1], [0, 0, 1, 1], [], []>} : vector<8x4xf32>, vector<4x256xf32>, vector<8x256xf32> -> vector<8x256xf32>
    %345 = arith.addf %336, %344 : vector<8x256xf32>
    %c241_i32_232 = arith.constant 241 : i32
    %346 = tpu.dynamic_rotate %297 by %c241_i32_232 dim 1 : vector<4x256xf32>, i32 -> vector<4x256xf32>
    %c6_233 = arith.constant 6 : index
    %c0_234 = arith.constant 0 : index
    %c0_235 = arith.constant 0 : index
    %347 = vector.load %arg2[%c6_233, %c0_234, %c0_235] : memref<9x1x256xf32, #tpu.memory_space<vmem>>, vector<1x1x256xf32>
    %348 = vector.shape_cast %347 : vector<1x1x256xf32> to vector<1x256xf32>
    %349 = vector.broadcast %348 : vector<1x256xf32> to vector<4x256xf32>
    %350 = arith.mulf %346, %349 : vector<4x256xf32>
    %c6_236 = arith.constant 6 : index
    %c0_237 = arith.constant 0 : index
    %c0_238 = arith.constant 0 : index
    %351 = vector.load %arg9[%c6_236, %c0_237, %c0_238] : memref<9x8x4xf32, #tpu.memory_space<vmem>>, vector<1x8x4xf32>
    %352 = vector.shape_cast %351 : vector<1x8x4xf32> to vector<8x4xf32>
    %cst_239 = arith.constant dense<0.000000e+00> : vector<8x256xf32>
    %353 = tpu.matmul %352, %350, %cst_239 {dimension_numbers = #tpu.dot_dimension_numbers<[1], [0], [0], [1], [0, 0, 1, 1], [], []>} : vector<8x4xf32>, vector<4x256xf32>, vector<8x256xf32> -> vector<8x256xf32>
    %354 = arith.addf %345, %353 : vector<8x256xf32>
    %c240_i32_240 = arith.constant 240 : i32
    %355 = tpu.dynamic_rotate %297 by %c240_i32_240 dim 1 : vector<4x256xf32>, i32 -> vector<4x256xf32>
    %c7_241 = arith.constant 7 : index
    %c0_242 = arith.constant 0 : index
    %c0_243 = arith.constant 0 : index
    %356 = vector.load %arg2[%c7_241, %c0_242, %c0_243] : memref<9x1x256xf32, #tpu.memory_space<vmem>>, vector<1x1x256xf32>
    %357 = vector.shape_cast %356 : vector<1x1x256xf32> to vector<1x256xf32>
    %358 = vector.broadcast %357 : vector<1x256xf32> to vector<4x256xf32>
    %359 = arith.mulf %355, %358 : vector<4x256xf32>
    %c7_244 = arith.constant 7 : index
    %c0_245 = arith.constant 0 : index
    %c0_246 = arith.constant 0 : index
    %360 = vector.load %arg9[%c7_244, %c0_245, %c0_246] : memref<9x8x4xf32, #tpu.memory_space<vmem>>, vector<1x8x4xf32>
    %361 = vector.shape_cast %360 : vector<1x8x4xf32> to vector<8x4xf32>
    %cst_247 = arith.constant dense<0.000000e+00> : vector<8x256xf32>
    %362 = tpu.matmul %361, %359, %cst_247 {dimension_numbers = #tpu.dot_dimension_numbers<[1], [0], [0], [1], [0, 0, 1, 1], [], []>} : vector<8x4xf32>, vector<4x256xf32>, vector<8x256xf32> -> vector<8x256xf32>
    %363 = arith.addf %354, %362 : vector<8x256xf32>
    %c239_i32_248 = arith.constant 239 : i32
    %364 = tpu.dynamic_rotate %297 by %c239_i32_248 dim 1 : vector<4x256xf32>, i32 -> vector<4x256xf32>
    %c8_249 = arith.constant 8 : index
    %c0_250 = arith.constant 0 : index
    %c0_251 = arith.constant 0 : index
    %365 = vector.load %arg2[%c8_249, %c0_250, %c0_251] : memref<9x1x256xf32, #tpu.memory_space<vmem>>, vector<1x1x256xf32>
    %366 = vector.shape_cast %365 : vector<1x1x256xf32> to vector<1x256xf32>
    %367 = vector.broadcast %366 : vector<1x256xf32> to vector<4x256xf32>
    %368 = arith.mulf %364, %367 : vector<4x256xf32>
    %c8_252 = arith.constant 8 : index
    %c0_253 = arith.constant 0 : index
    %c0_254 = arith.constant 0 : index
    %369 = vector.load %arg9[%c8_252, %c0_253, %c0_254] : memref<9x8x4xf32, #tpu.memory_space<vmem>>, vector<1x8x4xf32>
    %370 = vector.shape_cast %369 : vector<1x8x4xf32> to vector<8x4xf32>
    %cst_255 = arith.constant dense<0.000000e+00> : vector<8x256xf32>
    %371 = tpu.matmul %370, %368, %cst_255 {dimension_numbers = #tpu.dot_dimension_numbers<[1], [0], [0], [1], [0, 0, 1, 1], [], []>} : vector<8x4xf32>, vector<4x256xf32>, vector<8x256xf32> -> vector<8x256xf32>
    %372 = arith.addf %363, %371 : vector<8x256xf32>
    %cst_256 = arith.constant dense<0.000000e+00> : vector<256xf32>
    %373 = vector.multi_reduction <add>, %372, %cst_256 [0] : vector<8x256xf32> to vector<256xf32>
    %374 = vector.shape_cast %373 : vector<256xf32> to vector<1x256xf32>
    %375 = vector.shape_cast %374 : vector<1x256xf32> to vector<1x1x256xf32>
    %cst_257 = arith.constant dense<0.000000e+00> : vector<1xf32>
    %376 = vector.multi_reduction <add>, %375, %cst_257 [1, 2] : vector<1x1x256xf32> to vector<1xf32>
    %377 = vector.shape_cast %376 : vector<1xf32> to vector<1x1x1xf32>
    %378 = vector.extract %377[0, 0, 0] : f32 from vector<1x1x1xf32>
    %cst_258 = arith.constant 4.8828125E-4 : f32
    %379 = arith.mulf %378, %cst_258 : f32
    %380 = vector.broadcast %379 : f32 to vector<8x256xf32>
    %381 = arith.subf %372, %380 : vector<8x256xf32>
    %382 = arith.mulf %381, %381 : vector<8x256xf32>
    %cst_259 = arith.constant dense<0.000000e+00> : vector<256xf32>
    %383 = vector.multi_reduction <add>, %382, %cst_259 [0] : vector<8x256xf32> to vector<256xf32>
    %384 = vector.shape_cast %383 : vector<256xf32> to vector<1x256xf32>
    %385 = vector.shape_cast %384 : vector<1x256xf32> to vector<1x1x256xf32>
    %cst_260 = arith.constant dense<0.000000e+00> : vector<1xf32>
    %386 = vector.multi_reduction <add>, %385, %cst_260 [1, 2] : vector<1x1x256xf32> to vector<1xf32>
    %387 = vector.shape_cast %386 : vector<1xf32> to vector<1x1x1xf32>
    %388 = vector.extract %387[0, 0, 0] : f32 from vector<1x1x1xf32>
    %cst_261 = arith.constant 4.8828125E-4 : f32
    %389 = arith.mulf %388, %cst_261 : f32
    %cst_262 = arith.constant 9.99999974E-6 : f32
    %390 = arith.addf %389, %cst_262 : f32
    %391 = math.rsqrt %390 : f32
    %392 = vector.broadcast %391 : f32 to vector<8x256xf32>
    %393 = arith.mulf %381, %392 : vector<8x256xf32>
    %c0_263 = arith.constant 0 : index
    %c0_264 = arith.constant 0 : index
    %394 = vector.load %arg10[%c0_263, %c0_264] : memref<8x1xf32, #tpu.memory_space<vmem>>, vector<8x1xf32>
    %395 = vector.broadcast %394 : vector<8x1xf32> to vector<8x256xf32>
    %396 = arith.mulf %393, %395 : vector<8x256xf32>
    %c0_265 = arith.constant 0 : index
    %c0_266 = arith.constant 0 : index
    %397 = vector.load %arg11[%c0_265, %c0_266] : memref<8x1xf32, #tpu.memory_space<vmem>>, vector<8x1xf32>
    %398 = vector.broadcast %397 : vector<8x1xf32> to vector<8x256xf32>
    %399 = arith.addf %396, %398 : vector<8x256xf32>
    %cst_267 = arith.constant 5.000000e-01 : f32
    %400 = vector.broadcast %cst_267 : f32 to vector<8x256xf32>
    %401 = arith.mulf %400, %399 : vector<8x256xf32>
    %cst_268 = arith.constant 0.707106769 : f32
    %402 = vector.broadcast %cst_268 : f32 to vector<8x256xf32>
    %403 = arith.mulf %399, %402 : vector<8x256xf32>
    %cst_269 = arith.constant 0.000000e+00 : f32
    %404 = vector.broadcast %cst_269 : f32 to vector<8x256xf32>
    %405 = arith.cmpf oge, %403, %404 : vector<8x256xf32>
    %cst_270 = arith.constant 1.000000e+00 : f32
    %cst_271 = arith.constant -1.000000e+00 : f32
    %406 = vector.broadcast %cst_270 : f32 to vector<8x256xf32>
    %407 = vector.broadcast %cst_271 : f32 to vector<8x256xf32>
    %408 = arith.select %405, %406, %407 : vector<8x256xi1>, vector<8x256xf32>
    %409 = math.absf %403 : vector<8x256xf32>
    %cst_272 = arith.constant 0.327591091 : f32
    %410 = vector.broadcast %cst_272 : f32 to vector<8x256xf32>
    %411 = arith.mulf %410, %409 : vector<8x256xf32>
    %cst_273 = arith.constant 1.000000e+00 : f32
    %412 = vector.broadcast %cst_273 : f32 to vector<8x256xf32>
    %413 = arith.addf %412, %411 : vector<8x256xf32>
    %cst_274 = arith.constant 1.000000e+00 : f32
    %414 = vector.broadcast %cst_274 : f32 to vector<8x256xf32>
    %415 = arith.divf %414, %413 : vector<8x256xf32>
    %cst_275 = arith.constant 1.06140542 : f32
    %416 = vector.broadcast %cst_275 : f32 to vector<8x256xf32>
    %417 = arith.mulf %416, %415 : vector<8x256xf32>
    %cst_276 = arith.constant -1.45315206 : f32
    %418 = vector.broadcast %cst_276 : f32 to vector<8x256xf32>
    %419 = arith.addf %417, %418 : vector<8x256xf32>
    %420 = arith.mulf %419, %415 : vector<8x256xf32>
    %cst_277 = arith.constant 1.42141378 : f32
    %421 = vector.broadcast %cst_277 : f32 to vector<8x256xf32>
    %422 = arith.addf %420, %421 : vector<8x256xf32>
    %423 = arith.mulf %422, %415 : vector<8x256xf32>
    %cst_278 = arith.constant -0.284496725 : f32
    %424 = vector.broadcast %cst_278 : f32 to vector<8x256xf32>
    %425 = arith.addf %423, %424 : vector<8x256xf32>
    %426 = arith.mulf %425, %415 : vector<8x256xf32>
    %cst_279 = arith.constant 0.254829586 : f32
    %427 = vector.broadcast %cst_279 : f32 to vector<8x256xf32>
    %428 = arith.addf %426, %427 : vector<8x256xf32>
    %429 = arith.mulf %428, %415 : vector<8x256xf32>
    %cst_280 = arith.constant 0.000000e+00 : f32
    %430 = vector.broadcast %cst_280 : f32 to vector<8x256xf32>
    %431 = arith.subf %430, %409 : vector<8x256xf32>
    %432 = arith.mulf %431, %409 : vector<8x256xf32>
    %433 = math.exp %432 : vector<8x256xf32>
    %434 = arith.mulf %429, %433 : vector<8x256xf32>
    %cst_281 = arith.constant 1.000000e+00 : f32
    %435 = vector.broadcast %cst_281 : f32 to vector<8x256xf32>
    %436 = arith.subf %435, %434 : vector<8x256xf32>
    %437 = arith.mulf %408, %436 : vector<8x256xf32>
    %cst_282 = arith.constant 1.000000e+00 : f32
    %438 = vector.broadcast %cst_282 : f32 to vector<8x256xf32>
    %439 = arith.addf %438, %437 : vector<8x256xf32>
    %440 = arith.mulf %401, %439 : vector<8x256xf32>
    %c17_i32_283 = arith.constant 17 : i32
    %441 = tpu.dynamic_rotate %440 by %c17_i32_283 dim 1 : vector<8x256xf32>, i32 -> vector<8x256xf32>
    %c0_284 = arith.constant 0 : index
    %c0_285 = arith.constant 0 : index
    %c0_286 = arith.constant 0 : index
    %442 = vector.load %arg2[%c0_284, %c0_285, %c0_286] : memref<9x1x256xf32, #tpu.memory_space<vmem>>, vector<1x1x256xf32>
    %443 = vector.shape_cast %442 : vector<1x1x256xf32> to vector<1x256xf32>
    %444 = vector.broadcast %443 : vector<1x256xf32> to vector<8x256xf32>
    %445 = arith.mulf %441, %444 : vector<8x256xf32>
    %c0_287 = arith.constant 0 : index
    %c0_288 = arith.constant 0 : index
    %c0_289 = arith.constant 0 : index
    %446 = vector.load %arg12[%c0_287, %c0_288, %c0_289] : memref<9x8x8xf32, #tpu.memory_space<vmem>>, vector<1x8x8xf32>
    %447 = vector.shape_cast %446 : vector<1x8x8xf32> to vector<8x8xf32>
    %cst_290 = arith.constant dense<0.000000e+00> : vector<8x256xf32>
    %448 = tpu.matmul %447, %445, %cst_290 {dimension_numbers = #tpu.dot_dimension_numbers<[1], [0], [0], [1], [0, 0, 1, 1], [], []>} : vector<8x8xf32>, vector<8x256xf32>, vector<8x256xf32> -> vector<8x256xf32>
    %c16_i32_291 = arith.constant 16 : i32
    %449 = tpu.dynamic_rotate %440 by %c16_i32_291 dim 1 : vector<8x256xf32>, i32 -> vector<8x256xf32>
    %c1_292 = arith.constant 1 : index
    %c0_293 = arith.constant 0 : index
    %c0_294 = arith.constant 0 : index
    %450 = vector.load %arg2[%c1_292, %c0_293, %c0_294] : memref<9x1x256xf32, #tpu.memory_space<vmem>>, vector<1x1x256xf32>
    %451 = vector.shape_cast %450 : vector<1x1x256xf32> to vector<1x256xf32>
    %452 = vector.broadcast %451 : vector<1x256xf32> to vector<8x256xf32>
    %453 = arith.mulf %449, %452 : vector<8x256xf32>
    %c1_295 = arith.constant 1 : index
    %c0_296 = arith.constant 0 : index
    %c0_297 = arith.constant 0 : index
    %454 = vector.load %arg12[%c1_295, %c0_296, %c0_297] : memref<9x8x8xf32, #tpu.memory_space<vmem>>, vector<1x8x8xf32>
    %455 = vector.shape_cast %454 : vector<1x8x8xf32> to vector<8x8xf32>
    %cst_298 = arith.constant dense<0.000000e+00> : vector<8x256xf32>
    %456 = tpu.matmul %455, %453, %cst_298 {dimension_numbers = #tpu.dot_dimension_numbers<[1], [0], [0], [1], [0, 0, 1, 1], [], []>} : vector<8x8xf32>, vector<8x256xf32>, vector<8x256xf32> -> vector<8x256xf32>
    %457 = arith.addf %448, %456 : vector<8x256xf32>
    %c15_i32_299 = arith.constant 15 : i32
    %458 = tpu.dynamic_rotate %440 by %c15_i32_299 dim 1 : vector<8x256xf32>, i32 -> vector<8x256xf32>
    %c2_300 = arith.constant 2 : index
    %c0_301 = arith.constant 0 : index
    %c0_302 = arith.constant 0 : index
    %459 = vector.load %arg2[%c2_300, %c0_301, %c0_302] : memref<9x1x256xf32, #tpu.memory_space<vmem>>, vector<1x1x256xf32>
    %460 = vector.shape_cast %459 : vector<1x1x256xf32> to vector<1x256xf32>
    %461 = vector.broadcast %460 : vector<1x256xf32> to vector<8x256xf32>
    %462 = arith.mulf %458, %461 : vector<8x256xf32>
    %c2_303 = arith.constant 2 : index
    %c0_304 = arith.constant 0 : index
    %c0_305 = arith.constant 0 : index
    %463 = vector.load %arg12[%c2_303, %c0_304, %c0_305] : memref<9x8x8xf32, #tpu.memory_space<vmem>>, vector<1x8x8xf32>
    %464 = vector.shape_cast %463 : vector<1x8x8xf32> to vector<8x8xf32>
    %cst_306 = arith.constant dense<0.000000e+00> : vector<8x256xf32>
    %465 = tpu.matmul %464, %462, %cst_306 {dimension_numbers = #tpu.dot_dimension_numbers<[1], [0], [0], [1], [0, 0, 1, 1], [], []>} : vector<8x8xf32>, vector<8x256xf32>, vector<8x256xf32> -> vector<8x256xf32>
    %466 = arith.addf %457, %465 : vector<8x256xf32>
    %c1_i32_307 = arith.constant 1 : i32
    %467 = tpu.dynamic_rotate %440 by %c1_i32_307 dim 1 : vector<8x256xf32>, i32 -> vector<8x256xf32>
    %c3_308 = arith.constant 3 : index
    %c0_309 = arith.constant 0 : index
    %c0_310 = arith.constant 0 : index
    %468 = vector.load %arg2[%c3_308, %c0_309, %c0_310] : memref<9x1x256xf32, #tpu.memory_space<vmem>>, vector<1x1x256xf32>
    %469 = vector.shape_cast %468 : vector<1x1x256xf32> to vector<1x256xf32>
    %470 = vector.broadcast %469 : vector<1x256xf32> to vector<8x256xf32>
    %471 = arith.mulf %467, %470 : vector<8x256xf32>
    %c3_311 = arith.constant 3 : index
    %c0_312 = arith.constant 0 : index
    %c0_313 = arith.constant 0 : index
    %472 = vector.load %arg12[%c3_311, %c0_312, %c0_313] : memref<9x8x8xf32, #tpu.memory_space<vmem>>, vector<1x8x8xf32>
    %473 = vector.shape_cast %472 : vector<1x8x8xf32> to vector<8x8xf32>
    %cst_314 = arith.constant dense<0.000000e+00> : vector<8x256xf32>
    %474 = tpu.matmul %473, %471, %cst_314 {dimension_numbers = #tpu.dot_dimension_numbers<[1], [0], [0], [1], [0, 0, 1, 1], [], []>} : vector<8x8xf32>, vector<8x256xf32>, vector<8x256xf32> -> vector<8x256xf32>
    %475 = arith.addf %466, %474 : vector<8x256xf32>
    %c4_315 = arith.constant 4 : index
    %c0_316 = arith.constant 0 : index
    %c0_317 = arith.constant 0 : index
    %476 = vector.load %arg12[%c4_315, %c0_316, %c0_317] : memref<9x8x8xf32, #tpu.memory_space<vmem>>, vector<1x8x8xf32>
    %477 = vector.shape_cast %476 : vector<1x8x8xf32> to vector<8x8xf32>
    %cst_318 = arith.constant dense<0.000000e+00> : vector<8x256xf32>
    %478 = tpu.matmul %477, %440, %cst_318 {dimension_numbers = #tpu.dot_dimension_numbers<[1], [0], [0], [1], [0, 0, 1, 1], [], []>} : vector<8x8xf32>, vector<8x256xf32>, vector<8x256xf32> -> vector<8x256xf32>
    %479 = arith.addf %475, %478 : vector<8x256xf32>
    %c255_i32_319 = arith.constant 255 : i32
    %480 = tpu.dynamic_rotate %440 by %c255_i32_319 dim 1 : vector<8x256xf32>, i32 -> vector<8x256xf32>
    %c5_320 = arith.constant 5 : index
    %c0_321 = arith.constant 0 : index
    %c0_322 = arith.constant 0 : index
    %481 = vector.load %arg2[%c5_320, %c0_321, %c0_322] : memref<9x1x256xf32, #tpu.memory_space<vmem>>, vector<1x1x256xf32>
    %482 = vector.shape_cast %481 : vector<1x1x256xf32> to vector<1x256xf32>
    %483 = vector.broadcast %482 : vector<1x256xf32> to vector<8x256xf32>
    %484 = arith.mulf %480, %483 : vector<8x256xf32>
    %c5_323 = arith.constant 5 : index
    %c0_324 = arith.constant 0 : index
    %c0_325 = arith.constant 0 : index
    %485 = vector.load %arg12[%c5_323, %c0_324, %c0_325] : memref<9x8x8xf32, #tpu.memory_space<vmem>>, vector<1x8x8xf32>
    %486 = vector.shape_cast %485 : vector<1x8x8xf32> to vector<8x8xf32>
    %cst_326 = arith.constant dense<0.000000e+00> : vector<8x256xf32>
    %487 = tpu.matmul %486, %484, %cst_326 {dimension_numbers = #tpu.dot_dimension_numbers<[1], [0], [0], [1], [0, 0, 1, 1], [], []>} : vector<8x8xf32>, vector<8x256xf32>, vector<8x256xf32> -> vector<8x256xf32>
    %488 = arith.addf %479, %487 : vector<8x256xf32>
    %c241_i32_327 = arith.constant 241 : i32
    %489 = tpu.dynamic_rotate %440 by %c241_i32_327 dim 1 : vector<8x256xf32>, i32 -> vector<8x256xf32>
    %c6_328 = arith.constant 6 : index
    %c0_329 = arith.constant 0 : index
    %c0_330 = arith.constant 0 : index
    %490 = vector.load %arg2[%c6_328, %c0_329, %c0_330] : memref<9x1x256xf32, #tpu.memory_space<vmem>>, vector<1x1x256xf32>
    %491 = vector.shape_cast %490 : vector<1x1x256xf32> to vector<1x256xf32>
    %492 = vector.broadcast %491 : vector<1x256xf32> to vector<8x256xf32>
    %493 = arith.mulf %489, %492 : vector<8x256xf32>
    %c6_331 = arith.constant 6 : index
    %c0_332 = arith.constant 0 : index
    %c0_333 = arith.constant 0 : index
    %494 = vector.load %arg12[%c6_331, %c0_332, %c0_333] : memref<9x8x8xf32, #tpu.memory_space<vmem>>, vector<1x8x8xf32>
    %495 = vector.shape_cast %494 : vector<1x8x8xf32> to vector<8x8xf32>
    %cst_334 = arith.constant dense<0.000000e+00> : vector<8x256xf32>
    %496 = tpu.matmul %495, %493, %cst_334 {dimension_numbers = #tpu.dot_dimension_numbers<[1], [0], [0], [1], [0, 0, 1, 1], [], []>} : vector<8x8xf32>, vector<8x256xf32>, vector<8x256xf32> -> vector<8x256xf32>
    %497 = arith.addf %488, %496 : vector<8x256xf32>
    %c240_i32_335 = arith.constant 240 : i32
    %498 = tpu.dynamic_rotate %440 by %c240_i32_335 dim 1 : vector<8x256xf32>, i32 -> vector<8x256xf32>
    %c7_336 = arith.constant 7 : index
    %c0_337 = arith.constant 0 : index
    %c0_338 = arith.constant 0 : index
    %499 = vector.load %arg2[%c7_336, %c0_337, %c0_338] : memref<9x1x256xf32, #tpu.memory_space<vmem>>, vector<1x1x256xf32>
    %500 = vector.shape_cast %499 : vector<1x1x256xf32> to vector<1x256xf32>
    %501 = vector.broadcast %500 : vector<1x256xf32> to vector<8x256xf32>
    %502 = arith.mulf %498, %501 : vector<8x256xf32>
    %c7_339 = arith.constant 7 : index
    %c0_340 = arith.constant 0 : index
    %c0_341 = arith.constant 0 : index
    %503 = vector.load %arg12[%c7_339, %c0_340, %c0_341] : memref<9x8x8xf32, #tpu.memory_space<vmem>>, vector<1x8x8xf32>
    %504 = vector.shape_cast %503 : vector<1x8x8xf32> to vector<8x8xf32>
    %cst_342 = arith.constant dense<0.000000e+00> : vector<8x256xf32>
    %505 = tpu.matmul %504, %502, %cst_342 {dimension_numbers = #tpu.dot_dimension_numbers<[1], [0], [0], [1], [0, 0, 1, 1], [], []>} : vector<8x8xf32>, vector<8x256xf32>, vector<8x256xf32> -> vector<8x256xf32>
    %506 = arith.addf %497, %505 : vector<8x256xf32>
    %c239_i32_343 = arith.constant 239 : i32
    %507 = tpu.dynamic_rotate %440 by %c239_i32_343 dim 1 : vector<8x256xf32>, i32 -> vector<8x256xf32>
    %c8_344 = arith.constant 8 : index
    %c0_345 = arith.constant 0 : index
    %c0_346 = arith.constant 0 : index
    %508 = vector.load %arg2[%c8_344, %c0_345, %c0_346] : memref<9x1x256xf32, #tpu.memory_space<vmem>>, vector<1x1x256xf32>
    %509 = vector.shape_cast %508 : vector<1x1x256xf32> to vector<1x256xf32>
    %510 = vector.broadcast %509 : vector<1x256xf32> to vector<8x256xf32>
    %511 = arith.mulf %507, %510 : vector<8x256xf32>
    %c8_347 = arith.constant 8 : index
    %c0_348 = arith.constant 0 : index
    %c0_349 = arith.constant 0 : index
    %512 = vector.load %arg12[%c8_347, %c0_348, %c0_349] : memref<9x8x8xf32, #tpu.memory_space<vmem>>, vector<1x8x8xf32>
    %513 = vector.shape_cast %512 : vector<1x8x8xf32> to vector<8x8xf32>
    %cst_350 = arith.constant dense<0.000000e+00> : vector<8x256xf32>
    %514 = tpu.matmul %513, %511, %cst_350 {dimension_numbers = #tpu.dot_dimension_numbers<[1], [0], [0], [1], [0, 0, 1, 1], [], []>} : vector<8x8xf32>, vector<8x256xf32>, vector<8x256xf32> -> vector<8x256xf32>
    %515 = arith.addf %506, %514 : vector<8x256xf32>
    %cst_351 = arith.constant dense<0.000000e+00> : vector<256xf32>
    %516 = vector.multi_reduction <add>, %515, %cst_351 [0] : vector<8x256xf32> to vector<256xf32>
    %517 = vector.shape_cast %516 : vector<256xf32> to vector<1x256xf32>
    %518 = vector.shape_cast %517 : vector<1x256xf32> to vector<1x1x256xf32>
    %cst_352 = arith.constant dense<0.000000e+00> : vector<1xf32>
    %519 = vector.multi_reduction <add>, %518, %cst_352 [1, 2] : vector<1x1x256xf32> to vector<1xf32>
    %520 = vector.shape_cast %519 : vector<1xf32> to vector<1x1x1xf32>
    %521 = vector.extract %520[0, 0, 0] : f32 from vector<1x1x1xf32>
    %cst_353 = arith.constant 4.8828125E-4 : f32
    %522 = arith.mulf %521, %cst_353 : f32
    %523 = vector.broadcast %522 : f32 to vector<8x256xf32>
    %524 = arith.subf %515, %523 : vector<8x256xf32>
    %525 = arith.mulf %524, %524 : vector<8x256xf32>
    %cst_354 = arith.constant dense<0.000000e+00> : vector<256xf32>
    %526 = vector.multi_reduction <add>, %525, %cst_354 [0] : vector<8x256xf32> to vector<256xf32>
    %527 = vector.shape_cast %526 : vector<256xf32> to vector<1x256xf32>
    %528 = vector.shape_cast %527 : vector<1x256xf32> to vector<1x1x256xf32>
    %cst_355 = arith.constant dense<0.000000e+00> : vector<1xf32>
    %529 = vector.multi_reduction <add>, %528, %cst_355 [1, 2] : vector<1x1x256xf32> to vector<1xf32>
    %530 = vector.shape_cast %529 : vector<1xf32> to vector<1x1x1xf32>
    %531 = vector.extract %530[0, 0, 0] : f32 from vector<1x1x1xf32>
    %cst_356 = arith.constant 4.8828125E-4 : f32
    %532 = arith.mulf %531, %cst_356 : f32
    %cst_357 = arith.constant 9.99999974E-6 : f32
    %533 = arith.addf %532, %cst_357 : f32
    %534 = math.rsqrt %533 : f32
    %535 = vector.broadcast %534 : f32 to vector<8x256xf32>
    %536 = arith.mulf %524, %535 : vector<8x256xf32>
    %c0_358 = arith.constant 0 : index
    %c0_359 = arith.constant 0 : index
    %537 = vector.load %arg13[%c0_358, %c0_359] : memref<8x1xf32, #tpu.memory_space<vmem>>, vector<8x1xf32>
    %538 = vector.broadcast %537 : vector<8x1xf32> to vector<8x256xf32>
    %539 = arith.mulf %536, %538 : vector<8x256xf32>
    %c0_360 = arith.constant 0 : index
    %c0_361 = arith.constant 0 : index
    %540 = vector.load %arg14[%c0_360, %c0_361] : memref<8x1xf32, #tpu.memory_space<vmem>>, vector<8x1xf32>
    %541 = vector.broadcast %540 : vector<8x1xf32> to vector<8x256xf32>
    %542 = arith.addf %539, %541 : vector<8x256xf32>
    %c0_362 = arith.constant 0 : index
    %c0_363 = arith.constant 0 : index
    %c0_364 = arith.constant 0 : index
    %543 = vector.load %arg15[%c0_362, %c0_363, %c0_364] : memref<1x8x1xf32, #tpu.memory_space<vmem>>, vector<1x8x1xf32>
    %544 = vector.shape_cast %543 : vector<1x8x1xf32> to vector<8x1xf32>
    %545 = vector.broadcast %544 : vector<8x1xf32> to vector<8x256xf32>
    %546 = arith.addf %542, %545 : vector<8x256xf32>
    %c0_365 = arith.constant 0 : index
    %c0_366 = arith.constant 0 : index
    %c0_367 = arith.constant 0 : index
    %547 = vector.load %arg16[%c0_365, %c0_366, %c0_367] : memref<1x8x256xf32, #tpu.memory_space<vmem>>, vector<1x8x256xf32>
    %548 = vector.shape_cast %547 : vector<1x8x256xf32> to vector<8x256xf32>
    %549 = vector.shape_cast %546 : vector<8x256xf32> to vector<1x8x256xf32>
    tpu.vector_store %arg16[%c0_365, %c0_366, %c0_367], %549 {strides = array<i32>} : memref<1x8x256xf32, #tpu.memory_space<vmem>>, vector<1x8x256xf32>,
    return
  }
  func.func @transform_0(%arg0: i32) -> (i32, i32, i32, i32) {
    %c0_i32 = arith.constant 0 : i32
    %c0_i32_0 = arith.constant 0 : i32
    %c0_i32_1 = arith.constant 0 : i32
    %c0_i32_2 = arith.constant 0 : i32
    return %arg0, %c0_i32, %c0_i32_0, %c0_i32_1 : i32, i32, i32, i32
  }
  func.func @transform_1(%arg0: i32) -> (i32, i32, i32) {
    %c0_i32 = arith.constant 0 : i32
    %c0_i32_0 = arith.constant 0 : i32
    %c0_i32_1 = arith.constant 0 : i32
    %c0_i32_2 = arith.constant 0 : i32
    return %c0_i32, %c0_i32_0, %c0_i32_1 : i32, i32, i32
  }
  func.func @transform_2(%arg0: i32) -> (i32, i32, i32) {
    %c0_i32 = arith.constant 0 : i32
    %c0_i32_0 = arith.constant 0 : i32
    %c0_i32_1 = arith.constant 0 : i32
    %c0_i32_2 = arith.constant 0 : i32
    return %c0_i32, %c0_i32_0, %c0_i32_1 : i32, i32, i32
  }
  func.func @transform_3(%arg0: i32) -> (i32, i32) {
    %c0_i32 = arith.constant 0 : i32
    %c0_i32_0 = arith.constant 0 : i32
    %c0_i32_1 = arith.constant 0 : i32
    return %c0_i32, %c0_i32_0 : i32, i32
  }
  func.func @transform_4(%arg0: i32) -> (i32, i32) {
    %c0_i32 = arith.constant 0 : i32
    %c0_i32_0 = arith.constant 0 : i32
    %c0_i32_1 = arith.constant 0 : i32
    return %c0_i32, %c0_i32_0 : i32, i32
  }
  func.func @transform_5(%arg0: i32) -> (i32, i32, i32) {
    %c0_i32 = arith.constant 0 : i32
    %c0_i32_0 = arith.constant 0 : i32
    %c0_i32_1 = arith.constant 0 : i32
    %c0_i32_2 = arith.constant 0 : i32
    return %c0_i32, %c0_i32_0, %c0_i32_1 : i32, i32, i32
  }
  func.func @transform_6(%arg0: i32) -> (i32, i32) {
    %c0_i32 = arith.constant 0 : i32
    %c0_i32_0 = arith.constant 0 : i32
    %c0_i32_1 = arith.constant 0 : i32
    return %c0_i32, %c0_i32_0 : i32, i32
  }
  func.func @transform_7(%arg0: i32) -> (i32, i32) {
    %c0_i32 = arith.constant 0 : i32
    %c0_i32_0 = arith.constant 0 : i32
    %c0_i32_1 = arith.constant 0 : i32
    return %c0_i32, %c0_i32_0 : i32, i32
  }
  func.func @transform_8(%arg0: i32) -> (i32, i32, i32) {
    %c0_i32 = arith.constant 0 : i32
    %c0_i32_0 = arith.constant 0 : i32
    %c0_i32_1 = arith.constant 0 : i32
    %c0_i32_2 = arith.constant 0 : i32
    return %c0_i32, %c0_i32_0, %c0_i32_1 : i32, i32, i32
  }
  func.func @transform_9(%arg0: i32) -> (i32, i32) {
    %c0_i32 = arith.constant 0 : i32
    %c0_i32_0 = arith.constant 0 : i32
    %c0_i32_1 = arith.constant 0 : i32
    return %c0_i32, %c0_i32_0 : i32, i32
  }
  func.func @transform_10(%arg0: i32) -> (i32, i32) {
    %c0_i32 = arith.constant 0 : i32
    %c0_i32_0 = arith.constant 0 : i32
    %c0_i32_1 = arith.constant 0 : i32
    return %c0_i32, %c0_i32_0 : i32, i32
  }
  func.func @transform_11(%arg0: i32) -> (i32, i32, i32) {
    %c0_i32 = arith.constant 0 : i32
    %c0_i32_0 = arith.constant 0 : i32
    %c0_i32_1 = arith.constant 0 : i32
    %c0_i32_2 = arith.constant 0 : i32
    return %c0_i32, %c0_i32_0, %c0_i32_1 : i32, i32, i32
  }
  func.func @transform_12(%arg0: i32) -> (i32, i32) {
    %c0_i32 = arith.constant 0 : i32
    %c0_i32_0 = arith.constant 0 : i32
    %c0_i32_1 = arith.constant 0 : i32
    return %c0_i32, %c0_i32_0 : i32, i32
  }
  func.func @transform_13(%arg0: i32) -> (i32, i32) {
    %c0_i32 = arith.constant 0 : i32
    %c0_i32_0 = arith.constant 0 : i32
    %c0_i32_1 = arith.constant 0 : i32
    return %c0_i32, %c0_i32_0 : i32, i32
  }
  func.func @transform_14(%arg0: i32) -> (i32, i32, i32) {
    %c0_i32 = arith.constant 0 : i32
    %c0_i32_0 = arith.constant 0 : i32
    %c0_i32_1 = arith.constant 0 : i32
    return %arg0, %c0_i32, %c0_i32_0 : i32, i32, i32
  }
  func.func @transform_15(%arg0: i32) -> (i32, i32, i32) {
    %c0_i32 = arith.constant 0 : i32
    %c0_i32_0 = arith.constant 0 : i32
    %c0_i32_1 = arith.constant 0 : i32
    return %arg0, %c0_i32, %c0_i32_0 : i32, i32, i32
  }
}

module attributes {stable_mosaic.version = 11 : i64} {
  func.func @kernel(%arg0: i32, %arg1: memref<1x4x4x256xf32, #tpu.memory_space<vmem>>, %arg2: memref<9x1x256xf32, #tpu.memory_space<vmem>>, %arg3: memref<9x4x4xf32, #tpu.memory_space<vmem>>, %arg4: memref<4x1xf32, #tpu.memory_space<vmem>>, %arg5: memref<4x1xf32, #tpu.memory_space<vmem>>, %arg6: memref<9x4x4xf32, #tpu.memory_space<vmem>>, %arg7: memref<4x1xf32, #tpu.memory_space<vmem>>, %arg8: memref<4x1xf32, #tpu.memory_space<vmem>>, %arg9: memref<9x8x4xf32, #tpu.memory_space<vmem>>, %arg10: memref<8x1xf32, #tpu.memory_space<vmem>>, %arg11: memref<8x1xf32, #tpu.memory_space<vmem>>, %arg12: memref<9x8x8xf32, #tpu.memory_space<vmem>>, %arg13: memref<8x1xf32, #tpu.memory_space<vmem>>, %arg14: memref<8x1xf32, #tpu.memory_space<vmem>>, %arg15: memref<1x8x1xf32, #tpu.memory_space<vmem>>, %arg16: memref<1x8x256xf32, #tpu.memory_space<vmem>>) attributes {dimension_semantics = [#tpu.dimension_semantics<parallel>], iteration_bounds = array<i64: 2>, scalar_prefetch = 0 : i64, scratch_operands = 0 : i64, tpu.core_type = #tpu.core_type<tc>, window_params = [{transform_indices = @transform_0, window_bounds = array<i64: 1, 4, 4, 256>}, {pipeline_mode = #tpu.pipeline_mode<synchronous>, transform_indices = @transform_1, window_bounds = array<i64: 9, 1, 256>}, {pipeline_mode = #tpu.pipeline_mode<synchronous>, transform_indices = @transform_2, window_bounds = array<i64: 9, 4, 4>}, {pipeline_mode = #tpu.pipeline_mode<synchronous>, transform_indices = @transform_3, window_bounds = array<i64: 4, 1>}, {pipeline_mode = #tpu.pipeline_mode<synchronous>, transform_indices = @transform_4, window_bounds = array<i64: 4, 1>}, {pipeline_mode = #tpu.pipeline_mode<synchronous>, transform_indices = @transform_5, window_bounds = array<i64: 9, 4, 4>}, {pipeline_mode = #tpu.pipeline_mode<synchronous>, transform_indices = @transform_6, window_bounds = array<i64: 4, 1>}, {pipeline_mode = #tpu.pipeline_mode<synchronous>, transform_indices = @transform_7, window_bounds = array<i64: 4, 1>}, {pipeline_mode = #tpu.pipeline_mode<synchronous>, transform_indices = @transform_8, window_bounds = array<i64: 9, 8, 4>}, {pipeline_mode = #tpu.pipeline_mode<synchronous>, transform_indices = @transform_9, window_bounds = array<i64: 8, 1>}, {pipeline_mode = #tpu.pipeline_mode<synchronous>, transform_indices = @transform_10, window_bounds = array<i64: 8, 1>}, {pipeline_mode = #tpu.pipeline_mode<synchronous>, transform_indices = @transform_11, window_bounds = array<i64: 9, 8, 8>}, {pipeline_mode = #tpu.pipeline_mode<synchronous>, transform_indices = @transform_12, window_bounds = array<i64: 8, 1>}, {pipeline_mode = #tpu.pipeline_mode<synchronous>, transform_indices = @transform_13, window_bounds = array<i64: 8, 1>}, {transform_indices = @transform_14, window_bounds = array<i64: 1, 8, 1>}, {transform_indices = @transform_15, window_bounds = array<i64: 1, 8, 256>}]} {
    %c0 = arith.constant 0 : index
    %c0_0 = arith.constant 0 : index
    %c0_1 = arith.constant 0 : index
    %c0_2 = arith.constant 0 : index
    %0 = vector.load %arg1[%c0, %c0_0, %c0_1, %c0_2] : memref<1x4x4x256xf32, #tpu.memory_space<vmem>>, vector<1x1x4x256xf32>
    %1 = vector.shape_cast %0 : vector<1x1x4x256xf32> to vector<4x256xf32>
    %c0_3 = arith.constant 0 : index
    %c1 = arith.constant 1 : index
    %c0_4 = arith.constant 0 : index
    %c0_5 = arith.constant 0 : index
    %2 = vector.load %arg1[%c0_3, %c1, %c0_4, %c0_5] : memref<1x4x4x256xf32, #tpu.memory_space<vmem>>, vector<1x1x4x256xf32>
    %3 = vector.shape_cast %2 : vector<1x1x4x256xf32> to vector<4x256xf32>
    %4 = arith.maximumf %1, %3 : vector<4x256xf32>
    %c0_6 = arith.constant 0 : index
    %c2 = arith.constant 2 : index
    %c0_7 = arith.constant 0 : index
    %c0_8 = arith.constant 0 : index
    %5 = vector.load %arg1[%c0_6, %c2, %c0_7, %c0_8] : memref<1x4x4x256xf32, #tpu.memory_space<vmem>>, vector<1x1x4x256xf32>
    %6 = vector.shape_cast %5 : vector<1x1x4x256xf32> to vector<4x256xf32>
    %c0_9 = arith.constant 0 : index
    %c3 = arith.constant 3 : index
    %c0_10 = arith.constant 0 : index
    %c0_11 = arith.constant 0 : index
    %7 = vector.load %arg1[%c0_9, %c3, %c0_10, %c0_11] : memref<1x4x4x256xf32, #tpu.memory_space<vmem>>, vector<1x1x4x256xf32>
    %8 = vector.shape_cast %7 : vector<1x1x4x256xf32> to vector<4x256xf32>
    %9 = arith.maximumf %6, %8 : vector<4x256xf32>
    %10 = arith.maximumf %4, %9 : vector<4x256xf32>
    %c17_i32 = arith.constant 17 : i32
    %11 = tpu.dynamic_rotate %10 by %c17_i32 dim 1 : vector<4x256xf32>, i32 -> vector<4x256xf32>
    %c0_12 = arith.constant 0 : index
    %c0_13 = arith.constant 0 : index
    %c0_14 = arith.constant 0 : index
    %12 = vector.load %arg2[%c0_12, %c0_13, %c0_14] : memref<9x1x256xf32, #tpu.memory_space<vmem>>, vector<1x1x256xf32>
    %13 = vector.shape_cast %12 : vector<1x1x256xf32> to vector<1x256xf32>
    %14 = vector.broadcast %13 : vector<1x256xf32> to vector<4x256xf32>
    %15 = arith.mulf %11, %14 : vector<4x256xf32>
    %c0_15 = arith.constant 0 : index
    %c0_16 = arith.constant 0 : index
    %c0_17 = arith.constant 0 : index
    %16 = vector.load %arg3[%c0_15, %c0_16, %c0_17] : memref<9x4x4xf32, #tpu.memory_space<vmem>>, vector<1x4x4xf32>
    %17 = vector.shape_cast %16 : vector<1x4x4xf32> to vector<4x4xf32>
    %cst = arith.constant dense<0.000000e+00> : vector<4x256xf32>
    %18 = tpu.matmul %17, %15, %cst {dimension_numbers = #tpu.dot_dimension_numbers<[1], [0], [0], [1], [0, 0, 1, 1], [], []>} : vector<4x4xf32>, vector<4x256xf32>, vector<4x256xf32> -> vector<4x256xf32>
    %c16_i32 = arith.constant 16 : i32
    %19 = tpu.dynamic_rotate %10 by %c16_i32 dim 1 : vector<4x256xf32>, i32 -> vector<4x256xf32>
    %c1_18 = arith.constant 1 : index
    %c0_19 = arith.constant 0 : index
    %c0_20 = arith.constant 0 : index
    %20 = vector.load %arg2[%c1_18, %c0_19, %c0_20] : memref<9x1x256xf32, #tpu.memory_space<vmem>>, vector<1x1x256xf32>
    %21 = vector.shape_cast %20 : vector<1x1x256xf32> to vector<1x256xf32>
    %22 = vector.broadcast %21 : vector<1x256xf32> to vector<4x256xf32>
    %23 = arith.mulf %19, %22 : vector<4x256xf32>
    %c1_21 = arith.constant 1 : index
    %c0_22 = arith.constant 0 : index
    %c0_23 = arith.constant 0 : index
    %24 = vector.load %arg3[%c1_21, %c0_22, %c0_23] : memref<9x4x4xf32, #tpu.memory_space<vmem>>, vector<1x4x4xf32>
    %25 = vector.shape_cast %24 : vector<1x4x4xf32> to vector<4x4xf32>
    %cst_24 = arith.constant dense<0.000000e+00> : vector<4x256xf32>
    %26 = tpu.matmul %25, %23, %cst_24 {dimension_numbers = #tpu.dot_dimension_numbers<[1], [0], [0], [1], [0, 0, 1, 1], [], []>} : vector<4x4xf32>, vector<4x256xf32>, vector<4x256xf32> -> vector<4x256xf32>
    %27 = arith.addf %18, %26 : vector<4x256xf32>
    %c15_i32 = arith.constant 15 : i32
    %28 = tpu.dynamic_rotate %10 by %c15_i32 dim 1 : vector<4x256xf32>, i32 -> vector<4x256xf32>
    %c2_25 = arith.constant 2 : index
    %c0_26 = arith.constant 0 : index
    %c0_27 = arith.constant 0 : index
    %29 = vector.load %arg2[%c2_25, %c0_26, %c0_27] : memref<9x1x256xf32, #tpu.memory_space<vmem>>, vector<1x1x256xf32>
    %30 = vector.shape_cast %29 : vector<1x1x256xf32> to vector<1x256xf32>
    %31 = vector.broadcast %30 : vector<1x256xf32> to vector<4x256xf32>
    %32 = arith.mulf %28, %31 : vector<4x256xf32>
    %c2_28 = arith.constant 2 : index
    %c0_29 = arith.constant 0 : index
    %c0_30 = arith.constant 0 : index
    %33 = vector.load %arg3[%c2_28, %c0_29, %c0_30] : memref<9x4x4xf32, #tpu.memory_space<vmem>>, vector<1x4x4xf32>
    %34 = vector.shape_cast %33 : vector<1x4x4xf32> to vector<4x4xf32>
    %cst_31 = arith.constant dense<0.000000e+00> : vector<4x256xf32>
    %35 = tpu.matmul %34, %32, %cst_31 {dimension_numbers = #tpu.dot_dimension_numbers<[1], [0], [0], [1], [0, 0, 1, 1], [], []>} : vector<4x4xf32>, vector<4x256xf32>, vector<4x256xf32> -> vector<4x256xf32>
    %36 = arith.addf %27, %35 : vector<4x256xf32>
    %c1_i32 = arith.constant 1 : i32
    %37 = tpu.dynamic_rotate %10 by %c1_i32 dim 1 : vector<4x256xf32>, i32 -> vector<4x256xf32>
    %c3_32 = arith.constant 3 : index
    %c0_33 = arith.constant 0 : index
    %c0_34 = arith.constant 0 : index
    %38 = vector.load %arg2[%c3_32, %c0_33, %c0_34] : memref<9x1x256xf32, #tpu.memory_space<vmem>>, vector<1x1x256xf32>
    %39 = vector.shape_cast %38 : vector<1x1x256xf32> to vector<1x256xf32>
    %40 = vector.broadcast %39 : vector<1x256xf32> to vector<4x256xf32>
    %41 = arith.mulf %37, %40 : vector<4x256xf32>
    %c3_35 = arith.constant 3 : index
    %c0_36 = arith.constant 0 : index
    %c0_37 = arith.constant 0 : index
    %42 = vector.load %arg3[%c3_35, %c0_36, %c0_37] : memref<9x4x4xf32, #tpu.memory_space<vmem>>, vector<1x4x4xf32>
    %43 = vector.shape_cast %42 : vector<1x4x4xf32> to vector<4x4xf32>
    %cst_38 = arith.constant dense<0.000000e+00> : vector<4x256xf32>
    %44 = tpu.matmul %43, %41, %cst_38 {dimension_numbers = #tpu.dot_dimension_numbers<[1], [0], [0], [1], [0, 0, 1, 1], [], []>} : vector<4x4xf32>, vector<4x256xf32>, vector<4x256xf32> -> vector<4x256xf32>
    %45 = arith.addf %36, %44 : vector<4x256xf32>
    %c4 = arith.constant 4 : index
    %c0_39 = arith.constant 0 : index
    %c0_40 = arith.constant 0 : index
    %46 = vector.load %arg3[%c4, %c0_39, %c0_40] : memref<9x4x4xf32, #tpu.memory_space<vmem>>, vector<1x4x4xf32>
    %47 = vector.shape_cast %46 : vector<1x4x4xf32> to vector<4x4xf32>
    %cst_41 = arith.constant dense<0.000000e+00> : vector<4x256xf32>
    %48 = tpu.matmul %47, %10, %cst_41 {dimension_numbers = #tpu.dot_dimension_numbers<[1], [0], [0], [1], [0, 0, 1, 1], [], []>} : vector<4x4xf32>, vector<4x256xf32>, vector<4x256xf32> -> vector<4x256xf32>
    %49 = arith.addf %45, %48 : vector<4x256xf32>
    %c255_i32 = arith.constant 255 : i32
    %50 = tpu.dynamic_rotate %10 by %c255_i32 dim 1 : vector<4x256xf32>, i32 -> vector<4x256xf32>
    %c5 = arith.constant 5 : index
    %c0_42 = arith.constant 0 : index
    %c0_43 = arith.constant 0 : index
    %51 = vector.load %arg2[%c5, %c0_42, %c0_43] : memref<9x1x256xf32, #tpu.memory_space<vmem>>, vector<1x1x256xf32>
    %52 = vector.shape_cast %51 : vector<1x1x256xf32> to vector<1x256xf32>
    %53 = vector.broadcast %52 : vector<1x256xf32> to vector<4x256xf32>
    %54 = arith.mulf %50, %53 : vector<4x256xf32>
    %c5_44 = arith.constant 5 : index
    %c0_45 = arith.constant 0 : index
    %c0_46 = arith.constant 0 : index
    %55 = vector.load %arg3[%c5_44, %c0_45, %c0_46] : memref<9x4x4xf32, #tpu.memory_space<vmem>>, vector<1x4x4xf32>
    %56 = vector.shape_cast %55 : vector<1x4x4xf32> to vector<4x4xf32>
    %cst_47 = arith.constant dense<0.000000e+00> : vector<4x256xf32>
    %57 = tpu.matmul %56, %54, %cst_47 {dimension_numbers = #tpu.dot_dimension_numbers<[1], [0], [0], [1], [0, 0, 1, 1], [], []>} : vector<4x4xf32>, vector<4x256xf32>, vector<4x256xf32> -> vector<4x256xf32>
    %58 = arith.addf %49, %57 : vector<4x256xf32>
    %c241_i32 = arith.constant 241 : i32
    %59 = tpu.dynamic_rotate %10 by %c241_i32 dim 1 : vector<4x256xf32>, i32 -> vector<4x256xf32>
    %c6 = arith.constant 6 : index
    %c0_48 = arith.constant 0 : index
    %c0_49 = arith.constant 0 : index
    %60 = vector.load %arg2[%c6, %c0_48, %c0_49] : memref<9x1x256xf32, #tpu.memory_space<vmem>>, vector<1x1x256xf32>
    %61 = vector.shape_cast %60 : vector<1x1x256xf32> to vector<1x256xf32>
    %62 = vector.broadcast %61 : vector<1x256xf32> to vector<4x256xf32>
    %63 = arith.mulf %59, %62 : vector<4x256xf32>
    %c6_50 = arith.constant 6 : index
    %c0_51 = arith.constant 0 : index
    %c0_52 = arith.constant 0 : index
    %64 = vector.load %arg3[%c6_50, %c0_51, %c0_52] : memref<9x4x4xf32, #tpu.memory_space<vmem>>, vector<1x4x4xf32>
    %65 = vector.shape_cast %64 : vector<1x4x4xf32> to vector<4x4xf32>
    %cst_53 = arith.constant dense<0.000000e+00> : vector<4x256xf32>
    %66 = tpu.matmul %65, %63, %cst_53 {dimension_numbers = #tpu.dot_dimension_numbers<[1], [0], [0], [1], [0, 0, 1, 1], [], []>} : vector<4x4xf32>, vector<4x256xf32>, vector<4x256xf32> -> vector<4x256xf32>
    %67 = arith.addf %58, %66 : vector<4x256xf32>
    %c240_i32 = arith.constant 240 : i32
    %68 = tpu.dynamic_rotate %10 by %c240_i32 dim 1 : vector<4x256xf32>, i32 -> vector<4x256xf32>
    %c7 = arith.constant 7 : index
    %c0_54 = arith.constant 0 : index
    %c0_55 = arith.constant 0 : index
    %69 = vector.load %arg2[%c7, %c0_54, %c0_55] : memref<9x1x256xf32, #tpu.memory_space<vmem>>, vector<1x1x256xf32>
    %70 = vector.shape_cast %69 : vector<1x1x256xf32> to vector<1x256xf32>
    %71 = vector.broadcast %70 : vector<1x256xf32> to vector<4x256xf32>
    %72 = arith.mulf %68, %71 : vector<4x256xf32>
    %c7_56 = arith.constant 7 : index
    %c0_57 = arith.constant 0 : index
    %c0_58 = arith.constant 0 : index
    %73 = vector.load %arg3[%c7_56, %c0_57, %c0_58] : memref<9x4x4xf32, #tpu.memory_space<vmem>>, vector<1x4x4xf32>
    %74 = vector.shape_cast %73 : vector<1x4x4xf32> to vector<4x4xf32>
    %cst_59 = arith.constant dense<0.000000e+00> : vector<4x256xf32>
    %75 = tpu.matmul %74, %72, %cst_59 {dimension_numbers = #tpu.dot_dimension_numbers<[1], [0], [0], [1], [0, 0, 1, 1], [], []>} : vector<4x4xf32>, vector<4x256xf32>, vector<4x256xf32> -> vector<4x256xf32>
    %76 = arith.addf %67, %75 : vector<4x256xf32>
    %c239_i32 = arith.constant 239 : i32
    %77 = tpu.dynamic_rotate %10 by %c239_i32 dim 1 : vector<4x256xf32>, i32 -> vector<4x256xf32>
    %c8 = arith.constant 8 : index
    %c0_60 = arith.constant 0 : index
    %c0_61 = arith.constant 0 : index
    %78 = vector.load %arg2[%c8, %c0_60, %c0_61] : memref<9x1x256xf32, #tpu.memory_space<vmem>>, vector<1x1x256xf32>
    %79 = vector.shape_cast %78 : vector<1x1x256xf32> to vector<1x256xf32>
    %80 = vector.broadcast %79 : vector<1x256xf32> to vector<4x256xf32>
    %81 = arith.mulf %77, %80 : vector<4x256xf32>
    %c8_62 = arith.constant 8 : index
    %c0_63 = arith.constant 0 : index
    %c0_64 = arith.constant 0 : index
    %82 = vector.load %arg3[%c8_62, %c0_63, %c0_64] : memref<9x4x4xf32, #tpu.memory_space<vmem>>, vector<1x4x4xf32>
    %83 = vector.shape_cast %82 : vector<1x4x4xf32> to vector<4x4xf32>
    %cst_65 = arith.constant dense<0.000000e+00> : vector<4x256xf32>
    %84 = tpu.matmul %83, %81, %cst_65 {dimension_numbers = #tpu.dot_dimension_numbers<[1], [0], [0], [1], [0, 0, 1, 1], [], []>} : vector<4x4xf32>, vector<4x256xf32>, vector<4x256xf32> -> vector<4x256xf32>
    %85 = arith.addf %76, %84 : vector<4x256xf32>
    %cst_66 = arith.constant dense<0.000000e+00> : vector<256xf32>
    %86 = vector.multi_reduction <add>, %85, %cst_66 [0] : vector<4x256xf32> to vector<256xf32>
    %87 = vector.shape_cast %86 : vector<256xf32> to vector<1x256xf32>
    %88 = vector.shape_cast %87 : vector<1x256xf32> to vector<1x1x256xf32>
    %cst_67 = arith.constant dense<0.000000e+00> : vector<1xf32>
    %89 = vector.multi_reduction <add>, %88, %cst_67 [1, 2] : vector<1x1x256xf32> to vector<1xf32>
    %90 = vector.shape_cast %89 : vector<1xf32> to vector<1x1x1xf32>
    %91 = vector.extract %90[0, 0, 0] : f32 from vector<1x1x1xf32>
    %cst_68 = arith.constant 9.765625E-4 : f32
    %92 = arith.mulf %91, %cst_68 : f32
    %93 = vector.broadcast %92 : f32 to vector<4x256xf32>
    %94 = arith.subf %85, %93 : vector<4x256xf32>
    %95 = arith.mulf %94, %94 : vector<4x256xf32>
    %cst_69 = arith.constant dense<0.000000e+00> : vector<256xf32>
    %96 = vector.multi_reduction <add>, %95, %cst_69 [0] : vector<4x256xf32> to vector<256xf32>
    %97 = vector.shape_cast %96 : vector<256xf32> to vector<1x256xf32>
    %98 = vector.shape_cast %97 : vector<1x256xf32> to vector<1x1x256xf32>
    %cst_70 = arith.constant dense<0.000000e+00> : vector<1xf32>
    %99 = vector.multi_reduction <add>, %98, %cst_70 [1, 2] : vector<1x1x256xf32> to vector<1xf32>
    %100 = vector.shape_cast %99 : vector<1xf32> to vector<1x1x1xf32>
    %101 = vector.extract %100[0, 0, 0] : f32 from vector<1x1x1xf32>
    %cst_71 = arith.constant 9.765625E-4 : f32
    %102 = arith.mulf %101, %cst_71 : f32
    %cst_72 = arith.constant 9.99999974E-6 : f32
    %103 = arith.addf %102, %cst_72 : f32
    %104 = math.rsqrt %103 : f32
    %105 = vector.broadcast %104 : f32 to vector<4x256xf32>
    %106 = arith.mulf %94, %105 : vector<4x256xf32>
    %c0_73 = arith.constant 0 : index
    %c0_74 = arith.constant 0 : index
    %107 = vector.load %arg4[%c0_73, %c0_74] : memref<4x1xf32, #tpu.memory_space<vmem>>, vector<4x1xf32>
    %108 = vector.broadcast %107 : vector<4x1xf32> to vector<4x256xf32>
    %109 = arith.mulf %106, %108 : vector<4x256xf32>
    %c0_75 = arith.constant 0 : index
    %c0_76 = arith.constant 0 : index
    %110 = vector.load %arg5[%c0_75, %c0_76] : memref<4x1xf32, #tpu.memory_space<vmem>>, vector<4x1xf32>
    %111 = vector.broadcast %110 : vector<4x1xf32> to vector<4x256xf32>
    %112 = arith.addf %109, %111 : vector<4x256xf32>
    %cst_77 = arith.constant 5.000000e-01 : f32
    %113 = vector.broadcast %cst_77 : f32 to vector<4x256xf32>
    %114 = arith.mulf %113, %112 : vector<4x256xf32>
    %cst_78 = arith.constant 0.707106769 : f32
    %115 = vector.broadcast %cst_78 : f32 to vector<4x256xf32>
    %116 = arith.mulf %112, %115 : vector<4x256xf32>
    %cst_79 = arith.constant 0.000000e+00 : f32
    %117 = vector.broadcast %cst_79 : f32 to vector<4x256xf32>
    %118 = arith.cmpf oge, %116, %117 : vector<4x256xf32>
    %cst_80 = arith.constant 1.000000e+00 : f32
    %cst_81 = arith.constant -1.000000e+00 : f32
    %119 = vector.broadcast %cst_80 : f32 to vector<4x256xf32>
    %120 = vector.broadcast %cst_81 : f32 to vector<4x256xf32>
    %121 = arith.select %118, %119, %120 : vector<4x256xi1>, vector<4x256xf32>
    %122 = math.absf %116 : vector<4x256xf32>
    %cst_82 = arith.constant 0.327591091 : f32
    %123 = vector.broadcast %cst_82 : f32 to vector<4x256xf32>
    %124 = arith.mulf %123, %122 : vector<4x256xf32>
    %cst_83 = arith.constant 1.000000e+00 : f32
    %125 = vector.broadcast %cst_83 : f32 to vector<4x256xf32>
    %126 = arith.addf %125, %124 : vector<4x256xf32>
    %cst_84 = arith.constant 1.000000e+00 : f32
    %127 = vector.broadcast %cst_84 : f32 to vector<4x256xf32>
    %128 = arith.divf %127, %126 : vector<4x256xf32>
    %cst_85 = arith.constant 1.06140542 : f32
    %129 = vector.broadcast %cst_85 : f32 to vector<4x256xf32>
    %130 = arith.mulf %129, %128 : vector<4x256xf32>
    %cst_86 = arith.constant -1.45315206 : f32
    %131 = vector.broadcast %cst_86 : f32 to vector<4x256xf32>
    %132 = arith.addf %130, %131 : vector<4x256xf32>
    %133 = arith.mulf %132, %128 : vector<4x256xf32>
    %cst_87 = arith.constant 1.42141378 : f32
    %134 = vector.broadcast %cst_87 : f32 to vector<4x256xf32>
    %135 = arith.addf %133, %134 : vector<4x256xf32>
    %136 = arith.mulf %135, %128 : vector<4x256xf32>
    %cst_88 = arith.constant -0.284496725 : f32
    %137 = vector.broadcast %cst_88 : f32 to vector<4x256xf32>
    %138 = arith.addf %136, %137 : vector<4x256xf32>
    %139 = arith.mulf %138, %128 : vector<4x256xf32>
    %cst_89 = arith.constant 0.254829586 : f32
    %140 = vector.broadcast %cst_89 : f32 to vector<4x256xf32>
    %141 = arith.addf %139, %140 : vector<4x256xf32>
    %142 = arith.mulf %141, %128 : vector<4x256xf32>
    %cst_90 = arith.constant 0.000000e+00 : f32
    %143 = vector.broadcast %cst_90 : f32 to vector<4x256xf32>
    %144 = arith.subf %143, %122 : vector<4x256xf32>
    %145 = arith.mulf %144, %122 : vector<4x256xf32>
    %146 = math.exp %145 : vector<4x256xf32>
    %147 = arith.mulf %142, %146 : vector<4x256xf32>
    %cst_91 = arith.constant 1.000000e+00 : f32
    %148 = vector.broadcast %cst_91 : f32 to vector<4x256xf32>
    %149 = arith.subf %148, %147 : vector<4x256xf32>
    %150 = arith.mulf %121, %149 : vector<4x256xf32>
    %cst_92 = arith.constant 1.000000e+00 : f32
    %151 = vector.broadcast %cst_92 : f32 to vector<4x256xf32>
    %152 = arith.addf %151, %150 : vector<4x256xf32>
    %153 = arith.mulf %114, %152 : vector<4x256xf32>
    %c17_i32_93 = arith.constant 17 : i32
    %154 = tpu.dynamic_rotate %153 by %c17_i32_93 dim 1 : vector<4x256xf32>, i32 -> vector<4x256xf32>
    %c0_94 = arith.constant 0 : index
    %c0_95 = arith.constant 0 : index
    %c0_96 = arith.constant 0 : index
    %155 = vector.load %arg2[%c0_94, %c0_95, %c0_96] : memref<9x1x256xf32, #tpu.memory_space<vmem>>, vector<1x1x256xf32>
    %156 = vector.shape_cast %155 : vector<1x1x256xf32> to vector<1x256xf32>
    %157 = vector.broadcast %156 : vector<1x256xf32> to vector<4x256xf32>
    %158 = arith.mulf %154, %157 : vector<4x256xf32>
    %c0_97 = arith.constant 0 : index
    %c0_98 = arith.constant 0 : index
    %c0_99 = arith.constant 0 : index
    %159 = vector.load %arg6[%c0_97, %c0_98, %c0_99] : memref<9x4x4xf32, #tpu.memory_space<vmem>>, vector<1x4x4xf32>
    %160 = vector.shape_cast %159 : vector<1x4x4xf32> to vector<4x4xf32>
    %cst_100 = arith.constant dense<0.000000e+00> : vector<4x256xf32>
    %161 = tpu.matmul %160, %158, %cst_100 {dimension_numbers = #tpu.dot_dimension_numbers<[1], [0], [0], [1], [0, 0, 1, 1], [], []>} : vector<4x4xf32>, vector<4x256xf32>, vector<4x256xf32> -> vector<4x256xf32>
    %c16_i32_101 = arith.constant 16 : i32
    %162 = tpu.dynamic_rotate %153 by %c16_i32_101 dim 1 : vector<4x256xf32>, i32 -> vector<4x256xf32>
    %c1_102 = arith.constant 1 : index
    %c0_103 = arith.constant 0 : index
    %c0_104 = arith.constant 0 : index
    %163 = vector.load %arg2[%c1_102, %c0_103, %c0_104] : memref<9x1x256xf32, #tpu.memory_space<vmem>>, vector<1x1x256xf32>
    %164 = vector.shape_cast %163 : vector<1x1x256xf32> to vector<1x256xf32>
    %165 = vector.broadcast %164 : vector<1x256xf32> to vector<4x256xf32>
    %166 = arith.mulf %162, %165 : vector<4x256xf32>
    %c1_105 = arith.constant 1 : index
    %c0_106 = arith.constant 0 : index
    %c0_107 = arith.constant 0 : index
    %167 = vector.load %arg6[%c1_105, %c0_106, %c0_107] : memref<9x4x4xf32, #tpu.memory_space<vmem>>, vector<1x4x4xf32>
    %168 = vector.shape_cast %167 : vector<1x4x4xf32> to vector<4x4xf32>
    %cst_108 = arith.constant dense<0.000000e+00> : vector<4x256xf32>
    %169 = tpu.matmul %168, %166, %cst_108 {dimension_numbers = #tpu.dot_dimension_numbers<[1], [0], [0], [1], [0, 0, 1, 1], [], []>} : vector<4x4xf32>, vector<4x256xf32>, vector<4x256xf32> -> vector<4x256xf32>
    %170 = arith.addf %161, %169 : vector<4x256xf32>
    %c15_i32_109 = arith.constant 15 : i32
    %171 = tpu.dynamic_rotate %153 by %c15_i32_109 dim 1 : vector<4x256xf32>, i32 -> vector<4x256xf32>
    %c2_110 = arith.constant 2 : index
    %c0_111 = arith.constant 0 : index
    %c0_112 = arith.constant 0 : index
    %172 = vector.load %arg2[%c2_110, %c0_111, %c0_112] : memref<9x1x256xf32, #tpu.memory_space<vmem>>, vector<1x1x256xf32>
    %173 = vector.shape_cast %172 : vector<1x1x256xf32> to vector<1x256xf32>
    %174 = vector.broadcast %173 : vector<1x256xf32> to vector<4x256xf32>
    %175 = arith.mulf %171, %174 : vector<4x256xf32>
    %c2_113 = arith.constant 2 : index
    %c0_114 = arith.constant 0 : index
    %c0_115 = arith.constant 0 : index
    %176 = vector.load %arg6[%c2_113, %c0_114, %c0_115] : memref<9x4x4xf32, #tpu.memory_space<vmem>>, vector<1x4x4xf32>
    %177 = vector.shape_cast %176 : vector<1x4x4xf32> to vector<4x4xf32>
    %cst_116 = arith.constant dense<0.000000e+00> : vector<4x256xf32>
    %178 = tpu.matmul %177, %175, %cst_116 {dimension_numbers = #tpu.dot_dimension_numbers<[1], [0], [0], [1], [0, 0, 1, 1], [], []>} : vector<4x4xf32>, vector<4x256xf32>, vector<4x256xf32> -> vector<4x256xf32>
    %179 = arith.addf %170, %178 : vector<4x256xf32>
    %c1_i32_117 = arith.constant 1 : i32
    %180 = tpu.dynamic_rotate %153 by %c1_i32_117 dim 1 : vector<4x256xf32>, i32 -> vector<4x256xf32>
    %c3_118 = arith.constant 3 : index
    %c0_119 = arith.constant 0 : index
    %c0_120 = arith.constant 0 : index
    %181 = vector.load %arg2[%c3_118, %c0_119, %c0_120] : memref<9x1x256xf32, #tpu.memory_space<vmem>>, vector<1x1x256xf32>
    %182 = vector.shape_cast %181 : vector<1x1x256xf32> to vector<1x256xf32>
    %183 = vector.broadcast %182 : vector<1x256xf32> to vector<4x256xf32>
    %184 = arith.mulf %180, %183 : vector<4x256xf32>
    %c3_121 = arith.constant 3 : index
    %c0_122 = arith.constant 0 : index
    %c0_123 = arith.constant 0 : index
    %185 = vector.load %arg6[%c3_121, %c0_122, %c0_123] : memref<9x4x4xf32, #tpu.memory_space<vmem>>, vector<1x4x4xf32>
    %186 = vector.shape_cast %185 : vector<1x4x4xf32> to vector<4x4xf32>
    %cst_124 = arith.constant dense<0.000000e+00> : vector<4x256xf32>
    %187 = tpu.matmul %186, %184, %cst_124 {dimension_numbers = #tpu.dot_dimension_numbers<[1], [0], [0], [1], [0, 0, 1, 1], [], []>} : vector<4x4xf32>, vector<4x256xf32>, vector<4x256xf32> -> vector<4x256xf32>
    %188 = arith.addf %179, %187 : vector<4x256xf32>
    %c4_125 = arith.constant 4 : index
    %c0_126 = arith.constant 0 : index
    %c0_127 = arith.constant 0 : index
    %189 = vector.load %arg6[%c4_125, %c0_126, %c0_127] : memref<9x4x4xf32, #tpu.memory_space<vmem>>, vector<1x4x4xf32>
    %190 = vector.shape_cast %189 : vector<1x4x4xf32> to vector<4x4xf32>
    %cst_128 = arith.constant dense<0.000000e+00> : vector<4x256xf32>
    %191 = tpu.matmul %190, %153, %cst_128 {dimension_numbers = #tpu.dot_dimension_numbers<[1], [0], [0], [1], [0, 0, 1, 1], [], []>} : vector<4x4xf32>, vector<4x256xf32>, vector<4x256xf32> -> vector<4x256xf32>
    %192 = arith.addf %188, %191 : vector<4x256xf32>
    %c255_i32_129 = arith.constant 255 : i32
    %193 = tpu.dynamic_rotate %153 by %c255_i32_129 dim 1 : vector<4x256xf32>, i32 -> vector<4x256xf32>
    %c5_130 = arith.constant 5 : index
    %c0_131 = arith.constant 0 : index
    %c0_132 = arith.constant 0 : index
    %194 = vector.load %arg2[%c5_130, %c0_131, %c0_132] : memref<9x1x256xf32, #tpu.memory_space<vmem>>, vector<1x1x256xf32>
    %195 = vector.shape_cast %194 : vector<1x1x256xf32> to vector<1x256xf32>
    %196 = vector.broadcast %195 : vector<1x256xf32> to vector<4x256xf32>
    %197 = arith.mulf %193, %196 : vector<4x256xf32>
    %c5_133 = arith.constant 5 : index
    %c0_134 = arith.constant 0 : index
    %c0_135 = arith.constant 0 : index
    %198 = vector.load %arg6[%c5_133, %c0_134, %c0_135] : memref<9x4x4xf32, #tpu.memory_space<vmem>>, vector<1x4x4xf32>
    %199 = vector.shape_cast %198 : vector<1x4x4xf32> to vector<4x4xf32>
    %cst_136 = arith.constant dense<0.000000e+00> : vector<4x256xf32>
    %200 = tpu.matmul %199, %197, %cst_136 {dimension_numbers = #tpu.dot_dimension_numbers<[1], [0], [0], [1], [0, 0, 1, 1], [], []>} : vector<4x4xf32>, vector<4x256xf32>, vector<4x256xf32> -> vector<4x256xf32>
    %201 = arith.addf %192, %200 : vector<4x256xf32>
    %c241_i32_137 = arith.constant 241 : i32
    %202 = tpu.dynamic_rotate %153 by %c241_i32_137 dim 1 : vector<4x256xf32>, i32 -> vector<4x256xf32>
    %c6_138 = arith.constant 6 : index
    %c0_139 = arith.constant 0 : index
    %c0_140 = arith.constant 0 : index
    %203 = vector.load %arg2[%c6_138, %c0_139, %c0_140] : memref<9x1x256xf32, #tpu.memory_space<vmem>>, vector<1x1x256xf32>
    %204 = vector.shape_cast %203 : vector<1x1x256xf32> to vector<1x256xf32>
    %205 = vector.broadcast %204 : vector<1x256xf32> to vector<4x256xf32>
    %206 = arith.mulf %202, %205 : vector<4x256xf32>
    %c6_141 = arith.constant 6 : index
    %c0_142 = arith.constant 0 : index
    %c0_143 = arith.constant 0 : index
    %207 = vector.load %arg6[%c6_141, %c0_142, %c0_143] : memref<9x4x4xf32, #tpu.memory_space<vmem>>, vector<1x4x4xf32>
    %208 = vector.shape_cast %207 : vector<1x4x4xf32> to vector<4x4xf32>
    %cst_144 = arith.constant dense<0.000000e+00> : vector<4x256xf32>
    %209 = tpu.matmul %208, %206, %cst_144 {dimension_numbers = #tpu.dot_dimension_numbers<[1], [0], [0], [1], [0, 0, 1, 1], [], []>} : vector<4x4xf32>, vector<4x256xf32>, vector<4x256xf32> -> vector<4x256xf32>
    %210 = arith.addf %201, %209 : vector<4x256xf32>
    %c240_i32_145 = arith.constant 240 : i32
    %211 = tpu.dynamic_rotate %153 by %c240_i32_145 dim 1 : vector<4x256xf32>, i32 -> vector<4x256xf32>
    %c7_146 = arith.constant 7 : index
    %c0_147 = arith.constant 0 : index
    %c0_148 = arith.constant 0 : index
    %212 = vector.load %arg2[%c7_146, %c0_147, %c0_148] : memref<9x1x256xf32, #tpu.memory_space<vmem>>, vector<1x1x256xf32>
    %213 = vector.shape_cast %212 : vector<1x1x256xf32> to vector<1x256xf32>
    %214 = vector.broadcast %213 : vector<1x256xf32> to vector<4x256xf32>
    %215 = arith.mulf %211, %214 : vector<4x256xf32>
    %c7_149 = arith.constant 7 : index
    %c0_150 = arith.constant 0 : index
    %c0_151 = arith.constant 0 : index
    %216 = vector.load %arg6[%c7_149, %c0_150, %c0_151] : memref<9x4x4xf32, #tpu.memory_space<vmem>>, vector<1x4x4xf32>
    %217 = vector.shape_cast %216 : vector<1x4x4xf32> to vector<4x4xf32>
    %cst_152 = arith.constant dense<0.000000e+00> : vector<4x256xf32>
    %218 = tpu.matmul %217, %215, %cst_152 {dimension_numbers = #tpu.dot_dimension_numbers<[1], [0], [0], [1], [0, 0, 1, 1], [], []>} : vector<4x4xf32>, vector<4x256xf32>, vector<4x256xf32> -> vector<4x256xf32>
    %219 = arith.addf %210, %218 : vector<4x256xf32>
    %c239_i32_153 = arith.constant 239 : i32
    %220 = tpu.dynamic_rotate %153 by %c239_i32_153 dim 1 : vector<4x256xf32>, i32 -> vector<4x256xf32>
    %c8_154 = arith.constant 8 : index
    %c0_155 = arith.constant 0 : index
    %c0_156 = arith.constant 0 : index
    %221 = vector.load %arg2[%c8_154, %c0_155, %c0_156] : memref<9x1x256xf32, #tpu.memory_space<vmem>>, vector<1x1x256xf32>
    %222 = vector.shape_cast %221 : vector<1x1x256xf32> to vector<1x256xf32>
    %223 = vector.broadcast %222 : vector<1x256xf32> to vector<4x256xf32>
    %224 = arith.mulf %220, %223 : vector<4x256xf32>
    %c8_157 = arith.constant 8 : index
    %c0_158 = arith.constant 0 : index
    %c0_159 = arith.constant 0 : index
    %225 = vector.load %arg6[%c8_157, %c0_158, %c0_159] : memref<9x4x4xf32, #tpu.memory_space<vmem>>, vector<1x4x4xf32>
    %226 = vector.shape_cast %225 : vector<1x4x4xf32> to vector<4x4xf32>
    %cst_160 = arith.constant dense<0.000000e+00> : vector<4x256xf32>
    %227 = tpu.matmul %226, %224, %cst_160 {dimension_numbers = #tpu.dot_dimension_numbers<[1], [0], [0], [1], [0, 0, 1, 1], [], []>} : vector<4x4xf32>, vector<4x256xf32>, vector<4x256xf32> -> vector<4x256xf32>
    %228 = arith.addf %219, %227 : vector<4x256xf32>
    %cst_161 = arith.constant dense<0.000000e+00> : vector<256xf32>
    %229 = vector.multi_reduction <add>, %228, %cst_161 [0] : vector<4x256xf32> to vector<256xf32>
    %230 = vector.shape_cast %229 : vector<256xf32> to vector<1x256xf32>
    %231 = vector.shape_cast %230 : vector<1x256xf32> to vector<1x1x256xf32>
    %cst_162 = arith.constant dense<0.000000e+00> : vector<1xf32>
    %232 = vector.multi_reduction <add>, %231, %cst_162 [1, 2] : vector<1x1x256xf32> to vector<1xf32>
    %233 = vector.shape_cast %232 : vector<1xf32> to vector<1x1x1xf32>
    %234 = vector.extract %233[0, 0, 0] : f32 from vector<1x1x1xf32>
    %cst_163 = arith.constant 9.765625E-4 : f32
    %235 = arith.mulf %234, %cst_163 : f32
    %236 = vector.broadcast %235 : f32 to vector<4x256xf32>
    %237 = arith.subf %228, %236 : vector<4x256xf32>
    %238 = arith.mulf %237, %237 : vector<4x256xf32>
    %cst_164 = arith.constant dense<0.000000e+00> : vector<256xf32>
    %239 = vector.multi_reduction <add>, %238, %cst_164 [0] : vector<4x256xf32> to vector<256xf32>
    %240 = vector.shape_cast %239 : vector<256xf32> to vector<1x256xf32>
    %241 = vector.shape_cast %240 : vector<1x256xf32> to vector<1x1x256xf32>
    %cst_165 = arith.constant dense<0.000000e+00> : vector<1xf32>
    %242 = vector.multi_reduction <add>, %241, %cst_165 [1, 2] : vector<1x1x256xf32> to vector<1xf32>
    %243 = vector.shape_cast %242 : vector<1xf32> to vector<1x1x1xf32>
    %244 = vector.extract %243[0, 0, 0] : f32 from vector<1x1x1xf32>
    %cst_166 = arith.constant 9.765625E-4 : f32
    %245 = arith.mulf %244, %cst_166 : f32
    %cst_167 = arith.constant 9.99999974E-6 : f32
    %246 = arith.addf %245, %cst_167 : f32
    %247 = math.rsqrt %246 : f32
    %248 = vector.broadcast %247 : f32 to vector<4x256xf32>
    %249 = arith.mulf %237, %248 : vector<4x256xf32>
    %c0_168 = arith.constant 0 : index
    %c0_169 = arith.constant 0 : index
    %250 = vector.load %arg7[%c0_168, %c0_169] : memref<4x1xf32, #tpu.memory_space<vmem>>, vector<4x1xf32>
    %251 = vector.broadcast %250 : vector<4x1xf32> to vector<4x256xf32>
    %252 = arith.mulf %249, %251 : vector<4x256xf32>
    %c0_170 = arith.constant 0 : index
    %c0_171 = arith.constant 0 : index
    %253 = vector.load %arg8[%c0_170, %c0_171] : memref<4x1xf32, #tpu.memory_space<vmem>>, vector<4x1xf32>
    %254 = vector.broadcast %253 : vector<4x1xf32> to vector<4x256xf32>
    %255 = arith.addf %252, %254 : vector<4x256xf32>
    %256 = arith.addf %10, %255 : vector<4x256xf32>
    %cst_172 = arith.constant 5.000000e-01 : f32
    %257 = vector.broadcast %cst_172 : f32 to vector<4x256xf32>
    %258 = arith.mulf %257, %256 : vector<4x256xf32>
    %cst_173 = arith.constant 0.707106769 : f32
    %259 = vector.broadcast %cst_173 : f32 to vector<4x256xf32>
    %260 = arith.mulf %256, %259 : vector<4x256xf32>
    %cst_174 = arith.constant 0.000000e+00 : f32
    %261 = vector.broadcast %cst_174 : f32 to vector<4x256xf32>
    %262 = arith.cmpf oge, %260, %261 : vector<4x256xf32>
    %cst_175 = arith.constant 1.000000e+00 : f32
    %cst_176 = arith.constant -1.000000e+00 : f32
    %263 = vector.broadcast %cst_175 : f32 to vector<4x256xf32>
    %264 = vector.broadcast %cst_176 : f32 to vector<4x256xf32>
    %265 = arith.select %262, %263, %264 : vector<4x256xi1>, vector<4x256xf32>
    %266 = math.absf %260 : vector<4x256xf32>
    %cst_177 = arith.constant 0.327591091 : f32
    %267 = vector.broadcast %cst_177 : f32 to vector<4x256xf32>
    %268 = arith.mulf %267, %266 : vector<4x256xf32>
    %cst_178 = arith.constant 1.000000e+00 : f32
    %269 = vector.broadcast %cst_178 : f32 to vector<4x256xf32>
    %270 = arith.addf %269, %268 : vector<4x256xf32>
    %cst_179 = arith.constant 1.000000e+00 : f32
    %271 = vector.broadcast %cst_179 : f32 to vector<4x256xf32>
    %272 = arith.divf %271, %270 : vector<4x256xf32>
    %cst_180 = arith.constant 1.06140542 : f32
    %273 = vector.broadcast %cst_180 : f32 to vector<4x256xf32>
    %274 = arith.mulf %273, %272 : vector<4x256xf32>
    %cst_181 = arith.constant -1.45315206 : f32
    %275 = vector.broadcast %cst_181 : f32 to vector<4x256xf32>
    %276 = arith.addf %274, %275 : vector<4x256xf32>
    %277 = arith.mulf %276, %272 : vector<4x256xf32>
    %cst_182 = arith.constant 1.42141378 : f32
    %278 = vector.broadcast %cst_182 : f32 to vector<4x256xf32>
    %279 = arith.addf %277, %278 : vector<4x256xf32>
    %280 = arith.mulf %279, %272 : vector<4x256xf32>
    %cst_183 = arith.constant -0.284496725 : f32
    %281 = vector.broadcast %cst_183 : f32 to vector<4x256xf32>
    %282 = arith.addf %280, %281 : vector<4x256xf32>
    %283 = arith.mulf %282, %272 : vector<4x256xf32>
    %cst_184 = arith.constant 0.254829586 : f32
    %284 = vector.broadcast %cst_184 : f32 to vector<4x256xf32>
    %285 = arith.addf %283, %284 : vector<4x256xf32>
    %286 = arith.mulf %285, %272 : vector<4x256xf32>
    %cst_185 = arith.constant 0.000000e+00 : f32
    %287 = vector.broadcast %cst_185 : f32 to vector<4x256xf32>
    %288 = arith.subf %287, %266 : vector<4x256xf32>
    %289 = arith.mulf %288, %266 : vector<4x256xf32>
    %290 = math.exp %289 : vector<4x256xf32>
    %291 = arith.mulf %286, %290 : vector<4x256xf32>
    %cst_186 = arith.constant 1.000000e+00 : f32
    %292 = vector.broadcast %cst_186 : f32 to vector<4x256xf32>
    %293 = arith.subf %292, %291 : vector<4x256xf32>
    %294 = arith.mulf %265, %293 : vector<4x256xf32>
    %cst_187 = arith.constant 1.000000e+00 : f32
    %295 = vector.broadcast %cst_187 : f32 to vector<4x256xf32>
    %296 = arith.addf %295, %294 : vector<4x256xf32>
    %297 = arith.mulf %258, %296 : vector<4x256xf32>
    %c17_i32_188 = arith.constant 17 : i32
    %298 = tpu.dynamic_rotate %297 by %c17_i32_188 dim 1 : vector<4x256xf32>, i32 -> vector<4x256xf32>
    %c0_189 = arith.constant 0 : index
    %c0_190 = arith.constant 0 : index
    %c0_191 = arith.constant 0 : index
    %299 = vector.load %arg2[%c0_189, %c0_190, %c0_191] : memref<9x1x256xf32, #tpu.memory_space<vmem>>, vector<1x1x256xf32>
    %300 = vector.shape_cast %299 : vector<1x1x256xf32> to vector<1x256xf32>
    %301 = vector.broadcast %300 : vector<1x256xf32> to vector<4x256xf32>
    %302 = arith.mulf %298, %301 : vector<4x256xf32>
    %c0_192 = arith.constant 0 : index
    %c0_193 = arith.constant 0 : index
    %c0_194 = arith.constant 0 : index
    %303 = vector.load %arg9[%c0_192, %c0_193, %c0_194] : memref<9x8x4xf32, #tpu.memory_space<vmem>>, vector<1x8x4xf32>
    %304 = vector.shape_cast %303 : vector<1x8x4xf32> to vector<8x4xf32>
    %cst_195 = arith.constant dense<0.000000e+00> : vector<8x256xf32>
    %305 = tpu.matmul %304, %302, %cst_195 {dimension_numbers = #tpu.dot_dimension_numbers<[1], [0], [0], [1], [0, 0, 1, 1], [], []>} : vector<8x4xf32>, vector<4x256xf32>, vector<8x256xf32> -> vector<8x256xf32>
    %c16_i32_196 = arith.constant 16 : i32
    %306 = tpu.dynamic_rotate %297 by %c16_i32_196 dim 1 : vector<4x256xf32>, i32 -> vector<4x256xf32>
    %c1_197 = arith.constant 1 : index
    %c0_198 = arith.constant 0 : index
    %c0_199 = arith.constant 0 : index
    %307 = vector.load %arg2[%c1_197, %c0_198, %c0_199] : memref<9x1x256xf32, #tpu.memory_space<vmem>>, vector<1x1x256xf32>
    %308 = vector.shape_cast %307 : vector<1x1x256xf32> to vector<1x256xf32>
    %309 = vector.broadcast %308 : vector<1x256xf32> to vector<4x256xf32>
    %310 = arith.mulf %306, %309 : vector<4x256xf32>
    %c1_200 = arith.constant 1 : index
    %c0_201 = arith.constant 0 : index
    %c0_202 = arith.constant 0 : index
    %311 = vector.load %arg9[%c1_200, %c0_201, %c0_202] : memref<9x8x4xf32, #tpu.memory_space<vmem>>, vector<1x8x4xf32>
    %312 = vector.shape_cast %311 : vector<1x8x4xf32> to vector<8x4xf32>
    %cst_203 = arith.constant dense<0.000000e+00> : vector<8x256xf32>
    %313 = tpu.matmul %312, %310, %cst_203 {dimension_numbers = #tpu.dot_dimension_numbers<[1], [0], [0], [1], [0, 0, 1, 1], [], []>} : vector<8x4xf32>, vector<4x256xf32>, vector<8x256xf32> -> vector<8x256xf32>
    %314 = arith.addf %305, %313 : vector<8x256xf32>
    %c15_i32_204 = arith.constant 15 : i32
    %315 = tpu.dynamic_rotate %297 by %c15_i32_204 dim 1 : vector<4x256xf32>, i32 -> vector<4x256xf32>
    %c2_205 = arith.constant 2 : index
    %c0_206 = arith.constant 0 : index
    %c0_207 = arith.constant 0 : index
    %316 = vector.load %arg2[%c2_205, %c0_206, %c0_207] : memref<9x1x256xf32, #tpu.memory_space<vmem>>, vector<1x1x256xf32>
    %317 = vector.shape_cast %316 : vector<1x1x256xf32> to vector<1x256xf32>
    %318 = vector.broadcast %317 : vector<1x256xf32> to vector<4x256xf32>
    %319 = arith.mulf %315, %318 : vector<4x256xf32>
    %c2_208 = arith.constant 2 : index
    %c0_209 = arith.constant 0 : index
    %c0_210 = arith.constant 0 : index
    %320 = vector.load %arg9[%c2_208, %c0_209, %c0_210] : memref<9x8x4xf32, #tpu.memory_space<vmem>>, vector<1x8x4xf32>
    %321 = vector.shape_cast %320 : vector<1x8x4xf32> to vector<8x4xf32>
    %cst_211 = arith.constant dense<0.000000e+00> : vector<8x256xf32>
    %322 = tpu.matmul %321, %319, %cst_211 {dimension_numbers = #tpu.dot_dimension_numbers<[1], [0], [0], [1], [0, 0, 1, 1], [], []>} : vector<8x4xf32>, vector<4x256xf32>, vector<8x256xf32> -> vector<8x256xf32>
    %323 = arith.addf %314, %322 : vector<8x256xf32>
    %c1_i32_212 = arith.constant 1 : i32
    %324 = tpu.dynamic_rotate %297 by %c1_i32_212 dim 1 : vector<4x256xf32>, i32 -> vector<4x256xf32>
    %c3_213 = arith.constant 3 : index
    %c0_214 = arith.constant 0 : index
    %c0_215 = arith.constant 0 : index
    %325 = vector.load %arg2[%c3_213, %c0_214, %c0_215] : memref<9x1x256xf32, #tpu.memory_space<vmem>>, vector<1x1x256xf32>
    %326 = vector.shape_cast %325 : vector<1x1x256xf32> to vector<1x256xf32>
    %327 = vector.broadcast %326 : vector<1x256xf32> to vector<4x256xf32>
    %328 = arith.mulf %324, %327 : vector<4x256xf32>
    %c3_216 = arith.constant 3 : index
    %c0_217 = arith.constant 0 : index
    %c0_218 = arith.constant 0 : index
    %329 = vector.load %arg9[%c3_216, %c0_217, %c0_218] : memref<9x8x4xf32, #tpu.memory_space<vmem>>, vector<1x8x4xf32>
    %330 = vector.shape_cast %329 : vector<1x8x4xf32> to vector<8x4xf32>
    %cst_219 = arith.constant dense<0.000000e+00> : vector<8x256xf32>
    %331 = tpu.matmul %330, %328, %cst_219 {dimension_numbers = #tpu.dot_dimension_numbers<[1], [0], [0], [1], [0, 0, 1, 1], [], []>} : vector<8x4xf32>, vector<4x256xf32>, vector<8x256xf32> -> vector<8x256xf32>
    %332 = arith.addf %323, %331 : vector<8x256xf32>
    %c4_220 = arith.constant 4 : index
    %c0_221 = arith.constant 0 : index
    %c0_222 = arith.constant 0 : index
    %333 = vector.load %arg9[%c4_220, %c0_221, %c0_222] : memref<9x8x4xf32, #tpu.memory_space<vmem>>, vector<1x8x4xf32>
    %334 = vector.shape_cast %333 : vector<1x8x4xf32> to vector<8x4xf32>
    %cst_223 = arith.constant dense<0.000000e+00> : vector<8x256xf32>
    %335 = tpu.matmul %334, %297, %cst_223 {dimension_numbers = #tpu.dot_dimension_numbers<[1], [0], [0], [1], [0, 0, 1, 1], [], []>} : vector<8x4xf32>, vector<4x256xf32>, vector<8x256xf32> -> vector<8x256xf32>
    %336 = arith.addf %332, %335 : vector<8x256xf32>
    %c255_i32_224 = arith.constant 255 : i32
    %337 = tpu.dynamic_rotate %297 by %c255_i32_224 dim 1 : vector<4x256xf32>, i32 -> vector<4x256xf32>
    %c5_225 = arith.constant 5 : index
    %c0_226 = arith.constant 0 : index
    %c0_227 = arith.constant 0 : index
    %338 = vector.load %arg2[%c5_225, %c0_226, %c0_227] : memref<9x1x256xf32, #tpu.memory_space<vmem>>, vector<1x1x256xf32>
    %339 = vector.shape_cast %338 : vector<1x1x256xf32> to vector<1x256xf32>
    %340 = vector.broadcast %339 : vector<1x256xf32> to vector<4x256xf32>
    %341 = arith.mulf %337, %340 : vector<4x256xf32>
    %c5_228 = arith.constant 5 : index
    %c0_229 = arith.constant 0 : index
    %c0_230 = arith.constant 0 : index
    %342 = vector.load %arg9[%c5_228, %c0_229, %c0_230] : memref<9x8x4xf32, #tpu.memory_space<vmem>>, vector<1x8x4xf32>
    %343 = vector.shape_cast %342 : vector<1x8x4xf32> to vector<8x4xf32>
    %cst_231 = arith.constant dense<0.000000e+00> : vector<8x256xf32>
    %344 = tpu.matmul %343, %341, %cst_231 {dimension_numbers = #tpu.dot_dimension_numbers<[1], [0], [0], [1], [0, 0, 1, 1], [], []>} : vector<8x4xf32>, vector<4x256xf32>, vector<8x256xf32> -> vector<8x256xf32>
    %345 = arith.addf %336, %344 : vector<8x256xf32>
    %c241_i32_232 = arith.constant 241 : i32
    %346 = tpu.dynamic_rotate %297 by %c241_i32_232 dim 1 : vector<4x256xf32>, i32 -> vector<4x256xf32>
    %c6_233 = arith.constant 6 : index
    %c0_234 = arith.constant 0 : index
    %c0_235 = arith.constant 0 : index
    %347 = vector.load %arg2[%c6_233, %c0_234, %c0_235] : memref<9x1x256xf32, #tpu.memory_space<vmem>>, vector<1x1x256xf32>
    %348 = vector.shape_cast %347 : vector<1x1x256xf32> to vector<1x256xf32>
    %349 = vector.broadcast %348 : vector<1x256xf32> to vector<4x256xf32>
    %350 = arith.mulf %346, %349 : vector<4x256xf32>
    %c6_236 = arith.constant 6 : index
    %c0_237 = arith.constant 0 : index
    %c0_238 = arith.constant 0 : index
    %351 = vector.load %arg9[%c6_236, %c0_237, %c0_238] : memref<9x8x4xf32, #tpu.memory_space<vmem>>, vector<1x8x4xf32>
    %352 = vector.shape_cast %351 : vector<1x8x4xf32> to vector<8x4xf32>
    %cst_239 = arith.constant dense<0.000000e+00> : vector<8x256xf32>
    %353 = tpu.matmul %352, %350, %cst_239 {dimension_numbers = #tpu.dot_dimension_numbers<[1], [0], [0], [1], [0, 0, 1, 1], [], []>} : vector<8x4xf32>, vector<4x256xf32>, vector<8x256xf32> -> vector<8x256xf32>
    %354 = arith.addf %345, %353 : vector<8x256xf32>
    %c240_i32_240 = arith.constant 240 : i32
    %355 = tpu.dynamic_rotate %297 by %c240_i32_240 dim 1 : vector<4x256xf32>, i32 -> vector<4x256xf32>
    %c7_241 = arith.constant 7 : index
    %c0_242 = arith.constant 0 : index
    %c0_243 = arith.constant 0 : index
    %356 = vector.load %arg2[%c7_241, %c0_242, %c0_243] : memref<9x1x256xf32, #tpu.memory_space<vmem>>, vector<1x1x256xf32>
    %357 = vector.shape_cast %356 : vector<1x1x256xf32> to vector<1x256xf32>
    %358 = vector.broadcast %357 : vector<1x256xf32> to vector<4x256xf32>
    %359 = arith.mulf %355, %358 : vector<4x256xf32>
    %c7_244 = arith.constant 7 : index
    %c0_245 = arith.constant 0 : index
    %c0_246 = arith.constant 0 : index
    %360 = vector.load %arg9[%c7_244, %c0_245, %c0_246] : memref<9x8x4xf32, #tpu.memory_space<vmem>>, vector<1x8x4xf32>
    %361 = vector.shape_cast %360 : vector<1x8x4xf32> to vector<8x4xf32>
    %cst_247 = arith.constant dense<0.000000e+00> : vector<8x256xf32>
    %362 = tpu.matmul %361, %359, %cst_247 {dimension_numbers = #tpu.dot_dimension_numbers<[1], [0], [0], [1], [0, 0, 1, 1], [], []>} : vector<8x4xf32>, vector<4x256xf32>, vector<8x256xf32> -> vector<8x256xf32>
    %363 = arith.addf %354, %362 : vector<8x256xf32>
    %c239_i32_248 = arith.constant 239 : i32
    %364 = tpu.dynamic_rotate %297 by %c239_i32_248 dim 1 : vector<4x256xf32>, i32 -> vector<4x256xf32>
    %c8_249 = arith.constant 8 : index
    %c0_250 = arith.constant 0 : index
    %c0_251 = arith.constant 0 : index
    %365 = vector.load %arg2[%c8_249, %c0_250, %c0_251] : memref<9x1x256xf32, #tpu.memory_space<vmem>>, vector<1x1x256xf32>
    %366 = vector.shape_cast %365 : vector<1x1x256xf32> to vector<1x256xf32>
    %367 = vector.broadcast %366 : vector<1x256xf32> to vector<4x256xf32>
    %368 = arith.mulf %364, %367 : vector<4x256xf32>
    %c8_252 = arith.constant 8 : index
    %c0_253 = arith.constant 0 : index
    %c0_254 = arith.constant 0 : index
    %369 = vector.load %arg9[%c8_252, %c0_253, %c0_254] : memref<9x8x4xf32, #tpu.memory_space<vmem>>, vector<1x8x4xf32>
    %370 = vector.shape_cast %369 : vector<1x8x4xf32> to vector<8x4xf32>
    %cst_255 = arith.constant dense<0.000000e+00> : vector<8x256xf32>
    %371 = tpu.matmul %370, %368, %cst_255 {dimension_numbers = #tpu.dot_dimension_numbers<[1], [0], [0], [1], [0, 0, 1, 1], [], []>} : vector<8x4xf32>, vector<4x256xf32>, vector<8x256xf32> -> vector<8x256xf32>
    %372 = arith.addf %363, %371 : vector<8x256xf32>
    %cst_256 = arith.constant dense<0.000000e+00> : vector<256xf32>
    %373 = vector.multi_reduction <add>, %372, %cst_256 [0] : vector<8x256xf32> to vector<256xf32>
    %374 = vector.shape_cast %373 : vector<256xf32> to vector<1x256xf32>
    %375 = vector.shape_cast %374 : vector<1x256xf32> to vector<1x1x256xf32>
    %cst_257 = arith.constant dense<0.000000e+00> : vector<1xf32>
    %376 = vector.multi_reduction <add>, %375, %cst_257 [1, 2] : vector<1x1x256xf32> to vector<1xf32>
    %377 = vector.shape_cast %376 : vector<1xf32> to vector<1x1x1xf32>
    %378 = vector.extract %377[0, 0, 0] : f32 from vector<1x1x1xf32>
    %cst_258 = arith.constant 4.8828125E-4 : f32
    %379 = arith.mulf %378, %cst_258 : f32
    %380 = vector.broadcast %379 : f32 to vector<8x256xf32>
    %381 = arith.subf %372, %380 : vector<8x256xf32>
    %382 = arith.mulf %381, %381 : vector<8x256xf32>
    %cst_259 = arith.constant dense<0.000000e+00> : vector<256xf32>
    %383 = vector.multi_reduction <add>, %382, %cst_259 [0] : vector<8x256xf32> to vector<256xf32>
    %384 = vector.shape_cast %383 : vector<256xf32> to vector<1x256xf32>
    %385 = vector.shape_cast %384 : vector<1x256xf32> to vector<1x1x256xf32>
    %cst_260 = arith.constant dense<0.000000e+00> : vector<1xf32>
    %386 = vector.multi_reduction <add>, %385, %cst_260 [1, 2] : vector<1x1x256xf32> to vector<1xf32>
    %387 = vector.shape_cast %386 : vector<1xf32> to vector<1x1x1xf32>
    %388 = vector.extract %387[0, 0, 0] : f32 from vector<1x1x1xf32>
    %cst_261 = arith.constant 4.8828125E-4 : f32
    %389 = arith.mulf %388, %cst_261 : f32
    %cst_262 = arith.constant 9.99999974E-6 : f32
    %390 = arith.addf %389, %cst_262 : f32
    %391 = math.rsqrt %390 : f32
    %392 = vector.broadcast %391 : f32 to vector<8x256xf32>
    %393 = arith.mulf %381, %392 : vector<8x256xf32>
    %c0_263 = arith.constant 0 : index
    %c0_264 = arith.constant 0 : index
    %394 = vector.load %arg10[%c0_263, %c0_264] : memref<8x1xf32, #tpu.memory_space<vmem>>, vector<8x1xf32>
    %395 = vector.broadcast %394 : vector<8x1xf32> to vector<8x256xf32>
    %396 = arith.mulf %393, %395 : vector<8x256xf32>
    %c0_265 = arith.constant 0 : index
    %c0_266 = arith.constant 0 : index
    %397 = vector.load %arg11[%c0_265, %c0_266] : memref<8x1xf32, #tpu.memory_space<vmem>>, vector<8x1xf32>
    %398 = vector.broadcast %397 : vector<8x1xf32> to vector<8x256xf32>
    %399 = arith.addf %396, %398 : vector<8x256xf32>
    %cst_267 = arith.constant 5.000000e-01 : f32
    %400 = vector.broadcast %cst_267 : f32 to vector<8x256xf32>
    %401 = arith.mulf %400, %399 : vector<8x256xf32>
    %cst_268 = arith.constant 0.707106769 : f32
    %402 = vector.broadcast %cst_268 : f32 to vector<8x256xf32>
    %403 = arith.mulf %399, %402 : vector<8x256xf32>
    %cst_269 = arith.constant 0.000000e+00 : f32
    %404 = vector.broadcast %cst_269 : f32 to vector<8x256xf32>
    %405 = arith.cmpf oge, %403, %404 : vector<8x256xf32>
    %cst_270 = arith.constant 1.000000e+00 : f32
    %cst_271 = arith.constant -1.000000e+00 : f32
    %406 = vector.broadcast %cst_270 : f32 to vector<8x256xf32>
    %407 = vector.broadcast %cst_271 : f32 to vector<8x256xf32>
    %408 = arith.select %405, %406, %407 : vector<8x256xi1>, vector<8x256xf32>
    %409 = math.absf %403 : vector<8x256xf32>
    %cst_272 = arith.constant 0.327591091 : f32
    %410 = vector.broadcast %cst_272 : f32 to vector<8x256xf32>
    %411 = arith.mulf %410, %409 : vector<8x256xf32>
    %cst_273 = arith.constant 1.000000e+00 : f32
    %412 = vector.broadcast %cst_273 : f32 to vector<8x256xf32>
    %413 = arith.addf %412, %411 : vector<8x256xf32>
    %cst_274 = arith.constant 1.000000e+00 : f32
    %414 = vector.broadcast %cst_274 : f32 to vector<8x256xf32>
    %415 = arith.divf %414, %413 : vector<8x256xf32>
    %cst_275 = arith.constant 1.06140542 : f32
    %416 = vector.broadcast %cst_275 : f32 to vector<8x256xf32>
    %417 = arith.mulf %416, %415 : vector<8x256xf32>
    %cst_276 = arith.constant -1.45315206 : f32
    %418 = vector.broadcast %cst_276 : f32 to vector<8x256xf32>
    %419 = arith.addf %417, %418 : vector<8x256xf32>
    %420 = arith.mulf %419, %415 : vector<8x256xf32>
    %cst_277 = arith.constant 1.42141378 : f32
    %421 = vector.broadcast %cst_277 : f32 to vector<8x256xf32>
    %422 = arith.addf %420, %421 : vector<8x256xf32>
    %423 = arith.mulf %422, %415 : vector<8x256xf32>
    %cst_278 = arith.constant -0.284496725 : f32
    %424 = vector.broadcast %cst_278 : f32 to vector<8x256xf32>
    %425 = arith.addf %423, %424 : vector<8x256xf32>
    %426 = arith.mulf %425, %415 : vector<8x256xf32>
    %cst_279 = arith.constant 0.254829586 : f32
    %427 = vector.broadcast %cst_279 : f32 to vector<8x256xf32>
    %428 = arith.addf %426, %427 : vector<8x256xf32>
    %429 = arith.mulf %428, %415 : vector<8x256xf32>
    %cst_280 = arith.constant 0.000000e+00 : f32
    %430 = vector.broadcast %cst_280 : f32 to vector<8x256xf32>
    %431 = arith.subf %430, %409 : vector<8x256xf32>
    %432 = arith.mulf %431, %409 : vector<8x256xf32>
    %433 = math.exp %432 : vector<8x256xf32>
    %434 = arith.mulf %429, %433 : vector<8x256xf32>
    %cst_281 = arith.constant 1.000000e+00 : f32
    %435 = vector.broadcast %cst_281 : f32 to vector<8x256xf32>
    %436 = arith.subf %435, %434 : vector<8x256xf32>
    %437 = arith.mulf %408, %436 : vector<8x256xf32>
    %cst_282 = arith.constant 1.000000e+00 : f32
    %438 = vector.broadcast %cst_282 : f32 to vector<8x256xf32>
    %439 = arith.addf %438, %437 : vector<8x256xf32>
    %440 = arith.mulf %401, %439 : vector<8x256xf32>
    %c17_i32_283 = arith.constant 17 : i32
    %441 = tpu.dynamic_rotate %440 by %c17_i32_283 dim 1 : vector<8x256xf32>, i32 -> vector<8x256xf32>
    %c0_284 = arith.constant 0 : index
    %c0_285 = arith.constant 0 : index
    %c0_286 = arith.constant 0 : index
    %442 = vector.load %arg2[%c0_284, %c0_285, %c0_286] : memref<9x1x256xf32, #tpu.memory_space<vmem>>, vector<1x1x256xf32>
    %443 = vector.shape_cast %442 : vector<1x1x256xf32> to vector<1x256xf32>
    %444 = vector.broadcast %443 : vector<1x256xf32> to vector<8x256xf32>
    %445 = arith.mulf %441, %444 : vector<8x256xf32>
    %c0_287 = arith.constant 0 : index
    %c0_288 = arith.constant 0 : index
    %c0_289 = arith.constant 0 : index
    %446 = vector.load %arg12[%c0_287, %c0_288, %c0_289] : memref<9x8x8xf32, #tpu.memory_space<vmem>>, vector<1x8x8xf32>
    %447 = vector.shape_cast %446 : vector<1x8x8xf32> to vector<8x8xf32>
    %cst_290 = arith.constant dense<0.000000e+00> : vector<8x256xf32>
    %448 = tpu.matmul %447, %445, %cst_290 {dimension_numbers = #tpu.dot_dimension_numbers<[1], [0], [0], [1], [0, 0, 1, 1], [], []>} : vector<8x8xf32>, vector<8x256xf32>, vector<8x256xf32> -> vector<8x256xf32>
    %c16_i32_291 = arith.constant 16 : i32
    %449 = tpu.dynamic_rotate %440 by %c16_i32_291 dim 1 : vector<8x256xf32>, i32 -> vector<8x256xf32>
    %c1_292 = arith.constant 1 : index
    %c0_293 = arith.constant 0 : index
    %c0_294 = arith.constant 0 : index
    %450 = vector.load %arg2[%c1_292, %c0_293, %c0_294] : memref<9x1x256xf32, #tpu.memory_space<vmem>>, vector<1x1x256xf32>
    %451 = vector.shape_cast %450 : vector<1x1x256xf32> to vector<1x256xf32>
    %452 = vector.broadcast %451 : vector<1x256xf32> to vector<8x256xf32>
    %453 = arith.mulf %449, %452 : vector<8x256xf32>
    %c1_295 = arith.constant 1 : index
    %c0_296 = arith.constant 0 : index
    %c0_297 = arith.constant 0 : index
    %454 = vector.load %arg12[%c1_295, %c0_296, %c0_297] : memref<9x8x8xf32, #tpu.memory_space<vmem>>, vector<1x8x8xf32>
    %455 = vector.shape_cast %454 : vector<1x8x8xf32> to vector<8x8xf32>
    %cst_298 = arith.constant dense<0.000000e+00> : vector<8x256xf32>
    %456 = tpu.matmul %455, %453, %cst_298 {dimension_numbers = #tpu.dot_dimension_numbers<[1], [0], [0], [1], [0, 0, 1, 1], [], []>} : vector<8x8xf32>, vector<8x256xf32>, vector<8x256xf32> -> vector<8x256xf32>
    %457 = arith.addf %448, %456 : vector<8x256xf32>
    %c15_i32_299 = arith.constant 15 : i32
    %458 = tpu.dynamic_rotate %440 by %c15_i32_299 dim 1 : vector<8x256xf32>, i32 -> vector<8x256xf32>
    %c2_300 = arith.constant 2 : index
    %c0_301 = arith.constant 0 : index
    %c0_302 = arith.constant 0 : index
    %459 = vector.load %arg2[%c2_300, %c0_301, %c0_302] : memref<9x1x256xf32, #tpu.memory_space<vmem>>, vector<1x1x256xf32>
    %460 = vector.shape_cast %459 : vector<1x1x256xf32> to vector<1x256xf32>
    %461 = vector.broadcast %460 : vector<1x256xf32> to vector<8x256xf32>
    %462 = arith.mulf %458, %461 : vector<8x256xf32>
    %c2_303 = arith.constant 2 : index
    %c0_304 = arith.constant 0 : index
    %c0_305 = arith.constant 0 : index
    %463 = vector.load %arg12[%c2_303, %c0_304, %c0_305] : memref<9x8x8xf32, #tpu.memory_space<vmem>>, vector<1x8x8xf32>
    %464 = vector.shape_cast %463 : vector<1x8x8xf32> to vector<8x8xf32>
    %cst_306 = arith.constant dense<0.000000e+00> : vector<8x256xf32>
    %465 = tpu.matmul %464, %462, %cst_306 {dimension_numbers = #tpu.dot_dimension_numbers<[1], [0], [0], [1], [0, 0, 1, 1], [], []>} : vector<8x8xf32>, vector<8x256xf32>, vector<8x256xf32> -> vector<8x256xf32>
    %466 = arith.addf %457, %465 : vector<8x256xf32>
    %c1_i32_307 = arith.constant 1 : i32
    %467 = tpu.dynamic_rotate %440 by %c1_i32_307 dim 1 : vector<8x256xf32>, i32 -> vector<8x256xf32>
    %c3_308 = arith.constant 3 : index
    %c0_309 = arith.constant 0 : index
    %c0_310 = arith.constant 0 : index
    %468 = vector.load %arg2[%c3_308, %c0_309, %c0_310] : memref<9x1x256xf32, #tpu.memory_space<vmem>>, vector<1x1x256xf32>
    %469 = vector.shape_cast %468 : vector<1x1x256xf32> to vector<1x256xf32>
    %470 = vector.broadcast %469 : vector<1x256xf32> to vector<8x256xf32>
    %471 = arith.mulf %467, %470 : vector<8x256xf32>
    %c3_311 = arith.constant 3 : index
    %c0_312 = arith.constant 0 : index
    %c0_313 = arith.constant 0 : index
    %472 = vector.load %arg12[%c3_311, %c0_312, %c0_313] : memref<9x8x8xf32, #tpu.memory_space<vmem>>, vector<1x8x8xf32>
    %473 = vector.shape_cast %472 : vector<1x8x8xf32> to vector<8x8xf32>
    %cst_314 = arith.constant dense<0.000000e+00> : vector<8x256xf32>
    %474 = tpu.matmul %473, %471, %cst_314 {dimension_numbers = #tpu.dot_dimension_numbers<[1], [0], [0], [1], [0, 0, 1, 1], [], []>} : vector<8x8xf32>, vector<8x256xf32>, vector<8x256xf32> -> vector<8x256xf32>
    %475 = arith.addf %466, %474 : vector<8x256xf32>
    %c4_315 = arith.constant 4 : index
    %c0_316 = arith.constant 0 : index
    %c0_317 = arith.constant 0 : index
    %476 = vector.load %arg12[%c4_315, %c0_316, %c0_317] : memref<9x8x8xf32, #tpu.memory_space<vmem>>, vector<1x8x8xf32>
    %477 = vector.shape_cast %476 : vector<1x8x8xf32> to vector<8x8xf32>
    %cst_318 = arith.constant dense<0.000000e+00> : vector<8x256xf32>
    %478 = tpu.matmul %477, %440, %cst_318 {dimension_numbers = #tpu.dot_dimension_numbers<[1], [0], [0], [1], [0, 0, 1, 1], [], []>} : vector<8x8xf32>, vector<8x256xf32>, vector<8x256xf32> -> vector<8x256xf32>
    %479 = arith.addf %475, %478 : vector<8x256xf32>
    %c255_i32_319 = arith.constant 255 : i32
    %480 = tpu.dynamic_rotate %440 by %c255_i32_319 dim 1 : vector<8x256xf32>, i32 -> vector<8x256xf32>
    %c5_320 = arith.constant 5 : index
    %c0_321 = arith.constant 0 : index
    %c0_322 = arith.constant 0 : index
    %481 = vector.load %arg2[%c5_320, %c0_321, %c0_322] : memref<9x1x256xf32, #tpu.memory_space<vmem>>, vector<1x1x256xf32>
    %482 = vector.shape_cast %481 : vector<1x1x256xf32> to vector<1x256xf32>
    %483 = vector.broadcast %482 : vector<1x256xf32> to vector<8x256xf32>
    %484 = arith.mulf %480, %483 : vector<8x256xf32>
    %c5_323 = arith.constant 5 : index
    %c0_324 = arith.constant 0 : index
    %c0_325 = arith.constant 0 : index
    %485 = vector.load %arg12[%c5_323, %c0_324, %c0_325] : memref<9x8x8xf32, #tpu.memory_space<vmem>>, vector<1x8x8xf32>
    %486 = vector.shape_cast %485 : vector<1x8x8xf32> to vector<8x8xf32>
    %cst_326 = arith.constant dense<0.000000e+00> : vector<8x256xf32>
    %487 = tpu.matmul %486, %484, %cst_326 {dimension_numbers = #tpu.dot_dimension_numbers<[1], [0], [0], [1], [0, 0, 1, 1], [], []>} : vector<8x8xf32>, vector<8x256xf32>, vector<8x256xf32> -> vector<8x256xf32>
    %488 = arith.addf %479, %487 : vector<8x256xf32>
    %c241_i32_327 = arith.constant 241 : i32
    %489 = tpu.dynamic_rotate %440 by %c241_i32_327 dim 1 : vector<8x256xf32>, i32 -> vector<8x256xf32>
    %c6_328 = arith.constant 6 : index
    %c0_329 = arith.constant 0 : index
    %c0_330 = arith.constant 0 : index
    %490 = vector.load %arg2[%c6_328, %c0_329, %c0_330] : memref<9x1x256xf32, #tpu.memory_space<vmem>>, vector<1x1x256xf32>
    %491 = vector.shape_cast %490 : vector<1x1x256xf32> to vector<1x256xf32>
    %492 = vector.broadcast %491 : vector<1x256xf32> to vector<8x256xf32>
    %493 = arith.mulf %489, %492 : vector<8x256xf32>
    %c6_331 = arith.constant 6 : index
    %c0_332 = arith.constant 0 : index
    %c0_333 = arith.constant 0 : index
    %494 = vector.load %arg12[%c6_331, %c0_332, %c0_333] : memref<9x8x8xf32, #tpu.memory_space<vmem>>, vector<1x8x8xf32>
    %495 = vector.shape_cast %494 : vector<1x8x8xf32> to vector<8x8xf32>
    %cst_334 = arith.constant dense<0.000000e+00> : vector<8x256xf32>
    %496 = tpu.matmul %495, %493, %cst_334 {dimension_numbers = #tpu.dot_dimension_numbers<[1], [0], [0], [1], [0, 0, 1, 1], [], []>} : vector<8x8xf32>, vector<8x256xf32>, vector<8x256xf32> -> vector<8x256xf32>
    %497 = arith.addf %488, %496 : vector<8x256xf32>
    %c240_i32_335 = arith.constant 240 : i32
    %498 = tpu.dynamic_rotate %440 by %c240_i32_335 dim 1 : vector<8x256xf32>, i32 -> vector<8x256xf32>
    %c7_336 = arith.constant 7 : index
    %c0_337 = arith.constant 0 : index
    %c0_338 = arith.constant 0 : index
    %499 = vector.load %arg2[%c7_336, %c0_337, %c0_338] : memref<9x1x256xf32, #tpu.memory_space<vmem>>, vector<1x1x256xf32>
    %500 = vector.shape_cast %499 : vector<1x1x256xf32> to vector<1x256xf32>
    %501 = vector.broadcast %500 : vector<1x256xf32> to vector<8x256xf32>
    %502 = arith.mulf %498, %501 : vector<8x256xf32>
    %c7_339 = arith.constant 7 : index
    %c0_340 = arith.constant 0 : index
    %c0_341 = arith.constant 0 : index
    %503 = vector.load %arg12[%c7_339, %c0_340, %c0_341] : memref<9x8x8xf32, #tpu.memory_space<vmem>>, vector<1x8x8xf32>
    %504 = vector.shape_cast %503 : vector<1x8x8xf32> to vector<8x8xf32>
    %cst_342 = arith.constant dense<0.000000e+00> : vector<8x256xf32>
    %505 = tpu.matmul %504, %502, %cst_342 {dimension_numbers = #tpu.dot_dimension_numbers<[1], [0], [0], [1], [0, 0, 1, 1], [], []>} : vector<8x8xf32>, vector<8x256xf32>, vector<8x256xf32> -> vector<8x256xf32>
    %506 = arith.addf %497, %505 : vector<8x256xf32>
    %c239_i32_343 = arith.constant 239 : i32
    %507 = tpu.dynamic_rotate %440 by %c239_i32_343 dim 1 : vector<8x256xf32>, i32 -> vector<8x256xf32>
    %c8_344 = arith.constant 8 : index
    %c0_345 = arith.constant 0 : index
    %c0_346 = arith.constant 0 : index
    %508 = vector.load %arg2[%c8_344, %c0_345, %c0_346] : memref<9x1x256xf32, #tpu.memory_space<vmem>>, vector<1x1x256xf32>
    %509 = vector.shape_cast %508 : vector<1x1x256xf32> to vector<1x256xf32>
    %510 = vector.broadcast %509 : vector<1x256xf32> to vector<8x256xf32>
    %511 = arith.mulf %507, %510 : vector<8x256xf32>
    %c8_347 = arith.constant 8 : index
    %c0_348 = arith.constant 0 : index
    %c0_349 = arith.constant 0 : index
    %512 = vector.load %arg12[%c8_347, %c0_348, %c0_349] : memref<9x8x8xf32, #tpu.memory_space<vmem>>, vector<1x8x8xf32>
    %513 = vector.shape_cast %512 : vector<1x8x8xf32> to vector<8x8xf32>
    %cst_350 = arith.constant dense<0.000000e+00> : vector<8x256xf32>
    %514 = tpu.matmul %513, %511, %cst_350 {dimension_numbers = #tpu.dot_dimension_numbers<[1], [0], [0], [1], [0, 0, 1, 1], [], []>} : vector<8x8xf32>, vector<8x256xf32>, vector<8x256xf32> -> vector<8x256xf32>
    %515 = arith.addf %506, %514 : vector<8x256xf32>
    %cst_351 = arith.constant dense<0.000000e+00> : vector<256xf32>
    %516 = vector.multi_reduction <add>, %515, %cst_351 [0] : vector<8x256xf32> to vector<256xf32>
    %517 = vector.shape_cast %516 : vector<256xf32> to vector<1x256xf32>
    %518 = vector.shape_cast %517 : vector<1x256xf32> to vector<1x1x256xf32>
    %cst_352 = arith.constant dense<0.000000e+00> : vector<1xf32>
    %519 = vector.multi_reduction <add>, %518, %cst_352 [1, 2] : vector<1x1x256xf32> to vector<1xf32>
    %520 = vector.shape_cast %519 : vector<1xf32> to vector<1x1x1xf32>
    %521 = vector.extract %520[0, 0, 0] : f32 from vector<1x1x1xf32>
    %cst_353 = arith.constant 4.8828125E-4 : f32
    %522 = arith.mulf %521, %cst_353 : f32
    %523 = vector.broadcast %522 : f32 to vector<8x256xf32>
    %524 = arith.subf %515, %523 : vector<8x256xf32>
    %525 = arith.mulf %524, %524 : vector<8x256xf32>
    %cst_354 = arith.constant dense<0.000000e+00> : vector<256xf32>
    %526 = vector.multi_reduction <add>, %525, %cst_354 [0] : vector<8x256xf32> to vector<256xf32>
    %527 = vector.shape_cast %526 : vector<256xf32> to vector<1x256xf32>
    %528 = vector.shape_cast %527 : vector<1x256xf32> to vector<1x1x256xf32>
    %cst_355 = arith.constant dense<0.000000e+00> : vector<1xf32>
    %529 = vector.multi_reduction <add>, %528, %cst_355 [1, 2] : vector<1x1x256xf32> to vector<1xf32>
    %530 = vector.shape_cast %529 : vector<1xf32> to vector<1x1x1xf32>
    %531 = vector.extract %530[0, 0, 0] : f32 from vector<1x1x1xf32>
    %cst_356 = arith.constant 4.8828125E-4 : f32
    %532 = arith.mulf %531, %cst_356 : f32
    %cst_357 = arith.constant 9.99999974E-6 : f32
    %533 = arith.addf %532, %cst_357 : f32
    %534 = math.rsqrt %533 : f32
    %535 = vector.broadcast %534 : f32 to vector<8x256xf32>
    %536 = arith.mulf %524, %535 : vector<8x256xf32>
    %c0_358 = arith.constant 0 : index
    %c0_359 = arith.constant 0 : index
    %537 = vector.load %arg13[%c0_358, %c0_359] : memref<8x1xf32, #tpu.memory_space<vmem>>, vector<8x1xf32>
    %538 = vector.broadcast %537 : vector<8x1xf32> to vector<8x256xf32>
    %539 = arith.mulf %536, %538 : vector<8x256xf32>
    %c0_360 = arith.constant 0 : index
    %c0_361 = arith.constant 0 : index
    %540 = vector.load %arg14[%c0_360, %c0_361] : memref<8x1xf32, #tpu.memory_space<vmem>>, vector<8x1xf32>
    %541 = vector.broadcast %540 : vector<8x1xf32> to vector<8x256xf32>
    %542 = arith.addf %539, %541 : vector<8x256xf32>
    %c0_362 = arith.constant 0 : index
    %c0_363 = arith.constant 0 : index
    %c0_364 = arith.constant 0 : index
    %543 = vector.load %arg15[%c0_362, %c0_363, %c0_364] : memref<1x8x1xf32, #tpu.memory_space<vmem>>, vector<1x8x1xf32>
    %544 = vector.shape_cast %543 : vector<1x8x1xf32> to vector<8x1xf32>
    %545 = vector.broadcast %544 : vector<8x1xf32> to vector<8x256xf32>
    %546 = arith.addf %542, %545 : vector<8x256xf32>
    %c0_365 = arith.constant 0 : index
    %c0_366 = arith.constant 0 : index
    %c0_367 = arith.constant 0 : index
    %547 = vector.load %arg16[%c0_365, %c0_366, %c0_367] : memref<1x8x256xf32, #tpu.memory_space<vmem>>, vector<1x8x256xf32>
    %548 = vector.shape_cast %547 : vector<1x8x256xf32> to vector<8x256xf32>
    %549 = vector.shape_cast %546 : vector<8x256xf32> to vector<1x8x256xf32>
    tpu.vector_store %arg16[%c0_365, %c0_366, %c0_367], %549 {strides = array<i32>} : memref<1x8x256xf32, #tpu.memory_space<vmem>>, vector<1x8x256xf32>,
    return
  }
  func.func @transform_0(%arg0: i32) -> (i32, i32, i32, i32) {
    %c0_i32 = arith.constant 0 : i32
    %c0_i32_0 = arith.constant 0 : i32
    %c0_i32_1 = arith.constant 0 : i32
    %c0_i32_2 = arith.constant 0 : i32
    return %arg0, %c0_i32, %c0_i32_0, %c0_i32_1 : i32, i32, i32, i32
  }
  func.func @transform_1(%arg0: i32) -> (i32, i32, i32) {
    %c0_i32 = arith.constant 0 : i32
    %c0_i32_0 = arith.constant 0 : i32
    %c0_i32_1 = arith.constant 0 : i32
    %c0_i32_2 = arith.constant 0 : i32
    return %c0_i32, %c0_i32_0, %c0_i32_1 : i32, i32, i32
  }
  func.func @transform_2(%arg0: i32) -> (i32, i32, i32) {
    %c0_i32 = arith.constant 0 : i32
    %c0_i32_0 = arith.constant 0 : i32
    %c0_i32_1 = arith.constant 0 : i32
    %c0_i32_2 = arith.constant 0 : i32
    return %c0_i32, %c0_i32_0, %c0_i32_1 : i32, i32, i32
  }
  func.func @transform_3(%arg0: i32) -> (i32, i32) {
    %c0_i32 = arith.constant 0 : i32
    %c0_i32_0 = arith.constant 0 : i32
    %c0_i32_1 = arith.constant 0 : i32
    return %c0_i32, %c0_i32_0 : i32, i32
  }
  func.func @transform_4(%arg0: i32) -> (i32, i32) {
    %c0_i32 = arith.constant 0 : i32
    %c0_i32_0 = arith.constant 0 : i32
    %c0_i32_1 = arith.constant 0 : i32
    return %c0_i32, %c0_i32_0 : i32, i32
  }
  func.func @transform_5(%arg0: i32) -> (i32, i32, i32) {
    %c0_i32 = arith.constant 0 : i32
    %c0_i32_0 = arith.constant 0 : i32
    %c0_i32_1 = arith.constant 0 : i32
    %c0_i32_2 = arith.constant 0 : i32
    return %c0_i32, %c0_i32_0, %c0_i32_1 : i32, i32, i32
  }
  func.func @transform_6(%arg0: i32) -> (i32, i32) {
    %c0_i32 = arith.constant 0 : i32
    %c0_i32_0 = arith.constant 0 : i32
    %c0_i32_1 = arith.constant 0 : i32
    return %c0_i32, %c0_i32_0 : i32, i32
  }
  func.func @transform_7(%arg0: i32) -> (i32, i32) {
    %c0_i32 = arith.constant 0 : i32
    %c0_i32_0 = arith.constant 0 : i32
    %c0_i32_1 = arith.constant 0 : i32
    return %c0_i32, %c0_i32_0 : i32, i32
  }
  func.func @transform_8(%arg0: i32) -> (i32, i32, i32) {
    %c0_i32 = arith.constant 0 : i32
    %c0_i32_0 = arith.constant 0 : i32
    %c0_i32_1 = arith.constant 0 : i32
    %c0_i32_2 = arith.constant 0 : i32
    return %c0_i32, %c0_i32_0, %c0_i32_1 : i32, i32, i32
  }
  func.func @transform_9(%arg0: i32) -> (i32, i32) {
    %c0_i32 = arith.constant 0 : i32
    %c0_i32_0 = arith.constant 0 : i32
    %c0_i32_1 = arith.constant 0 : i32
    return %c0_i32, %c0_i32_0 : i32, i32
  }
  func.func @transform_10(%arg0: i32) -> (i32, i32) {
    %c0_i32 = arith.constant 0 : i32
    %c0_i32_0 = arith.constant 0 : i32
    %c0_i32_1 = arith.constant 0 : i32
    return %c0_i32, %c0_i32_0 : i32, i32
  }
  func.func @transform_11(%arg0: i32) -> (i32, i32, i32) {
    %c0_i32 = arith.constant 0 : i32
    %c0_i32_0 = arith.constant 0 : i32
    %c0_i32_1 = arith.constant 0 : i32
    %c0_i32_2 = arith.constant 0 : i32
    return %c0_i32, %c0_i32_0, %c0_i32_1 : i32, i32, i32
  }
  func.func @transform_12(%arg0: i32) -> (i32, i32) {
    %c0_i32 = arith.constant 0 : i32
    %c0_i32_0 = arith.constant 0 : i32
    %c0_i32_1 = arith.constant 0 : i32
    return %c0_i32, %c0_i32_0 : i32, i32
  }
  func.func @transform_13(%arg0: i32) -> (i32, i32) {
    %c0_i32 = arith.constant 0 : i32
    %c0_i32_0 = arith.constant 0 : i32
    %c0_i32_1 = arith.constant 0 : i32
    return %c0_i32, %c0_i32_0 : i32, i32
  }
  func.func @transform_14(%arg0: i32) -> (i32, i32, i32) {
    %c0_i32 = arith.constant 0 : i32
    %c0_i32_0 = arith.constant 0 : i32
    %c0_i32_1 = arith.constant 0 : i32
    return %arg0, %c0_i32, %c0_i32_0 : i32, i32, i32
  }
  func.func @transform_15(%arg0: i32) -> (i32, i32, i32) {
    %c0_i32 = arith.constant 0 : i32
    %c0_i32_0 = arith.constant 0 : i32
    %c0_i32_1 = arith.constant 0 : i32
    return %arg0, %c0_i32, %c0_i32_0 : i32, i32, i32
  }
}

</mosaic_0001>

<bundles_post_ra>
// kernel: tpu_custom_call.1
= control target key start
LH: loop header
LB: loop body
LE: loop exit
PB: predicated region body
PF: predicated region fallthrough
CT: control target
= control target key end

     0   :  { %s4616_s0 = inlined_call_operand.vmem [shape: f32[2,4,4,256], index: 0, kind: input, shape index: {}]   ;;  %s4617_s1 = inlined_call_operand.vmem [shape: f32[9,1,256], index: 1, kind: input, shape index: {}]   ;;  %s4618_s2 = inlined_call_operand.vmem [shape: f32[9,4,4], index: 2, kind: input, shape index: {}]   ;;  %s4619_s3 = inlined_call_operand.vmem [shape: f32[4,1], index: 3, kind: input, shape index: {}]   ;;  %s4620_s4 = inlined_call_operand.vmem [shape: f32[4,1], index: 4, kind: input, shape index: {}]   ;;  %s4621_s5 = inlined_call_operand.vmem [shape: f32[9,4,4], index: 5, kind: input, shape index: {}]   ;;  %s4622_s6 = inlined_call_operand.vmem [shape: f32[4,1], index: 6, kind: input, shape index: {}]   ;;  %s4623_s7 = inlined_call_operand.vmem [shape: f32[4,1], index: 7, kind: input, shape index: {}]   ;;  %s4624_s8 = inlined_call_operand.vmem [shape: f32[9,8,4], index: 8, kind: input, shape index: {}]   ;;  %s4625_s9 = inlined_call_operand.vmem [shape: f32[8,1], index: 9, kind: input, shape index: {}]   ;;  %s4626_s10 = inlined_call_operand.vmem [shape: f32[8,1], index: 10, kind: input, shape index: {}]   ;;  %s4627_s11 = inlined_call_operand.vmem [shape: f32[9,8,8], index: 11, kind: input, shape index: {}]   ;;  %s4628_s12 = inlined_call_operand.vmem [shape: f32[8,1], index: 12, kind: input, shape index: {}]   ;;  %s4629_s13 = inlined_call_operand.vmem [shape: f32[8,1], index: 13, kind: input, shape index: {}]   ;;  %s4630_s14 = inlined_call_operand.vmem [shape: f32[2,8,1], index: 14, kind: input, shape index: {}]   ;;  %s4631_s15 = inlined_call_operand.hbm [shape: f32[2,8,256], index: 15, kind: output, shape index: {}]  }
   0x1   :  { %4652 = sst [smem:[#allocation7_spill]] %s4616_s0 }
   0x2   :  { %4653 = sst [smem:[#allocation8_spill]] %s4617_s1 }
   0x3   :  { %4654 = sst [smem:[#allocation9_spill]] %s4618_s2 }
   0x4   :  { %4655 = sst [smem:[#allocation10_spill]] %s4619_s3 }
   0x5   :  { %4656 = sst [smem:[#allocation11_spill]] %s4620_s4 }
   0x6   :  { %4657 = sst [smem:[#allocation12_spill]] %s4621_s5 }
   0x7   :  { %4658 = sst [smem:[#allocation13_spill]] %s4622_s6 }
   0x8   :  { %4659 = sst [smem:[#allocation14_spill]] %s4623_s7 }
   0x9   :  { %20 = vsyncpa [#allocation3], 0 }
   0xa   :  { %22 = vsyncpa [#allocation3 + $0x1], 0  ;;  %s3864_s18 = smov 0   ;;  %s3866_s19 = smov 0  }
   0xb   :  { %s3868_s20 = smov 0   ;;  %s3870_s21 = smov 0  }
   0xc LB: > { %4660 = sst [smem:[#allocation5_spill]] %s3768_s20  ;;  %s3885_s22 = sadd.s32 4294967295, %s3772_s21   ;;  %s3772_s21 = sphi %s3870_s21, %s4708_s21   ;;  %s3768_s20 = sphi %s3868_s20, %s4705_s20   ;;  %s3764_s19 = sphi %s3866_s19, %s4707_s19   ;;  %s3760_s18 = sphi %s3864_s18, %s4706_s18  }
   0xd   : > { %s3423_s23 = sadd.s32 4294967294, %s3772_s21   ;;  %s3889_s24 = sadd.s32 1, %s3772_s21  }
   0xe   : > { %s360_s25 = sadd.s32 1, %s3768_s20  ;;  %s357_s26 = ssub.s32 %s3772_s21, %s3889_s24 }
   0xf   : > { %p370_p0 = scmp.ne.s32.totalorder %s3768_s20, %s3764_s19  ;;  %p358_p1 = scmp.eq.s32.totalorder %s357_s26, 0 }
  0x10   : > { %p371_p2 = scmp.eq.s32.totalorder %s3885_s22, 1  ;;  %p376_p3 = scmp.ne.s32.totalorder %s3764_s19, %s3760_s18 }
  0x11   : > { %p377_p4 = scmp.eq.s32.totalorder %s3423_s23, 1  ;;  %p3426_p7 = scmp.ge.s32.totalorder %s3772_s21, 1 }
  0x12   : > { %s3900_s27 = scalar_select %p358_p1, %s3768_s20, %s360_s25  }
  0x13   : > { %p3902_p5 = por %p371_p2, %p370_p0  ;;  %p3906_p6 = por %p377_p4, %p376_p3 }
  0x14   : > { %4661 = sst [smem:[#allocation6_spill]] %s3900_s27  ;;  %p449_p8 = scmp.lt.s32.totalorder %s3772_s21, 3 }
  0x16   : > { %p450_p9 = pnand %p3426_p7, %p449_p8 }
  0x17   : > { %p501_p10 = scmp.lt.s32.totalorder (!%p450_p9), %s3885_s22, 1  ;;  %s4664_s0 = sld [smem:[#allocation7_spill]] (!%p450_p9) }
  0x18   : > { %453 = sbr.rel (%p450_p9) target bundleno = 3353 (0xd19), region = 80  ;;  %s4632_s26 = smov (!%p450_p9), 17  }
  0x19   : > { %s4646_s17 = smov (!%p450_p9), 15   ;;  %s4634_s23 = smov (!%p450_p9), 1  }
  0x1a   : > { %s4665_s1 = sld [smem:[#allocation8_spill]] (!%p450_p9) }
  0x1b   : > { %s4666_s2 = sld [smem:[#allocation9_spill]] (!%p450_p9) }
  0x1c   : > { %s4667_s3 = sld [smem:[#allocation10_spill]] (!%p450_p9) }
  0x1d   : > { %s3914_s30 = scalar_select %p501_p10, %s3885_s22, 1  ;;  %v530_v25 = vlaneseq  ;;  %vm571_vm1 = vcmask 1043456   ;;  %vm567_vm2 = vcmask 31744   ;;  %vm4648_vm10 = vcmask 1040384  }
  0x1e   : > { %s4668_s4 = sld [smem:[#allocation11_spill]] }
  0x1f   : > { %s3604_s16 = sshll.u32 %s3914_s30, 5  ;;  %v3951_v27 = vand.u32 127, %v530_v25  ;;  %s4677_s6 = sld [smem:[#allocation13_spill]] }
  0x20   : > { %s505_s25 = scalar_lea.vmem %s4664_s0, %s3604_s16  ;;  %s4640_s16 = smov 16   ;;  %v535_v29 = vld [vmem:[%s4665_s1] sm:$0x3]  ;;  %v3434_v39 = vld [vmem:[%s4665_s1 + $0x2] sm:$0x3] }
  0x21   : > { %v510_v0 = vld [vmem:[%s505_s25] sm:$0xff]  ;;  %v3431_v1 = vld [vmem:[%s505_s25 + $0x8] sm:$0xff]  ;;  %v3432_v2 = vld [vmem:[%s505_s25 + $0x10] sm:$0xff]  ;;  %vm532_vm0 = vcmp.lt.s32.totalorder %v3951_v27, 17  ;;  %v3957_v30 = vperm.slane %v535_v29, 0  ;;  %v3959_v31 = vperm.slane %v535_v29, 1 }
  0x22   : > { %v513_v3 = vmax.f32 %v510_v0, %v3431_v1  ;;  %v3433_v4 = vld [vmem:[%s505_s25 + $0x18] sm:$0xff]  ;;  %s4636_s25 = smov 127   ;;  %v543_v38 = vld [vmem:[%s4666_s2] sm:$0xf]  ;;  %v3444_v40 = vld [vmem:[%s4665_s1 + $0x4] sm:$0x3] }
  0x23   : > { %v518_v5 = vmax.f32 %v3432_v2, %v3433_v4  ;;  %vm676_vm3 = vcmp.lt.s32.totalorder %v3951_v27, 15  ;;  %vm553_vm4 = vcmp.lt.s32.totalorder %v3951_v27, 16  ;;  %v3982_v42 = vperm.slane %v3434_v39, 0  ;;  %v3435_v53 = vld [vmem:[%s4666_s2 + $0x4] sm:$0xf]  ;;  %s4669_s0 = smov 15  }
  0x24   : > { %v3984_v43 = vperm.slane %v3434_v39, 1  ;;  %v3986_v44 = vperm.slane %v3444_v40, 0  ;;  %v3988_v45 = vperm.slane %v3444_v40, 1  ;;  %v3450_v56 = vld [vmem:[%s4665_s1 + $0x6] sm:$0x3]  ;;  %vm750_vm5 = vcmp.lt.s32.totalorder %v3951_v27, 1 }
  0x25   : > { %v3920_v6 = vmax.f32 %v513_v3, %v518_v5  ;;  %v4013_v57 = vperm.slane %v3450_v56, 0  ;;  %v4015_v58 = vperm.slane %v3450_v56, 1  ;;  %v3445_v1 = vld [vmem:[%s4666_s2 + $0x8] sm:$0xf]  ;;  %v3451_v2 = vld [vmem:[%s4666_s2 + $0xc] sm:$0xf] }
  0x26   : > { %v3456_v3 = vld [vmem:[%s4666_s2 + $0x10] sm:$0xf]  ;;  %v3461_v4 = vld [vmem:[%s4665_s1 + $0xa] sm:$0x3]  ;;  %vm878_vm6 = vcmp.lt.s32.totalorder %v3951_v27, 127  ;;  %vm952_vm7 = vcmp.lt.s32.totalorder %v3951_v27, 113 }
  0x27   : > { %521 = vst [vmem:[#allocation1] ss:$2 sm:$0xff] %v3920_v6  ;;  %v3473_v25 = vld [vmem:[%s4665_s1 + $0xe] sm:$0x3]  ;;  %vm4649_vm8 = vcmp.lt.s32.totalorder %v3951_v27, 112  ;;  %vm4650_vm9 = vcmp.lt.s32.totalorder %v3951_v27, 111 }
  0x28   : > { %s4678_s7 = sld [smem:[#allocation14_spill]] }
  0x29   : > { %s4679_s5 = sld [smem:[#allocation12_spill]] }
  0x2e   : > { %v522_v7 = vld.sshfl [vmem:[#allocation1] sm:$0xff pattern:$0x75316420]  ;;  %v523_v8 = vld.sshfl [vmem:[#allocation1 + $0x8] sm:$0xff pattern:$0x75316420] }
  0x2f   : > { %526 = vrot.lane.b32.xlu0 %v522_v7, %s4632_s26  ;;  %544 = vst [vmem:[#allocation1] ss:$2 sm:$0xff] %v3920_v6  ;;  %v4050_v7 = vperm.slane %v3461_v4, 0 }
  0x36   : > { %v545_v9 = vld.sshfl [vmem:[#allocation1] sm:$0xff pattern:$0x75316420]  ;;  %v546_v10 = vld.sshfl [vmem:[#allocation1 + $0x8] sm:$0xff pattern:$0x75316420] }
  0x37   : > { %549 = vrot.lane.b32.xlu1 %v545_v9, %s4640_s16  ;;  %528 = vrot.lane.b32.xlu0 %v523_v8, %s4632_s26  ;;  %667 = vst [vmem:[#allocation1] ss:$2 sm:$0xff] %v3920_v6  ;;  %s4638_s26 = smov 113   ;;  %v4052_v8 = vperm.slane %v3461_v4, 1 }
  0x3e   : > { %v668_v11 = vld.sshfl [vmem:[#allocation1] sm:$0xff pattern:$0x75316420]  ;;  %v669_v12 = vld.sshfl [vmem:[#allocation1 + $0x8] sm:$0xff pattern:$0x75316420] }
  0x3f   : > { %551 = vrot.lane.b32.xlu1 %v546_v10, %s4640_s16  ;;  %741 = vst [vmem:[#allocation1] ss:$2 sm:$0xff] %v3920_v6  ;;  %672 = vrot.lane.b32.xlu2 %v668_v11, %s4646_s17 }
  0x46   : > { %v743_v13 = vld.sshfl [vmem:[#allocation1 + $0x8] sm:$0xff pattern:$0x75316420]  ;;  %v742_v14 = vld.sshfl [vmem:[#allocation1] sm:$0xff pattern:$0x75316420] }
  0x47   : > { %748 = vrot.lane.b32.xlu1 %v743_v13, %s4634_s23  ;;  %746 = vrot.lane.b32.xlu0 %v742_v14, %s4634_s23  ;;  %817 = vst [vmem:[#allocation1] ss:$2 sm:$0xff] %v3920_v6  ;;  %s4642_s23 = smov 112   ;;  %v3462_v14 = vld [vmem:[%s4666_s2 + $0x14] sm:$0xf] }
  0x48   : > { %674 = vrot.lane.b32.xlu2 %v669_v12, %s4646_s17  ;;  %s4670_s17 = smov 16  }
  0x4e   : > { %v3935_v15 = vld.sshfl [vmem:[#allocation1] sm:$0xff pattern:$0x75316420]  ;;  %v3937_v16 = vld.sshfl [vmem:[#allocation1 + $0x8] sm:$0xff pattern:$0x75316420] }
  0x4f   : > { %869 = vst [vmem:[#allocation1] ss:$2 sm:$0xff] %v3920_v6 }
  0x56   : > { %v871_v17 = vld.sshfl [vmem:[#allocation1 + $0x8] sm:$0xff pattern:$0x75316420]  ;;  %v870_v18 = vld.sshfl [vmem:[#allocation1] sm:$0xff pattern:$0x75316420] }
  0x57   : > { %876 = vrot.lane.b32.xlu0 %v871_v17, %s4636_s25  ;;  %943 = vst [vmem:[#allocation1] ss:$2 sm:$0xff] %v3920_v6  ;;  %874 = vrot.lane.b32.xlu2 %v870_v18, %s4636_s25  ;;  %s4644_s25 = smov 111  }
  0x5e   : > { %v944_v19 = vld.sshfl [vmem:[#allocation1] sm:$0xff pattern:$0x75316420]  ;;  %v945_v20 = vld.sshfl [vmem:[#allocation1 + $0x8] sm:$0xff pattern:$0x75316420] }
  0x5f   : > { %948 = vrot.lane.b32.xlu1 %v944_v19, %s4638_s26  ;;  %1017 = vst [vmem:[#allocation1] ss:$2 sm:$0xff] %v3920_v6  ;;  %950 = vrot.lane.b32.xlu2 %v945_v20, %s4638_s26 }
  0x66   : > { %v1019_v21 = vld.sshfl [vmem:[#allocation1 + $0x8] sm:$0xff pattern:$0x75316420]  ;;  %v1018_v22 = vld.sshfl [vmem:[#allocation1] sm:$0xff pattern:$0x75316420] }
  0x67   : > { %1024 = vrot.lane.b32.xlu1 %v1019_v21, %s4642_s23  ;;  %1022 = vrot.lane.b32.xlu0 %v1018_v22, %s4642_s23  ;;  %1091 = vst [vmem:[#allocation1] ss:$2 sm:$0xff] %v3920_v6 }
  0x6e   : > { %v1093_v23 = vld.sshfl [vmem:[#allocation1 + $0x8] sm:$0xff pattern:$0x75316420]  ;;  %v1092_v24 = vld.sshfl [vmem:[#allocation1] sm:$0xff pattern:$0x75316420] }
  0x6f   : > { %1098 = vrot.lane.b32.xlu0 %v1093_v23, %s4644_s25  ;;  %1096 = vrot.lane.b32.xlu2 %v1092_v24, %s4644_s25  ;;  %v3468_v24 = vld [vmem:[%s4666_s2 + $0x18] sm:$0xf] }
  0x99   : > { %v673_v28 = vpop.permute.xlu2 %672 }
  0xa1   : > { %v527_v26 = vpop.permute.xlu0 %526 }
  0xa2   : > { %v675_v41 = vpop.permute.xlu2 %674 }
  0xa3   : > { %v677_v46 = vsel %vm676_vm3, %v673_v28, %v675_v41  ;;  %v678_v47 = vsel %vm676_vm3, %v675_v41, %v673_v28  ;;  %v4094_v28 = vperm.slane %v3473_v25, 1 }
  0xa4   : > { %v686_v54 = vmul.f32 %v3986_v44, %v678_v47  ;;  %v687_v55 = vmul.f32 %v3988_v45, %v677_v46 }
  0xa9   : > { %v550_v32 = vpop.permute.xlu1 %549  ;;  %v529_v33 = vpop.permute.xlu0 %528 }
  0xaa   : > { %v533_v34 = vsel %vm532_vm0, %v527_v26, %v529_v33  ;;  %v534_v35 = vsel %vm532_vm0, %v529_v33, %v527_v26  ;;  %v4092_v26 = vperm.slane %v3473_v25, 0 }
  0xab   : > { %v541_v36 = vmul.f32 %v3957_v30, %v534_v35  ;;  %v542_v37 = vmul.f32 %v3959_v31, %v533_v34 }
  0xad   : > { %3440 = vmatpush.msk.msra.mxu2 %vm571_vm1, %v541_v36  ;;  %3442 = vmatpush.msk.msra.mxu3 %vm571_vm1, %v542_v37  ;;  %v3474_v37 = vld [vmem:[%s4666_s2 + $0x1c] sm:$0xf] }
  0xae   : > { %3441 = vmatmul.msk.f32.vlgmr.msra.gmra.mxu2 %vm567_vm2, %v543_v38  ;;  %3443 = vmatmul.msk.f32.vlgmr.msra.gmra.mxu3 %vm567_vm2, %v543_v38  ;;  %v3479_v38 = vld [vmem:[%s4665_s1 + $0x10] sm:$0x3] }
  0xaf   : > { %v4113_v39 = vperm.slane %v3479_v38, 0  ;;  %v4115_v40 = vperm.slane %v3479_v38, 1 }
  0xb1   : > { %v552_v48 = vpop.permute.xlu1 %551  ;;  %v875_v5 = vpop.permute.xlu2 %874 }
  0xb2   : > { %v554_v49 = vsel %vm553_vm4, %v550_v32, %v552_v48  ;;  %v555_v50 = vsel %vm553_vm4, %v552_v48, %v550_v32 }
  0xb3   : > { %v563_v51 = vmul.f32 %v3982_v42, %v555_v50  ;;  %v564_v52 = vmul.f32 %v3984_v43, %v554_v49 }
  0xb5   : > { %3436 = vmatpush.msk.msra.mxu0 %vm571_vm1, %v563_v51  ;;  %3438 = vmatpush.msk.msra.mxu1 %vm571_vm1, %v564_v52  ;;  %v3480_v51 = vld [vmem:[%s4666_s2 + $0x20] sm:$0xf]  ;;  %s4676_s2 = smov 112  }
  0xb6   : > { %3437 = vmatmul.msk.f32.vlgmr.msra.gmra.mxu0 %vm567_vm2, %v3435_v53  ;;  %3439 = vmatmul.msk.f32.vlgmr.msra.gmra.mxu1 %vm567_vm2, %v3435_v53 }
  0xb7   : > { %3446 = vmatpush.msk.msrb.mxu0 %vm571_vm1, %v686_v54  ;;  %3448 = vmatpush.msk.msrb.mxu1 %vm571_vm1, %v687_v55 }
  0xb9   : > { %3457 = vmatpush.msk.msra.mxu0 %vm571_vm1, %v3935_v15  ;;  %3459 = vmatpush.msk.msra.mxu1 %vm571_vm1, %v3937_v16  ;;  %v749_v59 = vpop.permute.xlu1 %748  ;;  %v747_v60 = vpop.permute.xlu0 %746  ;;  %v3467_v15 = vld [vmem:[%s4665_s1 + $0xc] sm:$0x3]  ;;  %s4675_s1 = smov 111  }
  0xba   : > { %v751_v61 = vsel %vm750_vm5, %v747_v60, %v749_v59  ;;  %v752_v62 = vsel %vm750_vm5, %v749_v59, %v747_v60  ;;  %v951_v16 = vpop.permute.xlu2 %950  ;;  %v4071_v17 = vperm.slane %v3467_v15, 0  ;;  %v4073_v18 = vperm.slane %v3467_v15, 1 }
  0xbb   : > { %v760_v63 = vmul.f32 %v4013_v57, %v752_v62  ;;  %v761_v0 = vmul.f32 %v4015_v58, %v751_v61 }
  0xbd   : > { %3452 = vmatpush.msk.msrb.mxu2 %vm571_vm1, %v760_v63  ;;  %3454 = vmatpush.msk.msrb.mxu3 %vm571_vm1, %v761_v0 }
  0xbe   : > { %3447 = vmatmul.msk.f32.vlgmr.msrb.gmra.mxu0 %vm567_vm2, %v3445_v1  ;;  %3449 = vmatmul.msk.f32.vlgmr.msrb.gmra.mxu1 %vm567_vm2, %v3445_v1 }
  0xbf   : > { %3453 = vmatmul.msk.f32.vlgmr.msrb.gmra.mxu2 %vm567_vm2, %v3451_v2  ;;  %3455 = vmatmul.msk.f32.vlgmr.msrb.gmra.mxu3 %vm567_vm2, %v3451_v2 }
  0xc6   : > { %3458 = vmatmul.msk.f32.vlgmr.msra.gmra.mxu0 %vm567_vm2, %v3456_v3  ;;  %3460 = vmatmul.msk.f32.vlgmr.msra.gmra.mxu1 %vm567_vm2, %v3456_v3 }
  0xc9   : > { %v877_v9 = vpop.permute.xlu0 %876  ;;  %v1097_v41 = vpop.permute.xlu2 %1096 }
  0xca   : > { %v879_v10 = vsel %vm878_vm6, %v875_v5, %v877_v9  ;;  %v880_v11 = vsel %vm878_vm6, %v877_v9, %v875_v5 }
  0xcb   : > { %v888_v12 = vmul.f32 %v4050_v7, %v879_v10  ;;  %v889_v13 = vmul.f32 %v4052_v8, %v880_v11 }
  0xcd   : > { %3463 = vmatpush.msk.msra.mxu2 %vm571_vm1, %v888_v12  ;;  %3465 = vmatpush.msk.msra.mxu3 %vm571_vm1, %v889_v13 }
  0xce   : > { %3464 = vmatmul.msk.f32.vlgmr.msra.gmra.mxu2 %vm567_vm2, %v3462_v14  ;;  %3466 = vmatmul.msk.f32.vlgmr.msra.gmra.mxu3 %vm567_vm2, %v3462_v14 }
  0xd1   : > { %v949_v19 = vpop.permute.xlu1 %948 }
  0xd2   : > { %v953_v20 = vsel %vm952_vm7, %v949_v19, %v951_v16  ;;  %v954_v21 = vsel %vm952_vm7, %v951_v16, %v949_v19 }
  0xd3   : > { %v962_v22 = vmul.f32 %v4071_v17, %v953_v20  ;;  %v963_v23 = vmul.f32 %v4073_v18, %v954_v21 }
  0xd5   : > { %3469 = vmatpush.msk.msrb.mxu0 %vm571_vm1, %v962_v22  ;;  %3471 = vmatpush.msk.msrb.mxu1 %vm571_vm1, %v963_v23 }
  0xd6   : > { %3470 = vmatmul.msk.f32.vlgmr.msrb.gmra.mxu0 %vm567_vm2, %v3468_v24  ;;  %3472 = vmatmul.msk.f32.vlgmr.msrb.gmra.mxu1 %vm567_vm2, %v3468_v24 }
  0xd9   : > { %v1025_v29 = vpop.permute.xlu1 %1024  ;;  %v1023_v32 = vpop.permute.xlu0 %1022 }
  0xda   : > { %v1027_v33 = vsel %vm4649_vm8, %v1023_v32, %v1025_v29  ;;  %v1028_v34 = vsel %vm4649_vm8, %v1025_v29, %v1023_v32 }
  0xdb   : > { %v1036_v35 = vmul.f32 %v4092_v26, %v1027_v33  ;;  %v1037_v36 = vmul.f32 %v4094_v28, %v1028_v34 }
  0xdd   : > { %3475 = vmatpush.msk.msrb.mxu2 %vm571_vm1, %v1036_v35  ;;  %3477 = vmatpush.msk.msrb.mxu3 %vm571_vm1, %v1037_v36 }
  0xde   : > { %3476 = vmatmul.msk.f32.vlgmr.msrb.gmra.mxu2 %vm567_vm2, %v3474_v37  ;;  %3478 = vmatmul.msk.f32.vlgmr.msrb.gmra.mxu3 %vm567_vm2, %v3474_v37 }
  0xe1   : > { %v1099_v46 = vpop.permute.xlu0 %1098 }
  0xe2   : > { %v1101_v47 = vsel %vm4650_vm9, %v1097_v41, %v1099_v46  ;;  %v1102_v48 = vsel %vm4650_vm9, %v1099_v46, %v1097_v41 }
  0xe3   : > { %v1110_v49 = vmul.f32 %v4113_v39, %v1101_v47  ;;  %v1111_v50 = vmul.f32 %v4115_v40, %v1102_v48 }
  0xe5   : > { %3481 = vmatpush.msk.msra.mxu0 %vm571_vm1, %v1110_v49  ;;  %3483 = vmatpush.msk.msra.mxu1 %vm571_vm1, %v1111_v50 }
  0xe6   : > { %3482 = vmatmul.msk.f32.vlgmr.msra.gmra.mxu0 %vm567_vm2, %v3480_v51  ;;  %3484 = vmatmul.msk.f32.vlgmr.msra.gmra.mxu1 %vm567_vm2, %v3480_v51 }
 0x131   : > { %v644_v54 = vpop.f32.mrf.mxu2  ;;  %v664_v55 = vpop.f32.mrf.mxu3 }
 0x133   : > { %v595_v52 = vpop.f32.mrf.mxu0  ;;  %v615_v53 = vpop.f32.mrf.mxu1 }
 0x134   : > { %v645_v60 = vadd.f32 %v644_v54, %v595_v52  ;;  %v665_v61 = vadd.f32 %v664_v55, %v615_v53 }
 0x13b   : > { %v716_v56 = vpop.f32.mrf.mxu0  ;;  %v736_v59 = vpop.f32.mrf.mxu1 }
 0x13c   : > { %v739_v0 = vadd.f32 %v716_v56, %v645_v60  ;;  %v740_v1 = vadd.f32 %v736_v59, %v665_v61 }
 0x142   : > { %v790_v62 = vpop.f32.mrf.mxu2  ;;  %v810_v63 = vpop.f32.mrf.mxu3 }
 0x143   : > { %v844_v2 = vpop.f32.mrf.mxu0  ;;  %v864_v3 = vpop.f32.mrf.mxu1  ;;  %v813_v4 = vadd.f32 %v790_v62, %v739_v0  ;;  %v814_v5 = vadd.f32 %v810_v63, %v740_v1 }
 0x145   : > { %v867_v11 = vadd.f32 %v844_v2, %v813_v4  ;;  %v868_v12 = vadd.f32 %v864_v3, %v814_v5 }
 0x151   : > { %v918_v9 = vpop.f32.mrf.mxu2  ;;  %v938_v10 = vpop.f32.mrf.mxu3 }
 0x152   : > { %v941_v15 = vadd.f32 %v918_v9, %v867_v11  ;;  %v942_v16 = vadd.f32 %v938_v10, %v868_v12 }
 0x153   : > { %v992_v13 = vpop.f32.mrf.mxu0  ;;  %v1012_v14 = vpop.f32.mrf.mxu1 }
 0x154   : > { %v1015_v19 = vadd.f32 %v992_v13, %v941_v15  ;;  %v1016_v20 = vadd.f32 %v1012_v14, %v942_v16 }
 0x161   : > { %v1066_v21 = vpop.f32.mrf.mxu2  ;;  %v1086_v22 = vpop.f32.mrf.mxu3 }
 0x162   : > { %v1089_v23 = vadd.f32 %v1066_v21, %v1015_v19  ;;  %v1090_v24 = vadd.f32 %v1086_v22, %v1016_v20 }
 0x163   : > { %v1140_v25 = vpop.f32.mrf.mxu0  ;;  %v1160_v29 = vpop.f32.mrf.mxu1 }
 0x164   : > { %v1163_v32 = vadd.f32 %v1140_v25, %v1089_v23  ;;  %v1164_v33 = vadd.f32 %v1160_v29, %v1090_v24 }
 0x166   : > { %v1165_v34 = vsel %vm571_vm1, %v1163_v32, 0.0  ;;  %v1172_v35 = vsel %vm571_vm1, %v1164_v33, 0.0 }
 0x167   : > { %v1166_v36 = vrot.slane %v1165_v34, 4  ;;  %v1173_v37 = vrot.slane %v1172_v35, 4 }
 0x169   : > { %v1167_v38 = vadd.f32 %v1166_v36, %v1165_v34  ;;  %v1174_v41 = vadd.f32 %v1173_v37, %v1172_v35  ;;  %v1241_v34 = vld [vmem:[%s4667_s3] sm:$0xf]  ;;  %v3782_v35 = vmov 0  }
 0x16a   : > { %3679 = vset.pattern.permute.xlu0 %v3782_v35  ;;  %3680 = vset.pattern.permute.xlu1 %v3782_v35  ;;  %v1249_v36 = vld [vmem:[%s4668_s4] sm:$0xf] }
 0x16b   : > { %v1168_v46 = vrot.slane %v1167_v38, 2  ;;  %v1175_v47 = vrot.slane %v1174_v41, 2  ;;  %1244 = vperm.xlu0 %3679, %v1241_v34   ;;  %3681 = vset.pattern.permute.xlu2 %v3782_v35 }
 0x16d   : > { %v1169_v48 = vadd.f32 %v1168_v46, %v1167_v38  ;;  %v1176_v49 = vadd.f32 %v1175_v47, %v1174_v41 }
 0x16f   : > { %v1170_v50 = vrot.slane %v1169_v48, 1  ;;  %v1177_v51 = vrot.slane %v1176_v49, 1 }
 0x171   : > { %v1171_v52 = vadd.f32 %v1170_v50, %v1169_v48  ;;  %v1178_v53 = vadd.f32 %v1177_v51, %v1176_v49 }
 0x173   : > { %v1180_v54 = vsel %vm4648_vm10, %v1171_v52, 0.0  ;;  %v1181_v55 = vsel %vm4648_vm10, %v1178_v53, 0.0  ;;  %1252 = vperm.xlu0 %3679, %v1249_v36  }
 0x174   : > { %v1182_v56 = vadd.f32 %v1181_v55, %v1180_v54 }
 0x176   : > { %1183 = vadd.xlane.f32.xlu1 %v1182_v56 }
 0x1e9   : > { %v1184_v59 = vpop.xlane.xlu1 %1183 }
 0x1ea   : > { %v1185_v60 = vrot.slane %v1184_v59, 4 }
 0x1ec   : > { %v1186_v61 = vadd.f32 %v1185_v60, %v1184_v59  ;;  %v1245_v60 = vpop.permute.xlu0 %1244 }
 0x1ee   : > { %v1187_v62 = vrot.slane %v1186_v61, 2 }
 0x1f0   : > { %v1188_v63 = vadd.f32 %v1187_v62, %v1186_v61 }
 0x1f2   : > { %v1189_v0 = vrot.slane %v1188_v63, 1 }
 0x1f4   : > { %v1190_v1 = vadd.f32 %v1189_v0, %v1188_v63 }
 0x1f6   : > { %3606 = vpush %v1190_v1 }
 0x227   : > { %s3607_s23 = spop %3606 }
 0x228   : > { %s1192_s25 = smul.f32 0.0009765625, %s3607_s23 }
 0x22a   : > { %v1193_v2 = vstv %s1192_s25 }
 0x22b   : > { %v1194_v3 = vsub.f32 %v1163_v32, %v1193_v2  ;;  %v1195_v4 = vsub.f32 %v1164_v33, %v1193_v2  ;;  %v1253_v2 = vpop.permute.xlu0 %1252 }
 0x22d   : > { %v1196_v5 = vmul.f32 %v1194_v3, %v1194_v3  ;;  %v1197_v9 = vmul.f32 %v1195_v4, %v1195_v4 }
 0x22f   : > { %v1198_v10 = vsel %vm571_vm1, %v1196_v5, 0.0  ;;  %v1205_v11 = vsel %vm571_vm1, %v1197_v9, 0.0 }
 0x230   : > { %v1199_v12 = vrot.slane %v1198_v10, 4  ;;  %v1206_v13 = vrot.slane %v1205_v11, 4 }
 0x232   : > { %v1200_v14 = vadd.f32 %v1199_v12, %v1198_v10  ;;  %v1207_v15 = vadd.f32 %v1206_v13, %v1205_v11 }
 0x234   : > { %v1201_v16 = vrot.slane %v1200_v14, 2  ;;  %v1208_v19 = vrot.slane %v1207_v15, 2 }
 0x236   : > { %v1202_v20 = vadd.f32 %v1201_v16, %v1200_v14  ;;  %v1209_v21 = vadd.f32 %v1208_v19, %v1207_v15 }
 0x238   : > { %v1203_v22 = vrot.slane %v1202_v20, 1  ;;  %v1210_v23 = vrot.slane %v1209_v21, 1 }
 0x23a   : > { %v1204_v24 = vadd.f32 %v1203_v22, %v1202_v20  ;;  %v1211_v25 = vadd.f32 %v1210_v23, %v1209_v21 }
 0x23c   : > { %v1212_v29 = vsel %vm4648_vm10, %v1204_v24, 0.0  ;;  %v1213_v32 = vsel %vm4648_vm10, %v1211_v25, 0.0 }
 0x23d   : > { %v1214_v33 = vadd.f32 %v1213_v32, %v1212_v29 }
 0x23f   : > { %1215 = vadd.xlane.f32.xlu2 %v1214_v33 }
 0x2b2   : > { %v1216_v37 = vpop.xlane.xlu2 %1215 }
 0x2b3   : > { %v1217_v38 = vrot.slane %v1216_v37, 4 }
 0x2b5   : > { %v1218_v41 = vadd.f32 %v1217_v38, %v1216_v37 }
 0x2b7   : > { %v1219_v46 = vrot.slane %v1218_v41, 2 }
 0x2b9   : > { %v1220_v47 = vadd.f32 %v1219_v46, %v1218_v41 }
 0x2bb   : > { %v1221_v48 = vrot.slane %v1220_v47, 1 }
 0x2bd   : > { %v1222_v49 = vadd.f32 %v1221_v48, %v1220_v47 }
 0x2bf   : > { %3608 = vpush %v1222_v49 }
 0x2f0   : > { %s3609_s23 = spop %3608 }
 0x2f1   : > { %s1224_s25 = smul.f32 0.0009765625, %s3609_s23  ;;  %s4671_s23 = smov 1  }
 0x2f3   : > { %s1225_s26 = sadd.f32 1e-05, %s1224_s25  ;;  %s4672_s25 = smov 113  }
 0x2f5   : > { %v1226_v50 = vstv %s1225_s26  ;;  %s4673_s26 = smov 127  }
 0x2f6   : > { %3682 = vrsqrt.f32 %v1226_v50  ;;  %vm1233_vm12 = vweird.f32 %v1226_v50 }
 0x2fc   : > { %v3683_v51 = vpop.eup %3682 }
 0x2fd   : > { %v1228_v52 = vmul.f32 %v3683_v51, %v1226_v50  ;;  %vm1234_vm11 = vweird.f32 %v3683_v51 }
 0x2fe   : > { %vm1235_vm13 = vmor %vm1233_vm12, %vm1234_vm11 }
 0x2ff   : > { %v1229_v53 = vmul.f32 %v3683_v51, %v1228_v52 }
 0x301   : > { %v1230_v54 = vmul.f32 0.5, %v1229_v53 }
 0x303   : > { %v1231_v55 = vsub.f32 1.5, %v1230_v54 }
 0x305   : > { %v1232_v56 = vmul.f32 %v3683_v51, %v1231_v55 }
 0x307   : > { %v1236_v59 = vsel %vm1235_vm13, %v3683_v51, %v1232_v56 }
 0x308   : > { %3610 = vpush %v1236_v59 }
 0x339   : > { %s3611_s16 = spop %3610 }
 0x33a   : > { %v1238_v61 = vstv %s3611_s16  ;;  %s4674_s16 = smov 17  }
 0x33b   : > { %v1239_v62 = vmul.f32 %v1238_v61, %v1194_v3  ;;  %v1240_v63 = vmul.f32 %v1238_v61, %v1195_v4 }
 0x33d   : > { %v1247_v0 = vmul.f32 %v1245_v60, %v1239_v62  ;;  %v1248_v1 = vmul.f32 %v1245_v60, %v1240_v63 }
 0x33f   : > { %v4144_v5 = vadd.f32 %v1253_v2, %v1247_v0  ;;  %v4146_v9 = vadd.f32 %v1253_v2, %v1248_v1 }
 0x341   : > { %v4149_v10 = vmul.f32 0.70710677, %v4144_v5  ;;  %v4152_v11 = vmul.f32 0.70710677, %v4146_v9 }
 0x343   : > { %v1265_v12 = vand.u32 2147483647, %v4149_v10  ;;  %v1266_v13 = vand.u32 2147483647, %v4152_v11 }
 0x345   : > { %v1267_v14 = vmul.f32 0.3275911, %v1265_v12  ;;  %v1268_v3 = vmul.f32 0.3275911, %v1266_v13  ;;  %v1319_v48 = vsub.f32 0.0, %v1265_v12  ;;  %v1320_v51 = vsub.f32 0.0, %v1266_v13 }
 0x347   : > { %v1269_v4 = vadd.f32 1.0, %v1267_v14  ;;  %v1270_v15 = vadd.f32 1.0, %v1268_v3  ;;  %v1321_v55 = vmul.f32 %v1319_v48, %v1265_v12  ;;  %v1322_v59 = vmul.f32 %v1320_v51, %v1266_v13 }
 0x349   : > { %3684 = vrcp.f32 %v1269_v4  ;;  %v1282_v23 = vand.u32 2147483648, %v1269_v4  ;;  %v1280_v29 = vand.u32 2147483647, %v1269_v4  ;;  %v1297_v32 = vand.u32 2147483648, %v1270_v15 }
 0x34a   : > { %3686 = vrcp.f32 %v1270_v15  ;;  %v1295_v34 = vand.u32 2147483647, %v1270_v15  ;;  %vm1276_vm11 = vweird.f32 %v1269_v4  ;;  %vm1291_vm13 = vweird.f32 %v1270_v15 }
 0x34b   : > { %v1283_v36 = vor.u32 1.1754944e-38, %v1282_v23  ;;  %vm1281_vm10 = vcmp.eq.f32.partialorder %v1280_v29, 8.507059e+37  ;;  %v1298_v41 = vor.u32 1.1754944e-38, %v1297_v32  ;;  %v1323_v63 = vmul.f32 1.442695, %v1321_v55 }
 0x34c   : > { %vm1296_vm9 = vcmp.eq.f32.partialorder %v1295_v34, 8.507059e+37  ;;  %v1325_v1 = vmul.f32 1.442695, %v1322_v59 }
 0x34d   : > { %3688 = vpow2.f32 %v1323_v63 }
 0x34e   : > { %3690 = vpow2.f32 %v1325_v1 }
 0x34f   : > { %v3685_v16 = vpop.eup %3684 }
 0x350   : > { %v3687_v19 = vpop.eup %3686  ;;  %v1272_v20 = vmul.f32 %v3685_v16, %v1269_v4  ;;  %vm1277_vm14 = vweird.f32 %v3685_v16 }
 0x351   : > { %v1287_v21 = vmul.f32 %v3687_v19, %v1270_v15  ;;  %vm1292_vm15 = vweird.f32 %v3687_v19  ;;  %vm1278_vm12 = vmor %vm1276_vm11, %vm1277_vm14 }
 0x352   : > { %v1273_v22 = vsub.f32 1.0, %v1272_v20  ;;  %vm1293_vm8 = vmor %vm1291_vm13, %vm1292_vm15  ;;  %vm4682_vm15 = vcmp.lt.s32.totalorder %v3951_v27, 112 }
 0x353   : > { %v1288_v24 = vsub.f32 1.0, %v1287_v21  ;;  %v3689_v21 = vpop.eup %3688  ;;  %vm4683_vm11 = vmmov %vm4682_vm15 }
 0x354   : > { %v1274_v25 = vmul.f32 %v3685_v16, %v1273_v22  ;;  %v3691_v22 = vpop.eup %3690 }
 0x355   : > { %v1289_v33 = vmul.f32 %v3687_v19, %v1288_v24 }
 0x356   : > { %v1275_v35 = vadd.f32 %v3685_v16, %v1274_v25  ;;  %v3783_v25 = vmov -1.0  }
 0x357   : > { %v1290_v37 = vadd.f32 %v3687_v19, %v1289_v33 }
 0x358   : > { %v1279_v38 = vsel %vm1278_vm12, %v3685_v16, %v1275_v35  ;;  %vm4684_vm12 = vcmask 1040384  }
 0x359   : > { %v1284_v46 = vsel %vm1281_vm10, %v1283_v36, %v1279_v38  ;;  %v1294_v47 = vsel %vm1293_vm8, %v3687_v19, %v1290_v37  ;;  %vm1261_vm8 = vcmp.ge.f32.partialorder %v4149_v10, 0.0  ;;  %v1257_v36 = vmul.f32 0.5, %v4144_v5  ;;  %v1948_v5 = vld [vmem:[%s4677_s6] sm:$0xf]  ;;  %vm4685_vm13 = vmmov %vm4684_vm12 }
 0x35a   : > { %v1299_v49 = vsel %vm1296_vm9, %v1298_v41, %v1294_v47  ;;  %v1301_v50 = vmul.f32 1.0614054, %v1284_v46  ;;  %vm1262_vm9 = vcmp.ge.f32.partialorder %v4152_v11, 0.0  ;;  %v1263_v29 = vsel %vm1261_vm8, 1.0, %v3783_v25  ;;  %vm4686_vm8 = vmmov %vm4684_vm12 }
 0x35b   : > { %v1302_v52 = vmul.f32 1.0614054, %v1299_v49  ;;  %v1264_v33 = vsel %vm1262_vm9, 1.0, %v3783_v25  ;;  %v1258_v38 = vmul.f32 0.5, %v4146_v9  ;;  %v1956_v9 = vld [vmem:[%s4678_s7] sm:$0xf]  ;;  %vm4687_vm9 = vmmov %vm4686_vm8 }
 0x35c   : > { %v1303_v53 = vadd.f32 -1.4531521, %v1301_v50  ;;  %vm4680_vm10 = vcmp.lt.s32.totalorder %v3951_v27, 111 }
 0x35d   : > { %v1304_v54 = vadd.f32 -1.4531521, %v1302_v52  ;;  %vm4681_vm14 = vmmov %vm4680_vm10 }
 0x35e   : > { %v1305_v56 = vmul.f32 %v1303_v53, %v1284_v46 }
 0x35f   : > { %v1306_v60 = vmul.f32 %v1304_v54, %v1299_v49 }
 0x360   : > { %v1307_v61 = vadd.f32 1.4214138, %v1305_v56 }
 0x361   : > { %v1308_v62 = vadd.f32 1.4214138, %v1306_v60  ;;  %v3485_v60 = vld [vmem:[%s4679_s5 + $0x4] sm:$0xf] }
 0x362   : > { %v1309_v0 = vmul.f32 %v1307_v61, %v1284_v46 }
 0x363   : > { %v1310_v2 = vmul.f32 %v1308_v62, %v1299_v49  ;;  %v3494_v62 = vld [vmem:[%s4679_s5 + $0x8] sm:$0xf] }
 0x364   : > { %v1311_v14 = vadd.f32 -0.28449672, %v1309_v0 }
 0x365   : > { %v1312_v3 = vadd.f32 -0.28449672, %v1310_v2 }
 0x366   : > { %v1313_v4 = vmul.f32 %v1311_v14, %v1284_v46 }
 0x367   : > { %v1314_v15 = vmul.f32 %v1312_v3, %v1299_v49 }
 0x368   : > { %v1315_v16 = vadd.f32 0.2548296, %v1313_v4 }
 0x369   : > { %v1316_v19 = vadd.f32 0.2548296, %v1314_v15  ;;  %v1345_v15 = vld [vmem:[%s4679_s5] sm:$0xf] }
 0x36a   : > { %v1317_v20 = vmul.f32 %v1315_v16, %v1284_v46  ;;  %v3504_v16 = vld [vmem:[%s4679_s5 + $0x10] sm:$0xf] }
 0x36b   : > { %v1318_v12 = vmul.f32 %v1316_v19, %v1299_v49 }
 0x36c   : > { %v1327_v13 = vmul.f32 %v3689_v21, %v1317_v20 }
 0x36d   : > { %v1328_v23 = vmul.f32 %v3691_v22, %v1318_v12 }
 0x36e   : > { %v1329_v24 = vsub.f32 1.0, %v1327_v13 }
 0x36f   : > { %v1330_v32 = vsub.f32 1.0, %v1328_v23 }
 0x370   : > { %v1331_v34 = vmul.f32 %v1329_v24, %v1263_v29 }
 0x371   : > { %v1332_v35 = vmul.f32 %v1330_v32, %v1264_v33  ;;  %v3499_v32 = vld [vmem:[%s4679_s5 + $0xc] sm:$0xf] }
 0x372   : > { %v1333_v37 = vadd.f32 1.0, %v1331_v34 }
 0x373   : > { %v1334_v41 = vadd.f32 1.0, %v1332_v35 }
 0x374   : > { %v1335_v10 = vmul.f32 %v1333_v37, %v1257_v36 }
 0x375   : > { %v1336_v46 = vmul.f32 %v1334_v41, %v1258_v38 }
 0x376   : > { %1454 = vrot.lane.b32.xlu2 %v1335_v10, %s4669_s0  ;;  %1346 = vrot.lane.b32.xlu0 %v1335_v10, %s4670_s17 }
 0x377   : > { %1456 = vrot.lane.b32.xlu1 %v1336_v46, %s4669_s0 }
 0x37e   : > { %1517 = vrot.lane.b32.xlu2 %v1336_v46, %s4671_s23  ;;  %1348 = vrot.lane.b32.xlu0 %v1336_v46, %s4670_s17 }
 0x37f   : > { %1690 = vrot.lane.b32.xlu1 %v1335_v10, %s4672_s25 }
 0x386   : > { %1629 = vrot.lane.b32.xlu2 %v1335_v10, %s4673_s26  ;;  %1337 = vrot.lane.b32.xlu0 %v1335_v10, %s4674_s16 }
 0x387   : > { %1631 = vrot.lane.b32.xlu1 %v1336_v46, %s4673_s26 }
 0x38e   : > { %1814 = vrot.lane.b32.xlu2 %v1336_v46, %s4675_s1  ;;  %1339 = vrot.lane.b32.xlu0 %v1336_v46, %s4674_s16 }
 0x38f   : > { %1751 = vrot.lane.b32.xlu1 %v1335_v10, %s4676_s2 }
 0x396   : > { %1515 = vrot.lane.b32.xlu0 %v1335_v10, %s4671_s23 }
 0x39e   : > { %1692 = vrot.lane.b32.xlu0 %v1336_v46, %s4672_s25 }
 0x3a6   : > { %1812 = vrot.lane.b32.xlu0 %v1335_v10, %s4675_s1 }
 0x3ae   : > { %1753 = vrot.lane.b32.xlu0 %v1336_v46, %s4676_s2 }
 0x3b6   : > { %1951 = vperm.xlu0 %3679, %v1948_v5  }
 0x3be   : > { %1959 = vperm.xlu0 %3679, %v1956_v9  }
 0x3d0   : > { %v1455_v48 = vpop.permute.xlu2 %1454 }
 0x3d8   : > { %v1518_v0 = vpop.permute.xlu2 %1517 }
 0x3e0   : > { %v1630_v20 = vpop.permute.xlu2 %1629 }
 0x3e8   : > { %v1347_v11 = vpop.permute.xlu0 %1346  ;;  %v1815_v5 = vpop.permute.xlu2 %1814 }
 0x3e9   : > { %v1457_v47 = vpop.permute.xlu1 %1456 }
 0x3ea   : > { %v1458_v49 = vsel %vm676_vm3, %v1455_v48, %v1457_v47  ;;  %v1459_v50 = vsel %vm676_vm3, %v1457_v47, %v1455_v48 }
 0x3eb   : > { %v1460_v56 = vmul.f32 %v1459_v50, %v3986_v44  ;;  %v1461_v59 = vmul.f32 %v1458_v49, %v3988_v45  ;;  %v3524_v50 = vld [vmem:[%s4679_s5 + $0x20] sm:$0xf] }
 0x3f0   : > { %v1349_v51 = vpop.permute.xlu0 %1348 }
 0x3f1   : > { %v1350_v52 = vsel %vm553_vm4, %v1347_v11, %v1349_v51  ;;  %v1351_v53 = vsel %vm553_vm4, %v1349_v51, %v1347_v11  ;;  %v1691_v63 = vpop.permute.xlu1 %1690 }
 0x3f2   : > { %v1352_v54 = vmul.f32 %v1351_v53, %v3982_v42  ;;  %v1353_v55 = vmul.f32 %v1350_v52, %v3984_v43 }
 0x3f4   : > { %3486 = vmatpush.msk.msra.mxu2 %vm571_vm1, %v1352_v54  ;;  %3488 = vmatpush.msk.msra.mxu3 %vm571_vm1, %v1353_v55 }
 0x3f5   : > { %3487 = vmatmul.msk.f32.vlgmr.msra.gmra.mxu2 %vm567_vm2, %v3485_v60  ;;  %3489 = vmatmul.msk.f32.vlgmr.msra.gmra.mxu3 %vm567_vm2, %v3485_v60 }
 0x3f6   : > { %3495 = vmatpush.msk.msrb.mxu2 %vm571_vm1, %v1460_v56  ;;  %3497 = vmatpush.msk.msrb.mxu3 %vm571_vm1, %v1461_v59  ;;  %v3519_v59 = vld [vmem:[%s4679_s5 + $0x1c] sm:$0xf] }
 0x3f8   : > { %3505 = vmatpush.msk.msra.mxu2 %vm571_vm1, %v1335_v10  ;;  %3507 = vmatpush.msk.msra.mxu3 %vm571_vm1, %v1336_v46  ;;  %v1338_v61 = vpop.permute.xlu0 %1337  ;;  %v3509_v10 = vld [vmem:[%s4679_s5 + $0x14] sm:$0xf]  ;;  %v3514_v46 = vld [vmem:[%s4679_s5 + $0x18] sm:$0xf] }
 0x3f9   : > { %v1632_v19 = vpop.permute.xlu1 %1631 }
 0x3fa   : > { %v1633_v12 = vsel %vm878_vm6, %v1630_v20, %v1632_v19  ;;  %v1634_v22 = vsel %vm878_vm6, %v1632_v19, %v1630_v20 }
 0x3fb   : > { %v1635_v33 = vmul.f32 %v1633_v12, %v4050_v7  ;;  %v1636_v34 = vmul.f32 %v1634_v22, %v4052_v8 }
 0x3fd   : > { %3496 = vmatmul.msk.f32.vlgmr.msrb.gmra.mxu2 %vm567_vm2, %v3494_v62  ;;  %3498 = vmatmul.msk.f32.vlgmr.msrb.gmra.mxu3 %vm567_vm2, %v3494_v62 }
 0x400   : > { %v1340_v1 = vpop.permute.xlu0 %1339 }
 0x401   : > { %v1341_v2 = vsel %vm532_vm0, %v1338_v61, %v1340_v1  ;;  %v1342_v14 = vsel %vm532_vm0, %v1340_v1, %v1338_v61  ;;  %v1752_v51 = vpop.permute.xlu1 %1751 }
 0x402   : > { %v1343_v3 = vmul.f32 %v1342_v14, %v3957_v30  ;;  %v1344_v4 = vmul.f32 %v1341_v2, %v3959_v31 }
 0x404   : > { %3490 = vmatpush.msk.msrb.mxu0 %vm571_vm1, %v1343_v3  ;;  %3492 = vmatpush.msk.msrb.mxu1 %vm571_vm1, %v1344_v4 }
 0x405   : > { %3491 = vmatmul.msk.f32.vlgmr.msrb.gmra.mxu0 %vm567_vm2, %v1345_v15  ;;  %3493 = vmatmul.msk.f32.vlgmr.msrb.gmra.mxu1 %vm567_vm2, %v1345_v15 }
 0x406   : > { %3506 = vmatmul.msk.f32.vlgmr.msra.gmra.mxu2 %vm567_vm2, %v3504_v16  ;;  %3508 = vmatmul.msk.f32.vlgmr.msra.gmra.mxu3 %vm567_vm2, %v3504_v16 }
 0x408   : > { %v1516_v21 = vpop.permute.xlu0 %1515 }
 0x409   : > { %v1519_v13 = vsel %vm750_vm5, %v1516_v21, %v1518_v0  ;;  %v1520_v23 = vsel %vm750_vm5, %v1518_v0, %v1516_v21 }
 0x40a   : > { %v1521_v24 = vmul.f32 %v1520_v23, %v4013_v57  ;;  %v1522_v29 = vmul.f32 %v1519_v13, %v4015_v58 }
 0x40c   : > { %3500 = vmatpush.msk.msra.mxu0 %vm571_vm1, %v1521_v24  ;;  %3502 = vmatpush.msk.msra.mxu1 %vm571_vm1, %v1522_v29 }
 0x40d   : > { %3501 = vmatmul.msk.f32.vlgmr.msra.gmra.mxu0 %vm567_vm2, %v3499_v32  ;;  %3503 = vmatmul.msk.f32.vlgmr.msra.gmra.mxu1 %vm567_vm2, %v3499_v32 }
 0x40e   : > { %3510 = vmatpush.msk.msrb.mxu0 %vm571_vm1, %v1635_v33  ;;  %3512 = vmatpush.msk.msrb.mxu1 %vm571_vm1, %v1636_v34 }
 0x410   : > { %v1693_v35 = vpop.permute.xlu0 %1692 }
 0x411   : > { %v1694_v36 = vsel %vm952_vm7, %v1691_v63, %v1693_v35  ;;  %v1695_v37 = vsel %vm952_vm7, %v1693_v35, %v1691_v63 }
 0x412   : > { %v1696_v38 = vmul.f32 %v1694_v36, %v4071_v17  ;;  %v1697_v41 = vmul.f32 %v1695_v37, %v4073_v18 }
 0x414   : > { %3515 = vmatpush.msk.msrb.mxu2 %vm571_vm1, %v1696_v38  ;;  %3517 = vmatpush.msk.msrb.mxu3 %vm571_vm1, %v1697_v41 }
 0x415   : > { %3511 = vmatmul.msk.f32.vlgmr.msrb.gmra.mxu0 %vm567_vm2, %v3509_v10  ;;  %3513 = vmatmul.msk.f32.vlgmr.msrb.gmra.mxu1 %vm567_vm2, %v3509_v10 }
 0x416   : > { %3516 = vmatmul.msk.f32.vlgmr.msrb.gmra.mxu2 %vm567_vm2, %v3514_v46  ;;  %3518 = vmatmul.msk.f32.vlgmr.msrb.gmra.mxu3 %vm567_vm2, %v3514_v46 }
 0x418   : > { %v1813_v9 = vpop.permute.xlu0 %1812 }
 0x419   : > { %v1816_v11 = vsel %vm4680_vm10, %v1813_v9, %v1815_v5  ;;  %v1817_v47 = vsel %vm4681_vm14, %v1815_v5, %v1813_v9 }
 0x41a   : > { %v1818_v48 = vmul.f32 %v1816_v11, %v4113_v39  ;;  %v1819_v49 = vmul.f32 %v1817_v47, %v4115_v40 }
 0x41c   : > { %3525 = vmatpush.msk.msra.mxu2 %vm571_vm1, %v1818_v48  ;;  %3527 = vmatpush.msk.msra.mxu3 %vm571_vm1, %v1819_v49 }
 0x41e   : > { %3526 = vmatmul.msk.f32.vlgmr.msra.gmra.mxu2 %vm567_vm2, %v3524_v50  ;;  %3528 = vmatmul.msk.f32.vlgmr.msra.gmra.mxu3 %vm567_vm2, %v3524_v50 }
 0x420   : > { %v1754_v52 = vpop.permute.xlu0 %1753 }
 0x421   : > { %v1755_v53 = vsel %vm4682_vm15, %v1752_v51, %v1754_v52  ;;  %v1756_v54 = vsel %vm4683_vm11, %v1754_v52, %v1752_v51 }
 0x422   : > { %v1757_v55 = vmul.f32 %v1755_v53, %v4092_v26  ;;  %v1758_v56 = vmul.f32 %v1756_v54, %v4094_v28 }
 0x424   : > { %3520 = vmatpush.msk.msra.mxu0 %vm571_vm1, %v1757_v55  ;;  %3522 = vmatpush.msk.msra.mxu1 %vm571_vm1, %v1758_v56 }
 0x425   : > { %3521 = vmatmul.msk.f32.vlgmr.msra.gmra.mxu0 %vm567_vm2, %v3519_v59  ;;  %3523 = vmatmul.msk.f32.vlgmr.msra.gmra.mxu1 %vm567_vm2, %v3519_v59 }
 0x478   : > { %v1382_v60 = vpop.f32.mrf.mxu2  ;;  %v1402_v61 = vpop.f32.mrf.mxu3 }
 0x480   : > { %v1490_v0 = vpop.f32.mrf.mxu2  ;;  %v1510_v1 = vpop.f32.mrf.mxu3 }
 0x482   : > { %v1431_v62 = vpop.f32.mrf.mxu0  ;;  %v1451_v63 = vpop.f32.mrf.mxu1 }
 0x483   : > { %v1432_v15 = vadd.f32 %v1431_v62, %v1382_v60  ;;  %v1452_v16 = vadd.f32 %v1451_v63, %v1402_v61 }
 0x485   : > { %v1513_v19 = vadd.f32 %v1490_v0, %v1432_v15  ;;  %v1514_v20 = vadd.f32 %v1510_v1, %v1452_v16 }
 0x489   : > { %v1604_v3 = vpop.f32.mrf.mxu2  ;;  %v1624_v4 = vpop.f32.mrf.mxu3 }
 0x48a   : > { %v1551_v2 = vpop.f32.mrf.mxu0  ;;  %v1571_v14 = vpop.f32.mrf.mxu1 }
 0x48b   : > { %v1574_v21 = vadd.f32 %v1551_v2, %v1513_v19  ;;  %v1575_v12 = vadd.f32 %v1571_v14, %v1514_v20 }
 0x48d   : > { %v1627_v29 = vadd.f32 %v1604_v3, %v1574_v21  ;;  %v1628_v32 = vadd.f32 %v1624_v4, %v1575_v12 }
 0x492   : > { %v1665_v23 = vpop.f32.mrf.mxu0  ;;  %v1685_v24 = vpop.f32.mrf.mxu1 }
 0x493   : > { %v1688_v33 = vadd.f32 %v1665_v23, %v1627_v29  ;;  %v1689_v34 = vadd.f32 %v1685_v24, %v1628_v32 }
 0x499   : > { %v1726_v22 = vpop.f32.mrf.mxu2  ;;  %v1746_v13 = vpop.f32.mrf.mxu3 }
 0x49a   : > { %v1749_v35 = vadd.f32 %v1726_v22, %v1688_v33  ;;  %v1750_v36 = vadd.f32 %v1746_v13, %v1689_v34 }
 0x4a1   : > { %v1848_v37 = vpop.f32.mrf.mxu2  ;;  %v1868_v38 = vpop.f32.mrf.mxu3 }
 0x4a2   : > { %v1787_v41 = vpop.f32.mrf.mxu0  ;;  %v1807_v10 = vpop.f32.mrf.mxu1 }
 0x4a3   : > { %v1810_v46 = vadd.f32 %v1787_v41, %v1749_v35  ;;  %v1811_v5 = vadd.f32 %v1807_v10, %v1750_v36 }
 0x4a5   : > { %v1871_v9 = vadd.f32 %v1848_v37, %v1810_v46  ;;  %v1872_v11 = vadd.f32 %v1868_v38, %v1811_v5 }
 0x4a7   : > { %v1873_v47 = vsel %vm571_vm1, %v1871_v9, 0.0  ;;  %v1880_v48 = vsel %vm571_vm1, %v1872_v11, 0.0 }
 0x4a8   : > { %v1874_v49 = vrot.slane %v1873_v47, 4  ;;  %v1881_v50 = vrot.slane %v1880_v48, 4 }
 0x4aa   : > { %v1875_v51 = vadd.f32 %v1874_v49, %v1873_v47  ;;  %v1882_v52 = vadd.f32 %v1881_v50, %v1880_v48 }
 0x4ac   : > { %v1876_v53 = vrot.slane %v1875_v51, 2  ;;  %v1883_v54 = vrot.slane %v1882_v52, 2 }
 0x4ae   : > { %v1877_v55 = vadd.f32 %v1876_v53, %v1875_v51  ;;  %v1884_v56 = vadd.f32 %v1883_v54, %v1882_v52 }
 0x4b0   : > { %v1878_v59 = vrot.slane %v1877_v55, 1  ;;  %v1885_v60 = vrot.slane %v1884_v56, 1 }
 0x4b2   : > { %v1879_v61 = vadd.f32 %v1878_v59, %v1877_v55  ;;  %v1886_v62 = vadd.f32 %v1885_v60, %v1884_v56 }
 0x4b4   : > { %v1887_v63 = vsel %vm4684_vm12, %v1879_v61, 0.0  ;;  %v1888_v0 = vsel %vm4685_vm13, %v1886_v62, 0.0 }
 0x4b5   : > { %v1889_v1 = vadd.f32 %v1888_v0, %v1887_v63 }
 0x4b7   : > { %1890 = vadd.xlane.f32.xlu2 %v1889_v1  ;;  %v1952_v1 = vpop.permute.xlu0 %1951 }
 0x52a   : > { %v1891_v2 = vpop.xlane.xlu2 %1890 }
 0x52b   : > { %v1892_v14 = vrot.slane %v1891_v2, 4 }
 0x52d   : > { %v1893_v3 = vadd.f32 %v1892_v14, %v1891_v2 }
 0x52f   : > { %v1894_v4 = vrot.slane %v1893_v3, 2 }
 0x531   : > { %v1895_v15 = vadd.f32 %v1894_v4, %v1893_v3 }
 0x533   : > { %v1896_v16 = vrot.slane %v1895_v15, 1 }
 0x535   : > { %v1897_v19 = vadd.f32 %v1896_v16, %v1895_v15  ;;  %v1960_v16 = vpop.permute.xlu0 %1959 }
 0x537   : > { %3612 = vpush %v1897_v19 }
 0x568   : > { %s3613_s20 = spop %3612 }
 0x569   : > { %s1899_s27 = smul.f32 0.0009765625, %s3613_s20 }
 0x56b   : > { %v1900_v20 = vstv %s1899_s27 }
 0x56c   : > { %v1901_v21 = vsub.f32 %v1871_v9, %v1900_v20  ;;  %v1902_v12 = vsub.f32 %v1872_v11, %v1900_v20 }
 0x56e   : > { %v1903_v22 = vmul.f32 %v1901_v21, %v1901_v21  ;;  %v1904_v13 = vmul.f32 %v1902_v12, %v1902_v12 }
 0x570   : > { %v1905_v23 = vsel %vm571_vm1, %v1903_v22, 0.0  ;;  %v1912_v24 = vsel %vm571_vm1, %v1904_v13, 0.0 }
 0x571   : > { %v1906_v29 = vrot.slane %v1905_v23, 4  ;;  %v1913_v32 = vrot.slane %v1912_v24, 4 }
 0x573   : > { %v1907_v33 = vadd.f32 %v1906_v29, %v1905_v23  ;;  %v1914_v34 = vadd.f32 %v1913_v32, %v1912_v24 }
 0x575   : > { %v1908_v35 = vrot.slane %v1907_v33, 2  ;;  %v1915_v36 = vrot.slane %v1914_v34, 2 }
 0x577   : > { %v1909_v37 = vadd.f32 %v1908_v35, %v1907_v33  ;;  %v1916_v38 = vadd.f32 %v1915_v36, %v1914_v34 }
 0x579   : > { %v1910_v41 = vrot.slane %v1909_v37, 1  ;;  %v1917_v10 = vrot.slane %v1916_v38, 1 }
 0x57b   : > { %v1911_v46 = vadd.f32 %v1910_v41, %v1909_v37  ;;  %v1918_v5 = vadd.f32 %v1917_v10, %v1916_v38 }
 0x57d   : > { %v1919_v9 = vsel %vm4686_vm8, %v1911_v46, 0.0  ;;  %v1920_v11 = vsel %vm4687_vm9, %v1918_v5, 0.0 }
 0x57e   : > { %v1921_v47 = vadd.f32 %v1920_v11, %v1919_v9 }
 0x580   : > { %1922 = vadd.xlane.f32.xlu1 %v1921_v47 }
 0x5f3   : > { %v1923_v48 = vpop.xlane.xlu1 %1922 }
 0x5f4   : > { %v1924_v49 = vrot.slane %v1923_v48, 4 }
 0x5f6   : > { %v1925_v50 = vadd.f32 %v1924_v49, %v1923_v48 }
 0x5f8   : > { %v1926_v51 = vrot.slane %v1925_v50, 2 }
 0x5fa   : > { %v1927_v52 = vadd.f32 %v1926_v51, %v1925_v50 }
 0x5fc   : > { %v1928_v53 = vrot.slane %v1927_v52, 1 }
 0x5fe   : > { %v1929_v54 = vadd.f32 %v1928_v53, %v1927_v52 }
 0x600   : > { %3614 = vpush %v1929_v54 }
 0x631   : > { %s3615_s3 = spop %3614 }
 0x632   : > { %s1931_s4 = smul.f32 0.0009765625, %s3615_s3 }
 0x634   : > { %s1932_s20 = sadd.f32 1e-05, %s1931_s4 }
 0x636   : > { %v1933_v55 = vstv %s1932_s20 }
 0x637   : > { %3692 = vrsqrt.f32 %v1933_v55  ;;  %vm1940_vm14 = vweird.f32 %v1933_v55 }
 0x63d   : > { %v3693_v56 = vpop.eup %3692 }
 0x63e   : > { %v1935_v59 = vmul.f32 %v3693_v56, %v1933_v55  ;;  %vm1941_vm10 = vweird.f32 %v3693_v56 }
 0x63f   : > { %vm1942_vm15 = vmor %vm1940_vm14, %vm1941_vm10  ;;  %vm4688_vm10 = vcmp.lt.s32.totalorder %v3951_v27, 112 }
 0x640   : > { %v1936_v60 = vmul.f32 %v3693_v56, %v1935_v59  ;;  %vm4689_vm14 = vmmov %vm4688_vm10 }
 0x642   : > { %v1937_v61 = vmul.f32 0.5, %v1936_v60 }
 0x644   : > { %v1938_v62 = vsub.f32 1.5, %v1937_v61 }
 0x646   : > { %v1939_v63 = vmul.f32 %v3693_v56, %v1938_v62 }
 0x648   : > { %v1943_v0 = vsel %vm1942_vm15, %v3693_v56, %v1939_v63  ;;  %vm4690_vm15 = vcmp.lt.s32.totalorder %v3951_v27, 111 }
 0x649   : > { %3616 = vpush %v1943_v0 }
 0x67a   : > { %s3617_s27 = spop %3616 }
 0x67b   : > { %v1945_v2 = vstv %s3617_s27 }
 0x67c   : > { %v1946_v14 = vmul.f32 %v1945_v2, %v1901_v21  ;;  %v1947_v3 = vmul.f32 %v1945_v2, %v1902_v12 }
 0x67e   : > { %v1954_v4 = vmul.f32 %v1952_v1, %v1946_v14  ;;  %v1955_v15 = vmul.f32 %v1952_v1, %v1947_v3 }
 0x680   : > { %v1963_v19 = vadd.f32 %v1960_v16, %v1955_v15  ;;  %v1962_v20 = vadd.f32 %v1960_v16, %v1954_v4 }
 0x682   : > { %v1966_v22 = vrot.slane %v1963_v19, 4 }
 0x684   : > { %v1967_v13 = vsel %vm571_vm1, %v1962_v20, %v1966_v22 }
 0x685   : > { %v1969_v23 = vadd.f32 %v1967_v13, %v3920_v6 }
 0x687   : > { %v1971_v24 = vmul.f32 0.70710677, %v1969_v23  ;;  %v1970_v62 = vmul.f32 0.5, %v1969_v23 }
 0x689   : > { %v1974_v29 = vand.u32 2147483647, %v1971_v24  ;;  %vm1972_vm9 = vcmp.ge.f32.partialorder %v1971_v24, 0.0 }
 0x68a   : > { %v1973_v60 = vsel %vm1972_vm9, 1.0, %v3783_v25 }
 0x68b   : > { %v1975_v32 = vmul.f32 0.3275911, %v1974_v29  ;;  %v2001_v6 = vsub.f32 0.0, %v1974_v29 }
 0x68d   : > { %v1976_v33 = vadd.f32 1.0, %v1975_v32  ;;  %v2002_v11 = vmul.f32 %v2001_v6, %v1974_v29 }
 0x68f   : > { %3694 = vrcp.f32 %v1976_v33  ;;  %v1988_v21 = vand.u32 2147483648, %v1976_v33  ;;  %v1986_v37 = vand.u32 2147483647, %v1976_v33  ;;  %vm1982_vm12 = vweird.f32 %v1976_v33 }
 0x690   : > { %v2003_v49 = vmul.f32 1.442695, %v2002_v11 }
 0x691   : > { %v1989_v41 = vor.u32 1.1754944e-38, %v1988_v21  ;;  %vm1987_vm8 = vcmp.eq.f32.partialorder %v1986_v37, 8.507059e+37 }
 0x692   : > { %3696 = vpow2.f32 %v2003_v49 }
 0x695   : > { %v3695_v34 = vpop.eup %3694 }
 0x696   : > { %v1978_v35 = vmul.f32 %v3695_v34, %v1976_v33  ;;  %vm1983_vm11 = vweird.f32 %v3695_v34 }
 0x697   : > { %vm1984_vm13 = vmor %vm1982_vm12, %vm1983_vm11 }
 0x698   : > { %v1979_v36 = vsub.f32 1.0, %v1978_v35  ;;  %v3697_v55 = vpop.eup %3696  ;;  %vm4691_vm11 = vmmov %vm4690_vm15 }
 0x69a   : > { %v1980_v12 = vmul.f32 %v3695_v34, %v1979_v36 }
 0x69c   : > { %v1981_v38 = vadd.f32 %v3695_v34, %v1980_v12 }
 0x69e   : > { %v1985_v10 = vsel %vm1984_vm13, %v3695_v34, %v1981_v38 }
 0x69f   : > { %v1990_v46 = vsel %vm1987_vm8, %v1989_v41, %v1985_v10  ;;  %v2024_v10 = vld [vmem:[%s4624_s8] sm:$0xff] }
 0x6a0   : > { %v1992_v5 = vmul.f32 1.0614054, %v1990_v46 }
 0x6a2   : > { %v1993_v9 = vadd.f32 -1.4531521, %v1992_v5 }
 0x6a4   : > { %v1994_v47 = vmul.f32 %v1993_v9, %v1990_v46 }
 0x6a6   : > { %v1995_v48 = vadd.f32 1.4214138, %v1994_v47 }
 0x6a8   : > { %v1996_v50 = vmul.f32 %v1995_v48, %v1990_v46  ;;  %v3529_v48 = vld [vmem:[%s4624_s8 + $0x8] sm:$0xff] }
 0x6aa   : > { %v1997_v51 = vadd.f32 -0.28449672, %v1996_v50 }
 0x6ac   : > { %v1998_v52 = vmul.f32 %v1997_v51, %v1990_v46 }
 0x6ae   : > { %v1999_v53 = vadd.f32 0.2548296, %v1998_v52 }
 0x6b0   : > { %v2000_v54 = vmul.f32 %v1999_v53, %v1990_v46 }
 0x6b2   : > { %v2005_v56 = vmul.f32 %v3697_v55, %v2000_v54  ;;  %v3538_v55 = vld [vmem:[%s4624_s8 + $0x10] sm:$0xff] }
 0x6b4   : > { %v2006_v59 = vsub.f32 1.0, %v2005_v56 }
 0x6b6   : > { %v2007_v61 = vmul.f32 %v2006_v59, %v1973_v60  ;;  %v3548_v59 = vld [vmem:[%s4624_s8 + $0x20] sm:$0xff] }
 0x6b8   : > { %v2008_v63 = vadd.f32 1.0, %v2007_v61 }
 0x6ba   : > { %v2009_v0 = vmul.f32 %v2008_v63, %v1970_v62 }
 0x6bc   : > { %2011 = vst [vmem:[#allocation1] ss:$2 sm:$0xff] %v2009_v0 }
 0x6c3   : > { %v2012_v1 = vld.sshfl [vmem:[#allocation1] sm:$0xff pattern:$0x75316420]  ;;  %v2013_v2 = vld.sshfl [vmem:[#allocation1 + $0x8] sm:$0xff pattern:$0x75316420] }
 0x6c4   : > { %2016 = vrot.lane.b32.xlu0 %v2012_v1, %s4674_s16  ;;  %2025 = vst [vmem:[#allocation1] ss:$2 sm:$0xff] %v2009_v0 }
 0x6cb   : > { %v2027_v14 = vld.sshfl [vmem:[#allocation1 + $0x8] sm:$0xff pattern:$0x75316420]  ;;  %v2026_v3 = vld.sshfl [vmem:[#allocation1] sm:$0xff pattern:$0x75316420] }
 0x6cc   : > { %2018 = vrot.lane.b32.xlu0 %v2013_v2, %s4674_s16  ;;  %2032 = vrot.lane.b32.xlu2 %v2027_v14, %s4670_s17  ;;  %2138 = vst [vmem:[#allocation1] ss:$2 sm:$0xff] %v2009_v0 }
 0x6d3   : > { %v2139_v4 = vld.sshfl [vmem:[#allocation1] sm:$0xff pattern:$0x75316420]  ;;  %v2140_v15 = vld.sshfl [vmem:[#allocation1 + $0x8] sm:$0xff pattern:$0x75316420] }
 0x6d4   : > { %2030 = vrot.lane.b32.xlu0 %v2026_v3, %s4670_s17  ;;  %2143 = vrot.lane.b32.xlu1 %v2139_v4, %s4669_s0  ;;  %2204 = vst [vmem:[#allocation1] ss:$2 sm:$0xff] %v2009_v0 }
 0x6db   : > { %v2205_v16 = vld.sshfl [vmem:[#allocation1] sm:$0xff pattern:$0x75316420]  ;;  %v2206_v19 = vld.sshfl [vmem:[#allocation1 + $0x8] sm:$0xff pattern:$0x75316420] }
 0x6dc   : > { %2145 = vrot.lane.b32.xlu0 %v2140_v15, %s4669_s0  ;;  %2272 = vst [vmem:[#allocation1] ss:$2 sm:$0xff] %v2009_v0 }
 0x6e3   : > { %v2273_v20 = vld.sshfl [vmem:[#allocation1] sm:$0xff pattern:$0x75316420]  ;;  %v2274_v22 = vld.sshfl [vmem:[#allocation1 + $0x8] sm:$0xff pattern:$0x75316420] }
 0x6e4   : > { %2209 = vrot.lane.b32.xlu0 %v2205_v16, %s4671_s23  ;;  %2324 = vst [vmem:[#allocation1] ss:$2 sm:$0xff] %v2009_v0  ;;  %v3543_v16 = vld [vmem:[%s4624_s8 + $0x18] sm:$0xff] }
 0x6eb   : > { %v2326_v13 = vld.sshfl [vmem:[#allocation1 + $0x8] sm:$0xff pattern:$0x75316420]  ;;  %v2325_v23 = vld.sshfl [vmem:[#allocation1] sm:$0xff pattern:$0x75316420] }
 0x6ec   : > { %2211 = vrot.lane.b32.xlu0 %v2206_v19, %s4671_s23  ;;  %2331 = vrot.lane.b32.xlu1 %v2326_v13, %s4673_s26  ;;  %2390 = vst [vmem:[#allocation1] ss:$2 sm:$0xff] %v2009_v0 }
 0x6ed   : > { %2329 = vrot.lane.b32.xlu2 %v2325_v23, %s4673_s26 }
 0x6f3   : > { %v2392_v24 = vld.sshfl [vmem:[#allocation1 + $0x8] sm:$0xff pattern:$0x75316420]  ;;  %v2391_v29 = vld.sshfl [vmem:[#allocation1] sm:$0xff pattern:$0x75316420] }
 0x6f4   : > { %2395 = vrot.lane.b32.xlu0 %v2391_v29, %s4672_s25  ;;  %2456 = vst [vmem:[#allocation1] ss:$2 sm:$0xff] %v2009_v0  ;;  %v3553_v29 = vld [vmem:[%s4624_s8 + $0x28] sm:$0xff] }
 0x6f5   : > { %2397 = vrot.lane.b32.xlu2 %v2392_v24, %s4672_s25 }
 0x6fb   : > { %v2458_v32 = vld.sshfl [vmem:[#allocation1 + $0x8] sm:$0xff pattern:$0x75316420]  ;;  %v2457_v33 = vld.sshfl [vmem:[#allocation1] sm:$0xff pattern:$0x75316420] }
 0x6fc   : > { %2463 = vrot.lane.b32.xlu0 %v2458_v32, %s4676_s2  ;;  %2461 = vrot.lane.b32.xlu1 %v2457_v33, %s4676_s2  ;;  %2522 = vst [vmem:[#allocation1] ss:$2 sm:$0xff] %v2009_v0  ;;  %v3558_v32 = vld [vmem:[%s4624_s8 + $0x30] sm:$0xff] }
 0x703   : > { %v2524_v34 = vld.sshfl [vmem:[#allocation1 + $0x8] sm:$0xff pattern:$0x75316420]  ;;  %v2523_v35 = vld.sshfl [vmem:[#allocation1] sm:$0xff pattern:$0x75316420] }
 0x704   : > { %2529 = vrot.lane.b32.xlu1 %v2524_v34, %s4675_s1  ;;  %2527 = vrot.lane.b32.xlu2 %v2523_v35, %s4675_s1 }
 0x726   : > { %v2033_v46 = vpop.permute.xlu2 %2032 }
 0x736   : > { %v2017_v36 = vpop.permute.xlu0 %2016 }
 0x73e   : > { %v2019_v21 = vpop.permute.xlu0 %2018 }
 0x73f   : > { %v2020_v12 = vsel %vm532_vm0, %v2017_v36, %v2019_v21  ;;  %v2021_v37 = vsel %vm532_vm0, %v2019_v21, %v2017_v36 }
 0x740   : > { %v2022_v38 = vmul.f32 %v2021_v37, %v3957_v30  ;;  %v2023_v41 = vmul.f32 %v2020_v12, %v3959_v31  ;;  %v3563_v37 = vld [vmem:[%s4624_s8 + $0x38] sm:$0xff] }
 0x742   : > { %3534 = vmatpush.msk.msrb.mxu2 %vm571_vm1, %v2022_v38  ;;  %3536 = vmatpush.msk.msrb.mxu3 %vm571_vm1, %v2023_v41 }
 0x743   : > { %3535 = vmatmul.msk.f32.vlgmr.msrb.gmra.mxu2 %vm567_vm2, %v2024_v10  ;;  %3537 = vmatmul.msk.f32.vlgmr.msrb.gmra.mxu3 %vm567_vm2, %v2024_v10 }
 0x746   : > { %v2031_v6 = vpop.permute.xlu0 %2030  ;;  %v2144_v49 = vpop.permute.xlu1 %2143 }
 0x747   : > { %v2034_v5 = vsel %vm553_vm4, %v2031_v6, %v2033_v46  ;;  %v2035_v9 = vsel %vm553_vm4, %v2033_v46, %v2031_v6  ;;  %v2330_v60 = vpop.permute.xlu2 %2329 }
 0x748   : > { %v2036_v11 = vmul.f32 %v2035_v9, %v3982_v42  ;;  %v2037_v47 = vmul.f32 %v2034_v5, %v3984_v43  ;;  %v3568_v9 = vld [vmem:[%s4624_s8 + $0x40] sm:$0xff] }
 0x74a   : > { %3530 = vmatpush.msk.msrb.mxu0 %vm571_vm1, %v2036_v11  ;;  %3532 = vmatpush.msk.msrb.mxu1 %vm571_vm1, %v2037_v47 }
 0x74b   : > { %3531 = vmatmul.msk.f32.vlgmr.msrb.gmra.mxu0 %vm567_vm2, %v3529_v48  ;;  %3533 = vmatmul.msk.f32.vlgmr.msrb.gmra.mxu1 %vm567_vm2, %v3529_v48 }
 0x74e   : > { %v2146_v50 = vpop.permute.xlu0 %2145 }
 0x74f   : > { %v2147_v51 = vsel %vm676_vm3, %v2144_v49, %v2146_v50  ;;  %v2148_v52 = vsel %vm676_vm3, %v2146_v50, %v2144_v49  ;;  %v2398_v19 = vpop.permute.xlu2 %2397 }
 0x750   : > { %v2149_v53 = vmul.f32 %v2148_v52, %v3986_v44  ;;  %v2150_v54 = vmul.f32 %v2147_v51, %v3988_v45 }
 0x752   : > { %3539 = vmatpush.msk.msra.mxu0 %vm571_vm1, %v2149_v53  ;;  %3541 = vmatpush.msk.msra.mxu1 %vm571_vm1, %v2150_v54 }
 0x753   : > { %3540 = vmatmul.msk.f32.vlgmr.msra.gmra.mxu0 %vm567_vm2, %v3538_v55  ;;  %3542 = vmatmul.msk.f32.vlgmr.msra.gmra.mxu1 %vm567_vm2, %v3538_v55 }
 0x754   : > { %3549 = vmatpush.msk.msrb.mxu0 %vm571_vm1, %v2273_v20  ;;  %3551 = vmatpush.msk.msrb.mxu1 %vm571_vm1, %v2274_v22 }
 0x756   : > { %v2210_v56 = vpop.permute.xlu0 %2209 }
 0x75b   : > { %3550 = vmatmul.msk.f32.vlgmr.msrb.gmra.mxu0 %vm567_vm2, %v3548_v59  ;;  %3552 = vmatmul.msk.f32.vlgmr.msrb.gmra.mxu1 %vm567_vm2, %v3548_v59 }
 0x75e   : > { %v2212_v61 = vpop.permute.xlu0 %2211  ;;  %v2332_v62 = vpop.permute.xlu1 %2331 }
 0x75f   : > { %v2213_v63 = vsel %vm750_vm5, %v2210_v56, %v2212_v61  ;;  %v2214_v0 = vsel %vm750_vm5, %v2212_v61, %v2210_v56  ;;  %v2333_v1 = vsel %vm878_vm6, %v2330_v60, %v2332_v62  ;;  %v2334_v2 = vsel %vm878_vm6, %v2332_v62, %v2330_v60  ;;  %v2528_v38 = vpop.permute.xlu2 %2527 }
 0x760   : > { %v2215_v14 = vmul.f32 %v2214_v0, %v4013_v57  ;;  %v2216_v3 = vmul.f32 %v2213_v63, %v4015_v58  ;;  %v2335_v4 = vmul.f32 %v2333_v1, %v4050_v7  ;;  %v2336_v15 = vmul.f32 %v2334_v2, %v4052_v8 }
 0x762   : > { %3544 = vmatpush.msk.msra.mxu2 %vm571_vm1, %v2215_v14  ;;  %3546 = vmatpush.msk.msra.mxu3 %vm571_vm1, %v2216_v3 }
 0x763   : > { %3545 = vmatmul.msk.f32.vlgmr.msra.gmra.mxu2 %vm567_vm2, %v3543_v16  ;;  %3547 = vmatmul.msk.f32.vlgmr.msra.gmra.mxu3 %vm567_vm2, %v3543_v16 }
 0x764   : > { %3554 = vmatpush.msk.msrb.mxu2 %vm571_vm1, %v2335_v4  ;;  %3556 = vmatpush.msk.msrb.mxu3 %vm571_vm1, %v2336_v15 }
 0x766   : > { %v2396_v20 = vpop.permute.xlu0 %2395 }
 0x767   : > { %v2399_v22 = vsel %vm952_vm7, %v2396_v20, %v2398_v19  ;;  %v2400_v13 = vsel %vm952_vm7, %v2398_v19, %v2396_v20 }
 0x768   : > { %v2401_v23 = vmul.f32 %v2399_v22, %v4071_v17  ;;  %v2402_v24 = vmul.f32 %v2400_v13, %v4073_v18 }
 0x76a   : > { %3559 = vmatpush.msk.msra.mxu0 %vm571_vm1, %v2401_v23  ;;  %3561 = vmatpush.msk.msra.mxu1 %vm571_vm1, %v2402_v24 }
 0x76b   : > { %3555 = vmatmul.msk.f32.vlgmr.msrb.gmra.mxu2 %vm567_vm2, %v3553_v29  ;;  %3557 = vmatmul.msk.f32.vlgmr.msrb.gmra.mxu3 %vm567_vm2, %v3553_v29 }
 0x76c   : > { %3560 = vmatmul.msk.f32.vlgmr.msra.gmra.mxu0 %vm567_vm2, %v3558_v32  ;;  %3562 = vmatmul.msk.f32.vlgmr.msra.gmra.mxu1 %vm567_vm2, %v3558_v32 }
 0x76e   : > { %v2464_v33 = vpop.permute.xlu0 %2463  ;;  %v2462_v34 = vpop.permute.xlu1 %2461 }
 0x76f   : > { %v2465_v35 = vsel %vm4688_vm10, %v2462_v34, %v2464_v33  ;;  %v2466_v36 = vsel %vm4689_vm14, %v2464_v33, %v2462_v34 }
 0x770   : > { %v2467_v21 = vmul.f32 %v2465_v35, %v4092_v26  ;;  %v2468_v12 = vmul.f32 %v2466_v36, %v4094_v28 }
 0x772   : > { %3564 = vmatpush.msk.msra.mxu2 %vm571_vm1, %v2467_v21  ;;  %3566 = vmatpush.msk.msra.mxu3 %vm571_vm1, %v2468_v12 }
 0x773   : > { %3565 = vmatmul.msk.f32.vlgmr.msra.gmra.mxu2 %vm567_vm2, %v3563_v37  ;;  %3567 = vmatmul.msk.f32.vlgmr.msra.gmra.mxu3 %vm567_vm2, %v3563_v37 }
 0x776   : > { %v2530_v41 = vpop.permute.xlu1 %2529 }
 0x777   : > { %v2531_v10 = vsel %vm4690_vm15, %v2528_v38, %v2530_v41  ;;  %v2532_v46 = vsel %vm4691_vm11, %v2530_v41, %v2528_v38 }
 0x778   : > { %v2533_v6 = vmul.f32 %v2531_v10, %v4113_v39  ;;  %v2534_v5 = vmul.f32 %v2532_v46, %v4115_v40 }
 0x77a   : > { %3569 = vmatpush.msk.msrb.mxu0 %vm571_vm1, %v2533_v6  ;;  %3571 = vmatpush.msk.msrb.mxu1 %vm571_vm1, %v2534_v5  ;;  %vm4692_vm1 = vcmask 1040384  }
 0x77b   : > { %3570 = vmatmul.msk.f32.vlgmr.msrb.gmra.mxu0 %vm567_vm2, %v3568_v9  ;;  %3572 = vmatmul.msk.f32.vlgmr.msrb.gmra.mxu1 %vm567_vm2, %v3568_v9  ;;  %vm4693_vm2 = vmmov %vm4692_vm1 }
 0x77c   : > { %vm4694_vm12 = vmmov %vm4692_vm1 }
 0x77d   : > { %vm4695_vm13 = vmmov %vm4692_vm1 }
 0x7c6   : > { %v2115_v50 = vpop.f32.mrf.mxu2  ;;  %v2135_v51 = vpop.f32.mrf.mxu3 }
 0x7c8   : > { %v2066_v11 = vpop.f32.mrf.mxu0  ;;  %v2086_v47 = vpop.f32.mrf.mxu1 }
 0x7c9   : > { %v2116_v54 = vadd.f32 %v2115_v50, %v2066_v11  ;;  %v2136_v55 = vadd.f32 %v2135_v51, %v2086_v47 }
 0x7d0   : > { %v2179_v48 = vpop.f32.mrf.mxu0  ;;  %v2199_v49 = vpop.f32.mrf.mxu1 }
 0x7d1   : > { %v2202_v60 = vadd.f32 %v2179_v48, %v2116_v54  ;;  %v2203_v61 = vadd.f32 %v2199_v49, %v2136_v55 }
 0x7d8   : > { %v2299_v52 = vpop.f32.mrf.mxu0  ;;  %v2319_v53 = vpop.f32.mrf.mxu1 }
 0x7e6   : > { %v2245_v56 = vpop.f32.mrf.mxu2  ;;  %v2265_v59 = vpop.f32.mrf.mxu3 }
 0x7e7   : > { %v2268_v62 = vadd.f32 %v2245_v56, %v2202_v60  ;;  %v2269_v63 = vadd.f32 %v2265_v59, %v2203_v61 }
 0x7e9   : > { %v2431_v0 = vpop.f32.mrf.mxu0  ;;  %v2451_v1 = vpop.f32.mrf.mxu1  ;;  %v2322_v3 = vadd.f32 %v2299_v52, %v2268_v62  ;;  %v2323_v4 = vadd.f32 %v2319_v53, %v2269_v63 }
 0x7ee   : > { %v2365_v2 = vpop.f32.mrf.mxu2  ;;  %v2385_v14 = vpop.f32.mrf.mxu3 }
 0x7ef   : > { %v2388_v15 = vadd.f32 %v2365_v2, %v2322_v3  ;;  %v2389_v16 = vadd.f32 %v2385_v14, %v2323_v4 }
 0x7f1   : > { %v2454_v19 = vadd.f32 %v2431_v0, %v2388_v15  ;;  %v2455_v20 = vadd.f32 %v2451_v1, %v2389_v16 }
 0x7f6   : > { %v2497_v22 = vpop.f32.mrf.mxu2  ;;  %v2517_v13 = vpop.f32.mrf.mxu3 }
 0x7f7   : > { %v2520_v23 = vadd.f32 %v2497_v22, %v2454_v19  ;;  %v2521_v24 = vadd.f32 %v2517_v13, %v2455_v20 }
 0x7f8   : > { %v2563_v29 = vpop.f32.mrf.mxu0  ;;  %v2583_v32 = vpop.f32.mrf.mxu1 }
 0x7f9   : > { %v2586_v33 = vadd.f32 %v2563_v29, %v2520_v23  ;;  %v2587_v34 = vadd.f32 %v2583_v32, %v2521_v24  ;;  %v2659_v29 = vld [vmem:[%s4625_s9] sm:$0xff] }
 0x7fa   : > { %2662 = vperm.xlu1 %3680, %v2659_v29   ;;  %v2667_v32 = vld [vmem:[%s4626_s10] sm:$0xff] }
 0x7fb   : > { %v2588_v35 = vrot.slane %v2586_v33, 4  ;;  %v2594_v36 = vrot.slane %v2587_v34, 4 }
 0x7fd   : > { %v2589_v21 = vadd.f32 %v2588_v35, %v2586_v33  ;;  %v2595_v12 = vadd.f32 %v2594_v36, %v2587_v34 }
 0x7ff   : > { %v2590_v37 = vrot.slane %v2589_v21, 2  ;;  %v2596_v38 = vrot.slane %v2595_v12, 2 }
 0x801   : > { %v2591_v41 = vadd.f32 %v2590_v37, %v2589_v21  ;;  %v2597_v10 = vadd.f32 %v2596_v38, %v2595_v12 }
 0x802   : > { %2670 = vperm.xlu1 %3680, %v2667_v32  }
 0x803   : > { %v2592_v46 = vrot.slane %v2591_v41, 1  ;;  %v2598_v6 = vrot.slane %v2597_v10, 1 }
 0x805   : > { %v2593_v5 = vadd.f32 %v2592_v46, %v2591_v41  ;;  %v2599_v9 = vadd.f32 %v2598_v6, %v2597_v10 }
 0x807   : > { %v2600_v11 = vsel %vm4692_vm1, %v2593_v5, 0.0  ;;  %v2601_v47 = vsel %vm4693_vm2, %v2599_v9, 0.0 }
 0x808   : > { %v2602_v48 = vadd.f32 %v2601_v47, %v2600_v11 }
 0x80a   : > { %2603 = vadd.xlane.f32.xlu0 %v2602_v48 }
 0x86c   : > { %v2663_v47 = vpop.permute.xlu1 %2662 }
 0x87d   : > { %v2604_v49 = vpop.xlane.xlu0 %2603 }
 0x87e   : > { %v2605_v50 = vrot.slane %v2604_v49, 4 }
 0x880   : > { %v2606_v51 = vadd.f32 %v2605_v50, %v2604_v49 }
 0x882   : > { %v2607_v52 = vrot.slane %v2606_v51, 2 }
 0x884   : > { %v2608_v53 = vadd.f32 %v2607_v52, %v2606_v51 }
 0x886   : > { %v2609_v54 = vrot.slane %v2608_v53, 1 }
 0x888   : > { %v2610_v55 = vadd.f32 %v2609_v54, %v2608_v53  ;;  %v2671_v53 = vpop.permute.xlu1 %2670 }
 0x88a   : > { %3618 = vpush %v2610_v55 }
 0x8bb   : > { %s3619_s20 = spop %3618 }
 0x8bc   : > { %s2612_s27 = smul.f32 0.00048828125, %s3619_s20 }
 0x8be   : > { %v2613_v56 = vstv %s2612_s27 }
 0x8bf   : > { %v2614_v59 = vsub.f32 %v2586_v33, %v2613_v56  ;;  %v2615_v60 = vsub.f32 %v2587_v34, %v2613_v56 }
 0x8c1   : > { %v2616_v61 = vmul.f32 %v2614_v59, %v2614_v59  ;;  %v2617_v62 = vmul.f32 %v2615_v60, %v2615_v60 }
 0x8c3   : > { %v2618_v63 = vrot.slane %v2616_v61, 4  ;;  %v2624_v0 = vrot.slane %v2617_v62, 4 }
 0x8c5   : > { %v2619_v1 = vadd.f32 %v2618_v63, %v2616_v61  ;;  %v2625_v2 = vadd.f32 %v2624_v0, %v2617_v62 }
 0x8c7   : > { %v2620_v14 = vrot.slane %v2619_v1, 2  ;;  %v2626_v3 = vrot.slane %v2625_v2, 2 }
 0x8c9   : > { %v2621_v4 = vadd.f32 %v2620_v14, %v2619_v1  ;;  %v2627_v15 = vadd.f32 %v2626_v3, %v2625_v2 }
 0x8cb   : > { %v2622_v16 = vrot.slane %v2621_v4, 1  ;;  %v2628_v19 = vrot.slane %v2627_v15, 1 }
 0x8cd   : > { %v2623_v20 = vadd.f32 %v2622_v16, %v2621_v4  ;;  %v2629_v22 = vadd.f32 %v2628_v19, %v2627_v15 }
 0x8cf   : > { %v2630_v13 = vsel %vm4694_vm12, %v2623_v20, 0.0  ;;  %v2631_v23 = vsel %vm4695_vm13, %v2629_v22, 0.0 }
 0x8d0   : > { %v2632_v24 = vadd.f32 %v2631_v23, %v2630_v13 }
 0x8d2   : > { %2633 = vadd.xlane.f32.xlu2 %v2632_v24 }
 0x945   : > { %v2634_v33 = vpop.xlane.xlu2 %2633 }
 0x946   : > { %v2635_v34 = vrot.slane %v2634_v33, 4 }
 0x948   : > { %v2636_v35 = vadd.f32 %v2635_v34, %v2634_v33 }
 0x94a   : > { %v2637_v36 = vrot.slane %v2636_v35, 2 }
 0x94c   : > { %v2638_v21 = vadd.f32 %v2637_v36, %v2636_v35 }
 0x94e   : > { %v2639_v12 = vrot.slane %v2638_v21, 1 }
 0x950   : > { %v2640_v37 = vadd.f32 %v2639_v12, %v2638_v21 }
 0x952   : > { %3620 = vpush %v2640_v37 }
 0x983   : > { %s3621_s5 = spop %3620 }
 0x984   : > { %s2642_s6 = smul.f32 0.00048828125, %s3621_s5 }
 0x986   : > { %s2643_s7 = sadd.f32 1e-05, %s2642_s6 }
 0x988   : > { %v2644_v38 = vstv %s2643_s7 }
 0x989   : > { %3698 = vrsqrt.f32 %v2644_v38  ;;  %vm2651_vm9 = vweird.f32 %v2644_v38 }
 0x98f   : > { %v3699_v41 = vpop.eup %3698 }
 0x990   : > { %v2646_v10 = vmul.f32 %v3699_v41, %v2644_v38  ;;  %vm2652_vm8 = vweird.f32 %v3699_v41 }
 0x991   : > { %vm2653_vm10 = vmor %vm2651_vm9, %vm2652_vm8 }
 0x992   : > { %v2647_v46 = vmul.f32 %v3699_v41, %v2646_v10 }
 0x994   : > { %v2648_v6 = vmul.f32 0.5, %v2647_v46 }
 0x996   : > { %v2649_v5 = vsub.f32 1.5, %v2648_v6 }
 0x998   : > { %v2650_v9 = vmul.f32 %v3699_v41, %v2649_v5 }
 0x99a   : > { %v2654_v11 = vsel %vm2653_vm10, %v3699_v41, %v2650_v9 }
 0x99b   : > { %3622 = vpush %v2654_v11 }
 0x9cc   : > { %s3623_s3 = spop %3622 }
 0x9cd   : > { %v2656_v48 = vstv %s3623_s3 }
 0x9ce   : > { %v2657_v49 = vmul.f32 %v2656_v48, %v2614_v59  ;;  %v2658_v50 = vmul.f32 %v2656_v48, %v2615_v60 }
 0x9d0   : > { %v2665_v51 = vmul.f32 %v2663_v47, %v2657_v49  ;;  %v2666_v52 = vmul.f32 %v2663_v47, %v2658_v50 }
 0x9d2   : > { %v4443_v54 = vadd.f32 %v2671_v53, %v2665_v51  ;;  %v4445_v55 = vadd.f32 %v2671_v53, %v2666_v52 }
 0x9d4   : > { %v4448_v56 = vmul.f32 0.70710677, %v4443_v54  ;;  %v4451_v61 = vmul.f32 0.70710677, %v4445_v55 }
 0x9d6   : > { %v2683_v62 = vand.u32 2147483647, %v4448_v56  ;;  %v2684_v63 = vand.u32 2147483647, %v4451_v61  ;;  %vm2679_vm9 = vcmp.ge.f32.partialorder %v4448_v56, 0.0  ;;  %vm2680_vm10 = vcmp.ge.f32.partialorder %v4451_v61, 0.0 }
 0x9d8   : > { %v2685_v0 = vmul.f32 0.3275911, %v2683_v62  ;;  %v2686_v59 = vmul.f32 0.3275911, %v2684_v63  ;;  %v2737_v12 = vsub.f32 0.0, %v2683_v62  ;;  %v2738_v41 = vsub.f32 0.0, %v2684_v63 }
 0x9da   : > { %v2687_v60 = vadd.f32 1.0, %v2685_v0  ;;  %v2688_v1 = vadd.f32 1.0, %v2686_v59  ;;  %v2739_v5 = vmul.f32 %v2737_v12, %v2683_v62  ;;  %v2740_v11 = vmul.f32 %v2738_v41, %v2684_v63 }
 0x9dc   : > { %3700 = vrcp.f32 %v2687_v60  ;;  %v2700_v16 = vand.u32 2147483648, %v2687_v60  ;;  %v2698_v22 = vand.u32 2147483647, %v2687_v60  ;;  %v2715_v13 = vand.u32 2147483648, %v2688_v1 }
 0x9dd   : > { %3702 = vrcp.f32 %v2688_v1  ;;  %v2713_v24 = vand.u32 2147483647, %v2688_v1  ;;  %vm2694_vm11 = vweird.f32 %v2687_v60  ;;  %vm2709_vm2 = vweird.f32 %v2688_v1 }
 0x9de   : > { %v2701_v32 = vor.u32 1.1754944e-38, %v2700_v16  ;;  %vm2699_vm12 = vcmp.eq.f32.partialorder %v2698_v22, 8.507059e+37  ;;  %v2716_v35 = vor.u32 1.1754944e-38, %v2715_v13  ;;  %v2741_v50 = vmul.f32 1.442695, %v2739_v5  ;;  %v3578_v5 = vld [vmem:[%s4627_s11 + $0x10] sm:$0xff] }
 0x9df   : > { %vm2714_vm8 = vcmp.eq.f32.partialorder %v2713_v24, 8.507059e+37  ;;  %v2743_v52 = vmul.f32 1.442695, %v2740_v11  ;;  %v2682_v13 = vsel %vm2680_vm10, 1.0, %v3783_v25 }
 0x9e0   : > { %3704 = vpow2.f32 %v2741_v50  ;;  %v3584_v50 = vld [vmem:[%s4627_s11 + $0x20] sm:$0xff] }
 0x9e1   : > { %3706 = vpow2.f32 %v2743_v52 }
 0x9e2   : > { %v3701_v2 = vpop.eup %3700 }
 0x9e3   : > { %v3703_v14 = vpop.eup %3702  ;;  %v2690_v3 = vmul.f32 %v3701_v2, %v2687_v60  ;;  %vm2695_vm14 = vweird.f32 %v3701_v2 }
 0x9e4   : > { %v2705_v4 = vmul.f32 %v3703_v14, %v2688_v1  ;;  %vm2710_vm15 = vweird.f32 %v3703_v14  ;;  %vm2696_vm1 = vmor %vm2694_vm11, %vm2695_vm14  ;;  %vm2774_vm14 = vcmask 64512  }
 0x9e5   : > { %v2691_v15 = vsub.f32 1.0, %v2690_v3  ;;  %vm2711_vm13 = vmor %vm2709_vm2, %vm2710_vm15 }
 0x9e6   : > { %v2706_v19 = vsub.f32 1.0, %v2705_v4  ;;  %v3705_v4 = vpop.eup %3704 }
 0x9e7   : > { %v2692_v20 = vmul.f32 %v3701_v2, %v2691_v15  ;;  %v3707_v15 = vpop.eup %3706 }
 0x9e8   : > { %v2707_v23 = vmul.f32 %v3703_v14, %v2706_v19 }
 0x9e9   : > { %v2693_v29 = vadd.f32 %v3701_v2, %v2692_v20  ;;  %v2681_v20 = vsel %vm2679_vm9, 1.0, %v3783_v25 }
 0x9ea   : > { %v2708_v33 = vadd.f32 %v3703_v14, %v2707_v23 }
 0x9eb   : > { %v2697_v34 = vsel %vm2696_vm1, %v3701_v2, %v2693_v29  ;;  %v2675_v29 = vmul.f32 0.5, %v4443_v54 }
 0x9ec   : > { %v2702_v36 = vsel %vm2699_vm12, %v2701_v32, %v2697_v34  ;;  %v2712_v21 = vsel %vm2711_vm13, %v3703_v14, %v2708_v33  ;;  %v2676_v33 = vmul.f32 0.5, %v4445_v55 }
 0x9ed   : > { %v2717_v37 = vsel %vm2714_vm8, %v2716_v35, %v2712_v21  ;;  %v2719_v38 = vmul.f32 1.0614054, %v2702_v36 }
 0x9ee   : > { %v2720_v10 = vmul.f32 1.0614054, %v2717_v37 }
 0x9ef   : > { %v2721_v46 = vadd.f32 -1.4531521, %v2719_v38 }
 0x9f0   : > { %v2722_v6 = vadd.f32 -1.4531521, %v2720_v10 }
 0x9f1   : > { %v2723_v9 = vmul.f32 %v2721_v46, %v2702_v36 }
 0x9f2   : > { %v2724_v47 = vmul.f32 %v2722_v6, %v2717_v37 }
 0x9f3   : > { %v2725_v48 = vadd.f32 1.4214138, %v2723_v9 }
 0x9f4   : > { %v2726_v49 = vadd.f32 1.4214138, %v2724_v47 }
 0x9f5   : > { %v2727_v51 = vmul.f32 %v2725_v48, %v2702_v36  ;;  %v2763_v48 = vld [vmem:[%s4627_s11] sm:$0xff] }
 0x9f6   : > { %v2728_v53 = vmul.f32 %v2726_v49, %v2717_v37 }
 0x9f7   : > { %v2729_v0 = vadd.f32 -0.28449672, %v2727_v51 }
 0x9f8   : > { %v2730_v59 = vadd.f32 -0.28449672, %v2728_v53 }
 0x9f9   : > { %v2731_v60 = vmul.f32 %v2729_v0, %v2702_v36 }
 0x9fa   : > { %v2732_v1 = vmul.f32 %v2730_v59, %v2717_v37  ;;  %v3581_v59 = vld [vmem:[%s4627_s11 + $0x18] sm:$0xff] }
 0x9fb   : > { %v2733_v2 = vadd.f32 0.2548296, %v2731_v60 }
 0x9fc   : > { %v2734_v14 = vadd.f32 0.2548296, %v2732_v1 }
 0x9fd   : > { %v2735_v3 = vmul.f32 %v2733_v2, %v2702_v36 }
 0x9fe   : > { %v2736_v62 = vmul.f32 %v2734_v14, %v2717_v37  ;;  %v3573_v37 = vld [vmem:[%s4627_s11 + $0x8] sm:$0xff] }
 0x9ff   : > { %v2745_v63 = vmul.f32 %v3705_v4, %v2735_v3 }
 0xa00   : > { %v2746_v16 = vmul.f32 %v3707_v15, %v2736_v62 }
 0xa01   : > { %v2747_v19 = vsub.f32 1.0, %v2745_v63 }
 0xa02   : > { %v2748_v22 = vsub.f32 1.0, %v2746_v16  ;;  %v3590_v16 = vld [vmem:[%s4627_s11 + $0x30] sm:$0xff] }
 0xa03   : > { %v2749_v23 = vmul.f32 %v2747_v19, %v2681_v20  ;;  %v3587_v20 = vld [vmem:[%s4627_s11 + $0x28] sm:$0xff] }
 0xa04   : > { %v2750_v24 = vmul.f32 %v2748_v22, %v2682_v13  ;;  %v3596_v22 = vld [vmem:[%s4627_s11 + $0x40] sm:$0xff] }
 0xa05   : > { %v2751_v32 = vadd.f32 1.0, %v2749_v23 }
 0xa06   : > { %v2752_v34 = vadd.f32 1.0, %v2750_v24 }
 0xa07   : > { %v2753_v35 = vmul.f32 %v2751_v32, %v2675_v29  ;;  %v3593_v32 = vld [vmem:[%s4627_s11 + $0x38] sm:$0xff] }
 0xa08   : > { %v2754_v56 = vmul.f32 %v2752_v34, %v2676_v33 }
 0xa09   : > { %2755 = vrot.lane.b32.xlu2 %v2753_v35, %s4674_s16  ;;  %2764 = vrot.lane.b32.xlu1 %v2753_v35, %s4670_s17 }
 0xa0a   : > { %2863 = vrot.lane.b32.xlu0 %v2754_v56, %s4669_s0 }
 0xa11   : > { %3075 = vrot.lane.b32.xlu2 %v2754_v56, %s4672_s25  ;;  %2766 = vrot.lane.b32.xlu1 %v2754_v56, %s4670_s17 }
 0xa12   : > { %2918 = vrot.lane.b32.xlu0 %v2754_v56, %s4671_s23 }
 0xa19   : > { %3183 = vrot.lane.b32.xlu2 %v2753_v35, %s4675_s1  ;;  %2861 = vrot.lane.b32.xlu1 %v2753_v35, %s4669_s0 }
 0xa1a   : > { %3018 = vrot.lane.b32.xlu0 %v2753_v35, %s4673_s26 }
 0xa21   : > { %3130 = vrot.lane.b32.xlu2 %v2754_v56, %s4676_s2  ;;  %2757 = vrot.lane.b32.xlu1 %v2754_v56, %s4674_s16 }
 0xa22   : > { %3185 = vrot.lane.b32.xlu0 %v2754_v56, %s4675_s1 }
 0xa29   : > { %2916 = vrot.lane.b32.xlu1 %v2753_v35, %s4671_s23 }
 0xa31   : > { %3073 = vrot.lane.b32.xlu1 %v2753_v35, %s4672_s25 }
 0xa39   : > { %3020 = vrot.lane.b32.xlu1 %v2754_v56, %s4673_s26  ;;  %s3430_s26 = sshll.u32 %s3914_s30, 3  ;;  %s498_s30 = sand.u32 1, %s3764_s19  }
 0xa3a   : > { %s509_s20 = scalar_lea.vmem %s4630_s14, %s3430_s26  ;;  %s3427_s5 = sshll.u32 %s498_s30, 4 }
 0xa3b   : > { %s500_s23 = scalar_lea.vmem [#allocation2], %s3427_s5 }
 0xa3c   : > { %s3349_s25 = sshll.u32 %s500_s23, 4  ;;  %s3350_s25 = int_to_ptr.vmem [resolvable:$true] %s3349_s25 }
 0xa41   : > { %3128 = vrot.lane.b32.xlu1 %v2753_v35, %s4676_s2 }
 0xa63   : > { %v2756_v6 = vpop.permute.xlu2 %2755 }
 0xa6b   : > { %v3076_v51 = vpop.permute.xlu2 %3075 }
 0xa73   : > { %v3184_v1 = vpop.permute.xlu2 %3183 }
 0xa7b   : > { %v2765_v25 = vpop.permute.xlu1 %2764 }
 0xa7c   : > { %v2864_v54 = vpop.permute.xlu0 %2863 }
 0xa83   : > { %v2767_v55 = vpop.permute.xlu1 %2766 }
 0xa84   : > { %v2768_v61 = vsel %vm553_vm4, %v2765_v25, %v2767_v55  ;;  %v2769_v36 = vsel %vm553_vm4, %v2767_v55, %v2765_v25  ;;  %v2919_v41 = vpop.permute.xlu0 %2918  ;;  %vm4698_vm4 = vcmp.lt.s32.totalorder %v3951_v27, 112 }
 0xa85   : > { %v2770_v21 = vmul.f32 %v2769_v36, %v3982_v42  ;;  %v2771_v12 = vmul.f32 %v2768_v61, %v3984_v43 }
 0xa87   : > { %2793 = vmatpush.msrb.mxu2 %v2770_v21  ;;  %2813 = vmatpush.msrb.mxu3 %v2771_v12 }
 0xa88   : > { %3574 = vmatmul.msk.f32.vlgmr.msrb.gmra.mxu2 %vm2774_vm14, %v3573_v37  ;;  %3575 = vmatmul.msk.f32.vlgmr.msrb.gmra.mxu3 %vm2774_vm14, %v3573_v37 }
 0xa8b   : > { %v2862_v38 = vpop.permute.xlu1 %2861 }
 0xa8c   : > { %v2865_v10 = vsel %vm676_vm3, %v2862_v38, %v2864_v54  ;;  %v2866_v42 = vsel %vm676_vm3, %v2864_v54, %v2862_v38  ;;  %v3019_v49 = vpop.permute.xlu0 %3018 }
 0xa8d   : > { %v2867_v43 = vmul.f32 %v2866_v42, %v3986_v44  ;;  %v2868_v46 = vmul.f32 %v2865_v10, %v3988_v45 }
 0xa8f   : > { %2889 = vmatpush.msra.mxu2 %v2867_v43  ;;  %2909 = vmatpush.msra.mxu3 %v2868_v46 }
 0xa90   : > { %3579 = vmatmul.msk.f32.vlgmr.msra.gmra.mxu2 %vm2774_vm14, %v3578_v5  ;;  %3580 = vmatmul.msk.f32.vlgmr.msra.gmra.mxu3 %vm2774_vm14, %v3578_v5 }
 0xa91   : > { %2991 = vmatpush.msrb.mxu2 %v2753_v35  ;;  %3011 = vmatpush.msrb.mxu3 %v2754_v56 }
 0xa93   : > { %v2758_v9 = vpop.permute.xlu1 %2757 }
 0xa94   : > { %v2759_v11 = vsel %vm532_vm0, %v2756_v6, %v2758_v9  ;;  %v2760_v44 = vsel %vm532_vm0, %v2758_v9, %v2756_v6  ;;  %v3186_v60 = vpop.permute.xlu0 %3185  ;;  %vm4696_vm0 = vcmp.lt.s32.totalorder %v3951_v27, 111 }
 0xa95   : > { %v2761_v45 = vmul.f32 %v2760_v44, %v3957_v30  ;;  %v2762_v47 = vmul.f32 %v2759_v11, %v3959_v31  ;;  %v3187_v2 = vsel %vm4696_vm0, %v3184_v1, %v3186_v60  ;;  %vm4697_vm3 = vmmov %vm4696_vm0 }
 0xa96   : > { %v3189_v15 = vmul.f32 %v3187_v2, %v4113_v39 }
 0xa97   : > { %2836 = vmatpush.msra.mxu0 %v2761_v45  ;;  %2856 = vmatpush.msra.mxu1 %v2762_v47 }
 0xa98   : > { %3576 = vmatmul.msk.f32.vlgmr.msra.gmra.mxu0 %vm2774_vm14, %v2763_v48  ;;  %3577 = vmatmul.msk.f32.vlgmr.msra.gmra.mxu1 %vm2774_vm14, %v2763_v48 }
 0xa99   : > { %3585 = vmatmul.msk.f32.vlgmr.msrb.gmra.mxu2 %vm2774_vm14, %v3584_v50  ;;  %3586 = vmatmul.msk.f32.vlgmr.msrb.gmra.mxu3 %vm2774_vm14, %v3584_v50 }
 0xa9b   : > { %v2917_v30 = vpop.permute.xlu1 %2916 }
 0xa9c   : > { %v2920_v31 = vsel %vm750_vm5, %v2917_v30, %v2919_v41  ;;  %v2921_v52 = vsel %vm750_vm5, %v2919_v41, %v2917_v30  ;;  %vm4699_vm5 = vmmov %vm4698_vm4 }
 0xa9d   : > { %v2922_v53 = vmul.f32 %v2921_v52, %v4013_v57  ;;  %v2923_v0 = vmul.f32 %v2920_v31, %v4015_v58  ;;  %v3188_v57 = vsel %vm4697_vm3, %v3186_v60, %v3184_v1 }
 0xa9e   : > { %v3190_v63 = vmul.f32 %v3188_v57, %v4115_v40 }
 0xa9f   : > { %2944 = vmatpush.msrb.mxu0 %v2922_v53  ;;  %2964 = vmatpush.msrb.mxu1 %v2923_v0 }
 0xaa0   : > { %3582 = vmatmul.msk.f32.vlgmr.msrb.gmra.mxu0 %vm2774_vm14, %v3581_v59  ;;  %3583 = vmatmul.msk.f32.vlgmr.msrb.gmra.mxu1 %vm2774_vm14, %v3581_v59 }
 0xaa3   : > { %v3074_v14 = vpop.permute.xlu1 %3073 }
 0xaa4   : > { %v3077_v58 = vsel %vm952_vm7, %v3074_v14, %v3076_v51  ;;  %v3078_v3 = vsel %vm952_vm7, %v3076_v51, %v3074_v14 }
 0xaa5   : > { %v3079_v4 = vmul.f32 %v3077_v58, %v4071_v17  ;;  %v3080_v62 = vmul.f32 %v3078_v3, %v4073_v18 }
 0xaa7   : > { %3101 = vmatpush.msra.mxu2 %v3079_v4  ;;  %3121 = vmatpush.msra.mxu3 %v3080_v62 }
 0xaa8   : > { %3591 = vmatmul.msk.f32.vlgmr.msra.gmra.mxu2 %vm2774_vm14, %v3590_v16  ;;  %3592 = vmatmul.msk.f32.vlgmr.msra.gmra.mxu3 %vm2774_vm14, %v3590_v16 }
 0xaa9   : > { %3211 = vmatpush.msrb.mxu2 %v3189_v15  ;;  %3231 = vmatpush.msrb.mxu3 %v3190_v63 }
 0xaab   : > { %v3021_v19 = vpop.permute.xlu1 %3020 }
 0xaac   : > { %v3022_v17 = vsel %vm878_vm6, %v3019_v49, %v3021_v19  ;;  %v3023_v18 = vsel %vm878_vm6, %v3021_v19, %v3019_v49  ;;  %vm4700_vm6 = vcmask 1040384  }
 0xaad   : > { %v3024_v39 = vmul.f32 %v3022_v17, %v4050_v7  ;;  %v3025_v40 = vmul.f32 %v3023_v18, %v4052_v8  ;;  %v3131_v7 = vpop.permute.xlu2 %3130  ;;  %vm4701_vm7 = vmmov %vm4700_vm6 }
 0xaae   : > { %vm4702_vm15 = vmmov %vm4700_vm6 }
 0xaaf   : > { %3046 = vmatpush.msra.mxu0 %v3024_v39  ;;  %3066 = vmatpush.msra.mxu1 %v3025_v40  ;;  %vm4703_vm11 = vmmov %vm4700_vm6 }
 0xab0   : > { %3588 = vmatmul.msk.f32.vlgmr.msra.gmra.mxu0 %vm2774_vm14, %v3587_v20  ;;  %3589 = vmatmul.msk.f32.vlgmr.msra.gmra.mxu1 %vm2774_vm14, %v3587_v20 }
 0xab1   : > { %3597 = vmatmul.msk.f32.vlgmr.msrb.gmra.mxu2 %vm2774_vm14, %v3596_v22  ;;  %3598 = vmatmul.msk.f32.vlgmr.msrb.gmra.mxu3 %vm2774_vm14, %v3596_v22 }
 0xab3   : > { %v3129_v8 = vpop.permute.xlu1 %3128 }
 0xab4   : > { %v3132_v13 = vsel %vm4698_vm4, %v3129_v8, %v3131_v7  ;;  %v3133_v23 = vsel %vm4699_vm5, %v3131_v7, %v3129_v8 }
 0xab5   : > { %v3134_v24 = vmul.f32 %v3132_v13, %v4092_v26  ;;  %v3135_v29 = vmul.f32 %v3133_v23, %v4094_v28 }
 0xab7   : > { %3156 = vmatpush.msrb.mxu0 %v3134_v24  ;;  %3176 = vmatpush.msrb.mxu1 %v3135_v29 }
 0xab8   : > { %3594 = vmatmul.msk.f32.vlgmr.msrb.gmra.mxu0 %vm2774_vm14, %v3593_v32  ;;  %3595 = vmatmul.msk.f32.vlgmr.msrb.gmra.mxu1 %vm2774_vm14, %v3593_v32 }
 0xb0b   : > { %v2795_v33 = vpop.f32.mrf.mxu2  ;;  %v2815_v34 = vpop.f32.mrf.mxu3 }
 0xb13   : > { %v2891_v35 = vpop.f32.mrf.mxu2  ;;  %v2911_v56 = vpop.f32.mrf.mxu3 }
 0xb15   : > { %v2838_v27 = vpop.f32.mrf.mxu0  ;;  %v2858_v25 = vpop.f32.mrf.mxu1 }
 0xb16   : > { %v2839_v54 = vadd.f32 %v2838_v27, %v2795_v33  ;;  %v2859_v26 = vadd.f32 %v2858_v25, %v2815_v34 }
 0xb18   : > { %v2914_v21 = vadd.f32 %v2891_v35, %v2839_v54  ;;  %v2915_v12 = vadd.f32 %v2911_v56, %v2859_v26 }
 0xb1c   : > { %v2993_v55 = vpop.f32.mrf.mxu2  ;;  %v3013_v28 = vpop.f32.mrf.mxu3 }
 0xb1d   : > { %v2946_v61 = vpop.f32.mrf.mxu0  ;;  %v2966_v36 = vpop.f32.mrf.mxu1 }
 0xb1e   : > { %v2969_v37 = vadd.f32 %v2946_v61, %v2914_v21  ;;  %v2970_v38 = vadd.f32 %v2966_v36, %v2915_v12  ;;  %v3309_v21 = vld [vmem:[%s4628_s12] sm:$0xff] }
 0xb1f   : > { %3312 = vperm.xlu2 %3681, %v3309_v21   ;;  %v3317_v12 = vld [vmem:[%s4629_s13] sm:$0xff] }
 0xb20   : > { %v3016_v46 = vadd.f32 %v2993_v55, %v2969_v37  ;;  %v3017_v6 = vadd.f32 %v3013_v28, %v2970_v38  ;;  %v3325_v37 = vld [vmem:[%s509_s20] sm:$0xff] }
 0xb27   : > { %3320 = vperm.xlu2 %3681, %v3317_v12  }
 0xb2b   : > { %v3103_v41 = vpop.f32.mrf.mxu2  ;;  %v3123_v10 = vpop.f32.mrf.mxu3 }
 0xb2d   : > { %v3048_v42 = vpop.f32.mrf.mxu0  ;;  %v3068_v43 = vpop.f32.mrf.mxu1 }
 0xb2e   : > { %v3071_v5 = vadd.f32 %v3048_v42, %v3016_v46  ;;  %v3072_v9 = vadd.f32 %v3068_v43, %v3017_v6 }
 0xb2f   : > { %3328 = vperm.xlu2 %3681, %v3325_v37  }
 0xb30   : > { %v3126_v11 = vadd.f32 %v3103_v41, %v3071_v5  ;;  %v3127_v44 = vadd.f32 %v3123_v10, %v3072_v9 }
 0xb34   : > { %v3213_v45 = vpop.f32.mrf.mxu2  ;;  %v3233_v47 = vpop.f32.mrf.mxu3 }
 0xb35   : > { %v3158_v48 = vpop.f32.mrf.mxu0  ;;  %v3178_v49 = vpop.f32.mrf.mxu1 }
 0xb36   : > { %v3181_v50 = vadd.f32 %v3158_v48, %v3126_v11  ;;  %v3182_v51 = vadd.f32 %v3178_v49, %v3127_v44 }
 0xb38   : > { %v3236_v30 = vadd.f32 %v3213_v45, %v3181_v50  ;;  %v3237_v31 = vadd.f32 %v3233_v47, %v3182_v51 }
 0xb3a   : > { %v3238_v52 = vrot.slane %v3236_v30, 4  ;;  %v3244_v53 = vrot.slane %v3237_v31, 4 }
 0xb3c   : > { %v3239_v0 = vadd.f32 %v3238_v52, %v3236_v30  ;;  %v3245_v59 = vadd.f32 %v3244_v53, %v3237_v31 }
 0xb3e   : > { %v3240_v60 = vrot.slane %v3239_v0, 2  ;;  %v3246_v1 = vrot.slane %v3245_v59, 2 }
 0xb40   : > { %v3241_v2 = vadd.f32 %v3240_v60, %v3239_v0  ;;  %v3247_v57 = vadd.f32 %v3246_v1, %v3245_v59 }
 0xb42   : > { %v3242_v14 = vrot.slane %v3241_v2, 1  ;;  %v3248_v58 = vrot.slane %v3247_v57, 1 }
 0xb44   : > { %v3243_v3 = vadd.f32 %v3242_v14, %v3241_v2  ;;  %v3249_v4 = vadd.f32 %v3248_v58, %v3247_v57 }
 0xb46   : > { %v3250_v62 = vsel %vm4700_vm6, %v3243_v3, 0.0  ;;  %v3251_v15 = vsel %vm4701_vm7, %v3249_v4, 0.0 }
 0xb47   : > { %v3252_v63 = vadd.f32 %v3251_v15, %v3250_v62 }
 0xb49   : > { %3253 = vadd.xlane.f32.xlu0 %v3252_v63 }
 0xb79   : > { %v3313_v50 = vpop.permute.xlu2 %3312 }
 0xb81   : > { %v3321_v51 = vpop.permute.xlu2 %3320 }
 0xb89   : > { %v3329_v1 = vpop.permute.xlu2 %3328 }
 0xbbc   : > { %v3254_v16 = vpop.xlane.xlu0 %3253 }
 0xbbd   : > { %v3255_v19 = vrot.slane %v3254_v16, 4 }
 0xbbf   : > { %v3256_v17 = vadd.f32 %v3255_v19, %v3254_v16 }
 0xbc1   : > { %v3257_v18 = vrot.slane %v3256_v17, 2 }
 0xbc3   : > { %v3258_v39 = vadd.f32 %v3257_v18, %v3256_v17 }
 0xbc5   : > { %v3259_v40 = vrot.slane %v3258_v39, 1 }
 0xbc7   : > { %v3260_v20 = vadd.f32 %v3259_v40, %v3258_v39 }
 0xbc9   : > { %3624 = vpush %v3260_v20 }
 0xbfa   : > { %s3625_s6 = spop %3624 }
 0xbfb   : > { %s3262_s7 = smul.f32 0.00048828125, %s3625_s6  ;;  %s3605_s6 = sshll.u32 %s3885_s22, 4 }
 0xbfc   : > { %s3347_s17 = scalar_lea.hbm %s4631_s15, %s3605_s6  ;;  %s3336_s22 = scalar_lea.sflag [#allocation3], %s498_s30 }
 0xbfd   : > { %v3263_v22 = vstv %s3262_s7  ;;  %s3351_s26 = sshll.u32 %s3347_s17, 4  ;;  %s3352_s26 = int_to_ptr.hbm [resolvable:$true] %s3351_s26 }
 0xbfe   : > { %v3264_v7 = vsub.f32 %v3236_v30, %v3263_v22  ;;  %v3265_v8 = vsub.f32 %v3237_v31, %v3263_v22  ;;  %s3724_s16 = sshra.s32 %s3352_s26, 4  ;;  %s3725_s16 = int_to_ptr.hbm [resolvable:$true] %s3724_s16 }
 0xbff   : > { %s3726_s4 = scalar_lea.hbm %s3725_s16, 16  ;;  %p3731_p0 = scmp.lt.s32.totalorder %s3725_s16, %s4631_s15 }
 0xc00   : > { %v3266_v13 = vmul.f32 %v3264_v7, %v3264_v7  ;;  %v3267_v23 = vmul.f32 %v3265_v8, %v3265_v8  ;;  %p3727_p11 = scmp.ne.s32.totalorder %s3725_s16, %s3726_s4 }
 0xc02   : > { %v3268_v24 = vrot.slane %v3266_v13, 4  ;;  %v3274_v29 = vrot.slane %v3267_v23, 4  ;;  %p3728_p12 = pnand %p3727_p11, %p3902_p5 }
 0xc04   : > { %v3269_v32 = vadd.f32 %v3268_v24, %v3266_v13  ;;  %v3275_v33 = vadd.f32 %v3274_v29, %v3267_v23  ;;  %p3729_p13 = pneg %p3728_p12 }
 0xc06   : > { %v3270_v34 = vrot.slane %v3269_v32, 2  ;;  %v3276_v35 = vrot.slane %v3275_v33, 2 }
 0xc08   : > { %v3271_v56 = vadd.f32 %v3270_v34, %v3269_v32  ;;  %v3277_v27 = vadd.f32 %v3276_v35, %v3275_v33 }
 0xc0a   : > { %v3272_v25 = vrot.slane %v3271_v56, 1  ;;  %v3278_v54 = vrot.slane %v3277_v27, 1 }
 0xc0c   : > { %v3273_v26 = vadd.f32 %v3272_v25, %v3271_v56  ;;  %v3279_v55 = vadd.f32 %v3278_v54, %v3277_v27 }
 0xc0e   : > { %v3280_v28 = vsel %vm4702_vm15, %v3273_v26, 0.0  ;;  %v3281_v61 = vsel %vm4703_vm11, %v3279_v55, 0.0 }
 0xc0f   : > { %v3282_v36 = vadd.f32 %v3281_v61, %v3280_v28 }
 0xc11   : > { %3283 = vadd.xlane.f32.xlu1 %v3282_v36 }
 0xc84   : > { %v3284_v38 = vpop.xlane.xlu1 %3283 }
 0xc85   : > { %v3285_v41 = vrot.slane %v3284_v38, 4 }
 0xc87   : > { %v3286_v10 = vadd.f32 %v3285_v41, %v3284_v38 }
 0xc89   : > { %v3287_v42 = vrot.slane %v3286_v10, 2 }
 0xc8b   : > { %v3288_v43 = vadd.f32 %v3287_v42, %v3286_v10 }
 0xc8d   : > { %v3289_v46 = vrot.slane %v3288_v43, 1 }
 0xc8f   : > { %v3290_v6 = vadd.f32 %v3289_v46, %v3288_v43 }
 0xc91   : > { %3626 = vpush %v3290_v6 }
 0xcc2   : > { %s3627_s27 = spop %3626 }
 0xcc3   : > { %s3292_s3 = smul.f32 0.00048828125, %s3627_s27 }
 0xcc5   : > { %s3293_s1 = sadd.f32 1e-05, %s3292_s3  ;;  %s3730_s3 = scalar_lea.hbm %s4631_s15, 32 }
 0xcc6   : > { %p3732_p1 = scmp.lt.s32.totalorder %s3730_s3, %s3726_s4 }
 0xcc7   : > { %v3294_v5 = vstv %s3293_s1 }
 0xcc8   : > { %3708 = vrsqrt.f32 %v3294_v5  ;;  %vm3301_vm2 = vweird.f32 %v3294_v5  ;;  %p3733_p2 = por %p3732_p1, %p3731_p0 }
 0xcca   : > { %p3734_p3 = pnand %p3733_p2, %p3729_p13 }
 0xcce   : > { %v3709_v9 = vpop.eup %3708 }
 0xccf   : > { %v3296_v11 = vmul.f32 %v3709_v9, %v3294_v5  ;;  %vm3302_vm1 = vweird.f32 %v3709_v9 }
 0xcd0   : > { %vm3303_vm12 = vmor %vm3301_vm2, %vm3302_vm1 }
 0xcd1   : > { %v3297_v44 = vmul.f32 %v3709_v9, %v3296_v11 }
 0xcd3   : > { %v3298_v45 = vmul.f32 0.5, %v3297_v44 }
 0xcd5   : > { %v3299_v47 = vsub.f32 1.5, %v3298_v45 }
 0xcd7   : > { %v3300_v48 = vmul.f32 %v3709_v9, %v3299_v47 }
 0xcd9   : > { %v3304_v49 = vsel %vm3303_vm12, %v3709_v9, %v3300_v48 }
 0xcda   : > { %3628 = vpush %v3304_v49 }
 0xd0b   : > { %s3629_s2 = spop %3628 }
 0xd0c   : > { %v3306_v30 = vstv %s3629_s2 }
 0xd0d   : > { %v3307_v31 = vmul.f32 %v3306_v30, %v3264_v7  ;;  %v3308_v52 = vmul.f32 %v3306_v30, %v3265_v8 }
 0xd0f   : > { %v3315_v53 = vmul.f32 %v3313_v50, %v3307_v31  ;;  %v3316_v0 = vmul.f32 %v3313_v50, %v3308_v52 }
 0xd11   : > { %v3323_v59 = vadd.f32 %v3321_v51, %v3315_v53  ;;  %v3324_v60 = vadd.f32 %v3321_v51, %v3316_v0 }
 0xd13   : > { %v3331_v2 = vadd.f32 %v3329_v1, %v3323_v59  ;;  %v3332_v57 = vadd.f32 %v3329_v1, %v3324_v60 }
 0xd15   : > { %3333 = vst [vmem:[%s500_s23] sm:$0xff] %v3331_v2 }
 0xd16   : > { %3334 = vst [vmem:[%s500_s23 + $0x8] sm:$0xff] %v3332_v57 }
 0xd17   : > { %3737 = shalt.err (!%p3734_p3)
}
 0xd18   : > { %3630 = dma.vmem_to_hbm [thread:$0]  (%p3902_p5), %s3350_s25, 256, %s3352_s26, %s3336_s22  }
 0xd19 PF: > { %p3636_p4 = scmp.ge.s32.totalorder %s3772_s21, 2  ;;  %s3363_s30 = sand.u32 1, %s3760_s18  }
 0xd1a   : > { %s3364_s2 = scalar_lea.sflag [#allocation3], %s3363_s30 }
 0xd1b   : > { %p3633_p7 = pnand %p3636_p4, %p3906_p6 }
 0xd1d   : > { %p3634_p8 = pneg %p3633_p7 }
 0xd1f   : > { %3755 = dma.done.wait (%p3634_p8), %s3364_s2, 256  }
 0xd20   : > { %3757 = vsyncadd (%p3634_p8), %s3364_s2, 4294967040  ;;  %s4704_s6 = sld [smem:[#allocation5_spill]]  ;;  %p25_p9 = scmp.ge.s32.totalorder %s3889_s24, 4  }
 0xd21   : > { %s4705_s20 = sld [smem:[#allocation6_spill]]  ;;  %s4706_s18 = smov %s3764_s19 }
 0xd22   : > { %s4708_s21 = smov %s3889_s24  ;;  %27 = sbr.rel (!%p25_p9) target bundleno = 12 (0xc), region = 160 }
 0xd26   : > { %s4707_s19 = smov %s4704_s6 }
 0xd27   :  { %3370 = vsyncpa [#allocation3], 1 }
 0xd28   :  { %3372 = vsyncpa [#allocation3 + $0x1], 1 }

// kernel: tpu_custom_call.1
= control target key start
LH: loop header
LB: loop body
LE: loop exit
PB: predicated region body
PF: predicated region fallthrough
CT: control target
= control target key end

     0   :  { %s4616_s0 = inlined_call_operand.vmem [shape: f32[2,4,4,256], index: 0, kind: input, shape index: {}]   ;;  %s4617_s1 = inlined_call_operand.vmem [shape: f32[9,1,256], index: 1, kind: input, shape index: {}]   ;;  %s4618_s2 = inlined_call_operand.vmem [shape: f32[9,4,4], index: 2, kind: input, shape index: {}]   ;;  %s4619_s3 = inlined_call_operand.vmem [shape: f32[4,1], index: 3, kind: input, shape index: {}]   ;;  %s4620_s4 = inlined_call_operand.vmem [shape: f32[4,1], index: 4, kind: input, shape index: {}]   ;;  %s4621_s5 = inlined_call_operand.vmem [shape: f32[9,4,4], index: 5, kind: input, shape index: {}]   ;;  %s4622_s6 = inlined_call_operand.vmem [shape: f32[4,1], index: 6, kind: input, shape index: {}]   ;;  %s4623_s7 = inlined_call_operand.vmem [shape: f32[4,1], index: 7, kind: input, shape index: {}]   ;;  %s4624_s8 = inlined_call_operand.vmem [shape: f32[9,8,4], index: 8, kind: input, shape index: {}]   ;;  %s4625_s9 = inlined_call_operand.vmem [shape: f32[8,1], index: 9, kind: input, shape index: {}]   ;;  %s4626_s10 = inlined_call_operand.vmem [shape: f32[8,1], index: 10, kind: input, shape index: {}]   ;;  %s4627_s11 = inlined_call_operand.vmem [shape: f32[9,8,8], index: 11, kind: input, shape index: {}]   ;;  %s4628_s12 = inlined_call_operand.vmem [shape: f32[8,1], index: 12, kind: input, shape index: {}]   ;;  %s4629_s13 = inlined_call_operand.vmem [shape: f32[8,1], index: 13, kind: input, shape index: {}]   ;;  %s4630_s14 = inlined_call_operand.vmem [shape: f32[2,8,1], index: 14, kind: input, shape index: {}]   ;;  %s4631_s15 = inlined_call_operand.hbm [shape: f32[2,8,256], index: 15, kind: output, shape index: {}]  }
   0x1   :  { %4652 = sst [smem:[#allocation7_spill]] %s4616_s0 }
   0x2   :  { %4653 = sst [smem:[#allocation8_spill]] %s4617_s1 }
   0x3   :  { %4654 = sst [smem:[#allocation9_spill]] %s4618_s2 }
   0x4   :  { %4655 = sst [smem:[#allocation10_spill]] %s4619_s3 }
   0x5   :  { %4656 = sst [smem:[#allocation11_spill]] %s4620_s4 }
   0x6   :  { %4657 = sst [smem:[#allocation12_spill]] %s4621_s5 }
   0x7   :  { %4658 = sst [smem:[#allocation13_spill]] %s4622_s6 }
   0x8   :  { %4659 = sst [smem:[#allocation14_spill]] %s4623_s7 }
   0x9   :  { %20 = vsyncpa [#allocation3], 0 }
   0xa   :  { %22 = vsyncpa [#allocation3 + $0x1], 0  ;;  %s3864_s18 = smov 0   ;;  %s3866_s19 = smov 0  }
   0xb   :  { %s3868_s20 = smov 0   ;;  %s3870_s21 = smov 0  }
   0xc LB: > { %4660 = sst [smem:[#allocation5_spill]] %s3768_s20  ;;  %s3885_s22 = sadd.s32 4294967295, %s3772_s21   ;;  %s3772_s21 = sphi %s3870_s21, %s4708_s21   ;;  %s3768_s20 = sphi %s3868_s20, %s4705_s20   ;;  %s3764_s19 = sphi %s3866_s19, %s4707_s19   ;;  %s3760_s18 = sphi %s3864_s18, %s4706_s18  }
   0xd   : > { %s3423_s23 = sadd.s32 4294967294, %s3772_s21   ;;  %s3889_s24 = sadd.s32 1, %s3772_s21  }
   0xe   : > { %s360_s25 = sadd.s32 1, %s3768_s20  ;;  %s357_s26 = ssub.s32 %s3772_s21, %s3889_s24 }
   0xf   : > { %p370_p0 = scmp.ne.s32.totalorder %s3768_s20, %s3764_s19  ;;  %p358_p1 = scmp.eq.s32.totalorder %s357_s26, 0 }
  0x10   : > { %p371_p2 = scmp.eq.s32.totalorder %s3885_s22, 1  ;;  %p376_p3 = scmp.ne.s32.totalorder %s3764_s19, %s3760_s18 }
  0x11   : > { %p377_p4 = scmp.eq.s32.totalorder %s3423_s23, 1  ;;  %p3426_p7 = scmp.ge.s32.totalorder %s3772_s21, 1 }
  0x12   : > { %s3900_s27 = scalar_select %p358_p1, %s3768_s20, %s360_s25  }
  0x13   : > { %p3902_p5 = por %p371_p2, %p370_p0  ;;  %p3906_p6 = por %p377_p4, %p376_p3 }
  0x14   : > { %4661 = sst [smem:[#allocation6_spill]] %s3900_s27  ;;  %p449_p8 = scmp.lt.s32.totalorder %s3772_s21, 3 }
  0x16   : > { %p450_p9 = pnand %p3426_p7, %p449_p8 }
  0x17   : > { %p501_p10 = scmp.lt.s32.totalorder (!%p450_p9), %s3885_s22, 1  ;;  %s4664_s0 = sld [smem:[#allocation7_spill]] (!%p450_p9) }
  0x18   : > { %453 = sbr.rel (%p450_p9) target bundleno = 3353 (0xd19), region = 80  ;;  %s4632_s26 = smov (!%p450_p9), 17  }
  0x19   : > { %s4646_s17 = smov (!%p450_p9), 15   ;;  %s4634_s23 = smov (!%p450_p9), 1  }
  0x1a   : > { %s4665_s1 = sld [smem:[#allocation8_spill]] (!%p450_p9) }
  0x1b   : > { %s4666_s2 = sld [smem:[#allocation9_spill]] (!%p450_p9) }
  0x1c   : > { %s4667_s3 = sld [smem:[#allocation10_spill]] (!%p450_p9) }
  0x1d   : > { %s3914_s30 = scalar_select %p501_p10, %s3885_s22, 1  ;;  %v530_v25 = vlaneseq  ;;  %vm571_vm1 = vcmask 1043456   ;;  %vm567_vm2 = vcmask 31744   ;;  %vm4648_vm10 = vcmask 1040384  }
  0x1e   : > { %s4668_s4 = sld [smem:[#allocation11_spill]] }
  0x1f   : > { %s3604_s16 = sshll.u32 %s3914_s30, 5  ;;  %v3951_v27 = vand.u32 127, %v530_v25  ;;  %s4677_s6 = sld [smem:[#allocation13_spill]] }
  0x20   : > { %s505_s25 = scalar_lea.vmem %s4664_s0, %s3604_s16  ;;  %s4640_s16 = smov 16   ;;  %v535_v29 = vld [vmem:[%s4665_s1] sm:$0x3]  ;;  %v3434_v39 = vld [vmem:[%s4665_s1 + $0x2] sm:$0x3] }
  0x21   : > { %v510_v0 = vld [vmem:[%s505_s25] sm:$0xff]  ;;  %v3431_v1 = vld [vmem:[%s505_s25 + $0x8] sm:$0xff]  ;;  %v3432_v2 = vld [vmem:[%s505_s25 + $0x10] sm:$0xff]  ;;  %vm532_vm0 = vcmp.lt.s32.totalorder %v3951_v27, 17  ;;  %v3957_v30 = vperm.slane %v535_v29, 0  ;;  %v3959_v31 = vperm.slane %v535_v29, 1 }
  0x22   : > { %v513_v3 = vmax.f32 %v510_v0, %v3431_v1  ;;  %v3433_v4 = vld [vmem:[%s505_s25 + $0x18] sm:$0xff]  ;;  %s4636_s25 = smov 127   ;;  %v543_v38 = vld [vmem:[%s4666_s2] sm:$0xf]  ;;  %v3444_v40 = vld [vmem:[%s4665_s1 + $0x4] sm:$0x3] }
  0x23   : > { %v518_v5 = vmax.f32 %v3432_v2, %v3433_v4  ;;  %vm676_vm3 = vcmp.lt.s32.totalorder %v3951_v27, 15  ;;  %vm553_vm4 = vcmp.lt.s32.totalorder %v3951_v27, 16  ;;  %v3982_v42 = vperm.slane %v3434_v39, 0  ;;  %v3435_v53 = vld [vmem:[%s4666_s2 + $0x4] sm:$0xf]  ;;  %s4669_s0 = smov 15  }
  0x24   : > { %v3984_v43 = vperm.slane %v3434_v39, 1  ;;  %v3986_v44 = vperm.slane %v3444_v40, 0  ;;  %v3988_v45 = vperm.slane %v3444_v40, 1  ;;  %v3450_v56 = vld [vmem:[%s4665_s1 + $0x6] sm:$0x3]  ;;  %vm750_vm5 = vcmp.lt.s32.totalorder %v3951_v27, 1 }
  0x25   : > { %v3920_v6 = vmax.f32 %v513_v3, %v518_v5  ;;  %v4013_v57 = vperm.slane %v3450_v56, 0  ;;  %v4015_v58 = vperm.slane %v3450_v56, 1  ;;  %v3445_v1 = vld [vmem:[%s4666_s2 + $0x8] sm:$0xf]  ;;  %v3451_v2 = vld [vmem:[%s4666_s2 + $0xc] sm:$0xf] }
  0x26   : > { %v3456_v3 = vld [vmem:[%s4666_s2 + $0x10] sm:$0xf]  ;;  %v3461_v4 = vld [vmem:[%s4665_s1 + $0xa] sm:$0x3]  ;;  %vm878_vm6 = vcmp.lt.s32.totalorder %v3951_v27, 127  ;;  %vm952_vm7 = vcmp.lt.s32.totalorder %v3951_v27, 113 }
  0x27   : > { %521 = vst [vmem:[#allocation1] ss:$2 sm:$0xff] %v3920_v6  ;;  %v3473_v25 = vld [vmem:[%s4665_s1 + $0xe] sm:$0x3]  ;;  %vm4649_vm8 = vcmp.lt.s32.totalorder %v3951_v27, 112  ;;  %vm4650_vm9 = vcmp.lt.s32.totalorder %v3951_v27, 111 }
  0x28   : > { %s4678_s7 = sld [smem:[#allocation14_spill]] }
  0x29   : > { %s4679_s5 = sld [smem:[#allocation12_spill]] }
  0x2e   : > { %v522_v7 = vld.sshfl [vmem:[#allocation1] sm:$0xff pattern:$0x75316420]  ;;  %v523_v8 = vld.sshfl [vmem:[#allocation1 + $0x8] sm:$0xff pattern:$0x75316420] }
  0x2f   : > { %526 = vrot.lane.b32.xlu0 %v522_v7, %s4632_s26  ;;  %544 = vst [vmem:[#allocation1] ss:$2 sm:$0xff] %v3920_v6  ;;  %v4050_v7 = vperm.slane %v3461_v4, 0 }
  0x36   : > { %v545_v9 = vld.sshfl [vmem:[#allocation1] sm:$0xff pattern:$0x75316420]  ;;  %v546_v10 = vld.sshfl [vmem:[#allocation1 + $0x8] sm:$0xff pattern:$0x75316420] }
  0x37   : > { %549 = vrot.lane.b32.xlu1 %v545_v9, %s4640_s16  ;;  %528 = vrot.lane.b32.xlu0 %v523_v8, %s4632_s26  ;;  %667 = vst [vmem:[#allocation1] ss:$2 sm:$0xff] %v3920_v6  ;;  %s4638_s26 = smov 113   ;;  %v4052_v8 = vperm.slane %v3461_v4, 1 }
  0x3e   : > { %v668_v11 = vld.sshfl [vmem:[#allocation1] sm:$0xff pattern:$0x75316420]  ;;  %v669_v12 = vld.sshfl [vmem:[#allocation1 + $0x8] sm:$0xff pattern:$0x75316420] }
  0x3f   : > { %551 = vrot.lane.b32.xlu1 %v546_v10, %s4640_s16  ;;  %741 = vst [vmem:[#allocation1] ss:$2 sm:$0xff] %v3920_v6  ;;  %672 = vrot.lane.b32.xlu2 %v668_v11, %s4646_s17 }
  0x46   : > { %v743_v13 = vld.sshfl [vmem:[#allocation1 + $0x8] sm:$0xff pattern:$0x75316420]  ;;  %v742_v14 = vld.sshfl [vmem:[#allocation1] sm:$0xff pattern:$0x75316420] }
  0x47   : > { %748 = vrot.lane.b32.xlu1 %v743_v13, %s4634_s23  ;;  %746 = vrot.lane.b32.xlu0 %v742_v14, %s4634_s23  ;;  %817 = vst [vmem:[#allocation1] ss:$2 sm:$0xff] %v3920_v6  ;;  %s4642_s23 = smov 112   ;;  %v3462_v14 = vld [vmem:[%s4666_s2 + $0x14] sm:$0xf] }
  0x48   : > { %674 = vrot.lane.b32.xlu2 %v669_v12, %s4646_s17  ;;  %s4670_s17 = smov 16  }
  0x4e   : > { %v3935_v15 = vld.sshfl [vmem:[#allocation1] sm:$0xff pattern:$0x75316420]  ;;  %v3937_v16 = vld.sshfl [vmem:[#allocation1 + $0x8] sm:$0xff pattern:$0x75316420] }
  0x4f   : > { %869 = vst [vmem:[#allocation1] ss:$2 sm:$0xff] %v3920_v6 }
  0x56   : > { %v871_v17 = vld.sshfl [vmem:[#allocation1 + $0x8] sm:$0xff pattern:$0x75316420]  ;;  %v870_v18 = vld.sshfl [vmem:[#allocation1] sm:$0xff pattern:$0x75316420] }
  0x57   : > { %876 = vrot.lane.b32.xlu0 %v871_v17, %s4636_s25  ;;  %943 = vst [vmem:[#allocation1] ss:$2 sm:$0xff] %v3920_v6  ;;  %874 = vrot.lane.b32.xlu2 %v870_v18, %s4636_s25  ;;  %s4644_s25 = smov 111  }
  0x5e   : > { %v944_v19 = vld.sshfl [vmem:[#allocation1] sm:$0xff pattern:$0x75316420]  ;;  %v945_v20 = vld.sshfl [vmem:[#allocation1 + $0x8] sm:$0xff pattern:$0x75316420] }
  0x5f   : > { %948 = vrot.lane.b32.xlu1 %v944_v19, %s4638_s26  ;;  %1017 = vst [vmem:[#allocation1] ss:$2 sm:$0xff] %v3920_v6  ;;  %950 = vrot.lane.b32.xlu2 %v945_v20, %s4638_s26 }
  0x66   : > { %v1019_v21 = vld.sshfl [vmem:[#allocation1 + $0x8] sm:$0xff pattern:$0x75316420]  ;;  %v1018_v22 = vld.sshfl [vmem:[#allocation1] sm:$0xff pattern:$0x75316420] }
  0x67   : > { %1024 = vrot.lane.b32.xlu1 %v1019_v21, %s4642_s23  ;;  %1022 = vrot.lane.b32.xlu0 %v1018_v22, %s4642_s23  ;;  %1091 = vst [vmem:[#allocation1] ss:$2 sm:$0xff] %v3920_v6 }
  0x6e   : > { %v1093_v23 = vld.sshfl [vmem:[#allocation1 + $0x8] sm:$0xff pattern:$0x75316420]  ;;  %v1092_v24 = vld.sshfl [vmem:[#allocation1] sm:$0xff pattern:$0x75316420] }
  0x6f   : > { %1098 = vrot.lane.b32.xlu0 %v1093_v23, %s4644_s25  ;;  %1096 = vrot.lane.b32.xlu2 %v1092_v24, %s4644_s25  ;;  %v3468_v24 = vld [vmem:[%s4666_s2 + $0x18] sm:$0xf] }
  0x99   : > { %v673_v28 = vpop.permute.xlu2 %672 }
  0xa1   : > { %v527_v26 = vpop.permute.xlu0 %526 }
  0xa2   : > { %v675_v41 = vpop.permute.xlu2 %674 }
  0xa3   : > { %v677_v46 = vsel %vm676_vm3, %v673_v28, %v675_v41  ;;  %v678_v47 = vsel %vm676_vm3, %v675_v41, %v673_v28  ;;  %v4094_v28 = vperm.slane %v3473_v25, 1 }
  0xa4   : > { %v686_v54 = vmul.f32 %v3986_v44, %v678_v47  ;;  %v687_v55 = vmul.f32 %v3988_v45, %v677_v46 }
  0xa9   : > { %v550_v32 = vpop.permute.xlu1 %549  ;;  %v529_v33 = vpop.permute.xlu0 %528 }
  0xaa   : > { %v533_v34 = vsel %vm532_vm0, %v527_v26, %v529_v33  ;;  %v534_v35 = vsel %vm532_vm0, %v529_v33, %v527_v26  ;;  %v4092_v26 = vperm.slane %v3473_v25, 0 }
  0xab   : > { %v541_v36 = vmul.f32 %v3957_v30, %v534_v35  ;;  %v542_v37 = vmul.f32 %v3959_v31, %v533_v34 }
  0xad   : > { %3440 = vmatpush.msk.msra.mxu2 %vm571_vm1, %v541_v36  ;;  %3442 = vmatpush.msk.msra.mxu3 %vm571_vm1, %v542_v37  ;;  %v3474_v37 = vld [vmem:[%s4666_s2 + $0x1c] sm:$0xf] }
  0xae   : > { %3441 = vmatmul.msk.f32.vlgmr.msra.gmra.mxu2 %vm567_vm2, %v543_v38  ;;  %3443 = vmatmul.msk.f32.vlgmr.msra.gmra.mxu3 %vm567_vm2, %v543_v38  ;;  %v3479_v38 = vld [vmem:[%s4665_s1 + $0x10] sm:$0x3] }
  0xaf   : > { %v4113_v39 = vperm.slane %v3479_v38, 0  ;;  %v4115_v40 = vperm.slane %v3479_v38, 1 }
  0xb1   : > { %v552_v48 = vpop.permute.xlu1 %551  ;;  %v875_v5 = vpop.permute.xlu2 %874 }
  0xb2   : > { %v554_v49 = vsel %vm553_vm4, %v550_v32, %v552_v48  ;;  %v555_v50 = vsel %vm553_vm4, %v552_v48, %v550_v32 }
  0xb3   : > { %v563_v51 = vmul.f32 %v3982_v42, %v555_v50  ;;  %v564_v52 = vmul.f32 %v3984_v43, %v554_v49 }
  0xb5   : > { %3436 = vmatpush.msk.msra.mxu0 %vm571_vm1, %v563_v51  ;;  %3438 = vmatpush.msk.msra.mxu1 %vm571_vm1, %v564_v52  ;;  %v3480_v51 = vld [vmem:[%s4666_s2 + $0x20] sm:$0xf]  ;;  %s4676_s2 = smov 112  }
  0xb6   : > { %3437 = vmatmul.msk.f32.vlgmr.msra.gmra.mxu0 %vm567_vm2, %v3435_v53  ;;  %3439 = vmatmul.msk.f32.vlgmr.msra.gmra.mxu1 %vm567_vm2, %v3435_v53 }
  0xb7   : > { %3446 = vmatpush.msk.msrb.mxu0 %vm571_vm1, %v686_v54  ;;  %3448 = vmatpush.msk.msrb.mxu1 %vm571_vm1, %v687_v55 }
  0xb9   : > { %3457 = vmatpush.msk.msra.mxu0 %vm571_vm1, %v3935_v15  ;;  %3459 = vmatpush.msk.msra.mxu1 %vm571_vm1, %v3937_v16  ;;  %v749_v59 = vpop.permute.xlu1 %748  ;;  %v747_v60 = vpop.permute.xlu0 %746  ;;  %v3467_v15 = vld [vmem:[%s4665_s1 + $0xc] sm:$0x3]  ;;  %s4675_s1 = smov 111  }
  0xba   : > { %v751_v61 = vsel %vm750_vm5, %v747_v60, %v749_v59  ;;  %v752_v62 = vsel %vm750_vm5, %v749_v59, %v747_v60  ;;  %v951_v16 = vpop.permute.xlu2 %950  ;;  %v4071_v17 = vperm.slane %v3467_v15, 0  ;;  %v4073_v18 = vperm.slane %v3467_v15, 1 }
  0xbb   : > { %v760_v63 = vmul.f32 %v4013_v57, %v752_v62  ;;  %v761_v0 = vmul.f32 %v4015_v58, %v751_v61 }
  0xbd   : > { %3452 = vmatpush.msk.msrb.mxu2 %vm571_vm1, %v760_v63  ;;  %3454 = vmatpush.msk.msrb.mxu3 %vm571_vm1, %v761_v0 }
  0xbe   : > { %3447 = vmatmul.msk.f32.vlgmr.msrb.gmra.mxu0 %vm567_vm2, %v3445_v1  ;;  %3449 = vmatmul.msk.f32.vlgmr.msrb.gmra.mxu1 %vm567_vm2, %v3445_v1 }
  0xbf   : > { %3453 = vmatmul.msk.f32.vlgmr.msrb.gmra.mxu2 %vm567_vm2, %v3451_v2  ;;  %3455 = vmatmul.msk.f32.vlgmr.msrb.gmra.mxu3 %vm567_vm2, %v3451_v2 }
  0xc6   : > { %3458 = vmatmul.msk.f32.vlgmr.msra.gmra.mxu0 %vm567_vm2, %v3456_v3  ;;  %3460 = vmatmul.msk.f32.vlgmr.msra.gmra.mxu1 %vm567_vm2, %v3456_v3 }
  0xc9   : > { %v877_v9 = vpop.permute.xlu0 %876  ;;  %v1097_v41 = vpop.permute.xlu2 %1096 }
  0xca   : > { %v879_v10 = vsel %vm878_vm6, %v875_v5, %v877_v9  ;;  %v880_v11 = vsel %vm878_vm6, %v877_v9, %v875_v5 }
  0xcb   : > { %v888_v12 = vmul.f32 %v4050_v7, %v879_v10  ;;  %v889_v13 = vmul.f32 %v4052_v8, %v880_v11 }
  0xcd   : > { %3463 = vmatpush.msk.msra.mxu2 %vm571_vm1, %v888_v12  ;;  %3465 = vmatpush.msk.msra.mxu3 %vm571_vm1, %v889_v13 }
  0xce   : > { %3464 = vmatmul.msk.f32.vlgmr.msra.gmra.mxu2 %vm567_vm2, %v3462_v14  ;;  %3466 = vmatmul.msk.f32.vlgmr.msra.gmra.mxu3 %vm567_vm2, %v3462_v14 }
  0xd1   : > { %v949_v19 = vpop.permute.xlu1 %948 }
  0xd2   : > { %v953_v20 = vsel %vm952_vm7, %v949_v19, %v951_v16  ;;  %v954_v21 = vsel %vm952_vm7, %v951_v16, %v949_v19 }
  0xd3   : > { %v962_v22 = vmul.f32 %v4071_v17, %v953_v20  ;;  %v963_v23 = vmul.f32 %v4073_v18, %v954_v21 }
  0xd5   : > { %3469 = vmatpush.msk.msrb.mxu0 %vm571_vm1, %v962_v22  ;;  %3471 = vmatpush.msk.msrb.mxu1 %vm571_vm1, %v963_v23 }
  0xd6   : > { %3470 = vmatmul.msk.f32.vlgmr.msrb.gmra.mxu0 %vm567_vm2, %v3468_v24  ;;  %3472 = vmatmul.msk.f32.vlgmr.msrb.gmra.mxu1 %vm567_vm2, %v3468_v24 }
  0xd9   : > { %v1025_v29 = vpop.permute.xlu1 %1024  ;;  %v1023_v32 = vpop.permute.xlu0 %1022 }
  0xda   : > { %v1027_v33 = vsel %vm4649_vm8, %v1023_v32, %v1025_v29  ;;  %v1028_v34 = vsel %vm4649_vm8, %v1025_v29, %v1023_v32 }
  0xdb   : > { %v1036_v35 = vmul.f32 %v4092_v26, %v1027_v33  ;;  %v1037_v36 = vmul.f32 %v4094_v28, %v1028_v34 }
  0xdd   : > { %3475 = vmatpush.msk.msrb.mxu2 %vm571_vm1, %v1036_v35  ;;  %3477 = vmatpush.msk.msrb.mxu3 %vm571_vm1, %v1037_v36 }
  0xde   : > { %3476 = vmatmul.msk.f32.vlgmr.msrb.gmra.mxu2 %vm567_vm2, %v3474_v37  ;;  %3478 = vmatmul.msk.f32.vlgmr.msrb.gmra.mxu3 %vm567_vm2, %v3474_v37 }
  0xe1   : > { %v1099_v46 = vpop.permute.xlu0 %1098 }
  0xe2   : > { %v1101_v47 = vsel %vm4650_vm9, %v1097_v41, %v1099_v46  ;;  %v1102_v48 = vsel %vm4650_vm9, %v1099_v46, %v1097_v41 }
  0xe3   : > { %v1110_v49 = vmul.f32 %v4113_v39, %v1101_v47  ;;  %v1111_v50 = vmul.f32 %v4115_v40, %v1102_v48 }
  0xe5   : > { %3481 = vmatpush.msk.msra.mxu0 %vm571_vm1, %v1110_v49  ;;  %3483 = vmatpush.msk.msra.mxu1 %vm571_vm1, %v1111_v50 }
  0xe6   : > { %3482 = vmatmul.msk.f32.vlgmr.msra.gmra.mxu0 %vm567_vm2, %v3480_v51  ;;  %3484 = vmatmul.msk.f32.vlgmr.msra.gmra.mxu1 %vm567_vm2, %v3480_v51 }
 0x131   : > { %v644_v54 = vpop.f32.mrf.mxu2  ;;  %v664_v55 = vpop.f32.mrf.mxu3 }
 0x133   : > { %v595_v52 = vpop.f32.mrf.mxu0  ;;  %v615_v53 = vpop.f32.mrf.mxu1 }
 0x134   : > { %v645_v60 = vadd.f32 %v644_v54, %v595_v52  ;;  %v665_v61 = vadd.f32 %v664_v55, %v615_v53 }
 0x13b   : > { %v716_v56 = vpop.f32.mrf.mxu0  ;;  %v736_v59 = vpop.f32.mrf.mxu1 }
 0x13c   : > { %v739_v0 = vadd.f32 %v716_v56, %v645_v60  ;;  %v740_v1 = vadd.f32 %v736_v59, %v665_v61 }
 0x142   : > { %v790_v62 = vpop.f32.mrf.mxu2  ;;  %v810_v63 = vpop.f32.mrf.mxu3 }
 0x143   : > { %v844_v2 = vpop.f32.mrf.mxu0  ;;  %v864_v3 = vpop.f32.mrf.mxu1  ;;  %v813_v4 = vadd.f32 %v790_v62, %v739_v0  ;;  %v814_v5 = vadd.f32 %v810_v63, %v740_v1 }
 0x145   : > { %v867_v11 = vadd.f32 %v844_v2, %v813_v4  ;;  %v868_v12 = vadd.f32 %v864_v3, %v814_v5 }
 0x151   : > { %v918_v9 = vpop.f32.mrf.mxu2  ;;  %v938_v10 = vpop.f32.mrf.mxu3 }
 0x152   : > { %v941_v15 = vadd.f32 %v918_v9, %v867_v11  ;;  %v942_v16 = vadd.f32 %v938_v10, %v868_v12 }
 0x153   : > { %v992_v13 = vpop.f32.mrf.mxu0  ;;  %v1012_v14 = vpop.f32.mrf.mxu1 }
 0x154   : > { %v1015_v19 = vadd.f32 %v992_v13, %v941_v15  ;;  %v1016_v20 = vadd.f32 %v1012_v14, %v942_v16 }
 0x161   : > { %v1066_v21 = vpop.f32.mrf.mxu2  ;;  %v1086_v22 = vpop.f32.mrf.mxu3 }
 0x162   : > { %v1089_v23 = vadd.f32 %v1066_v21, %v1015_v19  ;;  %v1090_v24 = vadd.f32 %v1086_v22, %v1016_v20 }
 0x163   : > { %v1140_v25 = vpop.f32.mrf.mxu0  ;;  %v1160_v29 = vpop.f32.mrf.mxu1 }
 0x164   : > { %v1163_v32 = vadd.f32 %v1140_v25, %v1089_v23  ;;  %v1164_v33 = vadd.f32 %v1160_v29, %v1090_v24 }
 0x166   : > { %v1165_v34 = vsel %vm571_vm1, %v1163_v32, 0.0  ;;  %v1172_v35 = vsel %vm571_vm1, %v1164_v33, 0.0 }
 0x167   : > { %v1166_v36 = vrot.slane %v1165_v34, 4  ;;  %v1173_v37 = vrot.slane %v1172_v35, 4 }
 0x169   : > { %v1167_v38 = vadd.f32 %v1166_v36, %v1165_v34  ;;  %v1174_v41 = vadd.f32 %v1173_v37, %v1172_v35  ;;  %v1241_v34 = vld [vmem:[%s4667_s3] sm:$0xf]  ;;  %v3782_v35 = vmov 0  }
 0x16a   : > { %3679 = vset.pattern.permute.xlu0 %v3782_v35  ;;  %3680 = vset.pattern.permute.xlu1 %v3782_v35  ;;  %v1249_v36 = vld [vmem:[%s4668_s4] sm:$0xf] }
 0x16b   : > { %v1168_v46 = vrot.slane %v1167_v38, 2  ;;  %v1175_v47 = vrot.slane %v1174_v41, 2  ;;  %1244 = vperm.xlu0 %3679, %v1241_v34   ;;  %3681 = vset.pattern.permute.xlu2 %v3782_v35 }
 0x16d   : > { %v1169_v48 = vadd.f32 %v1168_v46, %v1167_v38  ;;  %v1176_v49 = vadd.f32 %v1175_v47, %v1174_v41 }
 0x16f   : > { %v1170_v50 = vrot.slane %v1169_v48, 1  ;;  %v1177_v51 = vrot.slane %v1176_v49, 1 }
 0x171   : > { %v1171_v52 = vadd.f32 %v1170_v50, %v1169_v48  ;;  %v1178_v53 = vadd.f32 %v1177_v51, %v1176_v49 }
 0x173   : > { %v1180_v54 = vsel %vm4648_vm10, %v1171_v52, 0.0  ;;  %v1181_v55 = vsel %vm4648_vm10, %v1178_v53, 0.0  ;;  %1252 = vperm.xlu0 %3679, %v1249_v36  }
 0x174   : > { %v1182_v56 = vadd.f32 %v1181_v55, %v1180_v54 }
 0x176   : > { %1183 = vadd.xlane.f32.xlu1 %v1182_v56 }
 0x1e9   : > { %v1184_v59 = vpop.xlane.xlu1 %1183 }
 0x1ea   : > { %v1185_v60 = vrot.slane %v1184_v59, 4 }
 0x1ec   : > { %v1186_v61 = vadd.f32 %v1185_v60, %v1184_v59  ;;  %v1245_v60 = vpop.permute.xlu0 %1244 }
 0x1ee   : > { %v1187_v62 = vrot.slane %v1186_v61, 2 }
 0x1f0   : > { %v1188_v63 = vadd.f32 %v1187_v62, %v1186_v61 }
 0x1f2   : > { %v1189_v0 = vrot.slane %v1188_v63, 1 }
 0x1f4   : > { %v1190_v1 = vadd.f32 %v1189_v0, %v1188_v63 }
 0x1f6   : > { %3606 = vpush %v1190_v1 }
 0x227   : > { %s3607_s23 = spop %3606 }
 0x228   : > { %s1192_s25 = smul.f32 0.0009765625, %s3607_s23 }
 0x22a   : > { %v1193_v2 = vstv %s1192_s25 }
 0x22b   : > { %v1194_v3 = vsub.f32 %v1163_v32, %v1193_v2  ;;  %v1195_v4 = vsub.f32 %v1164_v33, %v1193_v2  ;;  %v1253_v2 = vpop.permute.xlu0 %1252 }
 0x22d   : > { %v1196_v5 = vmul.f32 %v1194_v3, %v1194_v3  ;;  %v1197_v9 = vmul.f32 %v1195_v4, %v1195_v4 }
 0x22f   : > { %v1198_v10 = vsel %vm571_vm1, %v1196_v5, 0.0  ;;  %v1205_v11 = vsel %vm571_vm1, %v1197_v9, 0.0 }
 0x230   : > { %v1199_v12 = vrot.slane %v1198_v10, 4  ;;  %v1206_v13 = vrot.slane %v1205_v11, 4 }
 0x232   : > { %v1200_v14 = vadd.f32 %v1199_v12, %v1198_v10  ;;  %v1207_v15 = vadd.f32 %v1206_v13, %v1205_v11 }
 0x234   : > { %v1201_v16 = vrot.slane %v1200_v14, 2  ;;  %v1208_v19 = vrot.slane %v1207_v15, 2 }
 0x236   : > { %v1202_v20 = vadd.f32 %v1201_v16, %v1200_v14  ;;  %v1209_v21 = vadd.f32 %v1208_v19, %v1207_v15 }
 0x238   : > { %v1203_v22 = vrot.slane %v1202_v20, 1  ;;  %v1210_v23 = vrot.slane %v1209_v21, 1 }
 0x23a   : > { %v1204_v24 = vadd.f32 %v1203_v22, %v1202_v20  ;;  %v1211_v25 = vadd.f32 %v1210_v23, %v1209_v21 }
 0x23c   : > { %v1212_v29 = vsel %vm4648_vm10, %v1204_v24, 0.0  ;;  %v1213_v32 = vsel %vm4648_vm10, %v1211_v25, 0.0 }
 0x23d   : > { %v1214_v33 = vadd.f32 %v1213_v32, %v1212_v29 }
 0x23f   : > { %1215 = vadd.xlane.f32.xlu2 %v1214_v33 }
 0x2b2   : > { %v1216_v37 = vpop.xlane.xlu2 %1215 }
 0x2b3   : > { %v1217_v38 = vrot.slane %v1216_v37, 4 }
 0x2b5   : > { %v1218_v41 = vadd.f32 %v1217_v38, %v1216_v37 }
 0x2b7   : > { %v1219_v46 = vrot.slane %v1218_v41, 2 }
 0x2b9   : > { %v1220_v47 = vadd.f32 %v1219_v46, %v1218_v41 }
 0x2bb   : > { %v1221_v48 = vrot.slane %v1220_v47, 1 }
 0x2bd   : > { %v1222_v49 = vadd.f32 %v1221_v48, %v1220_v47 }
 0x2bf   : > { %3608 = vpush %v1222_v49 }
 0x2f0   : > { %s3609_s23 = spop %3608 }
 0x2f1   : > { %s1224_s25 = smul.f32 0.0009765625, %s3609_s23  ;;  %s4671_s23 = smov 1  }
 0x2f3   : > { %s1225_s26 = sadd.f32 1e-05, %s1224_s25  ;;  %s4672_s25 = smov 113  }
 0x2f5   : > { %v1226_v50 = vstv %s1225_s26  ;;  %s4673_s26 = smov 127  }
 0x2f6   : > { %3682 = vrsqrt.f32 %v1226_v50  ;;  %vm1233_vm12 = vweird.f32 %v1226_v50 }
 0x2fc   : > { %v3683_v51 = vpop.eup %3682 }
 0x2fd   : > { %v1228_v52 = vmul.f32 %v3683_v51, %v1226_v50  ;;  %vm1234_vm11 = vweird.f32 %v3683_v51 }
 0x2fe   : > { %vm1235_vm13 = vmor %vm1233_vm12, %vm1234_vm11 }
 0x2ff   : > { %v1229_v53 = vmul.f32 %v3683_v51, %v1228_v52 }
 0x301   : > { %v1230_v54 = vmul.f32 0.5, %v1229_v53 }
 0x303   : > { %v1231_v55 = vsub.f32 1.5, %v1230_v54 }
 0x305   : > { %v1232_v56 = vmul.f32 %v3683_v51, %v1231_v55 }
 0x307   : > { %v1236_v59 = vsel %vm1235_vm13, %v3683_v51, %v1232_v56 }
 0x308   : > { %3610 = vpush %v1236_v59 }
 0x339   : > { %s3611_s16 = spop %3610 }
 0x33a   : > { %v1238_v61 = vstv %s3611_s16  ;;  %s4674_s16 = smov 17  }
 0x33b   : > { %v1239_v62 = vmul.f32 %v1238_v61, %v1194_v3  ;;  %v1240_v63 = vmul.f32 %v1238_v61, %v1195_v4 }
 0x33d   : > { %v1247_v0 = vmul.f32 %v1245_v60, %v1239_v62  ;;  %v1248_v1 = vmul.f32 %v1245_v60, %v1240_v63 }
 0x33f   : > { %v4144_v5 = vadd.f32 %v1253_v2, %v1247_v0  ;;  %v4146_v9 = vadd.f32 %v1253_v2, %v1248_v1 }
 0x341   : > { %v4149_v10 = vmul.f32 0.70710677, %v4144_v5  ;;  %v4152_v11 = vmul.f32 0.70710677, %v4146_v9 }
 0x343   : > { %v1265_v12 = vand.u32 2147483647, %v4149_v10  ;;  %v1266_v13 = vand.u32 2147483647, %v4152_v11 }
 0x345   : > { %v1267_v14 = vmul.f32 0.3275911, %v1265_v12  ;;  %v1268_v3 = vmul.f32 0.3275911, %v1266_v13  ;;  %v1319_v48 = vsub.f32 0.0, %v1265_v12  ;;  %v1320_v51 = vsub.f32 0.0, %v1266_v13 }
 0x347   : > { %v1269_v4 = vadd.f32 1.0, %v1267_v14  ;;  %v1270_v15 = vadd.f32 1.0, %v1268_v3  ;;  %v1321_v55 = vmul.f32 %v1319_v48, %v1265_v12  ;;  %v1322_v59 = vmul.f32 %v1320_v51, %v1266_v13 }
 0x349   : > { %3684 = vrcp.f32 %v1269_v4  ;;  %v1282_v23 = vand.u32 2147483648, %v1269_v4  ;;  %v1280_v29 = vand.u32 2147483647, %v1269_v4  ;;  %v1297_v32 = vand.u32 2147483648, %v1270_v15 }
 0x34a   : > { %3686 = vrcp.f32 %v1270_v15  ;;  %v1295_v34 = vand.u32 2147483647, %v1270_v15  ;;  %vm1276_vm11 = vweird.f32 %v1269_v4  ;;  %vm1291_vm13 = vweird.f32 %v1270_v15 }
 0x34b   : > { %v1283_v36 = vor.u32 1.1754944e-38, %v1282_v23  ;;  %vm1281_vm10 = vcmp.eq.f32.partialorder %v1280_v29, 8.507059e+37  ;;  %v1298_v41 = vor.u32 1.1754944e-38, %v1297_v32  ;;  %v1323_v63 = vmul.f32 1.442695, %v1321_v55 }
 0x34c   : > { %vm1296_vm9 = vcmp.eq.f32.partialorder %v1295_v34, 8.507059e+37  ;;  %v1325_v1 = vmul.f32 1.442695, %v1322_v59 }
 0x34d   : > { %3688 = vpow2.f32 %v1323_v63 }
 0x34e   : > { %3690 = vpow2.f32 %v1325_v1 }
 0x34f   : > { %v3685_v16 = vpop.eup %3684 }
 0x350   : > { %v3687_v19 = vpop.eup %3686  ;;  %v1272_v20 = vmul.f32 %v3685_v16, %v1269_v4  ;;  %vm1277_vm14 = vweird.f32 %v3685_v16 }
 0x351   : > { %v1287_v21 = vmul.f32 %v3687_v19, %v1270_v15  ;;  %vm1292_vm15 = vweird.f32 %v3687_v19  ;;  %vm1278_vm12 = vmor %vm1276_vm11, %vm1277_vm14 }
 0x352   : > { %v1273_v22 = vsub.f32 1.0, %v1272_v20  ;;  %vm1293_vm8 = vmor %vm1291_vm13, %vm1292_vm15  ;;  %vm4682_vm15 = vcmp.lt.s32.totalorder %v3951_v27, 112 }
 0x353   : > { %v1288_v24 = vsub.f32 1.0, %v1287_v21  ;;  %v3689_v21 = vpop.eup %3688  ;;  %vm4683_vm11 = vmmov %vm4682_vm15 }
 0x354   : > { %v1274_v25 = vmul.f32 %v3685_v16, %v1273_v22  ;;  %v3691_v22 = vpop.eup %3690 }
 0x355   : > { %v1289_v33 = vmul.f32 %v3687_v19, %v1288_v24 }
 0x356   : > { %v1275_v35 = vadd.f32 %v3685_v16, %v1274_v25  ;;  %v3783_v25 = vmov -1.0  }
 0x357   : > { %v1290_v37 = vadd.f32 %v3687_v19, %v1289_v33 }
 0x358   : > { %v1279_v38 = vsel %vm1278_vm12, %v3685_v16, %v1275_v35  ;;  %vm4684_vm12 = vcmask 1040384  }
 0x359   : > { %v1284_v46 = vsel %vm1281_vm10, %v1283_v36, %v1279_v38  ;;  %v1294_v47 = vsel %vm1293_vm8, %v3687_v19, %v1290_v37  ;;  %vm1261_vm8 = vcmp.ge.f32.partialorder %v4149_v10, 0.0  ;;  %v1257_v36 = vmul.f32 0.5, %v4144_v5  ;;  %v1948_v5 = vld [vmem:[%s4677_s6] sm:$0xf]  ;;  %vm4685_vm13 = vmmov %vm4684_vm12 }
 0x35a   : > { %v1299_v49 = vsel %vm1296_vm9, %v1298_v41, %v1294_v47  ;;  %v1301_v50 = vmul.f32 1.0614054, %v1284_v46  ;;  %vm1262_vm9 = vcmp.ge.f32.partialorder %v4152_v11, 0.0  ;;  %v1263_v29 = vsel %vm1261_vm8, 1.0, %v3783_v25  ;;  %vm4686_vm8 = vmmov %vm4684_vm12 }
 0x35b   : > { %v1302_v52 = vmul.f32 1.0614054, %v1299_v49  ;;  %v1264_v33 = vsel %vm1262_vm9, 1.0, %v3783_v25  ;;  %v1258_v38 = vmul.f32 0.5, %v4146_v9  ;;  %v1956_v9 = vld [vmem:[%s4678_s7] sm:$0xf]  ;;  %vm4687_vm9 = vmmov %vm4686_vm8 }
 0x35c   : > { %v1303_v53 = vadd.f32 -1.4531521, %v1301_v50  ;;  %vm4680_vm10 = vcmp.lt.s32.totalorder %v3951_v27, 111 }
 0x35d   : > { %v1304_v54 = vadd.f32 -1.4531521, %v1302_v52  ;;  %vm4681_vm14 = vmmov %vm4680_vm10 }
 0x35e   : > { %v1305_v56 = vmul.f32 %v1303_v53, %v1284_v46 }
 0x35f   : > { %v1306_v60 = vmul.f32 %v1304_v54, %v1299_v49 }
 0x360   : > { %v1307_v61 = vadd.f32 1.4214138, %v1305_v56 }
 0x361   : > { %v1308_v62 = vadd.f32 1.4214138, %v1306_v60  ;;  %v3485_v60 = vld [vmem:[%s4679_s5 + $0x4] sm:$0xf] }
 0x362   : > { %v1309_v0 = vmul.f32 %v1307_v61, %v1284_v46 }
 0x363   : > { %v1310_v2 = vmul.f32 %v1308_v62, %v1299_v49  ;;  %v3494_v62 = vld [vmem:[%s4679_s5 + $0x8] sm:$0xf] }
 0x364   : > { %v1311_v14 = vadd.f32 -0.28449672, %v1309_v0 }
 0x365   : > { %v1312_v3 = vadd.f32 -0.28449672, %v1310_v2 }
 0x366   : > { %v1313_v4 = vmul.f32 %v1311_v14, %v1284_v46 }
 0x367   : > { %v1314_v15 = vmul.f32 %v1312_v3, %v1299_v49 }
 0x368   : > { %v1315_v16 = vadd.f32 0.2548296, %v1313_v4 }
 0x369   : > { %v1316_v19 = vadd.f32 0.2548296, %v1314_v15  ;;  %v1345_v15 = vld [vmem:[%s4679_s5] sm:$0xf] }
 0x36a   : > { %v1317_v20 = vmul.f32 %v1315_v16, %v1284_v46  ;;  %v3504_v16 = vld [vmem:[%s4679_s5 + $0x10] sm:$0xf] }
 0x36b   : > { %v1318_v12 = vmul.f32 %v1316_v19, %v1299_v49 }
 0x36c   : > { %v1327_v13 = vmul.f32 %v3689_v21, %v1317_v20 }
 0x36d   : > { %v1328_v23 = vmul.f32 %v3691_v22, %v1318_v12 }
 0x36e   : > { %v1329_v24 = vsub.f32 1.0, %v1327_v13 }
 0x36f   : > { %v1330_v32 = vsub.f32 1.0, %v1328_v23 }
 0x370   : > { %v1331_v34 = vmul.f32 %v1329_v24, %v1263_v29 }
 0x371   : > { %v1332_v35 = vmul.f32 %v1330_v32, %v1264_v33  ;;  %v3499_v32 = vld [vmem:[%s4679_s5 + $0xc] sm:$0xf] }
 0x372   : > { %v1333_v37 = vadd.f32 1.0, %v1331_v34 }
 0x373   : > { %v1334_v41 = vadd.f32 1.0, %v1332_v35 }
 0x374   : > { %v1335_v10 = vmul.f32 %v1333_v37, %v1257_v36 }
 0x375   : > { %v1336_v46 = vmul.f32 %v1334_v41, %v1258_v38 }
 0x376   : > { %1454 = vrot.lane.b32.xlu2 %v1335_v10, %s4669_s0  ;;  %1346 = vrot.lane.b32.xlu0 %v1335_v10, %s4670_s17 }
 0x377   : > { %1456 = vrot.lane.b32.xlu1 %v1336_v46, %s4669_s0 }
 0x37e   : > { %1517 = vrot.lane.b32.xlu2 %v1336_v46, %s4671_s23  ;;  %1348 = vrot.lane.b32.xlu0 %v1336_v46, %s4670_s17 }
 0x37f   : > { %1690 = vrot.lane.b32.xlu1 %v1335_v10, %s4672_s25 }
 0x386   : > { %1629 = vrot.lane.b32.xlu2 %v1335_v10, %s4673_s26  ;;  %1337 = vrot.lane.b32.xlu0 %v1335_v10, %s4674_s16 }
 0x387   : > { %1631 = vrot.lane.b32.xlu1 %v1336_v46, %s4673_s26 }
 0x38e   : > { %1814 = vrot.lane.b32.xlu2 %v1336_v46, %s4675_s1  ;;  %1339 = vrot.lane.b32.xlu0 %v1336_v46, %s4674_s16 }
 0x38f   : > { %1751 = vrot.lane.b32.xlu1 %v1335_v10, %s4676_s2 }
 0x396   : > { %1515 = vrot.lane.b32.xlu0 %v1335_v10, %s4671_s23 }
 0x39e   : > { %1692 = vrot.lane.b32.xlu0 %v1336_v46, %s4672_s25 }
 0x3a6   : > { %1812 = vrot.lane.b32.xlu0 %v1335_v10, %s4675_s1 }
 0x3ae   : > { %1753 = vrot.lane.b32.xlu0 %v1336_v46, %s4676_s2 }
 0x3b6   : > { %1951 = vperm.xlu0 %3679, %v1948_v5  }
 0x3be   : > { %1959 = vperm.xlu0 %3679, %v1956_v9  }
 0x3d0   : > { %v1455_v48 = vpop.permute.xlu2 %1454 }
 0x3d8   : > { %v1518_v0 = vpop.permute.xlu2 %1517 }
 0x3e0   : > { %v1630_v20 = vpop.permute.xlu2 %1629 }
 0x3e8   : > { %v1347_v11 = vpop.permute.xlu0 %1346  ;;  %v1815_v5 = vpop.permute.xlu2 %1814 }
 0x3e9   : > { %v1457_v47 = vpop.permute.xlu1 %1456 }
 0x3ea   : > { %v1458_v49 = vsel %vm676_vm3, %v1455_v48, %v1457_v47  ;;  %v1459_v50 = vsel %vm676_vm3, %v1457_v47, %v1455_v48 }
 0x3eb   : > { %v1460_v56 = vmul.f32 %v1459_v50, %v3986_v44  ;;  %v1461_v59 = vmul.f32 %v1458_v49, %v3988_v45  ;;  %v3524_v50 = vld [vmem:[%s4679_s5 + $0x20] sm:$0xf] }
 0x3f0   : > { %v1349_v51 = vpop.permute.xlu0 %1348 }
 0x3f1   : > { %v1350_v52 = vsel %vm553_vm4, %v1347_v11, %v1349_v51  ;;  %v1351_v53 = vsel %vm553_vm4, %v1349_v51, %v1347_v11  ;;  %v1691_v63 = vpop.permute.xlu1 %1690 }
 0x3f2   : > { %v1352_v54 = vmul.f32 %v1351_v53, %v3982_v42  ;;  %v1353_v55 = vmul.f32 %v1350_v52, %v3984_v43 }
 0x3f4   : > { %3486 = vmatpush.msk.msra.mxu2 %vm571_vm1, %v1352_v54  ;;  %3488 = vmatpush.msk.msra.mxu3 %vm571_vm1, %v1353_v55 }
 0x3f5   : > { %3487 = vmatmul.msk.f32.vlgmr.msra.gmra.mxu2 %vm567_vm2, %v3485_v60  ;;  %3489 = vmatmul.msk.f32.vlgmr.msra.gmra.mxu3 %vm567_vm2, %v3485_v60 }
 0x3f6   : > { %3495 = vmatpush.msk.msrb.mxu2 %vm571_vm1, %v1460_v56  ;;  %3497 = vmatpush.msk.msrb.mxu3 %vm571_vm1, %v1461_v59  ;;  %v3519_v59 = vld [vmem:[%s4679_s5 + $0x1c] sm:$0xf] }
 0x3f8   : > { %3505 = vmatpush.msk.msra.mxu2 %vm571_vm1, %v1335_v10  ;;  %3507 = vmatpush.msk.msra.mxu3 %vm571_vm1, %v1336_v46  ;;  %v1338_v61 = vpop.permute.xlu0 %1337  ;;  %v3509_v10 = vld [vmem:[%s4679_s5 + $0x14] sm:$0xf]  ;;  %v3514_v46 = vld [vmem:[%s4679_s5 + $0x18] sm:$0xf] }
 0x3f9   : > { %v1632_v19 = vpop.permute.xlu1 %1631 }
 0x3fa   : > { %v1633_v12 = vsel %vm878_vm6, %v1630_v20, %v1632_v19  ;;  %v1634_v22 = vsel %vm878_vm6, %v1632_v19, %v1630_v20 }
 0x3fb   : > { %v1635_v33 = vmul.f32 %v1633_v12, %v4050_v7  ;;  %v1636_v34 = vmul.f32 %v1634_v22, %v4052_v8 }
 0x3fd   : > { %3496 = vmatmul.msk.f32.vlgmr.msrb.gmra.mxu2 %vm567_vm2, %v3494_v62  ;;  %3498 = vmatmul.msk.f32.vlgmr.msrb.gmra.mxu3 %vm567_vm2, %v3494_v62 }
 0x400   : > { %v1340_v1 = vpop.permute.xlu0 %1339 }
 0x401   : > { %v1341_v2 = vsel %vm532_vm0, %v1338_v61, %v1340_v1  ;;  %v1342_v14 = vsel %vm532_vm0, %v1340_v1, %v1338_v61  ;;  %v1752_v51 = vpop.permute.xlu1 %1751 }
 0x402   : > { %v1343_v3 = vmul.f32 %v1342_v14, %v3957_v30  ;;  %v1344_v4 = vmul.f32 %v1341_v2, %v3959_v31 }
 0x404   : > { %3490 = vmatpush.msk.msrb.mxu0 %vm571_vm1, %v1343_v3  ;;  %3492 = vmatpush.msk.msrb.mxu1 %vm571_vm1, %v1344_v4 }
 0x405   : > { %3491 = vmatmul.msk.f32.vlgmr.msrb.gmra.mxu0 %vm567_vm2, %v1345_v15  ;;  %3493 = vmatmul.msk.f32.vlgmr.msrb.gmra.mxu1 %vm567_vm2, %v1345_v15 }
 0x406   : > { %3506 = vmatmul.msk.f32.vlgmr.msra.gmra.mxu2 %vm567_vm2, %v3504_v16  ;;  %3508 = vmatmul.msk.f32.vlgmr.msra.gmra.mxu3 %vm567_vm2, %v3504_v16 }
 0x408   : > { %v1516_v21 = vpop.permute.xlu0 %1515 }
 0x409   : > { %v1519_v13 = vsel %vm750_vm5, %v1516_v21, %v1518_v0  ;;  %v1520_v23 = vsel %vm750_vm5, %v1518_v0, %v1516_v21 }
 0x40a   : > { %v1521_v24 = vmul.f32 %v1520_v23, %v4013_v57  ;;  %v1522_v29 = vmul.f32 %v1519_v13, %v4015_v58 }
 0x40c   : > { %3500 = vmatpush.msk.msra.mxu0 %vm571_vm1, %v1521_v24  ;;  %3502 = vmatpush.msk.msra.mxu1 %vm571_vm1, %v1522_v29 }
 0x40d   : > { %3501 = vmatmul.msk.f32.vlgmr.msra.gmra.mxu0 %vm567_vm2, %v3499_v32  ;;  %3503 = vmatmul.msk.f32.vlgmr.msra.gmra.mxu1 %vm567_vm2, %v3499_v32 }
 0x40e   : > { %3510 = vmatpush.msk.msrb.mxu0 %vm571_vm1, %v1635_v33  ;;  %3512 = vmatpush.msk.msrb.mxu1 %vm571_vm1, %v1636_v34 }
 0x410   : > { %v1693_v35 = vpop.permute.xlu0 %1692 }
 0x411   : > { %v1694_v36 = vsel %vm952_vm7, %v1691_v63, %v1693_v35  ;;  %v1695_v37 = vsel %vm952_vm7, %v1693_v35, %v1691_v63 }
 0x412   : > { %v1696_v38 = vmul.f32 %v1694_v36, %v4071_v17  ;;  %v1697_v41 = vmul.f32 %v1695_v37, %v4073_v18 }
 0x414   : > { %3515 = vmatpush.msk.msrb.mxu2 %vm571_vm1, %v1696_v38  ;;  %3517 = vmatpush.msk.msrb.mxu3 %vm571_vm1, %v1697_v41 }
 0x415   : > { %3511 = vmatmul.msk.f32.vlgmr.msrb.gmra.mxu0 %vm567_vm2, %v3509_v10  ;;  %3513 = vmatmul.msk.f32.vlgmr.msrb.gmra.mxu1 %vm567_vm2, %v3509_v10 }
 0x416   : > { %3516 = vmatmul.msk.f32.vlgmr.msrb.gmra.mxu2 %vm567_vm2, %v3514_v46  ;;  %3518 = vmatmul.msk.f32.vlgmr.msrb.gmra.mxu3 %vm567_vm2, %v3514_v46 }
 0x418   : > { %v1813_v9 = vpop.permute.xlu0 %1812 }
 0x419   : > { %v1816_v11 = vsel %vm4680_vm10, %v1813_v9, %v1815_v5  ;;  %v1817_v47 = vsel %vm4681_vm14, %v1815_v5, %v1813_v9 }
 0x41a   : > { %v1818_v48 = vmul.f32 %v1816_v11, %v4113_v39  ;;  %v1819_v49 = vmul.f32 %v1817_v47, %v4115_v40 }
 0x41c   : > { %3525 = vmatpush.msk.msra.mxu2 %vm571_vm1, %v1818_v48  ;;  %3527 = vmatpush.msk.msra.mxu3 %vm571_vm1, %v1819_v49 }
 0x41e   : > { %3526 = vmatmul.msk.f32.vlgmr.msra.gmra.mxu2 %vm567_vm2, %v3524_v50  ;;  %3528 = vmatmul.msk.f32.vlgmr.msra.gmra.mxu3 %vm567_vm2, %v3524_v50 }
 0x420   : > { %v1754_v52 = vpop.permute.xlu0 %1753 }
 0x421   : > { %v1755_v53 = vsel %vm4682_vm15, %v1752_v51, %v1754_v52  ;;  %v1756_v54 = vsel %vm4683_vm11, %v1754_v52, %v1752_v51 }
 0x422   : > { %v1757_v55 = vmul.f32 %v1755_v53, %v4092_v26  ;;  %v1758_v56 = vmul.f32 %v1756_v54, %v4094_v28 }
 0x424   : > { %3520 = vmatpush.msk.msra.mxu0 %vm571_vm1, %v1757_v55  ;;  %3522 = vmatpush.msk.msra.mxu1 %vm571_vm1, %v1758_v56 }
 0x425   : > { %3521 = vmatmul.msk.f32.vlgmr.msra.gmra.mxu0 %vm567_vm2, %v3519_v59  ;;  %3523 = vmatmul.msk.f32.vlgmr.msra.gmra.mxu1 %vm567_vm2, %v3519_v59 }
 0x478   : > { %v1382_v60 = vpop.f32.mrf.mxu2  ;;  %v1402_v61 = vpop.f32.mrf.mxu3 }
 0x480   : > { %v1490_v0 = vpop.f32.mrf.mxu2  ;;  %v1510_v1 = vpop.f32.mrf.mxu3 }
 0x482   : > { %v1431_v62 = vpop.f32.mrf.mxu0  ;;  %v1451_v63 = vpop.f32.mrf.mxu1 }
 0x483   : > { %v1432_v15 = vadd.f32 %v1431_v62, %v1382_v60  ;;  %v1452_v16 = vadd.f32 %v1451_v63, %v1402_v61 }
 0x485   : > { %v1513_v19 = vadd.f32 %v1490_v0, %v1432_v15  ;;  %v1514_v20 = vadd.f32 %v1510_v1, %v1452_v16 }
 0x489   : > { %v1604_v3 = vpop.f32.mrf.mxu2  ;;  %v1624_v4 = vpop.f32.mrf.mxu3 }
 0x48a   : > { %v1551_v2 = vpop.f32.mrf.mxu0  ;;  %v1571_v14 = vpop.f32.mrf.mxu1 }
 0x48b   : > { %v1574_v21 = vadd.f32 %v1551_v2, %v1513_v19  ;;  %v1575_v12 = vadd.f32 %v1571_v14, %v1514_v20 }
 0x48d   : > { %v1627_v29 = vadd.f32 %v1604_v3, %v1574_v21  ;;  %v1628_v32 = vadd.f32 %v1624_v4, %v1575_v12 }
 0x492   : > { %v1665_v23 = vpop.f32.mrf.mxu0  ;;  %v1685_v24 = vpop.f32.mrf.mxu1 }
 0x493   : > { %v1688_v33 = vadd.f32 %v1665_v23, %v1627_v29  ;;  %v1689_v34 = vadd.f32 %v1685_v24, %v1628_v32 }
 0x499   : > { %v1726_v22 = vpop.f32.mrf.mxu2  ;;  %v1746_v13 = vpop.f32.mrf.mxu3 }
 0x49a   : > { %v1749_v35 = vadd.f32 %v1726_v22, %v1688_v33  ;;  %v1750_v36 = vadd.f32 %v1746_v13, %v1689_v34 }
 0x4a1   : > { %v1848_v37 = vpop.f32.mrf.mxu2  ;;  %v1868_v38 = vpop.f32.mrf.mxu3 }
 0x4a2   : > { %v1787_v41 = vpop.f32.mrf.mxu0  ;;  %v1807_v10 = vpop.f32.mrf.mxu1 }
 0x4a3   : > { %v1810_v46 = vadd.f32 %v1787_v41, %v1749_v35  ;;  %v1811_v5 = vadd.f32 %v1807_v10, %v1750_v36 }
 0x4a5   : > { %v1871_v9 = vadd.f32 %v1848_v37, %v1810_v46  ;;  %v1872_v11 = vadd.f32 %v1868_v38, %v1811_v5 }
 0x4a7   : > { %v1873_v47 = vsel %vm571_vm1, %v1871_v9, 0.0  ;;  %v1880_v48 = vsel %vm571_vm1, %v1872_v11, 0.0 }
 0x4a8   : > { %v1874_v49 = vrot.slane %v1873_v47, 4  ;;  %v1881_v50 = vrot.slane %v1880_v48, 4 }
 0x4aa   : > { %v1875_v51 = vadd.f32 %v1874_v49, %v1873_v47  ;;  %v1882_v52 = vadd.f32 %v1881_v50, %v1880_v48 }
 0x4ac   : > { %v1876_v53 = vrot.slane %v1875_v51, 2  ;;  %v1883_v54 = vrot.slane %v1882_v52, 2 }
 0x4ae   : > { %v1877_v55 = vadd.f32 %v1876_v53, %v1875_v51  ;;  %v1884_v56 = vadd.f32 %v1883_v54, %v1882_v52 }
 0x4b0   : > { %v1878_v59 = vrot.slane %v1877_v55, 1  ;;  %v1885_v60 = vrot.slane %v1884_v56, 1 }
 0x4b2   : > { %v1879_v61 = vadd.f32 %v1878_v59, %v1877_v55  ;;  %v1886_v62 = vadd.f32 %v1885_v60, %v1884_v56 }
 0x4b4   : > { %v1887_v63 = vsel %vm4684_vm12, %v1879_v61, 0.0  ;;  %v1888_v0 = vsel %vm4685_vm13, %v1886_v62, 0.0 }
 0x4b5   : > { %v1889_v1 = vadd.f32 %v1888_v0, %v1887_v63 }
 0x4b7   : > { %1890 = vadd.xlane.f32.xlu2 %v1889_v1  ;;  %v1952_v1 = vpop.permute.xlu0 %1951 }
 0x52a   : > { %v1891_v2 = vpop.xlane.xlu2 %1890 }
 0x52b   : > { %v1892_v14 = vrot.slane %v1891_v2, 4 }
 0x52d   : > { %v1893_v3 = vadd.f32 %v1892_v14, %v1891_v2 }
 0x52f   : > { %v1894_v4 = vrot.slane %v1893_v3, 2 }
 0x531   : > { %v1895_v15 = vadd.f32 %v1894_v4, %v1893_v3 }
 0x533   : > { %v1896_v16 = vrot.slane %v1895_v15, 1 }
 0x535   : > { %v1897_v19 = vadd.f32 %v1896_v16, %v1895_v15  ;;  %v1960_v16 = vpop.permute.xlu0 %1959 }
 0x537   : > { %3612 = vpush %v1897_v19 }
 0x568   : > { %s3613_s20 = spop %3612 }
 0x569   : > { %s1899_s27 = smul.f32 0.0009765625, %s3613_s20 }
 0x56b   : > { %v1900_v20 = vstv %s1899_s27 }
 0x56c   : > { %v1901_v21 = vsub.f32 %v1871_v9, %v1900_v20  ;;  %v1902_v12 = vsub.f32 %v1872_v11, %v1900_v20 }
 0x56e   : > { %v1903_v22 = vmul.f32 %v1901_v21, %v1901_v21  ;;  %v1904_v13 = vmul.f32 %v1902_v12, %v1902_v12 }
 0x570   : > { %v1905_v23 = vsel %vm571_vm1, %v1903_v22, 0.0  ;;  %v1912_v24 = vsel %vm571_vm1, %v1904_v13, 0.0 }
 0x571   : > { %v1906_v29 = vrot.slane %v1905_v23, 4  ;;  %v1913_v32 = vrot.slane %v1912_v24, 4 }
 0x573   : > { %v1907_v33 = vadd.f32 %v1906_v29, %v1905_v23  ;;  %v1914_v34 = vadd.f32 %v1913_v32, %v1912_v24 }
 0x575   : > { %v1908_v35 = vrot.slane %v1907_v33, 2  ;;  %v1915_v36 = vrot.slane %v1914_v34, 2 }
 0x577   : > { %v1909_v37 = vadd.f32 %v1908_v35, %v1907_v33  ;;  %v1916_v38 = vadd.f32 %v1915_v36, %v1914_v34 }
 0x579   : > { %v1910_v41 = vrot.slane %v1909_v37, 1  ;;  %v1917_v10 = vrot.slane %v1916_v38, 1 }
 0x57b   : > { %v1911_v46 = vadd.f32 %v1910_v41, %v1909_v37  ;;  %v1918_v5 = vadd.f32 %v1917_v10, %v1916_v38 }
 0x57d   : > { %v1919_v9 = vsel %vm4686_vm8, %v1911_v46, 0.0  ;;  %v1920_v11 = vsel %vm4687_vm9, %v1918_v5, 0.0 }
 0x57e   : > { %v1921_v47 = vadd.f32 %v1920_v11, %v1919_v9 }
 0x580   : > { %1922 = vadd.xlane.f32.xlu1 %v1921_v47 }
 0x5f3   : > { %v1923_v48 = vpop.xlane.xlu1 %1922 }
 0x5f4   : > { %v1924_v49 = vrot.slane %v1923_v48, 4 }
 0x5f6   : > { %v1925_v50 = vadd.f32 %v1924_v49, %v1923_v48 }
 0x5f8   : > { %v1926_v51 = vrot.slane %v1925_v50, 2 }
 0x5fa   : > { %v1927_v52 = vadd.f32 %v1926_v51, %v1925_v50 }
 0x5fc   : > { %v1928_v53 = vrot.slane %v1927_v52, 1 }
 0x5fe   : > { %v1929_v54 = vadd.f32 %v1928_v53, %v1927_v52 }
 0x600   : > { %3614 = vpush %v1929_v54 }
 0x631   : > { %s3615_s3 = spop %3614 }
 0x632   : > { %s1931_s4 = smul.f32 0.0009765625, %s3615_s3 }
 0x634   : > { %s1932_s20 = sadd.f32 1e-05, %s1931_s4 }
 0x636   : > { %v1933_v55 = vstv %s1932_s20 }
 0x637   : > { %3692 = vrsqrt.f32 %v1933_v55  ;;  %vm1940_vm14 = vweird.f32 %v1933_v55 }
 0x63d   : > { %v3693_v56 = vpop.eup %3692 }
 0x63e   : > { %v1935_v59 = vmul.f32 %v3693_v56, %v1933_v55  ;;  %vm1941_vm10 = vweird.f32 %v3693_v56 }
 0x63f   : > { %vm1942_vm15 = vmor %vm1940_vm14, %vm1941_vm10  ;;  %vm4688_vm10 = vcmp.lt.s32.totalorder %v3951_v27, 112 }
 0x640   : > { %v1936_v60 = vmul.f32 %v3693_v56, %v1935_v59  ;;  %vm4689_vm14 = vmmov %vm4688_vm10 }
 0x642   : > { %v1937_v61 = vmul.f32 0.5, %v1936_v60 }
 0x644   : > { %v1938_v62 = vsub.f32 1.5, %v1937_v61 }
 0x646   : > { %v1939_v63 = vmul.f32 %v3693_v56, %v1938_v62 }
 0x648   : > { %v1943_v0 = vsel %vm1942_vm15, %v3693_v56, %v1939_v63  ;;  %vm4690_vm15 = vcmp.lt.s32.totalorder %v3951_v27, 111 }
 0x649   : > { %3616 = vpush %v1943_v0 }
 0x67a   : > { %s3617_s27 = spop %3616 }
 0x67b   : > { %v1945_v2 = vstv %s3617_s27 }
 0x67c   : > { %v1946_v14 = vmul.f32 %v1945_v2, %v1901_v21  ;;  %v1947_v3 = vmul.f32 %v1945_v2, %v1902_v12 }
 0x67e   : > { %v1954_v4 = vmul.f32 %v1952_v1, %v1946_v14  ;;  %v1955_v15 = vmul.f32 %v1952_v1, %v1947_v3 }
 0x680   : > { %v1963_v19 = vadd.f32 %v1960_v16, %v1955_v15  ;;  %v1962_v20 = vadd.f32 %v1960_v16, %v1954_v4 }
 0x682   : > { %v1966_v22 = vrot.slane %v1963_v19, 4 }
 0x684   : > { %v1967_v13 = vsel %vm571_vm1, %v1962_v20, %v1966_v22 }
 0x685   : > { %v1969_v23 = vadd.f32 %v1967_v13, %v3920_v6 }
 0x687   : > { %v1971_v24 = vmul.f32 0.70710677, %v1969_v23  ;;  %v1970_v62 = vmul.f32 0.5, %v1969_v23 }
 0x689   : > { %v1974_v29 = vand.u32 2147483647, %v1971_v24  ;;  %vm1972_vm9 = vcmp.ge.f32.partialorder %v1971_v24, 0.0 }
 0x68a   : > { %v1973_v60 = vsel %vm1972_vm9, 1.0, %v3783_v25 }
 0x68b   : > { %v1975_v32 = vmul.f32 0.3275911, %v1974_v29  ;;  %v2001_v6 = vsub.f32 0.0, %v1974_v29 }
 0x68d   : > { %v1976_v33 = vadd.f32 1.0, %v1975_v32  ;;  %v2002_v11 = vmul.f32 %v2001_v6, %v1974_v29 }
 0x68f   : > { %3694 = vrcp.f32 %v1976_v33  ;;  %v1988_v21 = vand.u32 2147483648, %v1976_v33  ;;  %v1986_v37 = vand.u32 2147483647, %v1976_v33  ;;  %vm1982_vm12 = vweird.f32 %v1976_v33 }
 0x690   : > { %v2003_v49 = vmul.f32 1.442695, %v2002_v11 }
 0x691   : > { %v1989_v41 = vor.u32 1.1754944e-38, %v1988_v21  ;;  %vm1987_vm8 = vcmp.eq.f32.partialorder %v1986_v37, 8.507059e+37 }
 0x692   : > { %3696 = vpow2.f32 %v2003_v49 }
 0x695   : > { %v3695_v34 = vpop.eup %3694 }
 0x696   : > { %v1978_v35 = vmul.f32 %v3695_v34, %v1976_v33  ;;  %vm1983_vm11 = vweird.f32 %v3695_v34 }
 0x697   : > { %vm1984_vm13 = vmor %vm1982_vm12, %vm1983_vm11 }
 0x698   : > { %v1979_v36 = vsub.f32 1.0, %v1978_v35  ;;  %v3697_v55 = vpop.eup %3696  ;;  %vm4691_vm11 = vmmov %vm4690_vm15 }
 0x69a   : > { %v1980_v12 = vmul.f32 %v3695_v34, %v1979_v36 }
 0x69c   : > { %v1981_v38 = vadd.f32 %v3695_v34, %v1980_v12 }
 0x69e   : > { %v1985_v10 = vsel %vm1984_vm13, %v3695_v34, %v1981_v38 }
 0x69f   : > { %v1990_v46 = vsel %vm1987_vm8, %v1989_v41, %v1985_v10  ;;  %v2024_v10 = vld [vmem:[%s4624_s8] sm:$0xff] }
 0x6a0   : > { %v1992_v5 = vmul.f32 1.0614054, %v1990_v46 }
 0x6a2   : > { %v1993_v9 = vadd.f32 -1.4531521, %v1992_v5 }
 0x6a4   : > { %v1994_v47 = vmul.f32 %v1993_v9, %v1990_v46 }
 0x6a6   : > { %v1995_v48 = vadd.f32 1.4214138, %v1994_v47 }
 0x6a8   : > { %v1996_v50 = vmul.f32 %v1995_v48, %v1990_v46  ;;  %v3529_v48 = vld [vmem:[%s4624_s8 + $0x8] sm:$0xff] }
 0x6aa   : > { %v1997_v51 = vadd.f32 -0.28449672, %v1996_v50 }
 0x6ac   : > { %v1998_v52 = vmul.f32 %v1997_v51, %v1990_v46 }
 0x6ae   : > { %v1999_v53 = vadd.f32 0.2548296, %v1998_v52 }
 0x6b0   : > { %v2000_v54 = vmul.f32 %v1999_v53, %v1990_v46 }
 0x6b2   : > { %v2005_v56 = vmul.f32 %v3697_v55, %v2000_v54  ;;  %v3538_v55 = vld [vmem:[%s4624_s8 + $0x10] sm:$0xff] }
 0x6b4   : > { %v2006_v59 = vsub.f32 1.0, %v2005_v56 }
 0x6b6   : > { %v2007_v61 = vmul.f32 %v2006_v59, %v1973_v60  ;;  %v3548_v59 = vld [vmem:[%s4624_s8 + $0x20] sm:$0xff] }
 0x6b8   : > { %v2008_v63 = vadd.f32 1.0, %v2007_v61 }
 0x6ba   : > { %v2009_v0 = vmul.f32 %v2008_v63, %v1970_v62 }
 0x6bc   : > { %2011 = vst [vmem:[#allocation1] ss:$2 sm:$0xff] %v2009_v0 }
 0x6c3   : > { %v2012_v1 = vld.sshfl [vmem:[#allocation1] sm:$0xff pattern:$0x75316420]  ;;  %v2013_v2 = vld.sshfl [vmem:[#allocation1 + $0x8] sm:$0xff pattern:$0x75316420] }
 0x6c4   : > { %2016 = vrot.lane.b32.xlu0 %v2012_v1, %s4674_s16  ;;  %2025 = vst [vmem:[#allocation1] ss:$2 sm:$0xff] %v2009_v0 }
 0x6cb   : > { %v2027_v14 = vld.sshfl [vmem:[#allocation1 + $0x8] sm:$0xff pattern:$0x75316420]  ;;  %v2026_v3 = vld.sshfl [vmem:[#allocation1] sm:$0xff pattern:$0x75316420] }
 0x6cc   : > { %2018 = vrot.lane.b32.xlu0 %v2013_v2, %s4674_s16  ;;  %2032 = vrot.lane.b32.xlu2 %v2027_v14, %s4670_s17  ;;  %2138 = vst [vmem:[#allocation1] ss:$2 sm:$0xff] %v2009_v0 }
 0x6d3   : > { %v2139_v4 = vld.sshfl [vmem:[#allocation1] sm:$0xff pattern:$0x75316420]  ;;  %v2140_v15 = vld.sshfl [vmem:[#allocation1 + $0x8] sm:$0xff pattern:$0x75316420] }
 0x6d4   : > { %2030 = vrot.lane.b32.xlu0 %v2026_v3, %s4670_s17  ;;  %2143 = vrot.lane.b32.xlu1 %v2139_v4, %s4669_s0  ;;  %2204 = vst [vmem:[#allocation1] ss:$2 sm:$0xff] %v2009_v0 }
 0x6db   : > { %v2205_v16 = vld.sshfl [vmem:[#allocation1] sm:$0xff pattern:$0x75316420]  ;;  %v2206_v19 = vld.sshfl [vmem:[#allocation1 + $0x8] sm:$0xff pattern:$0x75316420] }
 0x6dc   : > { %2145 = vrot.lane.b32.xlu0 %v2140_v15, %s4669_s0  ;;  %2272 = vst [vmem:[#allocation1] ss:$2 sm:$0xff] %v2009_v0 }
 0x6e3   : > { %v2273_v20 = vld.sshfl [vmem:[#allocation1] sm:$0xff pattern:$0x75316420]  ;;  %v2274_v22 = vld.sshfl [vmem:[#allocation1 + $0x8] sm:$0xff pattern:$0x75316420] }
 0x6e4   : > { %2209 = vrot.lane.b32.xlu0 %v2205_v16, %s4671_s23  ;;  %2324 = vst [vmem:[#allocation1] ss:$2 sm:$0xff] %v2009_v0  ;;  %v3543_v16 = vld [vmem:[%s4624_s8 + $0x18] sm:$0xff] }
 0x6eb   : > { %v2326_v13 = vld.sshfl [vmem:[#allocation1 + $0x8] sm:$0xff pattern:$0x75316420]  ;;  %v2325_v23 = vld.sshfl [vmem:[#allocation1] sm:$0xff pattern:$0x75316420] }
 0x6ec   : > { %2211 = vrot.lane.b32.xlu0 %v2206_v19, %s4671_s23  ;;  %2331 = vrot.lane.b32.xlu1 %v2326_v13, %s4673_s26  ;;  %2390 = vst [vmem:[#allocation1] ss:$2 sm:$0xff] %v2009_v0 }
 0x6ed   : > { %2329 = vrot.lane.b32.xlu2 %v2325_v23, %s4673_s26 }
 0x6f3   : > { %v2392_v24 = vld.sshfl [vmem:[#allocation1 + $0x8] sm:$0xff pattern:$0x75316420]  ;;  %v2391_v29 = vld.sshfl [vmem:[#allocation1] sm:$0xff pattern:$0x75316420] }
 0x6f4   : > { %2395 = vrot.lane.b32.xlu0 %v2391_v29, %s4672_s25  ;;  %2456 = vst [vmem:[#allocation1] ss:$2 sm:$0xff] %v2009_v0  ;;  %v3553_v29 = vld [vmem:[%s4624_s8 + $0x28] sm:$0xff] }
 0x6f5   : > { %2397 = vrot.lane.b32.xlu2 %v2392_v24, %s4672_s25 }
 0x6fb   : > { %v2458_v32 = vld.sshfl [vmem:[#allocation1 + $0x8] sm:$0xff pattern:$0x75316420]  ;;  %v2457_v33 = vld.sshfl [vmem:[#allocation1] sm:$0xff pattern:$0x75316420] }
 0x6fc   : > { %2463 = vrot.lane.b32.xlu0 %v2458_v32, %s4676_s2  ;;  %2461 = vrot.lane.b32.xlu1 %v2457_v33, %s4676_s2  ;;  %2522 = vst [vmem:[#allocation1] ss:$2 sm:$0xff] %v2009_v0  ;;  %v3558_v32 = vld [vmem:[%s4624_s8 + $0x30] sm:$0xff] }
 0x703   : > { %v2524_v34 = vld.sshfl [vmem:[#allocation1 + $0x8] sm:$0xff pattern:$0x75316420]  ;;  %v2523_v35 = vld.sshfl [vmem:[#allocation1] sm:$0xff pattern:$0x75316420] }
 0x704   : > { %2529 = vrot.lane.b32.xlu1 %v2524_v34, %s4675_s1  ;;  %2527 = vrot.lane.b32.xlu2 %v2523_v35, %s4675_s1 }
 0x726   : > { %v2033_v46 = vpop.permute.xlu2 %2032 }
 0x736   : > { %v2017_v36 = vpop.permute.xlu0 %2016 }
 0x73e   : > { %v2019_v21 = vpop.permute.xlu0 %2018 }
 0x73f   : > { %v2020_v12 = vsel %vm532_vm0, %v2017_v36, %v2019_v21  ;;  %v2021_v37 = vsel %vm532_vm0, %v2019_v21, %v2017_v36 }
 0x740   : > { %v2022_v38 = vmul.f32 %v2021_v37, %v3957_v30  ;;  %v2023_v41 = vmul.f32 %v2020_v12, %v3959_v31  ;;  %v3563_v37 = vld [vmem:[%s4624_s8 + $0x38] sm:$0xff] }
 0x742   : > { %3534 = vmatpush.msk.msrb.mxu2 %vm571_vm1, %v2022_v38  ;;  %3536 = vmatpush.msk.msrb.mxu3 %vm571_vm1, %v2023_v41 }
 0x743   : > { %3535 = vmatmul.msk.f32.vlgmr.msrb.gmra.mxu2 %vm567_vm2, %v2024_v10  ;;  %3537 = vmatmul.msk.f32.vlgmr.msrb.gmra.mxu3 %vm567_vm2, %v2024_v10 }
 0x746   : > { %v2031_v6 = vpop.permute.xlu0 %2030  ;;  %v2144_v49 = vpop.permute.xlu1 %2143 }
 0x747   : > { %v2034_v5 = vsel %vm553_vm4, %v2031_v6, %v2033_v46  ;;  %v2035_v9 = vsel %vm553_vm4, %v2033_v46, %v2031_v6  ;;  %v2330_v60 = vpop.permute.xlu2 %2329 }
 0x748   : > { %v2036_v11 = vmul.f32 %v2035_v9, %v3982_v42  ;;  %v2037_v47 = vmul.f32 %v2034_v5, %v3984_v43  ;;  %v3568_v9 = vld [vmem:[%s4624_s8 + $0x40] sm:$0xff] }
 0x74a   : > { %3530 = vmatpush.msk.msrb.mxu0 %vm571_vm1, %v2036_v11  ;;  %3532 = vmatpush.msk.msrb.mxu1 %vm571_vm1, %v2037_v47 }
 0x74b   : > { %3531 = vmatmul.msk.f32.vlgmr.msrb.gmra.mxu0 %vm567_vm2, %v3529_v48  ;;  %3533 = vmatmul.msk.f32.vlgmr.msrb.gmra.mxu1 %vm567_vm2, %v3529_v48 }
 0x74e   : > { %v2146_v50 = vpop.permute.xlu0 %2145 }
 0x74f   : > { %v2147_v51 = vsel %vm676_vm3, %v2144_v49, %v2146_v50  ;;  %v2148_v52 = vsel %vm676_vm3, %v2146_v50, %v2144_v49  ;;  %v2398_v19 = vpop.permute.xlu2 %2397 }
 0x750   : > { %v2149_v53 = vmul.f32 %v2148_v52, %v3986_v44  ;;  %v2150_v54 = vmul.f32 %v2147_v51, %v3988_v45 }
 0x752   : > { %3539 = vmatpush.msk.msra.mxu0 %vm571_vm1, %v2149_v53  ;;  %3541 = vmatpush.msk.msra.mxu1 %vm571_vm1, %v2150_v54 }
 0x753   : > { %3540 = vmatmul.msk.f32.vlgmr.msra.gmra.mxu0 %vm567_vm2, %v3538_v55  ;;  %3542 = vmatmul.msk.f32.vlgmr.msra.gmra.mxu1 %vm567_vm2, %v3538_v55 }
 0x754   : > { %3549 = vmatpush.msk.msrb.mxu0 %vm571_vm1, %v2273_v20  ;;  %3551 = vmatpush.msk.msrb.mxu1 %vm571_vm1, %v2274_v22 }
 0x756   : > { %v2210_v56 = vpop.permute.xlu0 %2209 }
 0x75b   : > { %3550 = vmatmul.msk.f32.vlgmr.msrb.gmra.mxu0 %vm567_vm2, %v3548_v59  ;;  %3552 = vmatmul.msk.f32.vlgmr.msrb.gmra.mxu1 %vm567_vm2, %v3548_v59 }
 0x75e   : > { %v2212_v61 = vpop.permute.xlu0 %2211  ;;  %v2332_v62 = vpop.permute.xlu1 %2331 }
 0x75f   : > { %v2213_v63 = vsel %vm750_vm5, %v2210_v56, %v2212_v61  ;;  %v2214_v0 = vsel %vm750_vm5, %v2212_v61, %v2210_v56  ;;  %v2333_v1 = vsel %vm878_vm6, %v2330_v60, %v2332_v62  ;;  %v2334_v2 = vsel %vm878_vm6, %v2332_v62, %v2330_v60  ;;  %v2528_v38 = vpop.permute.xlu2 %2527 }
 0x760   : > { %v2215_v14 = vmul.f32 %v2214_v0, %v4013_v57  ;;  %v2216_v3 = vmul.f32 %v2213_v63, %v4015_v58  ;;  %v2335_v4 = vmul.f32 %v2333_v1, %v4050_v7  ;;  %v2336_v15 = vmul.f32 %v2334_v2, %v4052_v8 }
 0x762   : > { %3544 = vmatpush.msk.msra.mxu2 %vm571_vm1, %v2215_v14  ;;  %3546 = vmatpush.msk.msra.mxu3 %vm571_vm1, %v2216_v3 }
 0x763   : > { %3545 = vmatmul.msk.f32.vlgmr.msra.gmra.mxu2 %vm567_vm2, %v3543_v16  ;;  %3547 = vmatmul.msk.f32.vlgmr.msra.gmra.mxu3 %vm567_vm2, %v3543_v16 }
 0x764   : > { %3554 = vmatpush.msk.msrb.mxu2 %vm571_vm1, %v2335_v4  ;;  %3556 = vmatpush.msk.msrb.mxu3 %vm571_vm1, %v2336_v15 }
 0x766   : > { %v2396_v20 = vpop.permute.xlu0 %2395 }
 0x767   : > { %v2399_v22 = vsel %vm952_vm7, %v2396_v20, %v2398_v19  ;;  %v2400_v13 = vsel %vm952_vm7, %v2398_v19, %v2396_v20 }
 0x768   : > { %v2401_v23 = vmul.f32 %v2399_v22, %v4071_v17  ;;  %v2402_v24 = vmul.f32 %v2400_v13, %v4073_v18 }
 0x76a   : > { %3559 = vmatpush.msk.msra.mxu0 %vm571_vm1, %v2401_v23  ;;  %3561 = vmatpush.msk.msra.mxu1 %vm571_vm1, %v2402_v24 }
 0x76b   : > { %3555 = vmatmul.msk.f32.vlgmr.msrb.gmra.mxu2 %vm567_vm2, %v3553_v29  ;;  %3557 = vmatmul.msk.f32.vlgmr.msrb.gmra.mxu3 %vm567_vm2, %v3553_v29 }
 0x76c   : > { %3560 = vmatmul.msk.f32.vlgmr.msra.gmra.mxu0 %vm567_vm2, %v3558_v32  ;;  %3562 = vmatmul.msk.f32.vlgmr.msra.gmra.mxu1 %vm567_vm2, %v3558_v32 }
 0x76e   : > { %v2464_v33 = vpop.permute.xlu0 %2463  ;;  %v2462_v34 = vpop.permute.xlu1 %2461 }
 0x76f   : > { %v2465_v35 = vsel %vm4688_vm10, %v2462_v34, %v2464_v33  ;;  %v2466_v36 = vsel %vm4689_vm14, %v2464_v33, %v2462_v34 }
 0x770   : > { %v2467_v21 = vmul.f32 %v2465_v35, %v4092_v26  ;;  %v2468_v12 = vmul.f32 %v2466_v36, %v4094_v28 }
 0x772   : > { %3564 = vmatpush.msk.msra.mxu2 %vm571_vm1, %v2467_v21  ;;  %3566 = vmatpush.msk.msra.mxu3 %vm571_vm1, %v2468_v12 }
 0x773   : > { %3565 = vmatmul.msk.f32.vlgmr.msra.gmra.mxu2 %vm567_vm2, %v3563_v37  ;;  %3567 = vmatmul.msk.f32.vlgmr.msra.gmra.mxu3 %vm567_vm2, %v3563_v37 }
 0x776   : > { %v2530_v41 = vpop.permute.xlu1 %2529 }
 0x777   : > { %v2531_v10 = vsel %vm4690_vm15, %v2528_v38, %v2530_v41  ;;  %v2532_v46 = vsel %vm4691_vm11, %v2530_v41, %v2528_v38 }
 0x778   : > { %v2533_v6 = vmul.f32 %v2531_v10, %v4113_v39  ;;  %v2534_v5 = vmul.f32 %v2532_v46, %v4115_v40 }
 0x77a   : > { %3569 = vmatpush.msk.msrb.mxu0 %vm571_vm1, %v2533_v6  ;;  %3571 = vmatpush.msk.msrb.mxu1 %vm571_vm1, %v2534_v5  ;;  %vm4692_vm1 = vcmask 1040384  }
 0x77b   : > { %3570 = vmatmul.msk.f32.vlgmr.msrb.gmra.mxu0 %vm567_vm2, %v3568_v9  ;;  %3572 = vmatmul.msk.f32.vlgmr.msrb.gmra.mxu1 %vm567_vm2, %v3568_v9  ;;  %vm4693_vm2 = vmmov %vm4692_vm1 }
 0x77c   : > { %vm4694_vm12 = vmmov %vm4692_vm1 }
 0x77d   : > { %vm4695_vm13 = vmmov %vm4692_vm1 }
 0x7c6   : > { %v2115_v50 = vpop.f32.mrf.mxu2  ;;  %v2135_v51 = vpop.f32.mrf.mxu3 }
 0x7c8   : > { %v2066_v11 = vpop.f32.mrf.mxu0  ;;  %v2086_v47 = vpop.f32.mrf.mxu1 }
 0x7c9   : > { %v2116_v54 = vadd.f32 %v2115_v50, %v2066_v11  ;;  %v2136_v55 = vadd.f32 %v2135_v51, %v2086_v47 }
 0x7d0   : > { %v2179_v48 = vpop.f32.mrf.mxu0  ;;  %v2199_v49 = vpop.f32.mrf.mxu1 }
 0x7d1   : > { %v2202_v60 = vadd.f32 %v2179_v48, %v2116_v54  ;;  %v2203_v61 = vadd.f32 %v2199_v49, %v2136_v55 }
 0x7d8   : > { %v2299_v52 = vpop.f32.mrf.mxu0  ;;  %v2319_v53 = vpop.f32.mrf.mxu1 }
 0x7e6   : > { %v2245_v56 = vpop.f32.mrf.mxu2  ;;  %v2265_v59 = vpop.f32.mrf.mxu3 }
 0x7e7   : > { %v2268_v62 = vadd.f32 %v2245_v56, %v2202_v60  ;;  %v2269_v63 = vadd.f32 %v2265_v59, %v2203_v61 }
 0x7e9   : > { %v2431_v0 = vpop.f32.mrf.mxu0  ;;  %v2451_v1 = vpop.f32.mrf.mxu1  ;;  %v2322_v3 = vadd.f32 %v2299_v52, %v2268_v62  ;;  %v2323_v4 = vadd.f32 %v2319_v53, %v2269_v63 }
 0x7ee   : > { %v2365_v2 = vpop.f32.mrf.mxu2  ;;  %v2385_v14 = vpop.f32.mrf.mxu3 }
 0x7ef   : > { %v2388_v15 = vadd.f32 %v2365_v2, %v2322_v3  ;;  %v2389_v16 = vadd.f32 %v2385_v14, %v2323_v4 }
 0x7f1   : > { %v2454_v19 = vadd.f32 %v2431_v0, %v2388_v15  ;;  %v2455_v20 = vadd.f32 %v2451_v1, %v2389_v16 }
 0x7f6   : > { %v2497_v22 = vpop.f32.mrf.mxu2  ;;  %v2517_v13 = vpop.f32.mrf.mxu3 }
 0x7f7   : > { %v2520_v23 = vadd.f32 %v2497_v22, %v2454_v19  ;;  %v2521_v24 = vadd.f32 %v2517_v13, %v2455_v20 }
 0x7f8   : > { %v2563_v29 = vpop.f32.mrf.mxu0  ;;  %v2583_v32 = vpop.f32.mrf.mxu1 }
 0x7f9   : > { %v2586_v33 = vadd.f32 %v2563_v29, %v2520_v23  ;;  %v2587_v34 = vadd.f32 %v2583_v32, %v2521_v24  ;;  %v2659_v29 = vld [vmem:[%s4625_s9] sm:$0xff] }
 0x7fa   : > { %2662 = vperm.xlu1 %3680, %v2659_v29   ;;  %v2667_v32 = vld [vmem:[%s4626_s10] sm:$0xff] }
 0x7fb   : > { %v2588_v35 = vrot.slane %v2586_v33, 4  ;;  %v2594_v36 = vrot.slane %v2587_v34, 4 }
 0x7fd   : > { %v2589_v21 = vadd.f32 %v2588_v35, %v2586_v33  ;;  %v2595_v12 = vadd.f32 %v2594_v36, %v2587_v34 }
 0x7ff   : > { %v2590_v37 = vrot.slane %v2589_v21, 2  ;;  %v2596_v38 = vrot.slane %v2595_v12, 2 }
 0x801   : > { %v2591_v41 = vadd.f32 %v2590_v37, %v2589_v21  ;;  %v2597_v10 = vadd.f32 %v2596_v38, %v2595_v12 }
 0x802   : > { %2670 = vperm.xlu1 %3680, %v2667_v32  }
 0x803   : > { %v2592_v46 = vrot.slane %v2591_v41, 1  ;;  %v2598_v6 = vrot.slane %v2597_v10, 1 }
 0x805   : > { %v2593_v5 = vadd.f32 %v2592_v46, %v2591_v41  ;;  %v2599_v9 = vadd.f32 %v2598_v6, %v2597_v10 }
 0x807   : > { %v2600_v11 = vsel %vm4692_vm1, %v2593_v5, 0.0  ;;  %v2601_v47 = vsel %vm4693_vm2, %v2599_v9, 0.0 }
 0x808   : > { %v2602_v48 = vadd.f32 %v2601_v47, %v2600_v11 }
 0x80a   : > { %2603 = vadd.xlane.f32.xlu0 %v2602_v48 }
 0x86c   : > { %v2663_v47 = vpop.permute.xlu1 %2662 }
 0x87d   : > { %v2604_v49 = vpop.xlane.xlu0 %2603 }
 0x87e   : > { %v2605_v50 = vrot.slane %v2604_v49, 4 }
 0x880   : > { %v2606_v51 = vadd.f32 %v2605_v50, %v2604_v49 }
 0x882   : > { %v2607_v52 = vrot.slane %v2606_v51, 2 }
 0x884   : > { %v2608_v53 = vadd.f32 %v2607_v52, %v2606_v51 }
 0x886   : > { %v2609_v54 = vrot.slane %v2608_v53, 1 }
 0x888   : > { %v2610_v55 = vadd.f32 %v2609_v54, %v2608_v53  ;;  %v2671_v53 = vpop.permute.xlu1 %2670 }
 0x88a   : > { %3618 = vpush %v2610_v55 }
 0x8bb   : > { %s3619_s20 = spop %3618 }
 0x8bc   : > { %s2612_s27 = smul.f32 0.00048828125, %s3619_s20 }
 0x8be   : > { %v2613_v56 = vstv %s2612_s27 }
 0x8bf   : > { %v2614_v59 = vsub.f32 %v2586_v33, %v2613_v56  ;;  %v2615_v60 = vsub.f32 %v2587_v34, %v2613_v56 }
 0x8c1   : > { %v2616_v61 = vmul.f32 %v2614_v59, %v2614_v59  ;;  %v2617_v62 = vmul.f32 %v2615_v60, %v2615_v60 }
 0x8c3   : > { %v2618_v63 = vrot.slane %v2616_v61, 4  ;;  %v2624_v0 = vrot.slane %v2617_v62, 4 }
 0x8c5   : > { %v2619_v1 = vadd.f32 %v2618_v63, %v2616_v61  ;;  %v2625_v2 = vadd.f32 %v2624_v0, %v2617_v62 }
 0x8c7   : > { %v2620_v14 = vrot.slane %v2619_v1, 2  ;;  %v2626_v3 = vrot.slane %v2625_v2, 2 }
 0x8c9   : > { %v2621_v4 = vadd.f32 %v2620_v14, %v2619_v1  ;;  %v2627_v15 = vadd.f32 %v2626_v3, %v2625_v2 }
 0x8cb   : > { %v2622_v16 = vrot.slane %v2621_v4, 1  ;;  %v2628_v19 = vrot.slane %v2627_v15, 1 }
 0x8cd   : > { %v2623_v20 = vadd.f32 %v2622_v16, %v2621_v4  ;;  %v2629_v22 = vadd.f32 %v2628_v19, %v2627_v15 }
 0x8cf   : > { %v2630_v13 = vsel %vm4694_vm12, %v2623_v20, 0.0  ;;  %v2631_v23 = vsel %vm4695_vm13, %v2629_v22, 0.0 }
 0x8d0   : > { %v2632_v24 = vadd.f32 %v2631_v23, %v2630_v13 }
 0x8d2   : > { %2633 = vadd.xlane.f32.xlu2 %v2632_v24 }
 0x945   : > { %v2634_v33 = vpop.xlane.xlu2 %2633 }
 0x946   : > { %v2635_v34 = vrot.slane %v2634_v33, 4 }
 0x948   : > { %v2636_v35 = vadd.f32 %v2635_v34, %v2634_v33 }
 0x94a   : > { %v2637_v36 = vrot.slane %v2636_v35, 2 }
 0x94c   : > { %v2638_v21 = vadd.f32 %v2637_v36, %v2636_v35 }
 0x94e   : > { %v2639_v12 = vrot.slane %v2638_v21, 1 }
 0x950   : > { %v2640_v37 = vadd.f32 %v2639_v12, %v2638_v21 }
 0x952   : > { %3620 = vpush %v2640_v37 }
 0x983   : > { %s3621_s5 = spop %3620 }
 0x984   : > { %s2642_s6 = smul.f32 0.00048828125, %s3621_s5 }
 0x986   : > { %s2643_s7 = sadd.f32 1e-05, %s2642_s6 }
 0x988   : > { %v2644_v38 = vstv %s2643_s7 }
 0x989   : > { %3698 = vrsqrt.f32 %v2644_v38  ;;  %vm2651_vm9 = vweird.f32 %v2644_v38 }
 0x98f   : > { %v3699_v41 = vpop.eup %3698 }
 0x990   : > { %v2646_v10 = vmul.f32 %v3699_v41, %v2644_v38  ;;  %vm2652_vm8 = vweird.f32 %v3699_v41 }
 0x991   : > { %vm2653_vm10 = vmor %vm2651_vm9, %vm2652_vm8 }
 0x992   : > { %v2647_v46 = vmul.f32 %v3699_v41, %v2646_v10 }
 0x994   : > { %v2648_v6 = vmul.f32 0.5, %v2647_v46 }
 0x996   : > { %v2649_v5 = vsub.f32 1.5, %v2648_v6 }
 0x998   : > { %v2650_v9 = vmul.f32 %v3699_v41, %v2649_v5 }
 0x99a   : > { %v2654_v11 = vsel %vm2653_vm10, %v3699_v41, %v2650_v9 }
 0x99b   : > { %3622 = vpush %v2654_v11 }
 0x9cc   : > { %s3623_s3 = spop %3622 }
 0x9cd   : > { %v2656_v48 = vstv %s3623_s3 }
 0x9ce   : > { %v2657_v49 = vmul.f32 %v2656_v48, %v2614_v59  ;;  %v2658_v50 = vmul.f32 %v2656_v48, %v2615_v60 }
 0x9d0   : > { %v2665_v51 = vmul.f32 %v2663_v47, %v2657_v49  ;;  %v2666_v52 = vmul.f32 %v2663_v47, %v2658_v50 }
 0x9d2   : > { %v4443_v54 = vadd.f32 %v2671_v53, %v2665_v51  ;;  %v4445_v55 = vadd.f32 %v2671_v53, %v2666_v52 }
 0x9d4   : > { %v4448_v56 = vmul.f32 0.70710677, %v4443_v54  ;;  %v4451_v61 = vmul.f32 0.70710677, %v4445_v55 }
 0x9d6   : > { %v2683_v62 = vand.u32 2147483647, %v4448_v56  ;;  %v2684_v63 = vand.u32 2147483647, %v4451_v61  ;;  %vm2679_vm9 = vcmp.ge.f32.partialorder %v4448_v56, 0.0  ;;  %vm2680_vm10 = vcmp.ge.f32.partialorder %v4451_v61, 0.0 }
 0x9d8   : > { %v2685_v0 = vmul.f32 0.3275911, %v2683_v62  ;;  %v2686_v59 = vmul.f32 0.3275911, %v2684_v63  ;;  %v2737_v12 = vsub.f32 0.0, %v2683_v62  ;;  %v2738_v41 = vsub.f32 0.0, %v2684_v63 }
 0x9da   : > { %v2687_v60 = vadd.f32 1.0, %v2685_v0  ;;  %v2688_v1 = vadd.f32 1.0, %v2686_v59  ;;  %v2739_v5 = vmul.f32 %v2737_v12, %v2683_v62  ;;  %v2740_v11 = vmul.f32 %v2738_v41, %v2684_v63 }
 0x9dc   : > { %3700 = vrcp.f32 %v2687_v60  ;;  %v2700_v16 = vand.u32 2147483648, %v2687_v60  ;;  %v2698_v22 = vand.u32 2147483647, %v2687_v60  ;;  %v2715_v13 = vand.u32 2147483648, %v2688_v1 }
 0x9dd   : > { %3702 = vrcp.f32 %v2688_v1  ;;  %v2713_v24 = vand.u32 2147483647, %v2688_v1  ;;  %vm2694_vm11 = vweird.f32 %v2687_v60  ;;  %vm2709_vm2 = vweird.f32 %v2688_v1 }
 0x9de   : > { %v2701_v32 = vor.u32 1.1754944e-38, %v2700_v16  ;;  %vm2699_vm12 = vcmp.eq.f32.partialorder %v2698_v22, 8.507059e+37  ;;  %v2716_v35 = vor.u32 1.1754944e-38, %v2715_v13  ;;  %v2741_v50 = vmul.f32 1.442695, %v2739_v5  ;;  %v3578_v5 = vld [vmem:[%s4627_s11 + $0x10] sm:$0xff] }
 0x9df   : > { %vm2714_vm8 = vcmp.eq.f32.partialorder %v2713_v24, 8.507059e+37  ;;  %v2743_v52 = vmul.f32 1.442695, %v2740_v11  ;;  %v2682_v13 = vsel %vm2680_vm10, 1.0, %v3783_v25 }
 0x9e0   : > { %3704 = vpow2.f32 %v2741_v50  ;;  %v3584_v50 = vld [vmem:[%s4627_s11 + $0x20] sm:$0xff] }
 0x9e1   : > { %3706 = vpow2.f32 %v2743_v52 }
 0x9e2   : > { %v3701_v2 = vpop.eup %3700 }
 0x9e3   : > { %v3703_v14 = vpop.eup %3702  ;;  %v2690_v3 = vmul.f32 %v3701_v2, %v2687_v60  ;;  %vm2695_vm14 = vweird.f32 %v3701_v2 }
 0x9e4   : > { %v2705_v4 = vmul.f32 %v3703_v14, %v2688_v1  ;;  %vm2710_vm15 = vweird.f32 %v3703_v14  ;;  %vm2696_vm1 = vmor %vm2694_vm11, %vm2695_vm14  ;;  %vm2774_vm14 = vcmask 64512  }
 0x9e5   : > { %v2691_v15 = vsub.f32 1.0, %v2690_v3  ;;  %vm2711_vm13 = vmor %vm2709_vm2, %vm2710_vm15 }
 0x9e6   : > { %v2706_v19 = vsub.f32 1.0, %v2705_v4  ;;  %v3705_v4 = vpop.eup %3704 }
 0x9e7   : > { %v2692_v20 = vmul.f32 %v3701_v2, %v2691_v15  ;;  %v3707_v15 = vpop.eup %3706 }
 0x9e8   : > { %v2707_v23 = vmul.f32 %v3703_v14, %v2706_v19 }
 0x9e9   : > { %v2693_v29 = vadd.f32 %v3701_v2, %v2692_v20  ;;  %v2681_v20 = vsel %vm2679_vm9, 1.0, %v3783_v25 }
 0x9ea   : > { %v2708_v33 = vadd.f32 %v3703_v14, %v2707_v23 }
 0x9eb   : > { %v2697_v34 = vsel %vm2696_vm1, %v3701_v2, %v2693_v29  ;;  %v2675_v29 = vmul.f32 0.5, %v4443_v54 }
 0x9ec   : > { %v2702_v36 = vsel %vm2699_vm12, %v2701_v32, %v2697_v34  ;;  %v2712_v21 = vsel %vm2711_vm13, %v3703_v14, %v2708_v33  ;;  %v2676_v33 = vmul.f32 0.5, %v4445_v55 }
 0x9ed   : > { %v2717_v37 = vsel %vm2714_vm8, %v2716_v35, %v2712_v21  ;;  %v2719_v38 = vmul.f32 1.0614054, %v2702_v36 }
 0x9ee   : > { %v2720_v10 = vmul.f32 1.0614054, %v2717_v37 }
 0x9ef   : > { %v2721_v46 = vadd.f32 -1.4531521, %v2719_v38 }
 0x9f0   : > { %v2722_v6 = vadd.f32 -1.4531521, %v2720_v10 }
 0x9f1   : > { %v2723_v9 = vmul.f32 %v2721_v46, %v2702_v36 }
 0x9f2   : > { %v2724_v47 = vmul.f32 %v2722_v6, %v2717_v37 }
 0x9f3   : > { %v2725_v48 = vadd.f32 1.4214138, %v2723_v9 }
 0x9f4   : > { %v2726_v49 = vadd.f32 1.4214138, %v2724_v47 }
 0x9f5   : > { %v2727_v51 = vmul.f32 %v2725_v48, %v2702_v36  ;;  %v2763_v48 = vld [vmem:[%s4627_s11] sm:$0xff] }
 0x9f6   : > { %v2728_v53 = vmul.f32 %v2726_v49, %v2717_v37 }
 0x9f7   : > { %v2729_v0 = vadd.f32 -0.28449672, %v2727_v51 }
 0x9f8   : > { %v2730_v59 = vadd.f32 -0.28449672, %v2728_v53 }
 0x9f9   : > { %v2731_v60 = vmul.f32 %v2729_v0, %v2702_v36 }
 0x9fa   : > { %v2732_v1 = vmul.f32 %v2730_v59, %v2717_v37  ;;  %v3581_v59 = vld [vmem:[%s4627_s11 + $0x18] sm:$0xff] }
 0x9fb   : > { %v2733_v2 = vadd.f32 0.2548296, %v2731_v60 }
 0x9fc   : > { %v2734_v14 = vadd.f32 0.2548296, %v2732_v1 }
 0x9fd   : > { %v2735_v3 = vmul.f32 %v2733_v2, %v2702_v36 }
 0x9fe   : > { %v2736_v62 = vmul.f32 %v2734_v14, %v2717_v37  ;;  %v3573_v37 = vld [vmem:[%s4627_s11 + $0x8] sm:$0xff] }
 0x9ff   : > { %v2745_v63 = vmul.f32 %v3705_v4, %v2735_v3 }
 0xa00   : > { %v2746_v16 = vmul.f32 %v3707_v15, %v2736_v62 }
 0xa01   : > { %v2747_v19 = vsub.f32 1.0, %v2745_v63 }
 0xa02   : > { %v2748_v22 = vsub.f32 1.0, %v2746_v16  ;;  %v3590_v16 = vld [vmem:[%s4627_s11 + $0x30] sm:$0xff] }
 0xa03   : > { %v2749_v23 = vmul.f32 %v2747_v19, %v2681_v20  ;;  %v3587_v20 = vld [vmem:[%s4627_s11 + $0x28] sm:$0xff] }
 0xa04   : > { %v2750_v24 = vmul.f32 %v2748_v22, %v2682_v13  ;;  %v3596_v22 = vld [vmem:[%s4627_s11 + $0x40] sm:$0xff] }
 0xa05   : > { %v2751_v32 = vadd.f32 1.0, %v2749_v23 }
 0xa06   : > { %v2752_v34 = vadd.f32 1.0, %v2750_v24 }
 0xa07   : > { %v2753_v35 = vmul.f32 %v2751_v32, %v2675_v29  ;;  %v3593_v32 = vld [vmem:[%s4627_s11 + $0x38] sm:$0xff] }
 0xa08   : > { %v2754_v56 = vmul.f32 %v2752_v34, %v2676_v33 }
 0xa09   : > { %2755 = vrot.lane.b32.xlu2 %v2753_v35, %s4674_s16  ;;  %2764 = vrot.lane.b32.xlu1 %v2753_v35, %s4670_s17 }
 0xa0a   : > { %2863 = vrot.lane.b32.xlu0 %v2754_v56, %s4669_s0 }
 0xa11   : > { %3075 = vrot.lane.b32.xlu2 %v2754_v56, %s4672_s25  ;;  %2766 = vrot.lane.b32.xlu1 %v2754_v56, %s4670_s17 }
 0xa12   : > { %2918 = vrot.lane.b32.xlu0 %v2754_v56, %s4671_s23 }
 0xa19   : > { %3183 = vrot.lane.b32.xlu2 %v2753_v35, %s4675_s1  ;;  %2861 = vrot.lane.b32.xlu1 %v2753_v35, %s4669_s0 }
 0xa1a   : > { %3018 = vrot.lane.b32.xlu0 %v2753_v35, %s4673_s26 }
 0xa21   : > { %3130 = vrot.lane.b32.xlu2 %v2754_v56, %s4676_s2  ;;  %2757 = vrot.lane.b32.xlu1 %v2754_v56, %s4674_s16 }
 0xa22   : > { %3185 = vrot.lane.b32.xlu0 %v2754_v56, %s4675_s1 }
 0xa29   : > { %2916 = vrot.lane.b32.xlu1 %v2753_v35, %s4671_s23 }
 0xa31   : > { %3073 = vrot.lane.b32.xlu1 %v2753_v35, %s4672_s25 }
 0xa39   : > { %3020 = vrot.lane.b32.xlu1 %v2754_v56, %s4673_s26  ;;  %s3430_s26 = sshll.u32 %s3914_s30, 3  ;;  %s498_s30 = sand.u32 1, %s3764_s19  }
 0xa3a   : > { %s509_s20 = scalar_lea.vmem %s4630_s14, %s3430_s26  ;;  %s3427_s5 = sshll.u32 %s498_s30, 4 }
 0xa3b   : > { %s500_s23 = scalar_lea.vmem [#allocation2], %s3427_s5 }
 0xa3c   : > { %s3349_s25 = sshll.u32 %s500_s23, 4  ;;  %s3350_s25 = int_to_ptr.vmem [resolvable:$true] %s3349_s25 }
 0xa41   : > { %3128 = vrot.lane.b32.xlu1 %v2753_v35, %s4676_s2 }
 0xa63   : > { %v2756_v6 = vpop.permute.xlu2 %2755 }
 0xa6b   : > { %v3076_v51 = vpop.permute.xlu2 %3075 }
 0xa73   : > { %v3184_v1 = vpop.permute.xlu2 %3183 }
 0xa7b   : > { %v2765_v25 = vpop.permute.xlu1 %2764 }
 0xa7c   : > { %v2864_v54 = vpop.permute.xlu0 %2863 }
 0xa83   : > { %v2767_v55 = vpop.permute.xlu1 %2766 }
 0xa84   : > { %v2768_v61 = vsel %vm553_vm4, %v2765_v25, %v2767_v55  ;;  %v2769_v36 = vsel %vm553_vm4, %v2767_v55, %v2765_v25  ;;  %v2919_v41 = vpop.permute.xlu0 %2918  ;;  %vm4698_vm4 = vcmp.lt.s32.totalorder %v3951_v27, 112 }
 0xa85   : > { %v2770_v21 = vmul.f32 %v2769_v36, %v3982_v42  ;;  %v2771_v12 = vmul.f32 %v2768_v61, %v3984_v43 }
 0xa87   : > { %2793 = vmatpush.msrb.mxu2 %v2770_v21  ;;  %2813 = vmatpush.msrb.mxu3 %v2771_v12 }
 0xa88   : > { %3574 = vmatmul.msk.f32.vlgmr.msrb.gmra.mxu2 %vm2774_vm14, %v3573_v37  ;;  %3575 = vmatmul.msk.f32.vlgmr.msrb.gmra.mxu3 %vm2774_vm14, %v3573_v37 }
 0xa8b   : > { %v2862_v38 = vpop.permute.xlu1 %2861 }
 0xa8c   : > { %v2865_v10 = vsel %vm676_vm3, %v2862_v38, %v2864_v54  ;;  %v2866_v42 = vsel %vm676_vm3, %v2864_v54, %v2862_v38  ;;  %v3019_v49 = vpop.permute.xlu0 %3018 }
 0xa8d   : > { %v2867_v43 = vmul.f32 %v2866_v42, %v3986_v44  ;;  %v2868_v46 = vmul.f32 %v2865_v10, %v3988_v45 }
 0xa8f   : > { %2889 = vmatpush.msra.mxu2 %v2867_v43  ;;  %2909 = vmatpush.msra.mxu3 %v2868_v46 }
 0xa90   : > { %3579 = vmatmul.msk.f32.vlgmr.msra.gmra.mxu2 %vm2774_vm14, %v3578_v5  ;;  %3580 = vmatmul.msk.f32.vlgmr.msra.gmra.mxu3 %vm2774_vm14, %v3578_v5 }
 0xa91   : > { %2991 = vmatpush.msrb.mxu2 %v2753_v35  ;;  %3011 = vmatpush.msrb.mxu3 %v2754_v56 }
 0xa93   : > { %v2758_v9 = vpop.permute.xlu1 %2757 }
 0xa94   : > { %v2759_v11 = vsel %vm532_vm0, %v2756_v6, %v2758_v9  ;;  %v2760_v44 = vsel %vm532_vm0, %v2758_v9, %v2756_v6  ;;  %v3186_v60 = vpop.permute.xlu0 %3185  ;;  %vm4696_vm0 = vcmp.lt.s32.totalorder %v3951_v27, 111 }
 0xa95   : > { %v2761_v45 = vmul.f32 %v2760_v44, %v3957_v30  ;;  %v2762_v47 = vmul.f32 %v2759_v11, %v3959_v31  ;;  %v3187_v2 = vsel %vm4696_vm0, %v3184_v1, %v3186_v60  ;;  %vm4697_vm3 = vmmov %vm4696_vm0 }
 0xa96   : > { %v3189_v15 = vmul.f32 %v3187_v2, %v4113_v39 }
 0xa97   : > { %2836 = vmatpush.msra.mxu0 %v2761_v45  ;;  %2856 = vmatpush.msra.mxu1 %v2762_v47 }
 0xa98   : > { %3576 = vmatmul.msk.f32.vlgmr.msra.gmra.mxu0 %vm2774_vm14, %v2763_v48  ;;  %3577 = vmatmul.msk.f32.vlgmr.msra.gmra.mxu1 %vm2774_vm14, %v2763_v48 }
 0xa99   : > { %3585 = vmatmul.msk.f32.vlgmr.msrb.gmra.mxu2 %vm2774_vm14, %v3584_v50  ;;  %3586 = vmatmul.msk.f32.vlgmr.msrb.gmra.mxu3 %vm2774_vm14, %v3584_v50 }
 0xa9b   : > { %v2917_v30 = vpop.permute.xlu1 %2916 }
 0xa9c   : > { %v2920_v31 = vsel %vm750_vm5, %v2917_v30, %v2919_v41  ;;  %v2921_v52 = vsel %vm750_vm5, %v2919_v41, %v2917_v30  ;;  %vm4699_vm5 = vmmov %vm4698_vm4 }
 0xa9d   : > { %v2922_v53 = vmul.f32 %v2921_v52, %v4013_v57  ;;  %v2923_v0 = vmul.f32 %v2920_v31, %v4015_v58  ;;  %v3188_v57 = vsel %vm4697_vm3, %v3186_v60, %v3184_v1 }
 0xa9e   : > { %v3190_v63 = vmul.f32 %v3188_v57, %v4115_v40 }
 0xa9f   : > { %2944 = vmatpush.msrb.mxu0 %v2922_v53  ;;  %2964 = vmatpush.msrb.mxu1 %v2923_v0 }
 0xaa0   : > { %3582 = vmatmul.msk.f32.vlgmr.msrb.gmra.mxu0 %vm2774_vm14, %v3581_v59  ;;  %3583 = vmatmul.msk.f32.vlgmr.msrb.gmra.mxu1 %vm2774_vm14, %v3581_v59 }
 0xaa3   : > { %v3074_v14 = vpop.permute.xlu1 %3073 }
 0xaa4   : > { %v3077_v58 = vsel %vm952_vm7, %v3074_v14, %v3076_v51  ;;  %v3078_v3 = vsel %vm952_vm7, %v3076_v51, %v3074_v14 }
 0xaa5   : > { %v3079_v4 = vmul.f32 %v3077_v58, %v4071_v17  ;;  %v3080_v62 = vmul.f32 %v3078_v3, %v4073_v18 }
 0xaa7   : > { %3101 = vmatpush.msra.mxu2 %v3079_v4  ;;  %3121 = vmatpush.msra.mxu3 %v3080_v62 }
 0xaa8   : > { %3591 = vmatmul.msk.f32.vlgmr.msra.gmra.mxu2 %vm2774_vm14, %v3590_v16  ;;  %3592 = vmatmul.msk.f32.vlgmr.msra.gmra.mxu3 %vm2774_vm14, %v3590_v16 }
 0xaa9   : > { %3211 = vmatpush.msrb.mxu2 %v3189_v15  ;;  %3231 = vmatpush.msrb.mxu3 %v3190_v63 }
 0xaab   : > { %v3021_v19 = vpop.permute.xlu1 %3020 }
 0xaac   : > { %v3022_v17 = vsel %vm878_vm6, %v3019_v49, %v3021_v19  ;;  %v3023_v18 = vsel %vm878_vm6, %v3021_v19, %v3019_v49  ;;  %vm4700_vm6 = vcmask 1040384  }
 0xaad   : > { %v3024_v39 = vmul.f32 %v3022_v17, %v4050_v7  ;;  %v3025_v40 = vmul.f32 %v3023_v18, %v4052_v8  ;;  %v3131_v7 = vpop.permute.xlu2 %3130  ;;  %vm4701_vm7 = vmmov %vm4700_vm6 }
 0xaae   : > { %vm4702_vm15 = vmmov %vm4700_vm6 }
 0xaaf   : > { %3046 = vmatpush.msra.mxu0 %v3024_v39  ;;  %3066 = vmatpush.msra.mxu1 %v3025_v40  ;;  %vm4703_vm11 = vmmov %vm4700_vm6 }
 0xab0   : > { %3588 = vmatmul.msk.f32.vlgmr.msra.gmra.mxu0 %vm2774_vm14, %v3587_v20  ;;  %3589 = vmatmul.msk.f32.vlgmr.msra.gmra.mxu1 %vm2774_vm14, %v3587_v20 }
 0xab1   : > { %3597 = vmatmul.msk.f32.vlgmr.msrb.gmra.mxu2 %vm2774_vm14, %v3596_v22  ;;  %3598 = vmatmul.msk.f32.vlgmr.msrb.gmra.mxu3 %vm2774_vm14, %v3596_v22 }
 0xab3   : > { %v3129_v8 = vpop.permute.xlu1 %3128 }
 0xab4   : > { %v3132_v13 = vsel %vm4698_vm4, %v3129_v8, %v3131_v7  ;;  %v3133_v23 = vsel %vm4699_vm5, %v3131_v7, %v3129_v8 }
 0xab5   : > { %v3134_v24 = vmul.f32 %v3132_v13, %v4092_v26  ;;  %v3135_v29 = vmul.f32 %v3133_v23, %v4094_v28 }
 0xab7   : > { %3156 = vmatpush.msrb.mxu0 %v3134_v24  ;;  %3176 = vmatpush.msrb.mxu1 %v3135_v29 }
 0xab8   : > { %3594 = vmatmul.msk.f32.vlgmr.msrb.gmra.mxu0 %vm2774_vm14, %v3593_v32  ;;  %3595 = vmatmul.msk.f32.vlgmr.msrb.gmra.mxu1 %vm2774_vm14, %v3593_v32 }
 0xb0b   : > { %v2795_v33 = vpop.f32.mrf.mxu2  ;;  %v2815_v34 = vpop.f32.mrf.mxu3 }
 0xb13   : > { %v2891_v35 = vpop.f32.mrf.mxu2  ;;  %v2911_v56 = vpop.f32.mrf.mxu3 }
 0xb15   : > { %v2838_v27 = vpop.f32.mrf.mxu0  ;;  %v2858_v25 = vpop.f32.mrf.mxu1 }
 0xb16   : > { %v2839_v54 = vadd.f32 %v2838_v27, %v2795_v33  ;;  %v2859_v26 = vadd.f32 %v2858_v25, %v2815_v34 }
 0xb18   : > { %v2914_v21 = vadd.f32 %v2891_v35, %v2839_v54  ;;  %v2915_v12 = vadd.f32 %v2911_v56, %v2859_v26 }
 0xb1c   : > { %v2993_v55 = vpop.f32.mrf.mxu2  ;;  %v3013_v28 = vpop.f32.mrf.mxu3 }
 0xb1d   : > { %v2946_v61 = vpop.f32.mrf.mxu0  ;;  %v2966_v36 = vpop.f32.mrf.mxu1 }
 0xb1e   : > { %v2969_v37 = vadd.f32 %v2946_v61, %v2914_v21  ;;  %v2970_v38 = vadd.f32 %v2966_v36, %v2915_v12  ;;  %v3309_v21 = vld [vmem:[%s4628_s12] sm:$0xff] }
 0xb1f   : > { %3312 = vperm.xlu2 %3681, %v3309_v21   ;;  %v3317_v12 = vld [vmem:[%s4629_s13] sm:$0xff] }
 0xb20   : > { %v3016_v46 = vadd.f32 %v2993_v55, %v2969_v37  ;;  %v3017_v6 = vadd.f32 %v3013_v28, %v2970_v38  ;;  %v3325_v37 = vld [vmem:[%s509_s20] sm:$0xff] }
 0xb27   : > { %3320 = vperm.xlu2 %3681, %v3317_v12  }
 0xb2b   : > { %v3103_v41 = vpop.f32.mrf.mxu2  ;;  %v3123_v10 = vpop.f32.mrf.mxu3 }
 0xb2d   : > { %v3048_v42 = vpop.f32.mrf.mxu0  ;;  %v3068_v43 = vpop.f32.mrf.mxu1 }
 0xb2e   : > { %v3071_v5 = vadd.f32 %v3048_v42, %v3016_v46  ;;  %v3072_v9 = vadd.f32 %v3068_v43, %v3017_v6 }
 0xb2f   : > { %3328 = vperm.xlu2 %3681, %v3325_v37  }
 0xb30   : > { %v3126_v11 = vadd.f32 %v3103_v41, %v3071_v5  ;;  %v3127_v44 = vadd.f32 %v3123_v10, %v3072_v9 }
 0xb34   : > { %v3213_v45 = vpop.f32.mrf.mxu2  ;;  %v3233_v47 = vpop.f32.mrf.mxu3 }
 0xb35   : > { %v3158_v48 = vpop.f32.mrf.mxu0  ;;  %v3178_v49 = vpop.f32.mrf.mxu1 }
 0xb36   : > { %v3181_v50 = vadd.f32 %v3158_v48, %v3126_v11  ;;  %v3182_v51 = vadd.f32 %v3178_v49, %v3127_v44 }
 0xb38   : > { %v3236_v30 = vadd.f32 %v3213_v45, %v3181_v50  ;;  %v3237_v31 = vadd.f32 %v3233_v47, %v3182_v51 }
 0xb3a   : > { %v3238_v52 = vrot.slane %v3236_v30, 4  ;;  %v3244_v53 = vrot.slane %v3237_v31, 4 }
 0xb3c   : > { %v3239_v0 = vadd.f32 %v3238_v52, %v3236_v30  ;;  %v3245_v59 = vadd.f32 %v3244_v53, %v3237_v31 }
 0xb3e   : > { %v3240_v60 = vrot.slane %v3239_v0, 2  ;;  %v3246_v1 = vrot.slane %v3245_v59, 2 }
 0xb40   : > { %v3241_v2 = vadd.f32 %v3240_v60, %v3239_v0  ;;  %v3247_v57 = vadd.f32 %v3246_v1, %v3245_v59 }
 0xb42   : > { %v3242_v14 = vrot.slane %v3241_v2, 1  ;;  %v3248_v58 = vrot.slane %v3247_v57, 1 }
 0xb44   : > { %v3243_v3 = vadd.f32 %v3242_v14, %v3241_v2  ;;  %v3249_v4 = vadd.f32 %v3248_v58, %v3247_v57 }
 0xb46   : > { %v3250_v62 = vsel %vm4700_vm6, %v3243_v3, 0.0  ;;  %v3251_v15 = vsel %vm4701_vm7, %v3249_v4, 0.0 }
 0xb47   : > { %v3252_v63 = vadd.f32 %v3251_v15, %v3250_v62 }
 0xb49   : > { %3253 = vadd.xlane.f32.xlu0 %v3252_v63 }
 0xb79   : > { %v3313_v50 = vpop.permute.xlu2 %3312 }
 0xb81   : > { %v3321_v51 = vpop.permute.xlu2 %3320 }
 0xb89   : > { %v3329_v1 = vpop.permute.xlu2 %3328 }
 0xbbc   : > { %v3254_v16 = vpop.xlane.xlu0 %3253 }
 0xbbd   : > { %v3255_v19 = vrot.slane %v3254_v16, 4 }
 0xbbf   : > { %v3256_v17 = vadd.f32 %v3255_v19, %v3254_v16 }
 0xbc1   : > { %v3257_v18 = vrot.slane %v3256_v17, 2 }
 0xbc3   : > { %v3258_v39 = vadd.f32 %v3257_v18, %v3256_v17 }
 0xbc5   : > { %v3259_v40 = vrot.slane %v3258_v39, 1 }
 0xbc7   : > { %v3260_v20 = vadd.f32 %v3259_v40, %v3258_v39 }
 0xbc9   : > { %3624 = vpush %v3260_v20 }
 0xbfa   : > { %s3625_s6 = spop %3624 }
 0xbfb   : > { %s3262_s7 = smul.f32 0.00048828125, %s3625_s6  ;;  %s3605_s6 = sshll.u32 %s3885_s22, 4 }
 0xbfc   : > { %s3347_s17 = scalar_lea.hbm %s4631_s15, %s3605_s6  ;;  %s3336_s22 = scalar_lea.sflag [#allocation3], %s498_s30 }
 0xbfd   : > { %v3263_v22 = vstv %s3262_s7  ;;  %s3351_s26 = sshll.u32 %s3347_s17, 4  ;;  %s3352_s26 = int_to_ptr.hbm [resolvable:$true] %s3351_s26 }
 0xbfe   : > { %v3264_v7 = vsub.f32 %v3236_v30, %v3263_v22  ;;  %v3265_v8 = vsub.f32 %v3237_v31, %v3263_v22  ;;  %s3724_s16 = sshra.s32 %s3352_s26, 4  ;;  %s3725_s16 = int_to_ptr.hbm [resolvable:$true] %s3724_s16 }
 0xbff   : > { %s3726_s4 = scalar_lea.hbm %s3725_s16, 16  ;;  %p3731_p0 = scmp.lt.s32.totalorder %s3725_s16, %s4631_s15 }
 0xc00   : > { %v3266_v13 = vmul.f32 %v3264_v7, %v3264_v7  ;;  %v3267_v23 = vmul.f32 %v3265_v8, %v3265_v8  ;;  %p3727_p11 = scmp.ne.s32.totalorder %s3725_s16, %s3726_s4 }
 0xc02   : > { %v3268_v24 = vrot.slane %v3266_v13, 4  ;;  %v3274_v29 = vrot.slane %v3267_v23, 4  ;;  %p3728_p12 = pnand %p3727_p11, %p3902_p5 }
 0xc04   : > { %v3269_v32 = vadd.f32 %v3268_v24, %v3266_v13  ;;  %v3275_v33 = vadd.f32 %v3274_v29, %v3267_v23  ;;  %p3729_p13 = pneg %p3728_p12 }
 0xc06   : > { %v3270_v34 = vrot.slane %v3269_v32, 2  ;;  %v3276_v35 = vrot.slane %v3275_v33, 2 }
 0xc08   : > { %v3271_v56 = vadd.f32 %v3270_v34, %v3269_v32  ;;  %v3277_v27 = vadd.f32 %v3276_v35, %v3275_v33 }
 0xc0a   : > { %v3272_v25 = vrot.slane %v3271_v56, 1  ;;  %v3278_v54 = vrot.slane %v3277_v27, 1 }
 0xc0c   : > { %v3273_v26 = vadd.f32 %v3272_v25, %v3271_v56  ;;  %v3279_v55 = vadd.f32 %v3278_v54, %v3277_v27 }
 0xc0e   : > { %v3280_v28 = vsel %vm4702_vm15, %v3273_v26, 0.0  ;;  %v3281_v61 = vsel %vm4703_vm11, %v3279_v55, 0.0 }
 0xc0f   : > { %v3282_v36 = vadd.f32 %v3281_v61, %v3280_v28 }
 0xc11   : > { %3283 = vadd.xlane.f32.xlu1 %v3282_v36 }
 0xc84   : > { %v3284_v38 = vpop.xlane.xlu1 %3283 }
 0xc85   : > { %v3285_v41 = vrot.slane %v3284_v38, 4 }
 0xc87   : > { %v3286_v10 = vadd.f32 %v3285_v41, %v3284_v38 }
 0xc89   : > { %v3287_v42 = vrot.slane %v3286_v10, 2 }
 0xc8b   : > { %v3288_v43 = vadd.f32 %v3287_v42, %v3286_v10 }
 0xc8d   : > { %v3289_v46 = vrot.slane %v3288_v43, 1 }
 0xc8f   : > { %v3290_v6 = vadd.f32 %v3289_v46, %v3288_v43 }
 0xc91   : > { %3626 = vpush %v3290_v6 }
 0xcc2   : > { %s3627_s27 = spop %3626 }
 0xcc3   : > { %s3292_s3 = smul.f32 0.00048828125, %s3627_s27 }
 0xcc5   : > { %s3293_s1 = sadd.f32 1e-05, %s3292_s3  ;;  %s3730_s3 = scalar_lea.hbm %s4631_s15, 32 }
 0xcc6   : > { %p3732_p1 = scmp.lt.s32.totalorder %s3730_s3, %s3726_s4 }
 0xcc7   : > { %v3294_v5 = vstv %s3293_s1 }
 0xcc8   : > { %3708 = vrsqrt.f32 %v3294_v5  ;;  %vm3301_vm2 = vweird.f32 %v3294_v5  ;;  %p3733_p2 = por %p3732_p1, %p3731_p0 }
 0xcca   : > { %p3734_p3 = pnand %p3733_p2, %p3729_p13 }
 0xcce   : > { %v3709_v9 = vpop.eup %3708 }
 0xccf   : > { %v3296_v11 = vmul.f32 %v3709_v9, %v3294_v5  ;;  %vm3302_vm1 = vweird.f32 %v3709_v9 }
 0xcd0   : > { %vm3303_vm12 = vmor %vm3301_vm2, %vm3302_vm1 }
 0xcd1   : > { %v3297_v44 = vmul.f32 %v3709_v9, %v3296_v11 }
 0xcd3   : > { %v3298_v45 = vmul.f32 0.5, %v3297_v44 }
 0xcd5   : > { %v3299_v47 = vsub.f32 1.5, %v3298_v45 }
 0xcd7   : > { %v3300_v48 = vmul.f32 %v3709_v9, %v3299_v47 }
 0xcd9   : > { %v3304_v49 = vsel %vm3303_vm12, %v3709_v9, %v3300_v48 }
 0xcda   : > { %3628 = vpush %v3304_v49 }
 0xd0b   : > { %s3629_s2 = spop %3628 }
 0xd0c   : > { %v3306_v30 = vstv %s3629_s2 }
 0xd0d   : > { %v3307_v31 = vmul.f32 %v3306_v30, %v3264_v7  ;;  %v3308_v52 = vmul.f32 %v3306_v30, %v3265_v8 }
 0xd0f   : > { %v3315_v53 = vmul.f32 %v3313_v50, %v3307_v31  ;;  %v3316_v0 = vmul.f32 %v3313_v50, %v3308_v52 }
 0xd11   : > { %v3323_v59 = vadd.f32 %v3321_v51, %v3315_v53  ;;  %v3324_v60 = vadd.f32 %v3321_v51, %v3316_v0 }
 0xd13   : > { %v3331_v2 = vadd.f32 %v3329_v1, %v3323_v59  ;;  %v3332_v57 = vadd.f32 %v3329_v1, %v3324_v60 }
 0xd15   : > { %3333 = vst [vmem:[%s500_s23] sm:$0xff] %v3331_v2 }
 0xd16   : > { %3334 = vst [vmem:[%s500_s23 + $0x8] sm:$0xff] %v3332_v57 }
 0xd17   : > { %3737 = shalt.err (!%p3734_p3)
}
 0xd18   : > { %3630 = dma.vmem_to_hbm [thread:$0]  (%p3902_p5), %s3350_s25, 256, %s3352_s26, %s3336_s22  }
 0xd19 PF: > { %p3636_p4 = scmp.ge.s32.totalorder %s3772_s21, 2  ;;  %s3363_s30 = sand.u32 1, %s3760_s18  }
 0xd1a   : > { %s3364_s2 = scalar_lea.sflag [#allocation3], %s3363_s30 }
 0xd1b   : > { %p3633_p7 = pnand %p3636_p4, %p3906_p6 }
 0xd1d   : > { %p3634_p8 = pneg %p3633_p7 }
 0xd1f   : > { %3755 = dma.done.wait (%p3634_p8), %s3364_s2, 256  }
 0xd20   : > { %3757 = vsyncadd (%p3634_p8), %s3364_s2, 4294967040  ;;  %s4704_s6 = sld [smem:[#allocation5_spill]]  ;;  %p25_p9 = scmp.ge.s32.totalorder %s3889_s24, 4  }
 0xd21   : > { %s4705_s20 = sld [smem:[#allocation6_spill]]  ;;  %s4706_s18 = smov %s3764_s19 }
 0xd22   : > { %s4708_s21 = smov %s3889_s24  ;;  %27 = sbr.rel (!%p25_p9) target bundleno = 12 (0xc), region = 160 }
 0xd26   : > { %s4707_s19 = smov %s4704_s6 }
 0xd27   :  { %3370 = vsyncpa [#allocation3], 1 }
 0xd28   :  { %3372 = vsyncpa [#allocation3 + $0x1], 1 }

</bundles_post_ra>
